<compile_context>
chip_gen: v7x
topology: tpu7x:2x2x1
jax: 0.10.0
libtpu: 0.0.40
codegen_flags: <defaults>
</compile_context>

<pallas_src>
import functools

import jax
import jax.numpy as jnp
from jax.experimental import pallas as pl
from jax.experimental.pallas import tpu as pltpu


# ---------------------------------------------------------------------------
# In-kernel constant builders (iota + integer compare only; no div/mod so the
# vector lowering is trivially supported).  All matrices are tiny (<= 64x64).
# ---------------------------------------------------------------------------
def _shift_mat(M, L, B, delta, dtype):
    """(M, M) 0/1 matrix S with (S @ x)[i] = x[i + delta] inside each length-L
    sequence (rows are (b, l) row-major); zero rows at sequence boundaries."""
    r = jax.lax.broadcasted_iota(jnp.int32, (M, M), 0)
    c = jax.lax.broadcasted_iota(jnp.int32, (M, M), 1)
    ok = c == r + delta
    for b in range(B):  # B is tiny & static: unrolled boundary masks (no modulo)
        boundary = b * L if delta < 0 else b * L + L - 1
        ok = ok & (r != boundary)
    return jnp.where(ok, 1.0, 0.0).astype(dtype)


def _pool_mat(M, offset, dtype):
    """(M//2, M) selector: output row j picks input row 2j+offset ((b,l) order)."""
    r = jax.lax.broadcasted_iota(jnp.int32, (M // 2, M), 0)
    c = jax.lax.broadcasted_iota(jnp.int32, (M // 2, M), 1)
    return jnp.where(c == 2 * r + offset, 1.0, 0.0).astype(dtype)


def _pool_time_major_mat(B, L, offset, dtype):
    """(B*T, B*L) selector (T = L//2): output row t*B+b picks input row
    b*L + 2t + offset, i.e. pools by 2 AND reorders rows from (b,l) to (t,b)
    so the LSTM can slice contiguous per-timestep row blocks."""
    T = L // 2
    r = jax.lax.broadcasted_iota(jnp.int32, (B * T, B * L), 0)
    c = jax.lax.broadcasted_iota(jnp.int32, (B * T, B * L), 1)
    ok = None
    for b in range(B):          # B*T is tiny (e.g. 8) -> fully unrolled
        for t in range(T):
            term = (r == t * B + b) & (c == b * L + 2 * t + offset)
            ok = term if ok is None else ok | term
    return jnp.where(ok, 1.0, 0.0).astype(dtype)


# ---------------------------------------------------------------------------
# Fused forward kernel pieces (all operate on VMEM-resident values)
# ---------------------------------------------------------------------------
def _conv_bn_relu_pool(x_bf, w_ref, b_ref, B, L, time_major_out):
    """Conv1d(k=3, p=1, bias=False) + folded BN + ReLU + MaxPool1d(2) on a
    channels-last (B*L, Cin) bf16 slab.  Neighbour shifts and pooling are
    expressed as matmuls with tiny 0/1 matrices (MXU), f32 accumulation."""
    f32, bf16 = jnp.float32, jnp.bfloat16
    M = B * L
    xp = jnp.dot(_shift_mat(M, L, B, -1, bf16), x_bf,
                 preferred_element_type=f32).astype(bf16)   # x[l-1]
    xn = jnp.dot(_shift_mat(M, L, B, +1, bf16), x_bf,
                 preferred_element_type=f32).astype(bf16)   # x[l+1]
    y = (jnp.dot(xp, w_ref[0], preferred_element_type=f32)
         + jnp.dot(x_bf, w_ref[1], preferred_element_type=f32)
         + jnp.dot(xn, w_ref[2], preferred_element_type=f32))
    y = jnp.maximum(y + b_ref[...], 0.0).astype(bf16)       # folded BN bias + ReLU
    if time_major_out:
        s0 = _pool_time_major_mat(B, L, 0, bf16)
        s1 = _pool_time_major_mat(B, L, 1, bf16)
    else:
        s0 = _pool_mat(M, 0, bf16)
        s1 = _pool_mat(M, 1, bf16)
    p0 = jnp.dot(s0, y, preferred_element_type=f32)
    p1 = jnp.dot(s1, y, preferred_element_type=f32)
    return jnp.maximum(p0, p1).astype(bf16)                  # (M//2, Cout)


def _lstm_cell(gates, c_prev, H):
    # PyTorch gate order: i, f, g, o ; elementwise math kept in f32.
    i = jax.nn.sigmoid(gates[:, 0 * H:1 * H])
    f = jax.nn.sigmoid(gates[:, 1 * H:2 * H])
    g = jnp.tanh(gates[:, 2 * H:3 * H])
    o = jax.nn.sigmoid(gates[:, 3 * H:4 * H])
    c = f * c_prev + i * g
    return o * jnp.tanh(c), c


def _bilstm_layer(seq_bf, wih_ref, bg_ref, whhf_ref, whhb_ref,
                  gx_s, seq_s, B, T, H, write_seq):
    """One bidirectional LSTM layer.  seq_bf: (T*B, D) bf16, rows in (t, b)
    order.  Both directions' input projections are one matmul (wih is
    (D, 8H)); both directions advance inside the same unrolled time loop with
    h/c carried as vreg values.  When write_seq, the (T*B, 2H) output
    sequence is written to seq_s (f32); returns final (h_fwd, h_bwd)."""
    f32, bf16 = jnp.float32, jnp.bfloat16
    G = 4 * H
    gx_s[...] = (jnp.dot(seq_bf, wih_ref[...], preferred_element_type=f32)
                 + bg_ref[...])                               # (T*B, 8H) f32
    whh_f = whhf_ref[...]
    whh_b = whhb_ref[...]
    h_f = jnp.zeros((B, H), f32)
    c_f = jnp.zeros((B, H), f32)
    h_b = jnp.zeros((B, H), f32)
    c_b = jnp.zeros((B, H), f32)
    for s in range(T):   # T is tiny and static -> full unroll, h/c stay in vregs
        tf, tb = s, T - 1 - s
        gf = gx_s[pl.ds(tf * B, B), pl.ds(0, G)] + jnp.dot(
            h_f.astype(bf16), whh_f, preferred_element_type=f32)
        gb = gx_s[pl.ds(tb * B, B), pl.ds(G, G)] + jnp.dot(
            h_b.astype(bf16), whh_b, preferred_element_type=f32)
        h_f, c_f = _lstm_cell(gf, c_f, H)
        h_b, c_b = _lstm_cell(gb, c_b, H)
        if write_seq:
            seq_s[pl.ds(tf * B, B), pl.ds(0, H)] = h_f
            seq_s[pl.ds(tb * B, B), pl.ds(H, H)] = h_b
    return h_f, h_b


def _student_imu_kernel(x_ref, w1_ref, b1_ref, w2_ref, b2_ref, w3_ref, b3_ref,
                        wih0_ref, bg0_ref, whhf0_ref, whhb0_ref,
                        wih1_ref, bg1_ref, whhf1_ref, whhb1_ref,
                        wfc1_ref, bfc1_ref, wfc2_ref, bfc2_ref,
                        out_ref, gx_s, seq_s, *, B, L, H):
    f32, bf16 = jnp.float32, jnp.bfloat16
    # --- conv block: 3x (Conv1d k3 p1 -> BN -> ReLU -> MaxPool2); Dropout = id
    x = _conv_bn_relu_pool(x_ref[...], w1_ref, b1_ref, B, L, False)
    x = _conv_bn_relu_pool(x, w2_ref, b2_ref, B, L // 2, False)
    x = _conv_bn_relu_pool(x, w3_ref, b3_ref, B, L // 4, True)   # (T*B, 256), (t,b)
    T = L // 8
    # --- 2-layer bidirectional LSTM (batch_first); inter-layer dropout = id
    _bilstm_layer(x, wih0_ref, bg0_ref, whhf0_ref, whhb0_ref,
                  gx_s, seq_s, B, T, H, write_seq=True)
    seq1 = seq_s[...].astype(bf16)                               # (T*B, 2H)
    h_f, h_b = _bilstm_layer(seq1, wih1_ref, bg1_ref, whhf1_ref, whhb1_ref,
                             gx_s, seq_s, B, T, H, write_seq=False)
    # --- fc head on [h_fwd_final, h_bwd_final]: Linear -> ReLU -> Dropout(id) -> Linear
    z = jnp.maximum(
        jnp.dot(h_f.astype(bf16), wfc1_ref[pl.ds(0, H), :],
                preferred_element_type=f32)
        + jnp.dot(h_b.astype(bf16), wfc1_ref[pl.ds(H, H), :],
                  preferred_element_type=f32)
        + bfc1_ref[...], 0.0)
    logits = (jnp.dot(z.astype(bf16), wfc2_ref[...], preferred_element_type=f32)
              + bfc2_ref[...])
    out_ref[...] = logits.astype(out_ref.dtype)


# ---------------------------------------------------------------------------
# Wrapper: one-time weight packing + the single pallas_call
# ---------------------------------------------------------------------------
def pack_params(params, eps=1e-5):
    """Fold BN into conv weights, transpose/concatenate LSTM + FC weights into
    the kernel's MXU-friendly layouts, cast matmul operands to bf16."""
    bf16, f32 = jnp.bfloat16, jnp.float32
    out = {}
    for i in (1, 2, 3):
        s = params[f"bn{i}_gamma"] * jax.lax.rsqrt(params[f"bn{i}_var"] + eps)
        w = jnp.transpose(params[f"conv{i}_w"], (2, 1, 0))       # (3, Cin, Cout)
        cin = w.shape[1]
        cin_p = ((cin + 7) // 8) * 8
        if cin_p != cin:                                         # pad tiny Cin (sensors)
            w = jnp.pad(w, ((0, 0), (0, cin_p - cin), (0, 0)))
        out[f"w{i}"] = (w * s[None, None, :]).astype(bf16)
        out[f"b{i}"] = (params[f"bn{i}_beta"]
                        - params[f"bn{i}_mean"] * s)[None, :].astype(f32)
    for l in range(2):
        out[f"wih{l}"] = jnp.concatenate(
            [params[f"lstm_l{l}_wih_0"].T, params[f"lstm_l{l}_wih_1"].T],
            axis=1).astype(bf16)                                 # (D, 8H)
        out[f"bg{l}"] = jnp.concatenate(
            [params[f"lstm_l{l}_bih_0"] + params[f"lstm_l{l}_bhh_0"],
             params[f"lstm_l{l}_bih_1"] + params[f"lstm_l{l}_bhh_1"]]
        )[None, :].astype(f32)                                   # (1, 8H)
        out[f"whhf{l}"] = params[f"lstm_l{l}_whh_0"].T.astype(bf16)   # (H, 4H)
        out[f"whhb{l}"] = params[f"lstm_l{l}_whh_1"].T.astype(bf16)
    out["wfc1"] = params["fc1_w"].T.astype(bf16)                 # (2H, 256)
    out["bfc1"] = params["fc1_b"][None, :].astype(f32)
    out["wfc2"] = params["fc2_w"].T.astype(bf16)                 # (256, NG)
    out["bfc2"] = params["fc2_b"][None, :].astype(f32)
    return out


def student_imu_forward(packed, imu_pixel_values, *, hidden=128):
    """imu_pixel_values: (B, num_imu_sensors, L) -- PyTorch NCL layout."""
    B, C, L = imu_pixel_values.shape
    if L % 8 != 0:
        raise ValueError("imu_sequence_length must be a multiple of 8")
    T = L // 8
    num_gestures = packed["wfc2"].shape[1]
    # channels-last (B*L, C) slab, rows in (b, l) order; pad C to kernel's Cin
    x = jnp.transpose(imu_pixel_values, (0, 2, 1)).reshape(B * L, C)
    cin_p = packed["w1"].shape[1]
    if cin_p != C:
        x = jnp.pad(x, ((0, 0), (0, cin_p - C)))
    x = x.astype(jnp.bfloat16)

    args = (x,
            packed["w1"], packed["b1"], packed["w2"], packed["b2"],
            packed["w3"], packed["b3"],
            packed["wih0"], packed["bg0"], packed["whhf0"], packed["whhb0"],
            packed["wih1"], packed["bg1"], packed["whhf1"], packed["whhb1"],
            packed["wfc1"], packed["bfc1"], packed["wfc2"], packed["bfc2"])

    logits = pl.pallas_call(
        functools.partial(_student_imu_kernel, B=B, L=L, H=hidden),
        out_shape=jax.ShapeDtypeStruct((B, num_gestures), jnp.float32),
        in_specs=[pl.BlockSpec(memory_space=pltpu.MemorySpace.VMEM)
                  for _ in args],
        out_specs=pl.BlockSpec(memory_space=pltpu.MemorySpace.VMEM),
        scratch_shapes=[
            pltpu.VMEM((T * B, 8 * hidden), jnp.float32),   # per-layer gx buffer
            pltpu.VMEM((T * B, 2 * hidden), jnp.float32),   # layer-0 output sequence
        ],
    )(*args)
    return {"logits": logits}


# ---------------------------------------------------------------------------
# Deterministic parameter construction (shapes per the PyTorch __init__)
# ---------------------------------------------------------------------------
def init_params(key, num_imu_sensors, num_gestures, hidden=128):
    keys = iter(jax.random.split(key, 32))
    p = {}

    def kaiming_fan_out(k, shape):      # Conv1d (Cout, Cin, K): fan_out = Cout*K
        return jax.random.normal(k, shape, jnp.float32) * jnp.sqrt(
            2.0 / (shape[0] * shape[2]))

    def xavier_uniform(k, shape):
        b = jnp.sqrt(6.0 / (shape[0] + shape[1]))
        return jax.random.uniform(k, shape, jnp.float32, -b, b)

    def xavier_normal(k, shape):
        return jax.random.normal(k, shape, jnp.float32) * jnp.sqrt(
            2.0 / (shape[0] + shape[1]))

    for i, (cin, cout) in zip((1, 2, 3),
                              ((num_imu_sensors, 64), (64, 128), (128, 256))):
        p[f"conv{i}_w"] = kaiming_fan_out(next(keys), (cout, cin, 3))
        p[f"bn{i}_gamma"] = jnp.ones((cout,), jnp.float32)
        p[f"bn{i}_beta"] = jnp.zeros((cout,), jnp.float32)
        p[f"bn{i}_mean"] = jnp.zeros((cout,), jnp.float32)
        p[f"bn{i}_var"] = jnp.ones((cout,), jnp.float32)

    for l in range(2):
        in_dim = 256 if l == 0 else 2 * hidden
        for d in range(2):
            p[f"lstm_l{l}_wih_{d}"] = xavier_uniform(next(keys), (4 * hidden, in_dim))
            # TODO(synk): orthogonal init replaced by scaled normal (forward math
            # does not depend on the init distribution).
            p[f"lstm_l{l}_whh_{d}"] = (jax.random.normal(
                next(keys), (4 * hidden, hidden), jnp.float32) / jnp.sqrt(hidden))
            p[f"lstm_l{l}_bih_{d}"] = jnp.zeros((4 * hidden,), jnp.float32)
            p[f"lstm_l{l}_bhh_{d}"] = jnp.zeros((4 * hidden,), jnp.float32)

    p["fc1_w"] = xavier_normal(next(keys), (256, 2 * hidden))
    p["fc1_b"] = jnp.zeros((256,), jnp.float32)
    p["fc2_w"] = xavier_normal(next(keys), (num_gestures, 256))
    p["fc2_b"] = jnp.zeros((num_gestures,), jnp.float32)
    return p


if __name__ == "__main__":
    key = jax.random.PRNGKey(0)
    pkey, xkey = jax.random.split(key)

    batch = 2
    num_imu_sensors = 6
    imu_sequence_length = 32     # 3 MaxPool(2) stages -> T = 4 LSTM steps
    num_gestures = 8

    params = init_params(pkey, num_imu_sensors, num_gestures)
    packed = pack_params(params)          # one-time fold / layout / bf16 cast
    imu_pixel_values = jax.random.normal(
        xkey, (batch, num_imu_sensors, imu_sequence_length), jnp.float32)

    fwd = jax.jit(student_imu_forward)
    logits = jax.block_until_ready(fwd(packed, imu_pixel_values)["logits"])
    assert logits.shape == (batch, num_gestures), logits.shape
    assert bool(jnp.all(jnp.isfinite(logits)))
    print("KERNEL_OK")
</pallas_src>

<mosaic_0001>
module attributes {stable_mosaic.version = 11 : i64} {
  func.func @_student_imu_kernel(%arg0: memref<64x8xbf16, #tpu.memory_space<vmem>>, %arg1: memref<3x8x64xbf16, #tpu.memory_space<vmem>>, %arg2: memref<1x64xf32, #tpu.memory_space<vmem>>, %arg3: memref<3x64x128xbf16, #tpu.memory_space<vmem>>, %arg4: memref<1x128xf32, #tpu.memory_space<vmem>>, %arg5: memref<3x128x256xbf16, #tpu.memory_space<vmem>>, %arg6: memref<1x256xf32, #tpu.memory_space<vmem>>, %arg7: memref<256x1024xbf16, #tpu.memory_space<vmem>>, %arg8: memref<1x1024xf32, #tpu.memory_space<vmem>>, %arg9: memref<128x512xbf16, #tpu.memory_space<vmem>>, %arg10: memref<128x512xbf16, #tpu.memory_space<vmem>>, %arg11: memref<256x1024xbf16, #tpu.memory_space<vmem>>, %arg12: memref<1x1024xf32, #tpu.memory_space<vmem>>, %arg13: memref<128x512xbf16, #tpu.memory_space<vmem>>, %arg14: memref<128x512xbf16, #tpu.memory_space<vmem>>, %arg15: memref<256x256xbf16, #tpu.memory_space<vmem>>, %arg16: memref<1x256xf32, #tpu.memory_space<vmem>>, %arg17: memref<256x8xbf16, #tpu.memory_space<vmem>>, %arg18: memref<1x8xf32, #tpu.memory_space<vmem>>, %arg19: memref<2x8xf32, #tpu.memory_space<vmem>>, %arg20: memref<8x1024xf32, #tpu.memory_space<vmem>>, %arg21: memref<8x256xf32, #tpu.memory_space<vmem>>) attributes {dimension_semantics = [], scalar_prefetch = 0 : i64, scratch_operands = 2 : i64, tpu.core_type = #tpu.core_type<tc>} {
    %c0 = arith.constant 0 : index
    %c0_0 = arith.constant 0 : index
    %0 = vector.load %arg0[%c0, %c0_0] : memref<64x8xbf16, #tpu.memory_space<vmem>>, vector<64x8xbf16>
    %1 = tpu.iota {dimensions = array<i32: 0>} : vector<64x64xi32>
    %2 = tpu.iota {dimensions = array<i32: 1>} : vector<64x64xi32>
    %c-1_i32 = arith.constant -1 : i32
    %3 = vector.broadcast %c-1_i32 : i32 to vector<64x64xi32>
    %4 = arith.addi %1, %3 : vector<64x64xi32>
    %5 = arith.cmpi eq, %2, %4 : vector<64x64xi32>
    %c0_i32 = arith.constant 0 : i32
    %6 = vector.broadcast %c0_i32 : i32 to vector<64x64xi32>
    %7 = arith.cmpi ne, %1, %6 : vector<64x64xi32>
    %8 = arith.andi %5, %7 : vector<64x64xi1>
    %c32_i32 = arith.constant 32 : i32
    %9 = vector.broadcast %c32_i32 : i32 to vector<64x64xi32>
    %10 = arith.cmpi ne, %1, %9 : vector<64x64xi32>
    %11 = arith.andi %8, %10 : vector<64x64xi1>
    %cst = arith.constant 1.000000e+00 : f32
    %cst_1 = arith.constant 0.000000e+00 : f32
    %12 = vector.broadcast %cst : f32 to vector<64x64xf32>
    %13 = vector.broadcast %cst_1 : f32 to vector<64x64xf32>
    %14 = arith.select %11, %12, %13 : vector<64x64xi1>, vector<64x64xf32>
    %15 = arith.truncf %14 : vector<64x64xf32> to vector<64x64xbf16>
    %cst_2 = arith.constant dense<0.000000e+00> : vector<64x8xf32>
    %16 = tpu.matmul %15, %0, %cst_2 {dimension_numbers = #tpu.dot_dimension_numbers<[1], [0], [0], [1], [0, 0, 1, 1], [], []>} : vector<64x64xbf16>, vector<64x8xbf16>, vector<64x8xf32> -> vector<64x8xf32>
    %17 = arith.truncf %16 : vector<64x8xf32> to vector<64x8xbf16>
    %18 = tpu.iota {dimensions = array<i32: 0>} : vector<64x64xi32>
    %19 = tpu.iota {dimensions = array<i32: 1>} : vector<64x64xi32>
    %c1_i32 = arith.constant 1 : i32
    %20 = vector.broadcast %c1_i32 : i32 to vector<64x64xi32>
    %21 = arith.addi %18, %20 : vector<64x64xi32>
    %22 = arith.cmpi eq, %19, %21 : vector<64x64xi32>
    %c31_i32 = arith.constant 31 : i32
    %23 = vector.broadcast %c31_i32 : i32 to vector<64x64xi32>
    %24 = arith.cmpi ne, %18, %23 : vector<64x64xi32>
    %25 = arith.andi %22, %24 : vector<64x64xi1>
    %c63_i32 = arith.constant 63 : i32
    %26 = vector.broadcast %c63_i32 : i32 to vector<64x64xi32>
    %27 = arith.cmpi ne, %18, %26 : vector<64x64xi32>
    %28 = arith.andi %25, %27 : vector<64x64xi1>
    %cst_3 = arith.constant 1.000000e+00 : f32
    %cst_4 = arith.constant 0.000000e+00 : f32
    %29 = vector.broadcast %cst_3 : f32 to vector<64x64xf32>
    %30 = vector.broadcast %cst_4 : f32 to vector<64x64xf32>
    %31 = arith.select %28, %29, %30 : vector<64x64xi1>, vector<64x64xf32>
    %32 = arith.truncf %31 : vector<64x64xf32> to vector<64x64xbf16>
    %cst_5 = arith.constant dense<0.000000e+00> : vector<64x8xf32>
    %33 = tpu.matmul %32, %0, %cst_5 {dimension_numbers = #tpu.dot_dimension_numbers<[1], [0], [0], [1], [0, 0, 1, 1], [], []>} : vector<64x64xbf16>, vector<64x8xbf16>, vector<64x8xf32> -> vector<64x8xf32>
    %34 = arith.truncf %33 : vector<64x8xf32> to vector<64x8xbf16>
    %c0_6 = arith.constant 0 : index
    %c0_7 = arith.constant 0 : index
    %c0_8 = arith.constant 0 : index
    %35 = vector.load %arg1[%c0_6, %c0_7, %c0_8] : memref<3x8x64xbf16, #tpu.memory_space<vmem>>, vector<1x8x64xbf16>
    %36 = vector.shape_cast %35 : vector<1x8x64xbf16> to vector<8x64xbf16>
    %cst_9 = arith.constant dense<0.000000e+00> : vector<64x64xf32>
    %37 = tpu.matmul %17, %36, %cst_9 {dimension_numbers = #tpu.dot_dimension_numbers<[1], [0], [0], [1], [0, 0, 1, 1], [], []>} : vector<64x8xbf16>, vector<8x64xbf16>, vector<64x64xf32> -> vector<64x64xf32>
    %c1 = arith.constant 1 : index
    %c0_10 = arith.constant 0 : index
    %c0_11 = arith.constant 0 : index
    %38 = vector.load %arg1[%c1, %c0_10, %c0_11] : memref<3x8x64xbf16, #tpu.memory_space<vmem>>, vector<1x8x64xbf16>
    %39 = vector.shape_cast %38 : vector<1x8x64xbf16> to vector<8x64xbf16>
    %cst_12 = arith.constant dense<0.000000e+00> : vector<64x64xf32>
    %40 = tpu.matmul %0, %39, %cst_12 {dimension_numbers = #tpu.dot_dimension_numbers<[1], [0], [0], [1], [0, 0, 1, 1], [], []>} : vector<64x8xbf16>, vector<8x64xbf16>, vector<64x64xf32> -> vector<64x64xf32>
    %41 = arith.addf %37, %40 : vector<64x64xf32>
    %c2 = arith.constant 2 : index
    %c0_13 = arith.constant 0 : index
    %c0_14 = arith.constant 0 : index
    %42 = vector.load %arg1[%c2, %c0_13, %c0_14] : memref<3x8x64xbf16, #tpu.memory_space<vmem>>, vector<1x8x64xbf16>
    %43 = vector.shape_cast %42 : vector<1x8x64xbf16> to vector<8x64xbf16>
    %cst_15 = arith.constant dense<0.000000e+00> : vector<64x64xf32>
    %44 = tpu.matmul %34, %43, %cst_15 {dimension_numbers = #tpu.dot_dimension_numbers<[1], [0], [0], [1], [0, 0, 1, 1], [], []>} : vector<64x8xbf16>, vector<8x64xbf16>, vector<64x64xf32> -> vector<64x64xf32>
    %45 = arith.addf %41, %44 : vector<64x64xf32>
    %c0_16 = arith.constant 0 : index
    %c0_17 = arith.constant 0 : index
    %46 = vector.load %arg2[%c0_16, %c0_17] : memref<1x64xf32, #tpu.memory_space<vmem>>, vector<1x64xf32>
    %47 = vector.broadcast %46 : vector<1x64xf32> to vector<64x64xf32>
    %48 = arith.addf %45, %47 : vector<64x64xf32>
    %cst_18 = arith.constant 0.000000e+00 : f32
    %49 = vector.broadcast %cst_18 : f32 to vector<64x64xf32>
    %50 = arith.maximumf %48, %49 : vector<64x64xf32>
    %51 = arith.truncf %50 : vector<64x64xf32> to vector<64x64xbf16>
    %52 = tpu.iota {dimensions = array<i32: 0>} : vector<32x64xi32>
    %53 = tpu.iota {dimensions = array<i32: 1>} : vector<32x64xi32>
    %c2_i32 = arith.constant 2 : i32
    %54 = vector.broadcast %c2_i32 : i32 to vector<32x64xi32>
    %55 = arith.muli %54, %52 : vector<32x64xi32>
    %c0_i32_19 = arith.constant 0 : i32
    %56 = vector.broadcast %c0_i32_19 : i32 to vector<32x64xi32>
    %57 = arith.addi %55, %56 : vector<32x64xi32>
    %58 = arith.cmpi eq, %53, %57 : vector<32x64xi32>
    %cst_20 = arith.constant 1.000000e+00 : f32
    %cst_21 = arith.constant 0.000000e+00 : f32
    %59 = vector.broadcast %cst_20 : f32 to vector<32x64xf32>
    %60 = vector.broadcast %cst_21 : f32 to vector<32x64xf32>
    %61 = arith.select %58, %59, %60 : vector<32x64xi1>, vector<32x64xf32>
    %62 = arith.truncf %61 : vector<32x64xf32> to vector<32x64xbf16>
    %63 = tpu.iota {dimensions = array<i32: 0>} : vector<32x64xi32>
    %64 = tpu.iota {dimensions = array<i32: 1>} : vector<32x64xi32>
    %c2_i32_22 = arith.constant 2 : i32
    %65 = vector.broadcast %c2_i32_22 : i32 to vector<32x64xi32>
    %66 = arith.muli %65, %63 : vector<32x64xi32>
    %c1_i32_23 = arith.constant 1 : i32
    %67 = vector.broadcast %c1_i32_23 : i32 to vector<32x64xi32>
    %68 = arith.addi %66, %67 : vector<32x64xi32>
    %69 = arith.cmpi eq, %64, %68 : vector<32x64xi32>
    %cst_24 = arith.constant 1.000000e+00 : f32
    %cst_25 = arith.constant 0.000000e+00 : f32
    %70 = vector.broadcast %cst_24 : f32 to vector<32x64xf32>
    %71 = vector.broadcast %cst_25 : f32 to vector<32x64xf32>
    %72 = arith.select %69, %70, %71 : vector<32x64xi1>, vector<32x64xf32>
    %73 = arith.truncf %72 : vector<32x64xf32> to vector<32x64xbf16>
    %cst_26 = arith.constant dense<0.000000e+00> : vector<32x64xf32>
    %74 = tpu.matmul %62, %51, %cst_26 {dimension_numbers = #tpu.dot_dimension_numbers<[1], [0], [0], [1], [0, 0, 1, 1], [], []>} : vector<32x64xbf16>, vector<64x64xbf16>, vector<32x64xf32> -> vector<32x64xf32>
    %cst_27 = arith.constant dense<0.000000e+00> : vector<32x64xf32>
    %75 = tpu.matmul %73, %51, %cst_27 {dimension_numbers = #tpu.dot_dimension_numbers<[1], [0], [0], [1], [0, 0, 1, 1], [], []>} : vector<32x64xbf16>, vector<64x64xbf16>, vector<32x64xf32> -> vector<32x64xf32>
    %76 = arith.maximumf %74, %75 : vector<32x64xf32>
    %77 = arith.truncf %76 : vector<32x64xf32> to vector<32x64xbf16>
    %78 = tpu.iota {dimensions = array<i32: 0>} : vector<32x32xi32>
    %79 = tpu.iota {dimensions = array<i32: 1>} : vector<32x32xi32>
    %c-1_i32_28 = arith.constant -1 : i32
    %80 = vector.broadcast %c-1_i32_28 : i32 to vector<32x32xi32>
    %81 = arith.addi %78, %80 : vector<32x32xi32>
    %82 = arith.cmpi eq, %79, %81 : vector<32x32xi32>
    %c0_i32_29 = arith.constant 0 : i32
    %83 = vector.broadcast %c0_i32_29 : i32 to vector<32x32xi32>
    %84 = arith.cmpi ne, %78, %83 : vector<32x32xi32>
    %85 = arith.andi %82, %84 : vector<32x32xi1>
    %c16_i32 = arith.constant 16 : i32
    %86 = vector.broadcast %c16_i32 : i32 to vector<32x32xi32>
    %87 = arith.cmpi ne, %78, %86 : vector<32x32xi32>
    %88 = arith.andi %85, %87 : vector<32x32xi1>
    %cst_30 = arith.constant 1.000000e+00 : f32
    %cst_31 = arith.constant 0.000000e+00 : f32
    %89 = vector.broadcast %cst_30 : f32 to vector<32x32xf32>
    %90 = vector.broadcast %cst_31 : f32 to vector<32x32xf32>
    %91 = arith.select %88, %89, %90 : vector<32x32xi1>, vector<32x32xf32>
    %92 = arith.truncf %91 : vector<32x32xf32> to vector<32x32xbf16>
    %cst_32 = arith.constant dense<0.000000e+00> : vector<32x64xf32>
    %93 = tpu.matmul %92, %77, %cst_32 {dimension_numbers = #tpu.dot_dimension_numbers<[1], [0], [0], [1], [0, 0, 1, 1], [], []>} : vector<32x32xbf16>, vector<32x64xbf16>, vector<32x64xf32> -> vector<32x64xf32>
    %94 = arith.truncf %93 : vector<32x64xf32> to vector<32x64xbf16>
    %95 = tpu.iota {dimensions = array<i32: 0>} : vector<32x32xi32>
    %96 = tpu.iota {dimensions = array<i32: 1>} : vector<32x32xi32>
    %c1_i32_33 = arith.constant 1 : i32
    %97 = vector.broadcast %c1_i32_33 : i32 to vector<32x32xi32>
    %98 = arith.addi %95, %97 : vector<32x32xi32>
    %99 = arith.cmpi eq, %96, %98 : vector<32x32xi32>
    %c15_i32 = arith.constant 15 : i32
    %100 = vector.broadcast %c15_i32 : i32 to vector<32x32xi32>
    %101 = arith.cmpi ne, %95, %100 : vector<32x32xi32>
    %102 = arith.andi %99, %101 : vector<32x32xi1>
    %c31_i32_34 = arith.constant 31 : i32
    %103 = vector.broadcast %c31_i32_34 : i32 to vector<32x32xi32>
    %104 = arith.cmpi ne, %95, %103 : vector<32x32xi32>
    %105 = arith.andi %102, %104 : vector<32x32xi1>
    %cst_35 = arith.constant 1.000000e+00 : f32
    %cst_36 = arith.constant 0.000000e+00 : f32
    %106 = vector.broadcast %cst_35 : f32 to vector<32x32xf32>
    %107 = vector.broadcast %cst_36 : f32 to vector<32x32xf32>
    %108 = arith.select %105, %106, %107 : vector<32x32xi1>, vector<32x32xf32>
    %109 = arith.truncf %108 : vector<32x32xf32> to vector<32x32xbf16>
    %cst_37 = arith.constant dense<0.000000e+00> : vector<32x64xf32>
    %110 = tpu.matmul %109, %77, %cst_37 {dimension_numbers = #tpu.dot_dimension_numbers<[1], [0], [0], [1], [0, 0, 1, 1], [], []>} : vector<32x32xbf16>, vector<32x64xbf16>, vector<32x64xf32> -> vector<32x64xf32>
    %111 = arith.truncf %110 : vector<32x64xf32> to vector<32x64xbf16>
    %c0_38 = arith.constant 0 : index
    %c0_39 = arith.constant 0 : index
    %c0_40 = arith.constant 0 : index
    %112 = vector.load %arg3[%c0_38, %c0_39, %c0_40] : memref<3x64x128xbf16, #tpu.memory_space<vmem>>, vector<1x64x128xbf16>
    %113 = vector.shape_cast %112 : vector<1x64x128xbf16> to vector<64x128xbf16>
    %cst_41 = arith.constant dense<0.000000e+00> : vector<32x128xf32>
    %114 = tpu.matmul %94, %113, %cst_41 {dimension_numbers = #tpu.dot_dimension_numbers<[1], [0], [0], [1], [0, 0, 1, 1], [], []>} : vector<32x64xbf16>, vector<64x128xbf16>, vector<32x128xf32> -> vector<32x128xf32>
    %c1_42 = arith.constant 1 : index
    %c0_43 = arith.constant 0 : index
    %c0_44 = arith.constant 0 : index
    %115 = vector.load %arg3[%c1_42, %c0_43, %c0_44] : memref<3x64x128xbf16, #tpu.memory_space<vmem>>, vector<1x64x128xbf16>
    %116 = vector.shape_cast %115 : vector<1x64x128xbf16> to vector<64x128xbf16>
    %cst_45 = arith.constant dense<0.000000e+00> : vector<32x128xf32>
    %117 = tpu.matmul %77, %116, %cst_45 {dimension_numbers = #tpu.dot_dimension_numbers<[1], [0], [0], [1], [0, 0, 1, 1], [], []>} : vector<32x64xbf16>, vector<64x128xbf16>, vector<32x128xf32> -> vector<32x128xf32>
    %118 = arith.addf %114, %117 : vector<32x128xf32>
    %c2_46 = arith.constant 2 : index
    %c0_47 = arith.constant 0 : index
    %c0_48 = arith.constant 0 : index
    %119 = vector.load %arg3[%c2_46, %c0_47, %c0_48] : memref<3x64x128xbf16, #tpu.memory_space<vmem>>, vector<1x64x128xbf16>
    %120 = vector.shape_cast %119 : vector<1x64x128xbf16> to vector<64x128xbf16>
    %cst_49 = arith.constant dense<0.000000e+00> : vector<32x128xf32>
    %121 = tpu.matmul %111, %120, %cst_49 {dimension_numbers = #tpu.dot_dimension_numbers<[1], [0], [0], [1], [0, 0, 1, 1], [], []>} : vector<32x64xbf16>, vector<64x128xbf16>, vector<32x128xf32> -> vector<32x128xf32>
    %122 = arith.addf %118, %121 : vector<32x128xf32>
    %c0_50 = arith.constant 0 : index
    %c0_51 = arith.constant 0 : index
    %123 = vector.load %arg4[%c0_50, %c0_51] : memref<1x128xf32, #tpu.memory_space<vmem>>, vector<1x128xf32>
    %124 = vector.broadcast %123 : vector<1x128xf32> to vector<32x128xf32>
    %125 = arith.addf %122, %124 : vector<32x128xf32>
    %cst_52 = arith.constant 0.000000e+00 : f32
    %126 = vector.broadcast %cst_52 : f32 to vector<32x128xf32>
    %127 = arith.maximumf %125, %126 : vector<32x128xf32>
    %128 = arith.truncf %127 : vector<32x128xf32> to vector<32x128xbf16>
    %129 = tpu.iota {dimensions = array<i32: 0>} : vector<16x32xi32>
    %130 = tpu.iota {dimensions = array<i32: 1>} : vector<16x32xi32>
    %c2_i32_53 = arith.constant 2 : i32
    %131 = vector.broadcast %c2_i32_53 : i32 to vector<16x32xi32>
    %132 = arith.muli %131, %129 : vector<16x32xi32>
    %c0_i32_54 = arith.constant 0 : i32
    %133 = vector.broadcast %c0_i32_54 : i32 to vector<16x32xi32>
    %134 = arith.addi %132, %133 : vector<16x32xi32>
    %135 = arith.cmpi eq, %130, %134 : vector<16x32xi32>
    %cst_55 = arith.constant 1.000000e+00 : f32
    %cst_56 = arith.constant 0.000000e+00 : f32
    %136 = vector.broadcast %cst_55 : f32 to vector<16x32xf32>
    %137 = vector.broadcast %cst_56 : f32 to vector<16x32xf32>
    %138 = arith.select %135, %136, %137 : vector<16x32xi1>, vector<16x32xf32>
    %139 = arith.truncf %138 : vector<16x32xf32> to vector<16x32xbf16>
    %140 = tpu.iota {dimensions = array<i32: 0>} : vector<16x32xi32>
    %141 = tpu.iota {dimensions = array<i32: 1>} : vector<16x32xi32>
    %c2_i32_57 = arith.constant 2 : i32
    %142 = vector.broadcast %c2_i32_57 : i32 to vector<16x32xi32>
    %143 = arith.muli %142, %140 : vector<16x32xi32>
    %c1_i32_58 = arith.constant 1 : i32
    %144 = vector.broadcast %c1_i32_58 : i32 to vector<16x32xi32>
    %145 = arith.addi %143, %144 : vector<16x32xi32>
    %146 = arith.cmpi eq, %141, %145 : vector<16x32xi32>
    %cst_59 = arith.constant 1.000000e+00 : f32
    %cst_60 = arith.constant 0.000000e+00 : f32
    %147 = vector.broadcast %cst_59 : f32 to vector<16x32xf32>
    %148 = vector.broadcast %cst_60 : f32 to vector<16x32xf32>
    %149 = arith.select %146, %147, %148 : vector<16x32xi1>, vector<16x32xf32>
    %150 = arith.truncf %149 : vector<16x32xf32> to vector<16x32xbf16>
    %cst_61 = arith.constant dense<0.000000e+00> : vector<16x128xf32>
    %151 = tpu.matmul %139, %128, %cst_61 {dimension_numbers = #tpu.dot_dimension_numbers<[1], [0], [0], [1], [0, 0, 1, 1], [], []>} : vector<16x32xbf16>, vector<32x128xbf16>, vector<16x128xf32> -> vector<16x128xf32>
    %cst_62 = arith.constant dense<0.000000e+00> : vector<16x128xf32>
    %152 = tpu.matmul %150, %128, %cst_62 {dimension_numbers = #tpu.dot_dimension_numbers<[1], [0], [0], [1], [0, 0, 1, 1], [], []>} : vector<16x32xbf16>, vector<32x128xbf16>, vector<16x128xf32> -> vector<16x128xf32>
    %153 = arith.maximumf %151, %152 : vector<16x128xf32>
    %154 = arith.truncf %153 : vector<16x128xf32> to vector<16x128xbf16>
    %155 = tpu.iota {dimensions = array<i32: 0>} : vector<16x16xi32>
    %156 = tpu.iota {dimensions = array<i32: 1>} : vector<16x16xi32>
    %c-1_i32_63 = arith.constant -1 : i32
    %157 = vector.broadcast %c-1_i32_63 : i32 to vector<16x16xi32>
    %158 = arith.addi %155, %157 : vector<16x16xi32>
    %159 = arith.cmpi eq, %156, %158 : vector<16x16xi32>
    %c0_i32_64 = arith.constant 0 : i32
    %160 = vector.broadcast %c0_i32_64 : i32 to vector<16x16xi32>
    %161 = arith.cmpi ne, %155, %160 : vector<16x16xi32>
    %162 = arith.andi %159, %161 : vector<16x16xi1>
    %c8_i32 = arith.constant 8 : i32
    %163 = vector.broadcast %c8_i32 : i32 to vector<16x16xi32>
    %164 = arith.cmpi ne, %155, %163 : vector<16x16xi32>
    %165 = arith.andi %162, %164 : vector<16x16xi1>
    %cst_65 = arith.constant 1.000000e+00 : f32
    %cst_66 = arith.constant 0.000000e+00 : f32
    %166 = vector.broadcast %cst_65 : f32 to vector<16x16xf32>
    %167 = vector.broadcast %cst_66 : f32 to vector<16x16xf32>
    %168 = arith.select %165, %166, %167 : vector<16x16xi1>, vector<16x16xf32>
    %169 = arith.truncf %168 : vector<16x16xf32> to vector<16x16xbf16>
    %cst_67 = arith.constant dense<0.000000e+00> : vector<16x128xf32>
    %170 = tpu.matmul %169, %154, %cst_67 {dimension_numbers = #tpu.dot_dimension_numbers<[1], [0], [0], [1], [0, 0, 1, 1], [], []>} : vector<16x16xbf16>, vector<16x128xbf16>, vector<16x128xf32> -> vector<16x128xf32>
    %171 = arith.truncf %170 : vector<16x128xf32> to vector<16x128xbf16>
    %172 = tpu.iota {dimensions = array<i32: 0>} : vector<16x16xi32>
    %173 = tpu.iota {dimensions = array<i32: 1>} : vector<16x16xi32>
    %c1_i32_68 = arith.constant 1 : i32
    %174 = vector.broadcast %c1_i32_68 : i32 to vector<16x16xi32>
    %175 = arith.addi %172, %174 : vector<16x16xi32>
    %176 = arith.cmpi eq, %173, %175 : vector<16x16xi32>
    %c7_i32 = arith.constant 7 : i32
    %177 = vector.broadcast %c7_i32 : i32 to vector<16x16xi32>
    %178 = arith.cmpi ne, %172, %177 : vector<16x16xi32>
    %179 = arith.andi %176, %178 : vector<16x16xi1>
    %c15_i32_69 = arith.constant 15 : i32
    %180 = vector.broadcast %c15_i32_69 : i32 to vector<16x16xi32>
    %181 = arith.cmpi ne, %172, %180 : vector<16x16xi32>
    %182 = arith.andi %179, %181 : vector<16x16xi1>
    %cst_70 = arith.constant 1.000000e+00 : f32
    %cst_71 = arith.constant 0.000000e+00 : f32
    %183 = vector.broadcast %cst_70 : f32 to vector<16x16xf32>
    %184 = vector.broadcast %cst_71 : f32 to vector<16x16xf32>
    %185 = arith.select %182, %183, %184 : vector<16x16xi1>, vector<16x16xf32>
    %186 = arith.truncf %185 : vector<16x16xf32> to vector<16x16xbf16>
    %cst_72 = arith.constant dense<0.000000e+00> : vector<16x128xf32>
    %187 = tpu.matmul %186, %154, %cst_72 {dimension_numbers = #tpu.dot_dimension_numbers<[1], [0], [0], [1], [0, 0, 1, 1], [], []>} : vector<16x16xbf16>, vector<16x128xbf16>, vector<16x128xf32> -> vector<16x128xf32>
    %188 = arith.truncf %187 : vector<16x128xf32> to vector<16x128xbf16>
    %c0_73 = arith.constant 0 : index
    %c0_74 = arith.constant 0 : index
    %c0_75 = arith.constant 0 : index
    %189 = vector.load %arg5[%c0_73, %c0_74, %c0_75] : memref<3x128x256xbf16, #tpu.memory_space<vmem>>, vector<1x128x256xbf16>
    %190 = vector.shape_cast %189 : vector<1x128x256xbf16> to vector<128x256xbf16>
    %cst_76 = arith.constant dense<0.000000e+00> : vector<16x256xf32>
    %191 = tpu.matmul %171, %190, %cst_76 {dimension_numbers = #tpu.dot_dimension_numbers<[1], [0], [0], [1], [0, 0, 1, 1], [], []>} : vector<16x128xbf16>, vector<128x256xbf16>, vector<16x256xf32> -> vector<16x256xf32>
    %c1_77 = arith.constant 1 : index
    %c0_78 = arith.constant 0 : index
    %c0_79 = arith.constant 0 : index
    %192 = vector.load %arg5[%c1_77, %c0_78, %c0_79] : memref<3x128x256xbf16, #tpu.memory_space<vmem>>, vector<1x128x256xbf16>
    %193 = vector.shape_cast %192 : vector<1x128x256xbf16> to vector<128x256xbf16>
    %cst_80 = arith.constant dense<0.000000e+00> : vector<16x256xf32>
    %194 = tpu.matmul %154, %193, %cst_80 {dimension_numbers = #tpu.dot_dimension_numbers<[1], [0], [0], [1], [0, 0, 1, 1], [], []>} : vector<16x128xbf16>, vector<128x256xbf16>, vector<16x256xf32> -> vector<16x256xf32>
    %195 = arith.addf %191, %194 : vector<16x256xf32>
    %c2_81 = arith.constant 2 : index
    %c0_82 = arith.constant 0 : index
    %c0_83 = arith.constant 0 : index
    %196 = vector.load %arg5[%c2_81, %c0_82, %c0_83] : memref<3x128x256xbf16, #tpu.memory_space<vmem>>, vector<1x128x256xbf16>
    %197 = vector.shape_cast %196 : vector<1x128x256xbf16> to vector<128x256xbf16>
    %cst_84 = arith.constant dense<0.000000e+00> : vector<16x256xf32>
    %198 = tpu.matmul %188, %197, %cst_84 {dimension_numbers = #tpu.dot_dimension_numbers<[1], [0], [0], [1], [0, 0, 1, 1], [], []>} : vector<16x128xbf16>, vector<128x256xbf16>, vector<16x256xf32> -> vector<16x256xf32>
    %199 = arith.addf %195, %198 : vector<16x256xf32>
    %c0_85 = arith.constant 0 : index
    %c0_86 = arith.constant 0 : index
    %200 = vector.load %arg6[%c0_85, %c0_86] : memref<1x256xf32, #tpu.memory_space<vmem>>, vector<1x256xf32>
    %201 = vector.broadcast %200 : vector<1x256xf32> to vector<16x256xf32>
    %202 = arith.addf %199, %201 : vector<16x256xf32>
    %cst_87 = arith.constant 0.000000e+00 : f32
    %203 = vector.broadcast %cst_87 : f32 to vector<16x256xf32>
    %204 = arith.maximumf %202, %203 : vector<16x256xf32>
    %205 = arith.truncf %204 : vector<16x256xf32> to vector<16x256xbf16>
    %206 = tpu.iota {dimensions = array<i32: 0>} : vector<8x16xi32>
    %207 = tpu.iota {dimensions = array<i32: 1>} : vector<8x16xi32>
    %c0_i32_88 = arith.constant 0 : i32
    %208 = vector.broadcast %c0_i32_88 : i32 to vector<8x16xi32>
    %209 = arith.cmpi eq, %206, %208 : vector<8x16xi32>
    %c0_i32_89 = arith.constant 0 : i32
    %210 = vector.broadcast %c0_i32_89 : i32 to vector<8x16xi32>
    %211 = arith.cmpi eq, %207, %210 : vector<8x16xi32>
    %212 = arith.andi %209, %211 : vector<8x16xi1>
    %c2_i32_90 = arith.constant 2 : i32
    %213 = vector.broadcast %c2_i32_90 : i32 to vector<8x16xi32>
    %214 = arith.cmpi eq, %206, %213 : vector<8x16xi32>
    %c2_i32_91 = arith.constant 2 : i32
    %215 = vector.broadcast %c2_i32_91 : i32 to vector<8x16xi32>
    %216 = arith.cmpi eq, %207, %215 : vector<8x16xi32>
    %217 = arith.andi %214, %216 : vector<8x16xi1>
    %218 = arith.ori %212, %217 : vector<8x16xi1>
    %c4_i32 = arith.constant 4 : i32
    %219 = vector.broadcast %c4_i32 : i32 to vector<8x16xi32>
    %220 = arith.cmpi eq, %206, %219 : vector<8x16xi32>
    %c4_i32_92 = arith.constant 4 : i32
    %221 = vector.broadcast %c4_i32_92 : i32 to vector<8x16xi32>
    %222 = arith.cmpi eq, %207, %221 : vector<8x16xi32>
    %223 = arith.andi %220, %222 : vector<8x16xi1>
    %224 = arith.ori %218, %223 : vector<8x16xi1>
    %c6_i32 = arith.constant 6 : i32
    %225 = vector.broadcast %c6_i32 : i32 to vector<8x16xi32>
    %226 = arith.cmpi eq, %206, %225 : vector<8x16xi32>
    %c6_i32_93 = arith.constant 6 : i32
    %227 = vector.broadcast %c6_i32_93 : i32 to vector<8x16xi32>
    %228 = arith.cmpi eq, %207, %227 : vector<8x16xi32>
    %229 = arith.andi %226, %228 : vector<8x16xi1>
    %230 = arith.ori %224, %229 : vector<8x16xi1>
    %c1_i32_94 = arith.constant 1 : i32
    %231 = vector.broadcast %c1_i32_94 : i32 to vector<8x16xi32>
    %232 = arith.cmpi eq, %206, %231 : vector<8x16xi32>
    %c8_i32_95 = arith.constant 8 : i32
    %233 = vector.broadcast %c8_i32_95 : i32 to vector<8x16xi32>
    %234 = arith.cmpi eq, %207, %233 : vector<8x16xi32>
    %235 = arith.andi %232, %234 : vector<8x16xi1>
    %236 = arith.ori %230, %235 : vector<8x16xi1>
    %c3_i32 = arith.constant 3 : i32
    %237 = vector.broadcast %c3_i32 : i32 to vector<8x16xi32>
    %238 = arith.cmpi eq, %206, %237 : vector<8x16xi32>
    %c10_i32 = arith.constant 10 : i32
    %239 = vector.broadcast %c10_i32 : i32 to vector<8x16xi32>
    %240 = arith.cmpi eq, %207, %239 : vector<8x16xi32>
    %241 = arith.andi %238, %240 : vector<8x16xi1>
    %242 = arith.ori %236, %241 : vector<8x16xi1>
    %c5_i32 = arith.constant 5 : i32
    %243 = vector.broadcast %c5_i32 : i32 to vector<8x16xi32>
    %244 = arith.cmpi eq, %206, %243 : vector<8x16xi32>
    %c12_i32 = arith.constant 12 : i32
    %245 = vector.broadcast %c12_i32 : i32 to vector<8x16xi32>
    %246 = arith.cmpi eq, %207, %245 : vector<8x16xi32>
    %247 = arith.andi %244, %246 : vector<8x16xi1>
    %248 = arith.ori %242, %247 : vector<8x16xi1>
    %c7_i32_96 = arith.constant 7 : i32
    %249 = vector.broadcast %c7_i32_96 : i32 to vector<8x16xi32>
    %250 = arith.cmpi eq, %206, %249 : vector<8x16xi32>
    %c14_i32 = arith.constant 14 : i32
    %251 = vector.broadcast %c14_i32 : i32 to vector<8x16xi32>
    %252 = arith.cmpi eq, %207, %251 : vector<8x16xi32>
    %253 = arith.andi %250, %252 : vector<8x16xi1>
    %254 = arith.ori %248, %253 : vector<8x16xi1>
    %cst_97 = arith.constant 1.000000e+00 : f32
    %cst_98 = arith.constant 0.000000e+00 : f32
    %255 = vector.broadcast %cst_97 : f32 to vector<8x16xf32>
    %256 = vector.broadcast %cst_98 : f32 to vector<8x16xf32>
    %257 = arith.select %254, %255, %256 : vector<8x16xi1>, vector<8x16xf32>
    %258 = arith.truncf %257 : vector<8x16xf32> to vector<8x16xbf16>
    %259 = tpu.iota {dimensions = array<i32: 0>} : vector<8x16xi32>
    %260 = tpu.iota {dimensions = array<i32: 1>} : vector<8x16xi32>
    %c0_i32_99 = arith.constant 0 : i32
    %261 = vector.broadcast %c0_i32_99 : i32 to vector<8x16xi32>
    %262 = arith.cmpi eq, %259, %261 : vector<8x16xi32>
    %c1_i32_100 = arith.constant 1 : i32
    %263 = vector.broadcast %c1_i32_100 : i32 to vector<8x16xi32>
    %264 = arith.cmpi eq, %260, %263 : vector<8x16xi32>
    %265 = arith.andi %262, %264 : vector<8x16xi1>
    %c2_i32_101 = arith.constant 2 : i32
    %266 = vector.broadcast %c2_i32_101 : i32 to vector<8x16xi32>
    %267 = arith.cmpi eq, %259, %266 : vector<8x16xi32>
    %c3_i32_102 = arith.constant 3 : i32
    %268 = vector.broadcast %c3_i32_102 : i32 to vector<8x16xi32>
    %269 = arith.cmpi eq, %260, %268 : vector<8x16xi32>
    %270 = arith.andi %267, %269 : vector<8x16xi1>
    %271 = arith.ori %265, %270 : vector<8x16xi1>
    %c4_i32_103 = arith.constant 4 : i32
    %272 = vector.broadcast %c4_i32_103 : i32 to vector<8x16xi32>
    %273 = arith.cmpi eq, %259, %272 : vector<8x16xi32>
    %c5_i32_104 = arith.constant 5 : i32
    %274 = vector.broadcast %c5_i32_104 : i32 to vector<8x16xi32>
    %275 = arith.cmpi eq, %260, %274 : vector<8x16xi32>
    %276 = arith.andi %273, %275 : vector<8x16xi1>
    %277 = arith.ori %271, %276 : vector<8x16xi1>
    %c6_i32_105 = arith.constant 6 : i32
    %278 = vector.broadcast %c6_i32_105 : i32 to vector<8x16xi32>
    %279 = arith.cmpi eq, %259, %278 : vector<8x16xi32>
    %c7_i32_106 = arith.constant 7 : i32
    %280 = vector.broadcast %c7_i32_106 : i32 to vector<8x16xi32>
    %281 = arith.cmpi eq, %260, %280 : vector<8x16xi32>
    %282 = arith.andi %279, %281 : vector<8x16xi1>
    %283 = arith.ori %277, %282 : vector<8x16xi1>
    %c1_i32_107 = arith.constant 1 : i32
    %284 = vector.broadcast %c1_i32_107 : i32 to vector<8x16xi32>
    %285 = arith.cmpi eq, %259, %284 : vector<8x16xi32>
    %c9_i32 = arith.constant 9 : i32
    %286 = vector.broadcast %c9_i32 : i32 to vector<8x16xi32>
    %287 = arith.cmpi eq, %260, %286 : vector<8x16xi32>
    %288 = arith.andi %285, %287 : vector<8x16xi1>
    %289 = arith.ori %283, %288 : vector<8x16xi1>
    %c3_i32_108 = arith.constant 3 : i32
    %290 = vector.broadcast %c3_i32_108 : i32 to vector<8x16xi32>
    %291 = arith.cmpi eq, %259, %290 : vector<8x16xi32>
    %c11_i32 = arith.constant 11 : i32
    %292 = vector.broadcast %c11_i32 : i32 to vector<8x16xi32>
    %293 = arith.cmpi eq, %260, %292 : vector<8x16xi32>
    %294 = arith.andi %291, %293 : vector<8x16xi1>
    %295 = arith.ori %289, %294 : vector<8x16xi1>
    %c5_i32_109 = arith.constant 5 : i32
    %296 = vector.broadcast %c5_i32_109 : i32 to vector<8x16xi32>
    %297 = arith.cmpi eq, %259, %296 : vector<8x16xi32>
    %c13_i32 = arith.constant 13 : i32
    %298 = vector.broadcast %c13_i32 : i32 to vector<8x16xi32>
    %299 = arith.cmpi eq, %260, %298 : vector<8x16xi32>
    %300 = arith.andi %297, %299 : vector<8x16xi1>
    %301 = arith.ori %295, %300 : vector<8x16xi1>
    %c7_i32_110 = arith.constant 7 : i32
    %302 = vector.broadcast %c7_i32_110 : i32 to vector<8x16xi32>
    %303 = arith.cmpi eq, %259, %302 : vector<8x16xi32>
    %c15_i32_111 = arith.constant 15 : i32
    %304 = vector.broadcast %c15_i32_111 : i32 to vector<8x16xi32>
    %305 = arith.cmpi eq, %260, %304 : vector<8x16xi32>
    %306 = arith.andi %303, %305 : vector<8x16xi1>
    %307 = arith.ori %301, %306 : vector<8x16xi1>
    %cst_112 = arith.constant 1.000000e+00 : f32
    %cst_113 = arith.constant 0.000000e+00 : f32
    %308 = vector.broadcast %cst_112 : f32 to vector<8x16xf32>
    %309 = vector.broadcast %cst_113 : f32 to vector<8x16xf32>
    %310 = arith.select %307, %308, %309 : vector<8x16xi1>, vector<8x16xf32>
    %311 = arith.truncf %310 : vector<8x16xf32> to vector<8x16xbf16>
    %cst_114 = arith.constant dense<0.000000e+00> : vector<8x256xf32>
    %312 = tpu.matmul %258, %205, %cst_114 {dimension_numbers = #tpu.dot_dimension_numbers<[1], [0], [0], [1], [0, 0, 1, 1], [], []>} : vector<8x16xbf16>, vector<16x256xbf16>, vector<8x256xf32> -> vector<8x256xf32>
    %cst_115 = arith.constant dense<0.000000e+00> : vector<8x256xf32>
    %313 = tpu.matmul %311, %205, %cst_115 {dimension_numbers = #tpu.dot_dimension_numbers<[1], [0], [0], [1], [0, 0, 1, 1], [], []>} : vector<8x16xbf16>, vector<16x256xbf16>, vector<8x256xf32> -> vector<8x256xf32>
    %314 = arith.maximumf %312, %313 : vector<8x256xf32>
    %315 = arith.truncf %314 : vector<8x256xf32> to vector<8x256xbf16>
    %c0_116 = arith.constant 0 : index
    %c0_117 = arith.constant 0 : index
    %316 = vector.load %arg7[%c0_116, %c0_117] : memref<256x1024xbf16, #tpu.memory_space<vmem>>, vector<256x1024xbf16>
    %cst_118 = arith.constant dense<0.000000e+00> : vector<8x1024xf32>
    %317 = tpu.matmul %315, %316, %cst_118 {dimension_numbers = #tpu.dot_dimension_numbers<[1], [0], [0], [1], [0, 0, 1, 1], [], []>} : vector<8x256xbf16>, vector<256x1024xbf16>, vector<8x1024xf32> -> vector<8x1024xf32>
    %c0_119 = arith.constant 0 : index
    %c0_120 = arith.constant 0 : index
    %318 = vector.load %arg8[%c0_119, %c0_120] : memref<1x1024xf32, #tpu.memory_space<vmem>>, vector<1x1024xf32>
    %319 = vector.broadcast %318 : vector<1x1024xf32> to vector<8x1024xf32>
    %320 = arith.addf %317, %319 : vector<8x1024xf32>
    %c0_121 = arith.constant 0 : index
    %c0_122 = arith.constant 0 : index
    %321 = vector.load %arg20[%c0_121, %c0_122] : memref<8x1024xf32, #tpu.memory_space<vmem>>, vector<8x1024xf32>
    tpu.vector_store %arg20[%c0_121, %c0_122], %320 {strides = array<i32>} : memref<8x1024xf32, #tpu.memory_space<vmem>>, vector<8x1024xf32>,
    %c0_123 = arith.constant 0 : index
    %c0_124 = arith.constant 0 : index
    %322 = vector.load %arg9[%c0_123, %c0_124] : memref<128x512xbf16, #tpu.memory_space<vmem>>, vector<128x512xbf16>
    %c0_125 = arith.constant 0 : index
    %c0_126 = arith.constant 0 : index
    %323 = vector.load %arg10[%c0_125, %c0_126] : memref<128x512xbf16, #tpu.memory_space<vmem>>, vector<128x512xbf16>
    %cst_127 = arith.constant 0.000000e+00 : f32
    %324 = vector.broadcast %cst_127 : f32 to vector<2x128xf32>
    %cst_128 = arith.constant 0.000000e+00 : f32
    %325 = vector.broadcast %cst_128 : f32 to vector<2x128xf32>
    %cst_129 = arith.constant 0.000000e+00 : f32
    %326 = vector.broadcast %cst_129 : f32 to vector<2x128xf32>
    %cst_130 = arith.constant 0.000000e+00 : f32
    %327 = vector.broadcast %cst_130 : f32 to vector<2x128xf32>
    %c0_131 = arith.constant 0 : index
    %c0_132 = arith.constant 0 : index
    %328 = vector.load %arg20[%c0_131, %c0_132] : memref<8x1024xf32, #tpu.memory_space<vmem>>, vector<2x512xf32>
    %329 = arith.truncf %324 : vector<2x128xf32> to vector<2x128xbf16>
    %cst_133 = arith.constant dense<0.000000e+00> : vector<2x512xf32>
    %330 = tpu.matmul %329, %322, %cst_133 {dimension_numbers = #tpu.dot_dimension_numbers<[1], [0], [0], [1], [0, 0, 1, 1], [], []>} : vector<2x128xbf16>, vector<128x512xbf16>, vector<2x512xf32> -> vector<2x512xf32>
    %331 = arith.addf %328, %330 : vector<2x512xf32>
    %c6 = arith.constant 6 : index
    %c512 = arith.constant 512 : index
    %332 = vector.load %arg20[%c6, %c512] : memref<8x1024xf32, #tpu.memory_space<vmem>>, vector<2x512xf32>
    %333 = arith.truncf %326 : vector<2x128xf32> to vector<2x128xbf16>
    %cst_134 = arith.constant dense<0.000000e+00> : vector<2x512xf32>
    %334 = tpu.matmul %333, %323, %cst_134 {dimension_numbers = #tpu.dot_dimension_numbers<[1], [0], [0], [1], [0, 0, 1, 1], [], []>} : vector<2x128xbf16>, vector<128x512xbf16>, vector<2x512xf32> -> vector<2x512xf32>
    %335 = arith.addf %332, %334 : vector<2x512xf32>
    %336 = vector.extract_strided_slice %331 {offsets = [0, 0], sizes = [2, 128], strides = [1, 1]} : vector<2x512xf32> to vector<2x128xf32>
    %337 = arith.negf %336 : vector<2x128xf32>
    %338 = math.exp %337 : vector<2x128xf32>
    %cst_135 = arith.constant 1.000000e+00 : f32
    %339 = vector.broadcast %cst_135 : f32 to vector<2x128xf32>
    %340 = arith.addf %339, %338 : vector<2x128xf32>
    %341 = arith.divf %339, %340 : vector<2x128xf32>
    %342 = vector.extract_strided_slice %331 {offsets = [0, 128], sizes = [2, 128], strides = [1, 1]} : vector<2x512xf32> to vector<2x128xf32>
    %343 = arith.negf %342 : vector<2x128xf32>
    %344 = math.exp %343 : vector<2x128xf32>
    %cst_136 = arith.constant 1.000000e+00 : f32
    %345 = vector.broadcast %cst_136 : f32 to vector<2x128xf32>
    %346 = arith.addf %345, %344 : vector<2x128xf32>
    %347 = arith.divf %345, %346 : vector<2x128xf32>
    %348 = vector.extract_strided_slice %331 {offsets = [0, 256], sizes = [2, 128], strides = [1, 1]} : vector<2x512xf32> to vector<2x128xf32>
    %349 = math.tanh %348 : vector<2x128xf32>
    %350 = vector.extract_strided_slice %331 {offsets = [0, 384], sizes = [2, 128], strides = [1, 1]} : vector<2x512xf32> to vector<2x128xf32>
    %351 = arith.negf %350 : vector<2x128xf32>
    %352 = math.exp %351 : vector<2x128xf32>
    %cst_137 = arith.constant 1.000000e+00 : f32
    %353 = vector.broadcast %cst_137 : f32 to vector<2x128xf32>
    %354 = arith.addf %353, %352 : vector<2x128xf32>
    %355 = arith.divf %353, %354 : vector<2x128xf32>
    %356 = arith.mulf %347, %325 : vector<2x128xf32>
    %357 = arith.mulf %341, %349 : vector<2x128xf32>
    %358 = arith.addf %356, %357 : vector<2x128xf32>
    %359 = math.tanh %358 : vector<2x128xf32>
    %360 = arith.mulf %355, %359 : vector<2x128xf32>
    %361 = vector.extract_strided_slice %335 {offsets = [0, 0], sizes = [2, 128], strides = [1, 1]} : vector<2x512xf32> to vector<2x128xf32>
    %362 = arith.negf %361 : vector<2x128xf32>
    %363 = math.exp %362 : vector<2x128xf32>
    %cst_138 = arith.constant 1.000000e+00 : f32
    %364 = vector.broadcast %cst_138 : f32 to vector<2x128xf32>
    %365 = arith.addf %364, %363 : vector<2x128xf32>
    %366 = arith.divf %364, %365 : vector<2x128xf32>
    %367 = vector.extract_strided_slice %335 {offsets = [0, 128], sizes = [2, 128], strides = [1, 1]} : vector<2x512xf32> to vector<2x128xf32>
    %368 = arith.negf %367 : vector<2x128xf32>
    %369 = math.exp %368 : vector<2x128xf32>
    %cst_139 = arith.constant 1.000000e+00 : f32
    %370 = vector.broadcast %cst_139 : f32 to vector<2x128xf32>
    %371 = arith.addf %370, %369 : vector<2x128xf32>
    %372 = arith.divf %370, %371 : vector<2x128xf32>
    %373 = vector.extract_strided_slice %335 {offsets = [0, 256], sizes = [2, 128], strides = [1, 1]} : vector<2x512xf32> to vector<2x128xf32>
    %374 = math.tanh %373 : vector<2x128xf32>
    %375 = vector.extract_strided_slice %335 {offsets = [0, 384], sizes = [2, 128], strides = [1, 1]} : vector<2x512xf32> to vector<2x128xf32>
    %376 = arith.negf %375 : vector<2x128xf32>
    %377 = math.exp %376 : vector<2x128xf32>
    %cst_140 = arith.constant 1.000000e+00 : f32
    %378 = vector.broadcast %cst_140 : f32 to vector<2x128xf32>
    %379 = arith.addf %378, %377 : vector<2x128xf32>
    %380 = arith.divf %378, %379 : vector<2x128xf32>
    %381 = arith.mulf %372, %327 : vector<2x128xf32>
    %382 = arith.mulf %366, %374 : vector<2x128xf32>
    %383 = arith.addf %381, %382 : vector<2x128xf32>
    %384 = math.tanh %383 : vector<2x128xf32>
    %385 = arith.mulf %380, %384 : vector<2x128xf32>
    %c0_141 = arith.constant 0 : index
    %c0_142 = arith.constant 0 : index
    %386 = vector.load %arg21[%c0_141, %c0_142] : memref<8x256xf32, #tpu.memory_space<vmem>>, vector<2x128xf32>
    tpu.vector_store %arg21[%c0_141, %c0_142], %360 {strides = array<i32>} : memref<8x256xf32, #tpu.memory_space<vmem>>, vector<2x128xf32>,
    %c6_143 = arith.constant 6 : index
    %c128 = arith.constant 128 : index
    %387 = vector.load %arg21[%c6_143, %c128] : memref<8x256xf32, #tpu.memory_space<vmem>>, vector<2x128xf32>
    tpu.vector_store %arg21[%c6_143, %c128], %385 {strides = array<i32>} : memref<8x256xf32, #tpu.memory_space<vmem>>, vector<2x128xf32>,
    %c2_144 = arith.constant 2 : index
    %c0_145 = arith.constant 0 : index
    %388 = vector.load %arg20[%c2_144, %c0_145] : memref<8x1024xf32, #tpu.memory_space<vmem>>, vector<2x512xf32>
    %389 = arith.truncf %360 : vector<2x128xf32> to vector<2x128xbf16>
    %cst_146 = arith.constant dense<0.000000e+00> : vector<2x512xf32>
    %390 = tpu.matmul %389, %322, %cst_146 {dimension_numbers = #tpu.dot_dimension_numbers<[1], [0], [0], [1], [0, 0, 1, 1], [], []>} : vector<2x128xbf16>, vector<128x512xbf16>, vector<2x512xf32> -> vector<2x512xf32>
    %391 = arith.addf %388, %390 : vector<2x512xf32>
    %c4 = arith.constant 4 : index
    %c512_147 = arith.constant 512 : index
    %392 = vector.load %arg20[%c4, %c512_147] : memref<8x1024xf32, #tpu.memory_space<vmem>>, vector<2x512xf32>
    %393 = arith.truncf %385 : vector<2x128xf32> to vector<2x128xbf16>
    %cst_148 = arith.constant dense<0.000000e+00> : vector<2x512xf32>
    %394 = tpu.matmul %393, %323, %cst_148 {dimension_numbers = #tpu.dot_dimension_numbers<[1], [0], [0], [1], [0, 0, 1, 1], [], []>} : vector<2x128xbf16>, vector<128x512xbf16>, vector<2x512xf32> -> vector<2x512xf32>
    %395 = arith.addf %392, %394 : vector<2x512xf32>
    %396 = vector.extract_strided_slice %391 {offsets = [0, 0], sizes = [2, 128], strides = [1, 1]} : vector<2x512xf32> to vector<2x128xf32>
    %397 = arith.negf %396 : vector<2x128xf32>
    %398 = math.exp %397 : vector<2x128xf32>
    %cst_149 = arith.constant 1.000000e+00 : f32
    %399 = vector.broadcast %cst_149 : f32 to vector<2x128xf32>
    %400 = arith.addf %399, %398 : vector<2x128xf32>
    %401 = arith.divf %399, %400 : vector<2x128xf32>
    %402 = vector.extract_strided_slice %391 {offsets = [0, 128], sizes = [2, 128], strides = [1, 1]} : vector<2x512xf32> to vector<2x128xf32>
    %403 = arith.negf %402 : vector<2x128xf32>
    %404 = math.exp %403 : vector<2x128xf32>
    %cst_150 = arith.constant 1.000000e+00 : f32
    %405 = vector.broadcast %cst_150 : f32 to vector<2x128xf32>
    %406 = arith.addf %405, %404 : vector<2x128xf32>
    %407 = arith.divf %405, %406 : vector<2x128xf32>
    %408 = vector.extract_strided_slice %391 {offsets = [0, 256], sizes = [2, 128], strides = [1, 1]} : vector<2x512xf32> to vector<2x128xf32>
    %409 = math.tanh %408 : vector<2x128xf32>
    %410 = vector.extract_strided_slice %391 {offsets = [0, 384], sizes = [2, 128], strides = [1, 1]} : vector<2x512xf32> to vector<2x128xf32>
    %411 = arith.negf %410 : vector<2x128xf32>
    %412 = math.exp %411 : vector<2x128xf32>
    %cst_151 = arith.constant 1.000000e+00 : f32
    %413 = vector.broadcast %cst_151 : f32 to vector<2x128xf32>
    %414 = arith.addf %413, %412 : vector<2x128xf32>
    %415 = arith.divf %413, %414 : vector<2x128xf32>
    %416 = arith.mulf %407, %358 : vector<2x128xf32>
    %417 = arith.mulf %401, %409 : vector<2x128xf32>
    %418 = arith.addf %416, %417 : vector<2x128xf32>
    %419 = math.tanh %418 : vector<2x128xf32>
    %420 = arith.mulf %415, %419 : vector<2x128xf32>
    %421 = vector.extract_strided_slice %395 {offsets = [0, 0], sizes = [2, 128], strides = [1, 1]} : vector<2x512xf32> to vector<2x128xf32>
    %422 = arith.negf %421 : vector<2x128xf32>
    %423 = math.exp %422 : vector<2x128xf32>
    %cst_152 = arith.constant 1.000000e+00 : f32
    %424 = vector.broadcast %cst_152 : f32 to vector<2x128xf32>
    %425 = arith.addf %424, %423 : vector<2x128xf32>
    %426 = arith.divf %424, %425 : vector<2x128xf32>
    %427 = vector.extract_strided_slice %395 {offsets = [0, 128], sizes = [2, 128], strides = [1, 1]} : vector<2x512xf32> to vector<2x128xf32>
    %428 = arith.negf %427 : vector<2x128xf32>
    %429 = math.exp %428 : vector<2x128xf32>
    %cst_153 = arith.constant 1.000000e+00 : f32
    %430 = vector.broadcast %cst_153 : f32 to vector<2x128xf32>
    %431 = arith.addf %430, %429 : vector<2x128xf32>
    %432 = arith.divf %430, %431 : vector<2x128xf32>
    %433 = vector.extract_strided_slice %395 {offsets = [0, 256], sizes = [2, 128], strides = [1, 1]} : vector<2x512xf32> to vector<2x128xf32>
    %434 = math.tanh %433 : vector<2x128xf32>
    %435 = vector.extract_strided_slice %395 {offsets = [0, 384], sizes = [2, 128], strides = [1, 1]} : vector<2x512xf32> to vector<2x128xf32>
    %436 = arith.negf %435 : vector<2x128xf32>
    %437 = math.exp %436 : vector<2x128xf32>
    %cst_154 = arith.constant 1.000000e+00 : f32
    %438 = vector.broadcast %cst_154 : f32 to vector<2x128xf32>
    %439 = arith.addf %438, %437 : vector<2x128xf32>
    %440 = arith.divf %438, %439 : vector<2x128xf32>
    %441 = arith.mulf %432, %383 : vector<2x128xf32>
    %442 = arith.mulf %426, %434 : vector<2x128xf32>
    %443 = arith.addf %441, %442 : vector<2x128xf32>
    %444 = math.tanh %443 : vector<2x128xf32>
    %445 = arith.mulf %440, %444 : vector<2x128xf32>
    %c2_155 = arith.constant 2 : index
    %c0_156 = arith.constant 0 : index
    %446 = vector.load %arg21[%c2_155, %c0_156] : memref<8x256xf32, #tpu.memory_space<vmem>>, vector<2x128xf32>
    tpu.vector_store %arg21[%c2_155, %c0_156], %420 {strides = array<i32>} : memref<8x256xf32, #tpu.memory_space<vmem>>, vector<2x128xf32>,
    %c4_157 = arith.constant 4 : index
    %c128_158 = arith.constant 128 : index
    %447 = vector.load %arg21[%c4_157, %c128_158] : memref<8x256xf32, #tpu.memory_space<vmem>>, vector<2x128xf32>
    tpu.vector_store %arg21[%c4_157, %c128_158], %445 {strides = array<i32>} : memref<8x256xf32, #tpu.memory_space<vmem>>, vector<2x128xf32>,
    %c4_159 = arith.constant 4 : index
    %c0_160 = arith.constant 0 : index
    %448 = vector.load %arg20[%c4_159, %c0_160] : memref<8x1024xf32, #tpu.memory_space<vmem>>, vector<2x512xf32>
    %449 = arith.truncf %420 : vector<2x128xf32> to vector<2x128xbf16>
    %cst_161 = arith.constant dense<0.000000e+00> : vector<2x512xf32>
    %450 = tpu.matmul %449, %322, %cst_161 {dimension_numbers = #tpu.dot_dimension_numbers<[1], [0], [0], [1], [0, 0, 1, 1], [], []>} : vector<2x128xbf16>, vector<128x512xbf16>, vector<2x512xf32> -> vector<2x512xf32>
    %451 = arith.addf %448, %450 : vector<2x512xf32>
    %c2_162 = arith.constant 2 : index
    %c512_163 = arith.constant 512 : index
    %452 = vector.load %arg20[%c2_162, %c512_163] : memref<8x1024xf32, #tpu.memory_space<vmem>>, vector<2x512xf32>
    %453 = arith.truncf %445 : vector<2x128xf32> to vector<2x128xbf16>
    %cst_164 = arith.constant dense<0.000000e+00> : vector<2x512xf32>
    %454 = tpu.matmul %453, %323, %cst_164 {dimension_numbers = #tpu.dot_dimension_numbers<[1], [0], [0], [1], [0, 0, 1, 1], [], []>} : vector<2x128xbf16>, vector<128x512xbf16>, vector<2x512xf32> -> vector<2x512xf32>
    %455 = arith.addf %452, %454 : vector<2x512xf32>
    %456 = vector.extract_strided_slice %451 {offsets = [0, 0], sizes = [2, 128], strides = [1, 1]} : vector<2x512xf32> to vector<2x128xf32>
    %457 = arith.negf %456 : vector<2x128xf32>
    %458 = math.exp %457 : vector<2x128xf32>
    %cst_165 = arith.constant 1.000000e+00 : f32
    %459 = vector.broadcast %cst_165 : f32 to vector<2x128xf32>
    %460 = arith.addf %459, %458 : vector<2x128xf32>
    %461 = arith.divf %459, %460 : vector<2x128xf32>
    %462 = vector.extract_strided_slice %451 {offsets = [0, 128], sizes = [2, 128], strides = [1, 1]} : vector<2x512xf32> to vector<2x128xf32>
    %463 = arith.negf %462 : vector<2x128xf32>
    %464 = math.exp %463 : vector<2x128xf32>
    %cst_166 = arith.constant 1.000000e+00 : f32
    %465 = vector.broadcast %cst_166 : f32 to vector<2x128xf32>
    %466 = arith.addf %465, %464 : vector<2x128xf32>
    %467 = arith.divf %465, %466 : vector<2x128xf32>
    %468 = vector.extract_strided_slice %451 {offsets = [0, 256], sizes = [2, 128], strides = [1, 1]} : vector<2x512xf32> to vector<2x128xf32>
    %469 = math.tanh %468 : vector<2x128xf32>
    %470 = vector.extract_strided_slice %451 {offsets = [0, 384], sizes = [2, 128], strides = [1, 1]} : vector<2x512xf32> to vector<2x128xf32>
    %471 = arith.negf %470 : vector<2x128xf32>
    %472 = math.exp %471 : vector<2x128xf32>
    %cst_167 = arith.constant 1.000000e+00 : f32
    %473 = vector.broadcast %cst_167 : f32 to vector<2x128xf32>
    %474 = arith.addf %473, %472 : vector<2x128xf32>
    %475 = arith.divf %473, %474 : vector<2x128xf32>
    %476 = arith.mulf %467, %418 : vector<2x128xf32>
    %477 = arith.mulf %461, %469 : vector<2x128xf32>
    %478 = arith.addf %476, %477 : vector<2x128xf32>
    %479 = math.tanh %478 : vector<2x128xf32>
    %480 = arith.mulf %475, %479 : vector<2x128xf32>
    %481 = vector.extract_strided_slice %455 {offsets = [0, 0], sizes = [2, 128], strides = [1, 1]} : vector<2x512xf32> to vector<2x128xf32>
    %482 = arith.negf %481 : vector<2x128xf32>
    %483 = math.exp %482 : vector<2x128xf32>
    %cst_168 = arith.constant 1.000000e+00 : f32
    %484 = vector.broadcast %cst_168 : f32 to vector<2x128xf32>
    %485 = arith.addf %484, %483 : vector<2x128xf32>
    %486 = arith.divf %484, %485 : vector<2x128xf32>
    %487 = vector.extract_strided_slice %455 {offsets = [0, 128], sizes = [2, 128], strides = [1, 1]} : vector<2x512xf32> to vector<2x128xf32>
    %488 = arith.negf %487 : vector<2x128xf32>
    %489 = math.exp %488 : vector<2x128xf32>
    %cst_169 = arith.constant 1.000000e+00 : f32
    %490 = vector.broadcast %cst_169 : f32 to vector<2x128xf32>
    %491 = arith.addf %490, %489 : vector<2x128xf32>
    %492 = arith.divf %490, %491 : vector<2x128xf32>
    %493 = vector.extract_strided_slice %455 {offsets = [0, 256], sizes = [2, 128], strides = [1, 1]} : vector<2x512xf32> to vector<2x128xf32>
    %494 = math.tanh %493 : vector<2x128xf32>
    %495 = vector.extract_strided_slice %455 {offsets = [0, 384], sizes = [2, 128], strides = [1, 1]} : vector<2x512xf32> to vector<2x128xf32>
    %496 = arith.negf %495 : vector<2x128xf32>
    %497 = math.exp %496 : vector<2x128xf32>
    %cst_170 = arith.constant 1.000000e+00 : f32
    %498 = vector.broadcast %cst_170 : f32 to vector<2x128xf32>
    %499 = arith.addf %498, %497 : vector<2x128xf32>
    %500 = arith.divf %498, %499 : vector<2x128xf32>
    %501 = arith.mulf %492, %443 : vector<2x128xf32>
    %502 = arith.mulf %486, %494 : vector<2x128xf32>
    %503 = arith.addf %501, %502 : vector<2x128xf32>
    %504 = math.tanh %503 : vector<2x128xf32>
    %505 = arith.mulf %500, %504 : vector<2x128xf32>
    %c4_171 = arith.constant 4 : index
    %c0_172 = arith.constant 0 : index
    %506 = vector.load %arg21[%c4_171, %c0_172] : memref<8x256xf32, #tpu.memory_space<vmem>>, vector<2x128xf32>
    tpu.vector_store %arg21[%c4_171, %c0_172], %480 {strides = array<i32>} : memref<8x256xf32, #tpu.memory_space<vmem>>, vector<2x128xf32>,
    %c2_173 = arith.constant 2 : index
    %c128_174 = arith.constant 128 : index
    %507 = vector.load %arg21[%c2_173, %c128_174] : memref<8x256xf32, #tpu.memory_space<vmem>>, vector<2x128xf32>
    tpu.vector_store %arg21[%c2_173, %c128_174], %505 {strides = array<i32>} : memref<8x256xf32, #tpu.memory_space<vmem>>, vector<2x128xf32>,
    %c6_175 = arith.constant 6 : index
    %c0_176 = arith.constant 0 : index
    %508 = vector.load %arg20[%c6_175, %c0_176] : memref<8x1024xf32, #tpu.memory_space<vmem>>, vector<2x512xf32>
    %509 = arith.truncf %480 : vector<2x128xf32> to vector<2x128xbf16>
    %cst_177 = arith.constant dense<0.000000e+00> : vector<2x512xf32>
    %510 = tpu.matmul %509, %322, %cst_177 {dimension_numbers = #tpu.dot_dimension_numbers<[1], [0], [0], [1], [0, 0, 1, 1], [], []>} : vector<2x128xbf16>, vector<128x512xbf16>, vector<2x512xf32> -> vector<2x512xf32>
    %511 = arith.addf %508, %510 : vector<2x512xf32>
    %c0_178 = arith.constant 0 : index
    %c512_179 = arith.constant 512 : index
    %512 = vector.load %arg20[%c0_178, %c512_179] : memref<8x1024xf32, #tpu.memory_space<vmem>>, vector<2x512xf32>
    %513 = arith.truncf %505 : vector<2x128xf32> to vector<2x128xbf16>
    %cst_180 = arith.constant dense<0.000000e+00> : vector<2x512xf32>
    %514 = tpu.matmul %513, %323, %cst_180 {dimension_numbers = #tpu.dot_dimension_numbers<[1], [0], [0], [1], [0, 0, 1, 1], [], []>} : vector<2x128xbf16>, vector<128x512xbf16>, vector<2x512xf32> -> vector<2x512xf32>
    %515 = arith.addf %512, %514 : vector<2x512xf32>
    %516 = vector.extract_strided_slice %511 {offsets = [0, 0], sizes = [2, 128], strides = [1, 1]} : vector<2x512xf32> to vector<2x128xf32>
    %517 = arith.negf %516 : vector<2x128xf32>
    %518 = math.exp %517 : vector<2x128xf32>
    %cst_181 = arith.constant 1.000000e+00 : f32
    %519 = vector.broadcast %cst_181 : f32 to vector<2x128xf32>
    %520 = arith.addf %519, %518 : vector<2x128xf32>
    %521 = arith.divf %519, %520 : vector<2x128xf32>
    %522 = vector.extract_strided_slice %511 {offsets = [0, 128], sizes = [2, 128], strides = [1, 1]} : vector<2x512xf32> to vector<2x128xf32>
    %523 = arith.negf %522 : vector<2x128xf32>
    %524 = math.exp %523 : vector<2x128xf32>
    %cst_182 = arith.constant 1.000000e+00 : f32
    %525 = vector.broadcast %cst_182 : f32 to vector<2x128xf32>
    %526 = arith.addf %525, %524 : vector<2x128xf32>
    %527 = arith.divf %525, %526 : vector<2x128xf32>
    %528 = vector.extract_strided_slice %511 {offsets = [0, 256], sizes = [2, 128], strides = [1, 1]} : vector<2x512xf32> to vector<2x128xf32>
    %529 = math.tanh %528 : vector<2x128xf32>
    %530 = vector.extract_strided_slice %511 {offsets = [0, 384], sizes = [2, 128], strides = [1, 1]} : vector<2x512xf32> to vector<2x128xf32>
    %531 = arith.negf %530 : vector<2x128xf32>
    %532 = math.exp %531 : vector<2x128xf32>
    %cst_183 = arith.constant 1.000000e+00 : f32
    %533 = vector.broadcast %cst_183 : f32 to vector<2x128xf32>
    %534 = arith.addf %533, %532 : vector<2x128xf32>
    %535 = arith.divf %533, %534 : vector<2x128xf32>
    %536 = arith.mulf %527, %478 : vector<2x128xf32>
    %537 = arith.mulf %521, %529 : vector<2x128xf32>
    %538 = arith.addf %536, %537 : vector<2x128xf32>
    %539 = math.tanh %538 : vector<2x128xf32>
    %540 = arith.mulf %535, %539 : vector<2x128xf32>
    %541 = vector.extract_strided_slice %515 {offsets = [0, 0], sizes = [2, 128], strides = [1, 1]} : vector<2x512xf32> to vector<2x128xf32>
    %542 = arith.negf %541 : vector<2x128xf32>
    %543 = math.exp %542 : vector<2x128xf32>
    %cst_184 = arith.constant 1.000000e+00 : f32
    %544 = vector.broadcast %cst_184 : f32 to vector<2x128xf32>
    %545 = arith.addf %544, %543 : vector<2x128xf32>
    %546 = arith.divf %544, %545 : vector<2x128xf32>
    %547 = vector.extract_strided_slice %515 {offsets = [0, 128], sizes = [2, 128], strides = [1, 1]} : vector<2x512xf32> to vector<2x128xf32>
    %548 = arith.negf %547 : vector<2x128xf32>
    %549 = math.exp %548 : vector<2x128xf32>
    %cst_185 = arith.constant 1.000000e+00 : f32
    %550 = vector.broadcast %cst_185 : f32 to vector<2x128xf32>
    %551 = arith.addf %550, %549 : vector<2x128xf32>
    %552 = arith.divf %550, %551 : vector<2x128xf32>
    %553 = vector.extract_strided_slice %515 {offsets = [0, 256], sizes = [2, 128], strides = [1, 1]} : vector<2x512xf32> to vector<2x128xf32>
    %554 = math.tanh %553 : vector<2x128xf32>
    %555 = vector.extract_strided_slice %515 {offsets = [0, 384], sizes = [2, 128], strides = [1, 1]} : vector<2x512xf32> to vector<2x128xf32>
    %556 = arith.negf %555 : vector<2x128xf32>
    %557 = math.exp %556 : vector<2x128xf32>
    %cst_186 = arith.constant 1.000000e+00 : f32
    %558 = vector.broadcast %cst_186 : f32 to vector<2x128xf32>
    %559 = arith.addf %558, %557 : vector<2x128xf32>
    %560 = arith.divf %558, %559 : vector<2x128xf32>
    %561 = arith.mulf %552, %503 : vector<2x128xf32>
    %562 = arith.mulf %546, %554 : vector<2x128xf32>
    %563 = arith.addf %561, %562 : vector<2x128xf32>
    %564 = math.tanh %563 : vector<2x128xf32>
    %565 = arith.mulf %560, %564 : vector<2x128xf32>
    %c6_187 = arith.constant 6 : index
    %c0_188 = arith.constant 0 : index
    %566 = vector.load %arg21[%c6_187, %c0_188] : memref<8x256xf32, #tpu.memory_space<vmem>>, vector<2x128xf32>
    tpu.vector_store %arg21[%c6_187, %c0_188], %540 {strides = array<i32>} : memref<8x256xf32, #tpu.memory_space<vmem>>, vector<2x128xf32>,
    %c0_189 = arith.constant 0 : index
    %c128_190 = arith.constant 128 : index
    %567 = vector.load %arg21[%c0_189, %c128_190] : memref<8x256xf32, #tpu.memory_space<vmem>>, vector<2x128xf32>
    tpu.vector_store %arg21[%c0_189, %c128_190], %565 {strides = array<i32>} : memref<8x256xf32, #tpu.memory_space<vmem>>, vector<2x128xf32>,
    %c0_191 = arith.constant 0 : index
    %c0_192 = arith.constant 0 : index
    %568 = vector.load %arg21[%c0_191, %c0_192] : memref<8x256xf32, #tpu.memory_space<vmem>>, vector<8x256xf32>
    %569 = arith.truncf %568 : vector<8x256xf32> to vector<8x256xbf16>
    %c0_193 = arith.constant 0 : index
    %c0_194 = arith.constant 0 : index
    %570 = vector.load %arg11[%c0_193, %c0_194] : memref<256x1024xbf16, #tpu.memory_space<vmem>>, vector<256x1024xbf16>
    %cst_195 = arith.constant dense<0.000000e+00> : vector<8x1024xf32>
    %571 = tpu.matmul %569, %570, %cst_195 {dimension_numbers = #tpu.dot_dimension_numbers<[1], [0], [0], [1], [0, 0, 1, 1], [], []>} : vector<8x256xbf16>, vector<256x1024xbf16>, vector<8x1024xf32> -> vector<8x1024xf32>
    %c0_196 = arith.constant 0 : index
    %c0_197 = arith.constant 0 : index
    %572 = vector.load %arg12[%c0_196, %c0_197] : memref<1x1024xf32, #tpu.memory_space<vmem>>, vector<1x1024xf32>
    %573 = vector.broadcast %572 : vector<1x1024xf32> to vector<8x1024xf32>
    %574 = arith.addf %571, %573 : vector<8x1024xf32>
    %c0_198 = arith.constant 0 : index
    %c0_199 = arith.constant 0 : index
    %575 = vector.load %arg20[%c0_198, %c0_199] : memref<8x1024xf32, #tpu.memory_space<vmem>>, vector<8x1024xf32>
    tpu.vector_store %arg20[%c0_198, %c0_199], %574 {strides = array<i32>} : memref<8x1024xf32, #tpu.memory_space<vmem>>, vector<8x1024xf32>,
    %c0_200 = arith.constant 0 : index
    %c0_201 = arith.constant 0 : index
    %576 = vector.load %arg13[%c0_200, %c0_201] : memref<128x512xbf16, #tpu.memory_space<vmem>>, vector<128x512xbf16>
    %c0_202 = arith.constant 0 : index
    %c0_203 = arith.constant 0 : index
    %577 = vector.load %arg14[%c0_202, %c0_203] : memref<128x512xbf16, #tpu.memory_space<vmem>>, vector<128x512xbf16>
    %cst_204 = arith.constant 0.000000e+00 : f32
    %578 = vector.broadcast %cst_204 : f32 to vector<2x128xf32>
    %cst_205 = arith.constant 0.000000e+00 : f32
    %579 = vector.broadcast %cst_205 : f32 to vector<2x128xf32>
    %cst_206 = arith.constant 0.000000e+00 : f32
    %580 = vector.broadcast %cst_206 : f32 to vector<2x128xf32>
    %cst_207 = arith.constant 0.000000e+00 : f32
    %581 = vector.broadcast %cst_207 : f32 to vector<2x128xf32>
    %c0_208 = arith.constant 0 : index
    %c0_209 = arith.constant 0 : index
    %582 = vector.load %arg20[%c0_208, %c0_209] : memref<8x1024xf32, #tpu.memory_space<vmem>>, vector<2x512xf32>
    %583 = arith.truncf %578 : vector<2x128xf32> to vector<2x128xbf16>
    %cst_210 = arith.constant dense<0.000000e+00> : vector<2x512xf32>
    %584 = tpu.matmul %583, %576, %cst_210 {dimension_numbers = #tpu.dot_dimension_numbers<[1], [0], [0], [1], [0, 0, 1, 1], [], []>} : vector<2x128xbf16>, vector<128x512xbf16>, vector<2x512xf32> -> vector<2x512xf32>
    %585 = arith.addf %582, %584 : vector<2x512xf32>
    %c6_211 = arith.constant 6 : index
    %c512_212 = arith.constant 512 : index
    %586 = vector.load %arg20[%c6_211, %c512_212] : memref<8x1024xf32, #tpu.memory_space<vmem>>, vector<2x512xf32>
    %587 = arith.truncf %580 : vector<2x128xf32> to vector<2x128xbf16>
    %cst_213 = arith.constant dense<0.000000e+00> : vector<2x512xf32>
    %588 = tpu.matmul %587, %577, %cst_213 {dimension_numbers = #tpu.dot_dimension_numbers<[1], [0], [0], [1], [0, 0, 1, 1], [], []>} : vector<2x128xbf16>, vector<128x512xbf16>, vector<2x512xf32> -> vector<2x512xf32>
    %589 = arith.addf %586, %588 : vector<2x512xf32>
    %590 = vector.extract_strided_slice %585 {offsets = [0, 0], sizes = [2, 128], strides = [1, 1]} : vector<2x512xf32> to vector<2x128xf32>
    %591 = arith.negf %590 : vector<2x128xf32>
    %592 = math.exp %591 : vector<2x128xf32>
    %cst_214 = arith.constant 1.000000e+00 : f32
    %593 = vector.broadcast %cst_214 : f32 to vector<2x128xf32>
    %594 = arith.addf %593, %592 : vector<2x128xf32>
    %595 = arith.divf %593, %594 : vector<2x128xf32>
    %596 = vector.extract_strided_slice %585 {offsets = [0, 128], sizes = [2, 128], strides = [1, 1]} : vector<2x512xf32> to vector<2x128xf32>
    %597 = arith.negf %596 : vector<2x128xf32>
    %598 = math.exp %597 : vector<2x128xf32>
    %cst_215 = arith.constant 1.000000e+00 : f32
    %599 = vector.broadcast %cst_215 : f32 to vector<2x128xf32>
    %600 = arith.addf %599, %598 : vector<2x128xf32>
    %601 = arith.divf %599, %600 : vector<2x128xf32>
    %602 = vector.extract_strided_slice %585 {offsets = [0, 256], sizes = [2, 128], strides = [1, 1]} : vector<2x512xf32> to vector<2x128xf32>
    %603 = math.tanh %602 : vector<2x128xf32>
    %604 = vector.extract_strided_slice %585 {offsets = [0, 384], sizes = [2, 128], strides = [1, 1]} : vector<2x512xf32> to vector<2x128xf32>
    %605 = arith.negf %604 : vector<2x128xf32>
    %606 = math.exp %605 : vector<2x128xf32>
    %cst_216 = arith.constant 1.000000e+00 : f32
    %607 = vector.broadcast %cst_216 : f32 to vector<2x128xf32>
    %608 = arith.addf %607, %606 : vector<2x128xf32>
    %609 = arith.divf %607, %608 : vector<2x128xf32>
    %610 = arith.mulf %601, %579 : vector<2x128xf32>
    %611 = arith.mulf %595, %603 : vector<2x128xf32>
    %612 = arith.addf %610, %611 : vector<2x128xf32>
    %613 = math.tanh %612 : vector<2x128xf32>
    %614 = arith.mulf %609, %613 : vector<2x128xf32>
    %615 = vector.extract_strided_slice %589 {offsets = [0, 0], sizes = [2, 128], strides = [1, 1]} : vector<2x512xf32> to vector<2x128xf32>
    %616 = arith.negf %615 : vector<2x128xf32>
    %617 = math.exp %616 : vector<2x128xf32>
    %cst_217 = arith.constant 1.000000e+00 : f32
    %618 = vector.broadcast %cst_217 : f32 to vector<2x128xf32>
    %619 = arith.addf %618, %617 : vector<2x128xf32>
    %620 = arith.divf %618, %619 : vector<2x128xf32>
    %621 = vector.extract_strided_slice %589 {offsets = [0, 128], sizes = [2, 128], strides = [1, 1]} : vector<2x512xf32> to vector<2x128xf32>
    %622 = arith.negf %621 : vector<2x128xf32>
    %623 = math.exp %622 : vector<2x128xf32>
    %cst_218 = arith.constant 1.000000e+00 : f32
    %624 = vector.broadcast %cst_218 : f32 to vector<2x128xf32>
    %625 = arith.addf %624, %623 : vector<2x128xf32>
    %626 = arith.divf %624, %625 : vector<2x128xf32>
    %627 = vector.extract_strided_slice %589 {offsets = [0, 256], sizes = [2, 128], strides = [1, 1]} : vector<2x512xf32> to vector<2x128xf32>
    %628 = math.tanh %627 : vector<2x128xf32>
    %629 = vector.extract_strided_slice %589 {offsets = [0, 384], sizes = [2, 128], strides = [1, 1]} : vector<2x512xf32> to vector<2x128xf32>
    %630 = arith.negf %629 : vector<2x128xf32>
    %631 = math.exp %630 : vector<2x128xf32>
    %cst_219 = arith.constant 1.000000e+00 : f32
    %632 = vector.broadcast %cst_219 : f32 to vector<2x128xf32>
    %633 = arith.addf %632, %631 : vector<2x128xf32>
    %634 = arith.divf %632, %633 : vector<2x128xf32>
    %635 = arith.mulf %626, %581 : vector<2x128xf32>
    %636 = arith.mulf %620, %628 : vector<2x128xf32>
    %637 = arith.addf %635, %636 : vector<2x128xf32>
    %638 = math.tanh %637 : vector<2x128xf32>
    %639 = arith.mulf %634, %638 : vector<2x128xf32>
    %c2_220 = arith.constant 2 : index
    %c0_221 = arith.constant 0 : index
    %640 = vector.load %arg20[%c2_220, %c0_221] : memref<8x1024xf32, #tpu.memory_space<vmem>>, vector<2x512xf32>
    %641 = arith.truncf %614 : vector<2x128xf32> to vector<2x128xbf16>
    %cst_222 = arith.constant dense<0.000000e+00> : vector<2x512xf32>
    %642 = tpu.matmul %641, %576, %cst_222 {dimension_numbers = #tpu.dot_dimension_numbers<[1], [0], [0], [1], [0, 0, 1, 1], [], []>} : vector<2x128xbf16>, vector<128x512xbf16>, vector<2x512xf32> -> vector<2x512xf32>
    %643 = arith.addf %640, %642 : vector<2x512xf32>
    %c4_223 = arith.constant 4 : index
    %c512_224 = arith.constant 512 : index
    %644 = vector.load %arg20[%c4_223, %c512_224] : memref<8x1024xf32, #tpu.memory_space<vmem>>, vector<2x512xf32>
    %645 = arith.truncf %639 : vector<2x128xf32> to vector<2x128xbf16>
    %cst_225 = arith.constant dense<0.000000e+00> : vector<2x512xf32>
    %646 = tpu.matmul %645, %577, %cst_225 {dimension_numbers = #tpu.dot_dimension_numbers<[1], [0], [0], [1], [0, 0, 1, 1], [], []>} : vector<2x128xbf16>, vector<128x512xbf16>, vector<2x512xf32> -> vector<2x512xf32>
    %647 = arith.addf %644, %646 : vector<2x512xf32>
    %648 = vector.extract_strided_slice %643 {offsets = [0, 0], sizes = [2, 128], strides = [1, 1]} : vector<2x512xf32> to vector<2x128xf32>
    %649 = arith.negf %648 : vector<2x128xf32>
    %650 = math.exp %649 : vector<2x128xf32>
    %cst_226 = arith.constant 1.000000e+00 : f32
    %651 = vector.broadcast %cst_226 : f32 to vector<2x128xf32>
    %652 = arith.addf %651, %650 : vector<2x128xf32>
    %653 = arith.divf %651, %652 : vector<2x128xf32>
    %654 = vector.extract_strided_slice %643 {offsets = [0, 128], sizes = [2, 128], strides = [1, 1]} : vector<2x512xf32> to vector<2x128xf32>
    %655 = arith.negf %654 : vector<2x128xf32>
    %656 = math.exp %655 : vector<2x128xf32>
    %cst_227 = arith.constant 1.000000e+00 : f32
    %657 = vector.broadcast %cst_227 : f32 to vector<2x128xf32>
    %658 = arith.addf %657, %656 : vector<2x128xf32>
    %659 = arith.divf %657, %658 : vector<2x128xf32>
    %660 = vector.extract_strided_slice %643 {offsets = [0, 256], sizes = [2, 128], strides = [1, 1]} : vector<2x512xf32> to vector<2x128xf32>
    %661 = math.tanh %660 : vector<2x128xf32>
    %662 = vector.extract_strided_slice %643 {offsets = [0, 384], sizes = [2, 128], strides = [1, 1]} : vector<2x512xf32> to vector<2x128xf32>
    %663 = arith.negf %662 : vector<2x128xf32>
    %664 = math.exp %663 : vector<2x128xf32>
    %cst_228 = arith.constant 1.000000e+00 : f32
    %665 = vector.broadcast %cst_228 : f32 to vector<2x128xf32>
    %666 = arith.addf %665, %664 : vector<2x128xf32>
    %667 = arith.divf %665, %666 : vector<2x128xf32>
    %668 = arith.mulf %659, %612 : vector<2x128xf32>
    %669 = arith.mulf %653, %661 : vector<2x128xf32>
    %670 = arith.addf %668, %669 : vector<2x128xf32>
    %671 = math.tanh %670 : vector<2x128xf32>
    %672 = arith.mulf %667, %671 : vector<2x128xf32>
    %673 = vector.extract_strided_slice %647 {offsets = [0, 0], sizes = [2, 128], strides = [1, 1]} : vector<2x512xf32> to vector<2x128xf32>
    %674 = arith.negf %673 : vector<2x128xf32>
    %675 = math.exp %674 : vector<2x128xf32>
    %cst_229 = arith.constant 1.000000e+00 : f32
    %676 = vector.broadcast %cst_229 : f32 to vector<2x128xf32>
    %677 = arith.addf %676, %675 : vector<2x128xf32>
    %678 = arith.divf %676, %677 : vector<2x128xf32>
    %679 = vector.extract_strided_slice %647 {offsets = [0, 128], sizes = [2, 128], strides = [1, 1]} : vector<2x512xf32> to vector<2x128xf32>
    %680 = arith.negf %679 : vector<2x128xf32>
    %681 = math.exp %680 : vector<2x128xf32>
    %cst_230 = arith.constant 1.000000e+00 : f32
    %682 = vector.broadcast %cst_230 : f32 to vector<2x128xf32>
    %683 = arith.addf %682, %681 : vector<2x128xf32>
    %684 = arith.divf %682, %683 : vector<2x128xf32>
    %685 = vector.extract_strided_slice %647 {offsets = [0, 256], sizes = [2, 128], strides = [1, 1]} : vector<2x512xf32> to vector<2x128xf32>
    %686 = math.tanh %685 : vector<2x128xf32>
    %687 = vector.extract_strided_slice %647 {offsets = [0, 384], sizes = [2, 128], strides = [1, 1]} : vector<2x512xf32> to vector<2x128xf32>
    %688 = arith.negf %687 : vector<2x128xf32>
    %689 = math.exp %688 : vector<2x128xf32>
    %cst_231 = arith.constant 1.000000e+00 : f32
    %690 = vector.broadcast %cst_231 : f32 to vector<2x128xf32>
    %691 = arith.addf %690, %689 : vector<2x128xf32>
    %692 = arith.divf %690, %691 : vector<2x128xf32>
    %693 = arith.mulf %684, %637 : vector<2x128xf32>
    %694 = arith.mulf %678, %686 : vector<2x128xf32>
    %695 = arith.addf %693, %694 : vector<2x128xf32>
    %696 = math.tanh %695 : vector<2x128xf32>
    %697 = arith.mulf %692, %696 : vector<2x128xf32>
    %c4_232 = arith.constant 4 : index
    %c0_233 = arith.constant 0 : index
    %698 = vector.load %arg20[%c4_232, %c0_233] : memref<8x1024xf32, #tpu.memory_space<vmem>>, vector<2x512xf32>
    %699 = arith.truncf %672 : vector<2x128xf32> to vector<2x128xbf16>
    %cst_234 = arith.constant dense<0.000000e+00> : vector<2x512xf32>
    %700 = tpu.matmul %699, %576, %cst_234 {dimension_numbers = #tpu.dot_dimension_numbers<[1], [0], [0], [1], [0, 0, 1, 1], [], []>} : vector<2x128xbf16>, vector<128x512xbf16>, vector<2x512xf32> -> vector<2x512xf32>
    %701 = arith.addf %698, %700 : vector<2x512xf32>
    %c2_235 = arith.constant 2 : index
    %c512_236 = arith.constant 512 : index
    %702 = vector.load %arg20[%c2_235, %c512_236] : memref<8x1024xf32, #tpu.memory_space<vmem>>, vector<2x512xf32>
    %703 = arith.truncf %697 : vector<2x128xf32> to vector<2x128xbf16>
    %cst_237 = arith.constant dense<0.000000e+00> : vector<2x512xf32>
    %704 = tpu.matmul %703, %577, %cst_237 {dimension_numbers = #tpu.dot_dimension_numbers<[1], [0], [0], [1], [0, 0, 1, 1], [], []>} : vector<2x128xbf16>, vector<128x512xbf16>, vector<2x512xf32> -> vector<2x512xf32>
    %705 = arith.addf %702, %704 : vector<2x512xf32>
    %706 = vector.extract_strided_slice %701 {offsets = [0, 0], sizes = [2, 128], strides = [1, 1]} : vector<2x512xf32> to vector<2x128xf32>
    %707 = arith.negf %706 : vector<2x128xf32>
    %708 = math.exp %707 : vector<2x128xf32>
    %cst_238 = arith.constant 1.000000e+00 : f32
    %709 = vector.broadcast %cst_238 : f32 to vector<2x128xf32>
    %710 = arith.addf %709, %708 : vector<2x128xf32>
    %711 = arith.divf %709, %710 : vector<2x128xf32>
    %712 = vector.extract_strided_slice %701 {offsets = [0, 128], sizes = [2, 128], strides = [1, 1]} : vector<2x512xf32> to vector<2x128xf32>
    %713 = arith.negf %712 : vector<2x128xf32>
    %714 = math.exp %713 : vector<2x128xf32>
    %cst_239 = arith.constant 1.000000e+00 : f32
    %715 = vector.broadcast %cst_239 : f32 to vector<2x128xf32>
    %716 = arith.addf %715, %714 : vector<2x128xf32>
    %717 = arith.divf %715, %716 : vector<2x128xf32>
    %718 = vector.extract_strided_slice %701 {offsets = [0, 256], sizes = [2, 128], strides = [1, 1]} : vector<2x512xf32> to vector<2x128xf32>
    %719 = math.tanh %718 : vector<2x128xf32>
    %720 = vector.extract_strided_slice %701 {offsets = [0, 384], sizes = [2, 128], strides = [1, 1]} : vector<2x512xf32> to vector<2x128xf32>
    %721 = arith.negf %720 : vector<2x128xf32>
    %722 = math.exp %721 : vector<2x128xf32>
    %cst_240 = arith.constant 1.000000e+00 : f32
    %723 = vector.broadcast %cst_240 : f32 to vector<2x128xf32>
    %724 = arith.addf %723, %722 : vector<2x128xf32>
    %725 = arith.divf %723, %724 : vector<2x128xf32>
    %726 = arith.mulf %717, %670 : vector<2x128xf32>
    %727 = arith.mulf %711, %719 : vector<2x128xf32>
    %728 = arith.addf %726, %727 : vector<2x128xf32>
    %729 = math.tanh %728 : vector<2x128xf32>
    %730 = arith.mulf %725, %729 : vector<2x128xf32>
    %731 = vector.extract_strided_slice %705 {offsets = [0, 0], sizes = [2, 128], strides = [1, 1]} : vector<2x512xf32> to vector<2x128xf32>
    %732 = arith.negf %731 : vector<2x128xf32>
    %733 = math.exp %732 : vector<2x128xf32>
    %cst_241 = arith.constant 1.000000e+00 : f32
    %734 = vector.broadcast %cst_241 : f32 to vector<2x128xf32>
    %735 = arith.addf %734, %733 : vector<2x128xf32>
    %736 = arith.divf %734, %735 : vector<2x128xf32>
    %737 = vector.extract_strided_slice %705 {offsets = [0, 128], sizes = [2, 128], strides = [1, 1]} : vector<2x512xf32> to vector<2x128xf32>
    %738 = arith.negf %737 : vector<2x128xf32>
    %739 = math.exp %738 : vector<2x128xf32>
    %cst_242 = arith.constant 1.000000e+00 : f32
    %740 = vector.broadcast %cst_242 : f32 to vector<2x128xf32>
    %741 = arith.addf %740, %739 : vector<2x128xf32>
    %742 = arith.divf %740, %741 : vector<2x128xf32>
    %743 = vector.extract_strided_slice %705 {offsets = [0, 256], sizes = [2, 128], strides = [1, 1]} : vector<2x512xf32> to vector<2x128xf32>
    %744 = math.tanh %743 : vector<2x128xf32>
    %745 = vector.extract_strided_slice %705 {offsets = [0, 384], sizes = [2, 128], strides = [1, 1]} : vector<2x512xf32> to vector<2x128xf32>
    %746 = arith.negf %745 : vector<2x128xf32>
    %747 = math.exp %746 : vector<2x128xf32>
    %cst_243 = arith.constant 1.000000e+00 : f32
    %748 = vector.broadcast %cst_243 : f32 to vector<2x128xf32>
    %749 = arith.addf %748, %747 : vector<2x128xf32>
    %750 = arith.divf %748, %749 : vector<2x128xf32>
    %751 = arith.mulf %742, %695 : vector<2x128xf32>
    %752 = arith.mulf %736, %744 : vector<2x128xf32>
    %753 = arith.addf %751, %752 : vector<2x128xf32>
    %754 = math.tanh %753 : vector<2x128xf32>
    %755 = arith.mulf %750, %754 : vector<2x128xf32>
    %c6_244 = arith.constant 6 : index
    %c0_245 = arith.constant 0 : index
    %756 = vector.load %arg20[%c6_244, %c0_245] : memref<8x1024xf32, #tpu.memory_space<vmem>>, vector<2x512xf32>
    %757 = arith.truncf %730 : vector<2x128xf32> to vector<2x128xbf16>
    %cst_246 = arith.constant dense<0.000000e+00> : vector<2x512xf32>
    %758 = tpu.matmul %757, %576, %cst_246 {dimension_numbers = #tpu.dot_dimension_numbers<[1], [0], [0], [1], [0, 0, 1, 1], [], []>} : vector<2x128xbf16>, vector<128x512xbf16>, vector<2x512xf32> -> vector<2x512xf32>
    %759 = arith.addf %756, %758 : vector<2x512xf32>
    %c0_247 = arith.constant 0 : index
    %c512_248 = arith.constant 512 : index
    %760 = vector.load %arg20[%c0_247, %c512_248] : memref<8x1024xf32, #tpu.memory_space<vmem>>, vector<2x512xf32>
    %761 = arith.truncf %755 : vector<2x128xf32> to vector<2x128xbf16>
    %cst_249 = arith.constant dense<0.000000e+00> : vector<2x512xf32>
    %762 = tpu.matmul %761, %577, %cst_249 {dimension_numbers = #tpu.dot_dimension_numbers<[1], [0], [0], [1], [0, 0, 1, 1], [], []>} : vector<2x128xbf16>, vector<128x512xbf16>, vector<2x512xf32> -> vector<2x512xf32>
    %763 = arith.addf %760, %762 : vector<2x512xf32>
    %764 = vector.extract_strided_slice %759 {offsets = [0, 0], sizes = [2, 128], strides = [1, 1]} : vector<2x512xf32> to vector<2x128xf32>
    %765 = arith.negf %764 : vector<2x128xf32>
    %766 = math.exp %765 : vector<2x128xf32>
    %cst_250 = arith.constant 1.000000e+00 : f32
    %767 = vector.broadcast %cst_250 : f32 to vector<2x128xf32>
    %768 = arith.addf %767, %766 : vector<2x128xf32>
    %769 = arith.divf %767, %768 : vector<2x128xf32>
    %770 = vector.extract_strided_slice %759 {offsets = [0, 128], sizes = [2, 128], strides = [1, 1]} : vector<2x512xf32> to vector<2x128xf32>
    %771 = arith.negf %770 : vector<2x128xf32>
    %772 = math.exp %771 : vector<2x128xf32>
    %cst_251 = arith.constant 1.000000e+00 : f32
    %773 = vector.broadcast %cst_251 : f32 to vector<2x128xf32>
    %774 = arith.addf %773, %772 : vector<2x128xf32>
    %775 = arith.divf %773, %774 : vector<2x128xf32>
    %776 = vector.extract_strided_slice %759 {offsets = [0, 256], sizes = [2, 128], strides = [1, 1]} : vector<2x512xf32> to vector<2x128xf32>
    %777 = math.tanh %776 : vector<2x128xf32>
    %778 = vector.extract_strided_slice %759 {offsets = [0, 384], sizes = [2, 128], strides = [1, 1]} : vector<2x512xf32> to vector<2x128xf32>
    %779 = arith.negf %778 : vector<2x128xf32>
    %780 = math.exp %779 : vector<2x128xf32>
    %cst_252 = arith.constant 1.000000e+00 : f32
    %781 = vector.broadcast %cst_252 : f32 to vector<2x128xf32>
    %782 = arith.addf %781, %780 : vector<2x128xf32>
    %783 = arith.divf %781, %782 : vector<2x128xf32>
    %784 = arith.mulf %775, %728 : vector<2x128xf32>
    %785 = arith.mulf %769, %777 : vector<2x128xf32>
    %786 = arith.addf %784, %785 : vector<2x128xf32>
    %787 = math.tanh %786 : vector<2x128xf32>
    %788 = arith.mulf %783, %787 : vector<2x128xf32>
    %789 = vector.extract_strided_slice %763 {offsets = [0, 0], sizes = [2, 128], strides = [1, 1]} : vector<2x512xf32> to vector<2x128xf32>
    %790 = arith.negf %789 : vector<2x128xf32>
    %791 = math.exp %790 : vector<2x128xf32>
    %cst_253 = arith.constant 1.000000e+00 : f32
    %792 = vector.broadcast %cst_253 : f32 to vector<2x128xf32>
    %793 = arith.addf %792, %791 : vector<2x128xf32>
    %794 = arith.divf %792, %793 : vector<2x128xf32>
    %795 = vector.extract_strided_slice %763 {offsets = [0, 128], sizes = [2, 128], strides = [1, 1]} : vector<2x512xf32> to vector<2x128xf32>
    %796 = arith.negf %795 : vector<2x128xf32>
    %797 = math.exp %796 : vector<2x128xf32>
    %cst_254 = arith.constant 1.000000e+00 : f32
    %798 = vector.broadcast %cst_254 : f32 to vector<2x128xf32>
    %799 = arith.addf %798, %797 : vector<2x128xf32>
    %800 = arith.divf %798, %799 : vector<2x128xf32>
    %801 = vector.extract_strided_slice %763 {offsets = [0, 256], sizes = [2, 128], strides = [1, 1]} : vector<2x512xf32> to vector<2x128xf32>
    %802 = math.tanh %801 : vector<2x128xf32>
    %803 = vector.extract_strided_slice %763 {offsets = [0, 384], sizes = [2, 128], strides = [1, 1]} : vector<2x512xf32> to vector<2x128xf32>
    %804 = arith.negf %803 : vector<2x128xf32>
    %805 = math.exp %804 : vector<2x128xf32>
    %cst_255 = arith.constant 1.000000e+00 : f32
    %806 = vector.broadcast %cst_255 : f32 to vector<2x128xf32>
    %807 = arith.addf %806, %805 : vector<2x128xf32>
    %808 = arith.divf %806, %807 : vector<2x128xf32>
    %809 = arith.mulf %800, %753 : vector<2x128xf32>
    %810 = arith.mulf %794, %802 : vector<2x128xf32>
    %811 = arith.addf %809, %810 : vector<2x128xf32>
    %812 = math.tanh %811 : vector<2x128xf32>
    %813 = arith.mulf %808, %812 : vector<2x128xf32>
    %814 = arith.truncf %788 : vector<2x128xf32> to vector<2x128xbf16>
    %c0_256 = arith.constant 0 : index
    %c0_257 = arith.constant 0 : index
    %815 = vector.load %arg15[%c0_256, %c0_257] : memref<256x256xbf16, #tpu.memory_space<vmem>>, vector<128x256xbf16>
    %cst_258 = arith.constant dense<0.000000e+00> : vector<2x256xf32>
    %816 = tpu.matmul %814, %815, %cst_258 {dimension_numbers = #tpu.dot_dimension_numbers<[1], [0], [0], [1], [0, 0, 1, 1], [], []>} : vector<2x128xbf16>, vector<128x256xbf16>, vector<2x256xf32> -> vector<2x256xf32>
    %817 = arith.truncf %813 : vector<2x128xf32> to vector<2x128xbf16>
    %c128_259 = arith.constant 128 : index
    %c0_260 = arith.constant 0 : index
    %818 = vector.load %arg15[%c128_259, %c0_260] : memref<256x256xbf16, #tpu.memory_space<vmem>>, vector<128x256xbf16>
    %cst_261 = arith.constant dense<0.000000e+00> : vector<2x256xf32>
    %819 = tpu.matmul %817, %818, %cst_261 {dimension_numbers = #tpu.dot_dimension_numbers<[1], [0], [0], [1], [0, 0, 1, 1], [], []>} : vector<2x128xbf16>, vector<128x256xbf16>, vector<2x256xf32> -> vector<2x256xf32>
    %820 = arith.addf %816, %819 : vector<2x256xf32>
    %c0_262 = arith.constant 0 : index
    %c0_263 = arith.constant 0 : index
    %821 = vector.load %arg16[%c0_262, %c0_263] : memref<1x256xf32, #tpu.memory_space<vmem>>, vector<1x256xf32>
    %822 = vector.broadcast %821 : vector<1x256xf32> to vector<2x256xf32>
    %823 = arith.addf %820, %822 : vector<2x256xf32>
    %cst_264 = arith.constant 0.000000e+00 : f32
    %824 = vector.broadcast %cst_264 : f32 to vector<2x256xf32>
    %825 = arith.maximumf %823, %824 : vector<2x256xf32>
    %826 = arith.truncf %825 : vector<2x256xf32> to vector<2x256xbf16>
    %c0_265 = arith.constant 0 : index
    %c0_266 = arith.constant 0 : index
    %827 = vector.load %arg17[%c0_265, %c0_266] : memref<256x8xbf16, #tpu.memory_space<vmem>>, vector<256x8xbf16>
    %cst_267 = arith.constant dense<0.000000e+00> : vector<2x8xf32>
    %828 = tpu.matmul %826, %827, %cst_267 {dimension_numbers = #tpu.dot_dimension_numbers<[1], [0], [0], [1], [0, 0, 1, 1], [], []>} : vector<2x256xbf16>, vector<256x8xbf16>, vector<2x8xf32> -> vector<2x8xf32>
    %c0_268 = arith.constant 0 : index
    %c0_269 = arith.constant 0 : index
    %829 = vector.load %arg18[%c0_268, %c0_269] : memref<1x8xf32, #tpu.memory_space<vmem>>, vector<1x8xf32>
    %830 = vector.broadcast %829 : vector<1x8xf32> to vector<2x8xf32>
    %831 = arith.addf %828, %830 : vector<2x8xf32>
    %c0_270 = arith.constant 0 : index
    %c0_271 = arith.constant 0 : index
    %832 = vector.load %arg19[%c0_270, %c0_271] : memref<2x8xf32, #tpu.memory_space<vmem>>, vector<2x8xf32>
    tpu.vector_store %arg19[%c0_270, %c0_271], %831 {strides = array<i32>} : memref<2x8xf32, #tpu.memory_space<vmem>>, vector<2x8xf32>,
    return
  }
}

</mosaic_0001>

<bundles_post_ra>
// kernel: student_imu_forward.1
= control target key start
LH: loop header
LB: loop body
LE: loop exit
PB: predicated region body
PF: predicated region fallthrough
CT: control target
= control target key end

     0   :  { %s11083_s0 = inlined_call_operand.vmem [shape: bf16[64,8], index: 0, kind: input, shape index: {}]   ;;  %s11084_s1 = inlined_call_operand.vmem [shape: bf16[3,8,64], index: 1, kind: input, shape index: {}]   ;;  %s11085_s2 = inlined_call_operand.vmem [shape: f32[1,64], index: 2, kind: input, shape index: {}]   ;;  %s11086_s3 = inlined_call_operand.hbm [shape: bf16[3,64,128], index: 3, kind: input, shape index: {}]   ;;  %s11087_s4 = inlined_call_operand.vmem [shape: f32[1,128], index: 4, kind: input, shape index: {}]   ;;  %s11088_s5 = inlined_call_operand.hbm [shape: bf16[3,128,256], index: 5, kind: input, shape index: {}]   ;;  %s11089_s6 = inlined_call_operand.vmem [shape: f32[1,256], index: 6, kind: input, shape index: {}]   ;;  %s11090_s7 = inlined_call_operand.hbm [shape: bf16[256,1024], index: 7, kind: input, shape index: {}]   ;;  %s11091_s8 = inlined_call_operand.vmem [shape: f32[1,1024], index: 8, kind: input, shape index: {}]   ;;  %s11092_s9 = inlined_call_operand.vmem [shape: bf16[128,512], index: 9, kind: input, shape index: {}]   ;;  %s11093_s10 = inlined_call_operand.hbm [shape: bf16[128,512], index: 10, kind: input, shape index: {}]   ;;  %s11094_s11 = inlined_call_operand.hbm [shape: bf16[256,1024], index: 11, kind: input, shape index: {}]   ;;  %s11095_s12 = inlined_call_operand.vmem [shape: f32[1,1024], index: 12, kind: input, shape index: {}]   ;;  %s11096_s13 = inlined_call_operand.hbm [shape: bf16[128,512], index: 13, kind: input, shape index: {}]   ;;  %s11097_s14 = inlined_call_operand.hbm [shape: bf16[128,512], index: 14, kind: input, shape index: {}]   ;;  %s11098_s15 = inlined_call_operand.hbm [shape: bf16[256,256], index: 15, kind: input, shape index: {}]   ;;  %s11099_s16 = inlined_call_operand.vmem [shape: f32[1,256], index: 16, kind: input, shape index: {}]   ;;  %s11100_s17 = inlined_call_operand.vmem [shape: bf16[256,8], index: 17, kind: input, shape index: {}]   ;;  %s11101_s18 = inlined_call_operand.vmem [shape: f32[1,8], index: 18, kind: input, shape index: {}]   ;;  %s11102_s19 = inlined_call_operand.hbm [shape: f32[2,8], index: 19, kind: output, shape index: {}]  }
   0x1   :  { %11195 = sst [smem:[#allocation52_spill]] %s11083_s0 }
   0x2   :  { %11196 = sst [smem:[#allocation53_spill]] %s11084_s1 }
   0x3   :  { %11197 = sst [smem:[#allocation54_spill]] %s11085_s2 }
   0x4   :  { %11198 = sst [smem:[#allocation55_spill]] %s11086_s3 }
   0x5   :  { %24 = vsyncpa [#allocation5], 0 }
   0x6   :  { %25 = vsyncpa [#allocation8], 0 }
   0x7   :  { %26 = vsyncpa [#allocation11], 0 }
   0x8   :  { %27 = vsyncpa [#allocation14], 0 }
   0x9   :  { %28 = vsyncpa [#allocation17], 0 }
   0xa   :  { %29 = vsyncpa [#allocation6], 0  ;;  %s9231_s0 = smov [#allocation7]   ;;  %s9021_s1 = scalar_lea.hbm %s11088_s5, 6144 }
   0xb   :  { %s55_s30 = sshll.u32 %s9231_s0, 4  ;;  %p9022_p0 = scmp.ne.s32.totalorder %s11088_s5, %s9021_s1  ;;  %s56_s30 = int_to_ptr.vmem [resolvable:$true] %s55_s30 }
   0xc   :  { %p9025_p1 = scmp.lt.u32.totalorder %s9021_s1, %s11088_s5 }
   0xe   :  { %p9027_p2 = pnand %p9025_p1, %p9022_p0 }
  0x10   :  { %9030 = shalt.err (!%p9027_p2)
}
  0x11   :  { %s9031_s25 = scalar_lea.vmem %s56_s30, 6144  ;;  %p9036_p4 = scmp.lt.s32.totalorder %s56_s30, %s56_s30 }
  0x12   :  { %p9032_p3 = scmp.ne.s32.totalorder %s56_s30, %s9031_s25  ;;  %p9037_p5 = scmp.lt.s32.totalorder %s9031_s25, %s9031_s25 }
  0x14   :  { %p9038_p6 = por %p9037_p5, %p9036_p4 }
  0x16   :  { %p9039_p7 = pnand %p9038_p6, %p9032_p3 }
  0x18   :  { %9042 = shalt.err (!%p9039_p7)
}
  0x19   :  { %s11106_s3 = smov 128   ;;  %s11107_s26 = smov 8  }
  0x1a   :  { %61 = dma.hbm_to_vmem [thread:$0]  %s11088_s5, 6144, %s56_s30, [#allocation8], %s11106_s3, %s11106_s3, %s11107_s26  }
  0x1b   :  { %s9234_s29 = smov [#allocation10]   ;;  %s9043_s1 = scalar_lea.hbm %s11093_s10, 4096 }
  0x1c   :  { %s85_s0 = sshll.u32 %s9234_s29, 4  ;;  %p9044_p8 = scmp.ne.s32.totalorder %s11093_s10, %s9043_s1  ;;  %s86_s0 = int_to_ptr.vmem [resolvable:$true] %s85_s0 }
  0x1d   :  { %p9047_p9 = scmp.lt.u32.totalorder %s9043_s1, %s11093_s10 }
  0x1f   :  { %p9049_p10 = pnand %p9047_p9, %p9044_p8 }
  0x21   :  { %9052 = shalt.err (!%p9049_p10)
}
  0x22   :  { %s9053_s25 = scalar_lea.vmem %s86_s0, 4096  ;;  %p9058_p12 = scmp.lt.s32.totalorder %s86_s0, %s86_s0 }
  0x23   :  { %p9054_p11 = scmp.ne.s32.totalorder %s86_s0, %s9053_s25  ;;  %p9059_p13 = scmp.lt.s32.totalorder %s9053_s25, %s9053_s25 }
  0x25   :  { %p9060_p0 = por %p9059_p13, %p9058_p12 }
  0x27   :  { %p9061_p1 = pnand %p9060_p0, %p9054_p11 }
  0x29   :  { %9064 = shalt.err (!%p9061_p1)
}
  0x2a   :  { %s9235_s5 = smov 256   ;;  %s9236_s30 = smov 16  }
  0x2b   :  { %91 = dma.hbm_to_vmem [thread:$0]  %s11093_s10, 4096, %s86_s0, [#allocation11], %s9235_s5, %s9235_s5, %s9236_s30  }
  0x2c   :  { %s9237_s29 = smov [#allocation13]   ;;  %s9238_s21 = smov [#allocation4]  }
  0x2d   :  { %s111_s20 = sshll.u32 %s9237_s29, 4  ;;  %s41_s1 = sshll.u32 %s9238_s21, 4  ;;  %s112_s20 = int_to_ptr.vmem [resolvable:$true] %s111_s20  ;;  %s9381_s1 = int_to_ptr.vmem [resolvable:$true] %s41_s1 }
  0x2e   :  { %s9065_s23 = scalar_lea.hbm %s11096_s13, 4096 }
  0x2f   :  { %p9066_p2 = scmp.ne.s32.totalorder %s11096_s13, %s9065_s23  ;;  %p9069_p3 = scmp.lt.u32.totalorder %s9065_s23, %s11096_s13 }
  0x31   :  { %p9071_p4 = pnand %p9069_p3, %p9066_p2 }
  0x33   :  { %9074 = shalt.err (!%p9071_p4)
}
  0x34   :  { %s9075_s10 = scalar_lea.vmem %s112_s20, 4096  ;;  %p9080_p6 = scmp.lt.s32.totalorder %s112_s20, %s112_s20 }
  0x35   :  { %p9076_p5 = scmp.ne.s32.totalorder %s112_s20, %s9075_s10  ;;  %p9081_p7 = scmp.lt.s32.totalorder %s9075_s10, %s9075_s10 }
  0x37   :  { %p9082_p8 = por %p9081_p7, %p9080_p6 }
  0x39   :  { %p9083_p9 = pnand %p9082_p8, %p9076_p5 }
  0x3b   :  { %9086 = shalt.err (!%p9083_p9)
}
  0x3c   :  { %117 = dma.hbm_to_vmem [thread:$0]  %s11096_s13, 4096, %s112_s20, [#allocation14], %s9235_s5, %s9235_s5, %s9236_s30  }
  0x3d   :  { %s11199_s3 = sld [smem:[#allocation55_spill]] }
  0x43   :  { %s9087_s26 = scalar_lea.hbm %s11199_s3, 1536 }
  0x44   :  { %p9088_p10 = scmp.ne.s32.totalorder %s11199_s3, %s9087_s26  ;;  %p9091_p11 = scmp.lt.u32.totalorder %s9087_s26, %s11199_s3 }
  0x46   :  { %p9093_p12 = pnand %p9091_p11, %p9088_p10 }
  0x48   :  { %9096 = shalt.err (!%p9093_p12)
}
  0x49   :  { %s9097_s24 = scalar_lea.vmem %s9381_s1, 1536  ;;  %p9102_p0 = scmp.lt.s32.totalorder %s9381_s1, %s9381_s1 }
  0x4a   :  { %p9098_p13 = scmp.ne.s32.totalorder %s9381_s1, %s9097_s24  ;;  %p9103_p1 = scmp.lt.s32.totalorder %s9097_s24, %s9097_s24 }
  0x4c   :  { %p9104_p2 = por %p9103_p1, %p9102_p0 }
  0x4e   :  { %p9105_p3 = pnand %p9104_p2, %p9098_p13 }
  0x50   :  { %9108 = shalt.err (!%p9105_p3)
}
  0x51   :  { %s9239_s13 = smov 64   ;;  %s9240_s20 = smov 4  }
  0x52   :  { %47 = dma.hbm_to_vmem [thread:$0]  %s11199_s3, 1536, %s9381_s1, [#allocation5], %s9239_s13, %s9239_s13, %s9240_s20  }
  0x53   :  { %s9241_s0 = smov [#allocation9]   ;;  %s9109_s26 = scalar_lea.hbm %s11090_s7, 16384 }
  0x54   :  { %s69_s27 = sshll.u32 %s9241_s0, 4  ;;  %p9110_p4 = scmp.ne.s32.totalorder %s11090_s7, %s9109_s26  ;;  %s70_s27 = int_to_ptr.vmem [resolvable:$true] %s69_s27 }
  0x55   :  { %p9113_p5 = scmp.lt.u32.totalorder %s9109_s26, %s11090_s7 }
  0x57   :  { %p9115_p6 = pnand %p9113_p5, %p9110_p4 }
  0x59   :  { %9118 = shalt.err (!%p9115_p6)
}
  0x5a   :  { %s9119_s24 = scalar_lea.vmem %s70_s27, 16384  ;;  %p9124_p8 = scmp.lt.s32.totalorder %s70_s27, %s70_s27 }
  0x5b   :  { %p9120_p7 = scmp.ne.s32.totalorder %s70_s27, %s9119_s24  ;;  %p9125_p9 = scmp.lt.s32.totalorder %s9119_s24, %s9119_s24 }
  0x5d   :  { %p9126_p10 = por %p9125_p9, %p9124_p8 }
  0x5f   :  { %p9127_p11 = pnand %p9126_p10, %p9120_p7 }
  0x61   :  { %9130 = shalt.err (!%p9127_p11)
}
  0x62   :  { %s9242_s1 = smov 512   ;;  %s9243_s3 = smov 32  }
  0x63   :  { %75 = dma.hbm_to_vmem [thread:$0]  %s11090_s7, 16384, %s70_s27, [#allocation8], %s9242_s1, %s9242_s1, %s9243_s3  }
  0x64   :  { %s9244_s25 = smov [#allocation12]   ;;  %s9245_s0 = smov [#allocation15]  }
  0x65   :  { %s97_s10 = sshll.u32 %s9244_s25, 4  ;;  %s123_s28 = sshll.u32 %s9245_s0, 4  ;;  %s98_s10 = int_to_ptr.vmem [resolvable:$true] %s97_s10  ;;  %s124_s28 = int_to_ptr.vmem [resolvable:$true] %s123_s28 }
  0x66   :  { %s9131_s21 = scalar_lea.hbm %s11094_s11, 16384 }
  0x67   :  { %p9132_p12 = scmp.ne.s32.totalorder %s11094_s11, %s9131_s21  ;;  %p9135_p13 = scmp.lt.u32.totalorder %s9131_s21, %s11094_s11 }
  0x69   :  { %p9137_p0 = pnand %p9135_p13, %p9132_p12 }
  0x6b   :  { %9140 = shalt.err (!%p9137_p0)
}
  0x6c   :  { %s9141_s7 = scalar_lea.vmem %s98_s10, 16384  ;;  %p9146_p2 = scmp.lt.s32.totalorder %s98_s10, %s98_s10 }
  0x6d   :  { %p9142_p1 = scmp.ne.s32.totalorder %s98_s10, %s9141_s7  ;;  %p9147_p3 = scmp.lt.s32.totalorder %s9141_s7, %s9141_s7 }
  0x6f   :  { %p9148_p4 = por %p9147_p3, %p9146_p2 }
  0x71   :  { %p9149_p5 = pnand %p9148_p4, %p9142_p1 }
  0x73   :  { %9152 = shalt.err (!%p9149_p5)
}
  0x74   :  { %103 = dma.hbm_to_vmem [thread:$0]  %s11094_s11, 16384, %s98_s10, [#allocation11], %s9242_s1, %s9242_s1, %s9243_s3  }
  0x75   :  { %s9153_s0 = scalar_lea.hbm %s11097_s14, 4096 }
  0x76   :  { %p9154_p6 = scmp.ne.s32.totalorder %s11097_s14, %s9153_s0  ;;  %p9157_p7 = scmp.lt.u32.totalorder %s9153_s0, %s11097_s14 }
  0x78   :  { %p9159_p8 = pnand %p9157_p7, %p9154_p6 }
  0x7a   :  { %9162 = shalt.err (!%p9159_p8)
}
  0x7b   :  { %s9163_s2 = scalar_lea.vmem %s124_s28, 4096  ;;  %p9168_p10 = scmp.lt.s32.totalorder %s124_s28, %s124_s28 }
  0x7c   :  { %p9164_p9 = scmp.ne.s32.totalorder %s124_s28, %s9163_s2  ;;  %p9169_p11 = scmp.lt.s32.totalorder %s9163_s2, %s9163_s2 }
  0x7e   :  { %p9170_p12 = por %p9169_p11, %p9168_p10 }
  0x80   :  { %p9171_p13 = pnand %p9170_p12, %p9164_p9 }
  0x82   :  { %9174 = shalt.err (!%p9171_p13)
}
  0x83   :  { %129 = dma.hbm_to_vmem [thread:$0]  %s11097_s14, 4096, %s124_s28, [#allocation14], %s9235_s5, %s9235_s5, %s9236_s30  }
  0x84   :  { %s9246_s3 = smov [#allocation16]   ;;  %s9175_s7 = scalar_lea.hbm %s11098_s15, 4096 }
  0x85   :  { %s135_s10 = sshll.u32 %s9246_s3, 4  ;;  %p9176_p0 = scmp.ne.s32.totalorder %s11098_s15, %s9175_s7  ;;  %s136_s10 = int_to_ptr.vmem [resolvable:$true] %s135_s10 }
  0x86   :  { %p9179_p1 = scmp.lt.u32.totalorder %s9175_s7, %s11098_s15 }
  0x88   :  { %p9181_p2 = pnand %p9179_p1, %p9176_p0 }
  0x8a   :  { %9184 = shalt.err (!%p9181_p2)
}
  0x8b   :  { %s9185_s0 = scalar_lea.vmem %s136_s10, 4096  ;;  %p9190_p4 = scmp.lt.s32.totalorder %s136_s10, %s136_s10 }
  0x8c   :  { %p9186_p3 = scmp.ne.s32.totalorder %s136_s10, %s9185_s0  ;;  %p9191_p5 = scmp.lt.s32.totalorder %s9185_s0, %s9185_s0 }
  0x8e   :  { %p9192_p6 = por %p9191_p5, %p9190_p4 }
  0x90   :  { %p9193_p7 = pnand %p9192_p6, %p9186_p3 }
  0x92   :  { %9196 = shalt.err (!%p9193_p7)
}
  0x93   :  { %s11200_s14 = smov 8   ;;  %s11201_s5 = smov 128  }
  0x94   :  { %141 = dma.hbm_to_vmem [thread:$0]  %s11098_s15, 4096, %s136_s10, [#allocation17], %s11201_s5, %s11201_s5, %s11200_s14  }
  0x95   :  { %9219 = dma.done.wait [#allocation5], 1536  }
  0x96   :  { %9220 = vsyncadd [#allocation5], 4294965760 }
  0x97   :  { %9221 = dma.done.wait [#allocation8], 22528  }
  0x98   :  { %9222 = vsyncadd [#allocation8], 4294944768 }
  0x99   :  { %9223 = dma.done.wait [#allocation11], 20480  }
  0x9a   :  { %9224 = vsyncadd [#allocation11], 4294946816 }
  0x9b   :  { %9225 = dma.done.wait [#allocation14], 8192  }
  0x9c   :  { %9226 = vsyncadd [#allocation14], 4294959104 }
  0x9d   :  { %9227 = dma.done.wait [#allocation17], 4096  }
  0x9e   :  { %9228 = vsyncadd [#allocation17], 4294963200  ;;  %v181_v0 = vlaneseq  ;;  %vm502_vm0 = vcmask 64512   ;;  %s11203_s26 = sld [smem:[#allocation52_spill]]  ;;  %vm515_vm5 = vcmask 1043456   ;;  %v9247_v14 = vmov 0.0  }
  0x9f   :  { %vm276_vm8 = vcmask 523264   ;;  %s11204_s10 = sld [smem:[#allocation53_spill]]  ;;  %s11209_s14 = sld [smem:[#allocation54_spill]] }
  0xa0   :  { %v9469_v1 = vshrl.u32 %v181_v0, 7  ;;  %v9474_v3 = vand.u32 127, %v181_v0  ;;  %s9250_s27 = smov [#allocation18]  }
  0xa1   :  { %s7417_s13 = sshll.u32 %s9250_s27, 4  ;;  %s7418_s13 = int_to_ptr.vmem [resolvable:$true] %s7417_s13 }
  0xa2   :  { %11202 = vst [vmem:[#allocation25_spill] sm:$0xff] %v9469_v1  ;;  %v9472_v2 = vadd.s32 8, %v9469_v1  ;;  %v192_v4 = vadd.s32 4294967295, %v9469_v1  ;;  %v9478_v5 = vadd.s32 16, %v9469_v1  ;;  %v9481_v6 = vadd.s32 24, %v9469_v1  ;;  %s9197_s20 = scalar_lea.vmem %s7418_s13, 32  ;;  %p9202_p9 = scmp.lt.s32.totalorder %s7418_s13, %s7418_s13 }
  0xa3   :  { %vm208_vm1 = vcmp.ne.s32.totalorder %v9469_v1, 0  ;;  %v9486_v8 = vadd.s32 32, %v9469_v1  ;;  %v9489_v9 = vadd.s32 40, %v9469_v1  ;;  %v9525_v18 = vadd.s32 48, %v9469_v1  ;;  %p9198_p8 = scmp.ne.s32.totalorder %s7418_s13, %s9197_s20  ;;  %p9203_p10 = scmp.lt.s32.totalorder %s9197_s20, %s9197_s20 }
  0xa4   :  { %v193_v7 = vadd.s32 4294967295, %v9472_v2  ;;  %v9494_v10 = vld [vmem:[%s11203_s26] sm:$0xff]   ;;  %v195_v11 = vadd.s32 4294967295, %v9481_v6  ;;  %v9500_v12 = vld [vmem:[%s11203_s26 + $0x8] sm:$0xff]   ;;  %vm200_vm2 = vcmp.eq.s32.totalorder %v9474_v3, %v192_v4  ;;  %v194_v13 = vadd.s32 4294967295, %v9478_v5  ;;  %v9518_v16 = vld [vmem:[%s11203_s26 + $0x10] sm:$0xff]  }
  0xa5   :  { %8120 = vmatprep.subr.bf16.mxu1 %v9494_v10  ;;  %vm1446_vm4 = vcmp.ne.s32.totalorder %v9472_v2, 8  ;;  %8154 = vmatprep.mubr.msk.bf16.mxu0 %vm502_vm0, %v9494_v10  ;;  %vm927_vm6 = vcmp.ne.s32.totalorder %v9478_v5, 16  ;;  %vm216_vm7 = vmand %vm200_vm2, %vm208_vm1  ;;  %v196_v17 = vadd.s32 4294967295, %v9486_v8  ;;  %v7442_v19 = vld [vmem:[%s11204_s10 + $0x4] sm:$0xf]  ;;  %v197_v21 = vadd.s32 4294967295, %v9489_v9  ;;  %p9204_p11 = por %p9203_p10, %p9202_p9 }
  0xa6   :  { %vm201_vm3 = vcmp.eq.s32.totalorder %v9474_v3, %v193_v7  ;;  %8121 = vmatpush3.bf16.msra.mxu1 %v9494_v10  ;;  %vm203_vm9 = vcmp.eq.s32.totalorder %v9474_v3, %v195_v11  ;;  %v9531_v20 = vsel %vm216_vm7, 1.0, %v9247_v14  ;;  %vm202_vm11 = vcmp.eq.s32.totalorder %v9474_v3, %v194_v13  ;;  %8318 = vmatprep.subr.msk.bf16.mxu0 %vm515_vm5, %v7442_v19  ;;  %v9568_v28 = vld [vmem:[%s11203_s26 + $0x18] sm:$0xff]   ;;  %v499_v39 = vld [vmem:[%s11204_s10] sm:$0xf]  ;;  %v7451_v4 = vld [vmem:[%s11204_s10 + $0x8] sm:$0xf] }
  0xa7   :  { %v241_v15 = vsel %vm201_vm3, 1.0, %v9247_v14  ;;  %8122 = vmatprep.subr.bf16.mxu1 %v9500_v12  ;;  %vm1448_vm10 = vmand %vm201_vm3, %vm1446_vm4  ;;  %vm228_vm12 = vcmp.ne.s32.totalorder %v9486_v8, 32  ;;  %vm204_vm14 = vcmp.eq.s32.totalorder %v9474_v3, %v196_v17  ;;  %v189_v24 = vadd.s32 56, %v9469_v1  ;;  %p9205_p12 = pnand %p9204_p11, %p9198_p8 }
  0xa8   :  { %v9542_v22 = vpack.c.bf16 %v241_v15, %v9531_v20  ;;  %v9545_v23 = vsel %vm1448_vm10, 1.0, %v9247_v14  ;;  %vm931_vm13 = vmand %vm202_vm11, %vm927_vm6  ;;  %v9559_v26 = vsel %vm203_vm9, 1.0, %v9247_v14  ;;  %vm205_vm15 = vcmp.eq.s32.totalorder %v9474_v3, %v197_v21 }
  0xa9   :  { %v1451_v25 = vpack.c.bf16 %v9545_v23, %v9531_v20  ;;  %v9562_v27 = vsel %vm931_vm13, 1.0, %v9247_v14  ;;  %vm236_vm1 = vmand %vm204_vm14, %vm228_vm12  ;;  %v198_v30 = vadd.s32 4294967295, %v9525_v18  ;;  %v199_v31 = vadd.s32 4294967295, %v189_v24  ;;  %v8365_v20 = vld [vmem:[#allocation7 + $0xa4] ss:$8 sps:$4 sm:$0xff]  }
  0xaa   :  { %8123 = vmatpush3.bf16.msra.mxu1 %v9500_v12  ;;  %8128 = vmatprep.mubr.msk.bf16.mxu1 %vm276_vm8, %v9542_v22  ;;  %v938_v29 = vpack.c.bf16 %v9559_v26, %v9562_v27  ;;  %v242_v32 = vsel %vm202_vm11, 1.0, %v9247_v14  ;;  %v361_v33 = vadd.s32 1, %v9481_v6  ;;  %v244_v34 = vsel %vm236_vm1, 1.0, %v9247_v14  ;;  %v8363_v23 = vld [vmem:[#allocation7 + $0xa0] ss:$8 sps:$4 sm:$0xff]  }
  0xab   :  { %8124 = vmatprep.subr.bf16.mxu1 %v9518_v16  ;;  %v245_v35 = vsel %vm205_vm15, 1.0, %v9247_v14  ;;  %vm206_vm2 = vcmp.eq.s32.totalorder %v9474_v3, %v198_v30  ;;  %v9588_v36 = vadd.s32 1, %v9469_v1  ;;  %v9591_v37 = vadd.s32 1, %v9472_v2 }
  0xac   :  { %v249_v38 = vpack.c.bf16 %v9559_v26, %v242_v32  ;;  %vm207_vm3 = vcmp.eq.s32.totalorder %v9474_v3, %v199_v31  ;;  %vm369_vm4 = vcmp.eq.s32.totalorder %v9474_v3, %v361_v33  ;;  %vm377_vm6 = vcmp.ne.s32.totalorder %v9481_v6, 31 }
  0xad   :  { %v250_v40 = vpack.c.bf16 %v245_v35, %v244_v34  ;;  %v517_v41 = vsel %vm515_vm5, %v7442_v19, 0  ;;  %v246_v42 = vsel %vm206_vm2, 1.0, %v9247_v14  ;;  %v247_v43 = vsel %vm207_vm3, 1.0, %v9247_v14  ;;  %vm9609_vm10 = vmand %vm369_vm4, %vm377_vm6 }
  0xae   :  { %8125 = vmatpush3.bf16.msra.mxu1 %v9518_v16  ;;  %8153 = vmatpush3.bf16.msra.mxu0 %v517_v41  ;;  %vm366_vm7 = vcmp.eq.s32.totalorder %v9474_v3, %v9588_v36  ;;  %vm367_vm9 = vcmp.eq.s32.totalorder %v9474_v3, %v9591_v37  ;;  %v365_v45 = vadd.s32 1, %v189_v24  ;;  %v597_v46 = vsel %vm515_vm5, %v499_v39, 0 }
  0xaf   :  { %8126 = vmatprep.subr.bf16.mxu1 %v9568_v28  ;;  %8319 = vmatprep.subr.msk.bf16.mxu0 %vm515_vm5, %v499_v39  ;;  %v9623_v47 = vsel %vm366_vm7, 1.0, %v9247_v14  ;;  %v407_v48 = vsel %vm367_vm9, 1.0, %v9247_v14  ;;  %v360_v49 = vadd.s32 1, %v9478_v5  ;;  %v362_v50 = vadd.s32 1, %v9486_v8 }
  0xb0   :  { %v363_v51 = vadd.s32 1, %v9489_v9  ;;  %vm373_vm11 = vcmp.eq.s32.totalorder %v9474_v3, %v365_v45  ;;  %vm397_vm12 = vcmp.ne.s32.totalorder %v189_v24, 63  ;;  %v251_v52 = vpack.c.bf16 %v247_v43, %v246_v42 }
  0xb1   :  { %8155 = vmatmul.mubr.msk.bf16.vlgmr.msra.gmra.mrb[0].mxu0 %vm502_vm0, %v9500_v12  ;;  %v414_v53 = vpack.c.bf16 %v407_v48, %v9623_v47  ;;  %vm368_vm13 = vcmp.eq.s32.totalorder %v9474_v3, %v360_v49  ;;  %vm9641_vm14 = vmand %vm373_vm11, %vm397_vm12  ;;  %vm370_vm15 = vcmp.eq.s32.totalorder %v9474_v3, %v362_v50  ;;  %v409_v56 = vsel %vm9609_vm10, 1.0, %v9247_v14 }
  0xb2   :  { %8127 = vmatpush3.bf16.msra.mxu1 %v9568_v28  ;;  %8163 = vmatpush3.bf16.msra.mxu0 %v597_v46  ;;  %vm371_vm1 = vcmp.eq.s32.totalorder %v9474_v3, %v363_v51  ;;  %v408_v55 = vsel %vm368_vm13, 1.0, %v9247_v14  ;;  %v410_v57 = vsel %vm370_vm15, 1.0, %v9247_v14  ;;  %v364_v59 = vadd.s32 1, %v9525_v18 }
  0xb3   :  { %8136 = vmatprep.subr.bf16.mxu1 %v9494_v10  ;;  %8158 = vmatprep.mubr.msk.bf16.mxu0 %vm502_vm0, %v9518_v16  ;;  %v411_v58 = vsel %vm371_vm1, 1.0, %v9247_v14  ;;  %v9660_v60 = vpack.c.bf16 %v409_v56, %v408_v55  ;;  %v413_v63 = vsel %vm9641_vm14, 1.0, %v9247_v14  ;;  %v679_v13 = vsel %vm515_vm5, %v7451_v4, 0 }
  0xb4   :  { %v416_v61 = vpack.c.bf16 %v411_v58, %v410_v57  ;;  %vm372_vm2 = vcmp.eq.s32.totalorder %v9474_v3, %v364_v59  ;;  %8320 = vmatprep.subr.msk.bf16.mxu0 %vm515_vm5, %v7451_v4  ;;  %v781_v42 = vmul.u32 2, %v9469_v1  ;;  %v782_v43 = vmul.u32 2, %v9472_v2 }
  0xb5   :  { %8129 = vmatmul.mubr.msk.bf16.vlgmr.msra.gmra.mrb[0].mxu1 %vm276_vm8, %v249_v38  ;;  %v412_v62 = vsel %vm372_vm2, 1.0, %v9247_v14  ;;  %vm939_vm13 = vcmask 261120   ;;  %vm1498_vm14 = vcmp.ne.s32.totalorder %v9469_v1, 7  ;;  %vm998_vm1 = vcmp.ne.s32.totalorder %v9472_v2, 15 }
  0xb6   :  { %8137 = vmatpush3.bf16.msra.mxu1 %v9494_v10  ;;  %8132 = vmatprep.mubr.msk.bf16.mxu1 %vm276_vm8, %v250_v40  ;;  %v417_v0 = vpack.c.bf16 %v413_v63, %v412_v62  ;;  %vm785_vm5 = vcmp.eq.s32.totalorder %v9474_v3, %v781_v42  ;;  %vm786_vm3 = vcmp.eq.s32.totalorder %v9474_v3, %v782_v43  ;;  %v795_v48 = vadd.s32 1, %v781_v42  ;;  %v8345_v42 = vld [vmem:[#allocation4 + $0x20] sm:$0xff]   ;;  %vm1500_vm15 = vmand %vm366_vm7, %vm1498_vm14 }
  0xb7   :  { %8138 = vmatprep.subr.bf16.mxu1 %v9500_v12  ;;  %v789_v44 = vsel %vm785_vm5, 1.0, %v9247_v14  ;;  %v790_v45 = vsel %vm786_vm3, 1.0, %v9247_v14  ;;  %v796_v49 = vadd.s32 1, %v782_v43  ;;  %v8346_v43 = vld [vmem:[#allocation4 + $0x28] sm:$0xff]   ;;  %vm1002_vm2 = vmand %vm367_vm9, %vm998_vm1  ;;  %vm9248_vm7 = vmmov 0  }
  0xb8   :  { %v9691_v46 = vpack.c.bf16 %v790_v45, %v789_v44  ;;  %v8347_v44 = vld [vmem:[#allocation4 + $0x30] sm:$0xff]   ;;  %v8348_v45 = vld [vmem:[#allocation4 + $0x38] sm:$0xff]   ;;  %vm1997_vm9 = vcmp.eq.s32.totalorder %v9469_v1, 0  ;;  %vm1998_vm5 = vcmp.eq.s32.totalorder %v9474_v3, 0  ;;  %vm2000_vm3 = vcmp.eq.s32.totalorder %v9469_v1, 2 }
  0xb9   :  { %8159 = vmatmul.mubr.msk.bf16.gmra.mrb[4].mxu0 %vm502_vm0, %v9568_v28  ;;  %vm800_vm4 = vcmp.eq.s32.totalorder %v9474_v3, %v796_v49  ;;  %v9732_v49 = vsel %vm1002_vm2, 1.0, %v9247_v14  ;;  %vm11109_vm14 = vcmp.eq.s32.totalorder %v9469_v1, 6  ;;  %vm2030_vm1 = vcmp.eq.s32.totalorder %v9474_v3, 1 }
  0xba   :  { %8139 = vmatpush3.bf16.msra.mxu1 %v9500_v12  ;;  %v804_v51 = vsel %vm800_vm4, 1.0, %v9247_v14  ;;  %vm1999_vm4 = vmand %vm1997_vm9, %vm1998_vm5 }
  0xbb   :  { %8140 = vmatprep.subr.bf16.mxu1 %v9518_v16 }
  0xbd   :  { %8133 = vmatmul.mubr.msk.bf16.gmra.mrb[4].mxu1 %vm276_vm8, %v251_v52 }
  0xbe   :  { %8141 = vmatpush3.bf16.msra.mxu1 %v9518_v16  ;;  %8144 = vmatprep.mubr.msk.bf16.mxu1 %vm276_vm8, %v414_v53  ;;  %v7456_v53 = vld [vmem:[%s11209_s14] ss:$0 sm:$0xff] }
  0xbf   :  { %8142 = vmatprep.subr.bf16.mxu1 %v9568_v28 }
  0xc2   :  { %8143 = vmatpush3.bf16.msra.mxu1 %v9568_v28 }
  0xc5   :  { %8145 = vmatmul.mubr.msk.bf16.vlgmr.msra.gmra.mrb[8].mxu1 %vm276_vm8, %v9660_v60 }
  0xc6   :  { %8148 = vmatprep.mubr.msk.bf16.mxu1 %vm276_vm8, %v416_v61 }
  0xcd   :  { %8149 = vmatmul.mubr.msk.bf16.gmra.mrb[12].mxu1 %vm276_vm8, %v417_v0 }
  0xce   :  { %8190 = vmatprep.mubr.msk.bf16.mxu1 %vm276_vm8, %v9691_v46 }
 0x188   :  { %v8130_v7 = vpop.f32.mrb[0].mxu1 }
 0x189   :  { %v323_v8 = vpop.f32.mrb[1].mxu1 }
 0x18a   :  { %v8131_v9 = vpop.f32.mrb[2].mxu1 }
 0x18b   :  { %v355_v10 = vpack.c.bf16 %v8131_v9, %v8130_v7  ;;  %v326_v11 = vpop.f32.mrb[3].mxu1 }
 0x18c   :  { %v354_v12 = vpack.c.bf16 %v326_v11, %v323_v8 }
 0x18e   :  { %8164 = vmatprep.mubr.msk.bf16.mxu0 %vm502_vm0, %v354_v12 }
 0x18f   :  { %8165 = vmatmul.mubr.msk.bf16.vlgmr.msra.gmra.mrb[0].mxu0 %vm502_vm0, %v355_v10 }
 0x190   :  { %v8134_v15 = vpop.f32.mrb[4].mxu1  ;;  %8173 = vmatpush3.bf16.msra.mxu0 %v679_v13 }
 0x191   :  { %v339_v16 = vpop.f32.mrb[5].mxu1  ;;  %8222 = vmatprep.subr.bf16.mxu0 %v8345_v42 }
 0x192   :  { %v8135_v17 = vpop.f32.mrb[6].mxu1 }
 0x193   :  { %v357_v18 = vpack.c.bf16 %v8135_v17, %v8134_v15  ;;  %v342_v19 = vpop.f32.mrb[7].mxu1 }
 0x194   :  { %v356_v21 = vpack.c.bf16 %v342_v19, %v339_v16  ;;  %v783_v19 = vmul.u32 2, %v9478_v5 }
 0x196   :  { %8168 = vmatprep.mubr.msk.bf16.mxu0 %vm502_vm0, %v356_v21  ;;  %v784_v21 = vmul.u32 2, %v9481_v6  ;;  %vm787_vm6 = vcmp.eq.s32.totalorder %v9474_v3, %v783_v19  ;;  %v797_v6 = vadd.s32 1, %v783_v19 }
 0x197   :  { %8169 = vmatmul.mubr.msk.bf16.gmra.mrb[4].mxu0 %vm502_vm0, %v357_v18 }
 0x198   :  { %v8146_v24 = vpop.f32.mrb[8].mxu1  ;;  %vm788_vm10 = vcmp.eq.s32.totalorder %v9474_v3, %v784_v21  ;;  %vm801_vm11 = vcmp.eq.s32.totalorder %v9474_v3, %v797_v6 }
 0x199   :  { %v464_v28 = vpop.f32.mrb[9].mxu1 }
 0x19a   :  { %v8147_v30 = vpop.f32.mrb[10].mxu1 }
 0x19b   :  { %v496_v31 = vpack.c.bf16 %v8147_v30, %v8146_v24  ;;  %v467_v32 = vpop.f32.mrb[11].mxu1 }
 0x19c   :  { %v495_v33 = vpack.c.bf16 %v467_v32, %v464_v28 }
 0x19e   :  { %8174 = vmatprep.mubr.msk.bf16.mxu0 %vm502_vm0, %v495_v33 }
 0x19f   :  { %8175 = vmatmul.mubr.msk.bf16.vlgmr.msra.gmra.mrb[0].mxu0 %vm502_vm0, %v496_v31 }
 0x1a0   :  { %v8150_v34 = vpop.f32.mrb[12].mxu1  ;;  %8223 = vmatpush3.bf16.msra.mxu0 %v8345_v42 }
 0x1a1   :  { %v480_v35 = vpop.f32.mrb[13].mxu1  ;;  %8224 = vmatprep.subr.bf16.mxu0 %v8346_v43 }
 0x1a2   :  { %v8151_v38 = vpop.f32.mrb[14].mxu1 }
 0x1a3   :  { %v498_v39 = vpack.c.bf16 %v8151_v38, %v8150_v34  ;;  %v483_v40 = vpop.f32.mrb[15].mxu1  ;;  %v791_v34 = vsel %vm787_vm6, 1.0, %v9247_v14  ;;  %v798_v38 = vadd.s32 1, %v784_v21  ;;  %v8356_v21 = vld [vmem:[#allocation4 + $0x58] sm:$0xff]  }
 0x1a4   :  { %v497_v41 = vpack.c.bf16 %v483_v40, %v480_v35  ;;  %v792_v35 = vsel %vm788_vm10, 1.0, %v9247_v14  ;;  %8225 = vmatpush3.bf16.msra.mxu0 %v8346_v43  ;;  %v11110_v43 = vmov 0   ;;  %vm2004_vm10 = vcmp.eq.s32.totalorder %v9469_v1, 4 }
 0x1a5   :  { %v794_v5 = vpack.c.bf16 %v792_v35, %v791_v34  ;;  %vm802_vm12 = vcmp.eq.s32.totalorder %v9474_v3, %v798_v38  ;;  %8226 = vmatprep.subr.bf16.mxu0 %v8347_v44 }
 0x1a6   :  { %8178 = vmatprep.mubr.msk.bf16.mxu0 %vm502_vm0, %v497_v41  ;;  %v806_v40 = vsel %vm802_vm12, 1.0, %v9247_v14 }
 0x1a7   :  { %8179 = vmatmul.mubr.msk.bf16.gmra.mrb[4].mxu0 %vm502_vm0, %v498_v39  ;;  %vm799_vm0 = vcmp.eq.s32.totalorder %v9474_v3, %v795_v48  ;;  %v805_v39 = vsel %vm801_vm11, 1.0, %v9247_v14  ;;  %v9726_v48 = vsel %vm1500_vm15, 1.0, %v9247_v14  ;;  %vm2005_vm11 = vcmp.eq.s32.totalorder %v9474_v3, 4 }
 0x1a8   :  { %v803_v50 = vsel %vm799_vm0, 1.0, %v9247_v14  ;;  %v808_v41 = vpack.c.bf16 %v806_v40, %v805_v39  ;;  %8227 = vmatpush3.bf16.msra.mxu0 %v8347_v44  ;;  %vm2001_vm0 = vcmp.eq.s32.totalorder %v9474_v3, 2  ;;  %vm2009_vm15 = vcmp.eq.s32.totalorder %v9474_v3, 6 }
 0x1a9   :  { %v9699_v52 = vpack.c.bf16 %v804_v51, %v803_v50  ;;  %8228 = vmatprep.subr.bf16.mxu0 %v8348_v45  ;;  %v1506_v50 = vpack.c.bf16 %v9732_v49, %v9726_v48  ;;  %v8374_v48 = vld [vmem:[#allocation7 + $0xd4] ss:$8 sps:$4 sm:$0xff]   ;;  %vm2002_vm6 = vmand %vm2000_vm3, %vm2001_vm0  ;;  %vm2012_vm0 = vcmp.eq.s32.totalorder %v9469_v1, 1 }
 0x1aa   :  { %vm2003_vm12 = vmor %vm1999_vm4, %vm2002_vm6  ;;  %vm2013_vm4 = vcmp.eq.s32.totalorder %v9474_v3, 8 }
 0x1ab   :  { %vm2010_vm5 = vmand %vm11109_vm14, %vm2009_vm15  ;;  %vm2017_vm14 = vcmp.eq.s32.totalorder %v9474_v3, 10 }
 0x1ac   :  { %8229 = vmatpush3.bf16.msra.mxu0 %v8348_v45  ;;  %vm9810_vm6 = vmand %vm1997_vm9, %vm2030_vm1 }
 0x1ad   :  { %vm2014_vm15 = vmand %vm2012_vm0, %vm2013_vm4  ;;  %vm2021_vm4 = vcmp.eq.s32.totalorder %v9474_v3, 12 }
 0x272   :  { %v8176_v54 = vpop.f32.mrb[0].mxu0 }
 0x273   :  { %v763_v55 = vadd.f32 %v8176_v54, %v7456_v53  ;;  %v715_v56 = vpop.f32.mrb[1].mxu0 }
 0x274   :  { %v761_v57 = vadd.f32 %v7456_v53, %v715_v56  ;;  %v8177_v58 = vpop.f32.mrb[2].mxu0 }
 0x275   :  { %v764_v59 = vadd.f32 %v8177_v58, %v7456_v53  ;;  %v718_v61 = vpop.f32.mrb[3].mxu0  ;;  %v771_v63 = vmax.f32 %v763_v55, 0.0 }
 0x276   :  { %v762_v62 = vadd.f32 %v7456_v53, %v718_v61  ;;  %v769_v4 = vmax.f32 %v761_v57, 0.0 }
 0x277   :  { %v772_v0 = vmax.f32 %v764_v59, 0.0 }
 0x278   :  { %v770_v7 = vmax.f32 %v762_v62, 0.0 }
 0x279   :  { %v778_v8 = vpack.c.bf16 %v772_v0, %v771_v63  ;;  %v8350_v0 = vld [vmem:[#allocation4 + $0x8] sm:$0xff]  }
 0x27a   :  { %v777_v9 = vpack.c.bf16 %v770_v7, %v769_v4  ;;  %v8180_v10 = vpop.f32.mrb[4].mxu0  ;;  %v8351_v4 = vld [vmem:[#allocation4 + $0x10] sm:$0xff]   ;;  %v1013_v7 = vpack.c.bf16 %v9732_v49, %v9623_v47  ;;  %v8352_v47 = vld [vmem:[#allocation4 + $0x18] sm:$0xff]  }
 0x27b   :  { %v767_v11 = vadd.f32 %v8180_v10, %v7456_v53  ;;  %v731_v12 = vpop.f32.mrb[5].mxu0  ;;  %v8372_v49 = vld [vmem:[#allocation7 + $0xd0] ss:$8 sps:$4 sm:$0xff]  }
 0x27c   :  { %v765_v13 = vadd.f32 %v7456_v53, %v731_v12  ;;  %v8181_v15 = vpop.f32.mrb[6].mxu0  ;;  %8182 = vmatprep.subr.bf16.mxu1 %v777_v9  ;;  %v8354_v12 = vld [vmem:[#allocation4 + $0x48] sm:$0xff]  }
 0x27d   :  { %v768_v16 = vadd.f32 %v8181_v15, %v7456_v53  ;;  %v734_v17 = vpop.f32.mrb[7].mxu0  ;;  %8183 = vmatpush3.bf16.msra.mxu1 %v777_v9  ;;  %v775_v24 = vmax.f32 %v767_v11, 0.0  ;;  %v8355_v15 = vld [vmem:[#allocation4 + $0x50] sm:$0xff]  }
 0x27e   :  { %v766_v18 = vadd.f32 %v7456_v53, %v734_v17  ;;  %8184 = vmatprep.subr.bf16.mxu1 %v778_v8  ;;  %v773_v30 = vmax.f32 %v765_v13, 0.0 }
 0x27f   :  { %v776_v28 = vmax.f32 %v768_v16, 0.0 }
 0x280   :  { %v774_v31 = vmax.f32 %v766_v18, 0.0 }
 0x281   :  { %v780_v32 = vpack.c.bf16 %v776_v28, %v775_v24  ;;  %8185 = vmatpush3.bf16.msra.mxu1 %v778_v8  ;;  %v7483_v24 = vld [vmem:[%s11087_s4] ss:$0 sm:$0xff] }
 0x282   :  { %v779_v33 = vpack.c.bf16 %v774_v31, %v773_v30 }
 0x284   :  { %8186 = vmatprep.subr.bf16.mxu1 %v779_v33 }
 0x285   :  { %8187 = vmatpush3.bf16.msra.mxu1 %v779_v33 }
 0x286   :  { %8188 = vmatprep.subr.bf16.mxu1 %v780_v32 }
 0x289   :  { %8189 = vmatpush3.bf16.msra.mxu1 %v780_v32 }
 0x28a   :  { %8194 = vmatprep.subr.bf16.mxu1 %v777_v9 }
 0x28c   :  { %8191 = vmatmul.mubr.msk.bf16.vlgmr.msra.gmra.mrb[16].mxu1 %vm276_vm8, %v794_v5 }
 0x28d   :  { %8195 = vmatpush3.bf16.msra.mxu1 %v777_v9  ;;  %8202 = vmatprep.mubr.msk.bf16.mxu1 %vm276_vm8, %v9699_v52 }
 0x28e   :  { %8196 = vmatprep.subr.bf16.mxu1 %v778_v8 }
 0x291   :  { %8197 = vmatpush3.bf16.msra.mxu1 %v778_v8  ;;  %v8353_v8 = vld [vmem:[#allocation4 + $0x40] sm:$0xff]  }
 0x292   :  { %8198 = vmatprep.subr.bf16.mxu1 %v779_v33 }
 0x295   :  { %8199 = vmatpush3.bf16.msra.mxu1 %v779_v33 }
 0x296   :  { %8200 = vmatprep.subr.bf16.mxu1 %v780_v32 }
 0x299   :  { %8201 = vmatpush3.bf16.msra.mxu1 %v780_v32 }
 0x29c   :  { %8203 = vmatmul.mubr.msk.bf16.vlgmr.msra.gmra.mrb[20].mxu1 %vm276_vm8, %v808_v41 }
 0x29d   :  { %8210 = vmatprep.mubr.msk.bf16.mxu1 %vm939_vm13, %v9542_v22  ;;  %v8349_v22 = vld [vmem:[#allocation4] sm:$0xff]  }
 0x29e   :  { %8234 = vmatprep.subr.bf16.mxu0 %v8349_v22 }
 0x35f   :  { %v8192_v51 = vpop.f32.mrb[16].mxu1 }
 0x360   :  { %v849_v36 = vpop.f32.mrb[17].mxu1 }
 0x361   :  { %v8193_v53 = vpop.f32.mrb[18].mxu1 }
 0x362   :  { %v852_v54 = vpop.f32.mrb[19].mxu1 }
 0x36f   :  { %v8204_v2 = vpop.f32.mrb[20].mxu1 }
 0x370   :  { %v921_v55 = vmax.f32 %v8192_v51, %v8204_v2  ;;  %v904_v56 = vpop.f32.mrb[21].mxu1 }
 0x371   :  { %v919_v57 = vmax.f32 %v849_v36, %v904_v56  ;;  %v8205_v58 = vpop.f32.mrb[22].mxu1 }
 0x372   :  { %v922_v59 = vmax.f32 %v8193_v53, %v8205_v58  ;;  %v907_v37 = vpop.f32.mrb[23].mxu1  ;;  %v8362_v58 = vld [vmem:[#allocation7 + $0x94] ss:$8 sps:$4 sm:$0xff]  }
 0x373   :  { %v920_v61 = vmax.f32 %v852_v54, %v907_v37  ;;  %v8366_v37 = vld [vmem:[#allocation7 + $0xb0] ss:$8 sps:$4 sm:$0xff]  }
 0x374   :  { %v924_v62 = vpack.c.bf16 %v922_v59, %v921_v55  ;;  %v8360_v59 = vld [vmem:[#allocation7 + $0x90] ss:$8 sps:$4 sm:$0xff]  }
 0x375   :  { %v923_v63 = vpack.c.bf16 %v920_v61, %v919_v57  ;;  %v8357_v57 = vld [vmem:[#allocation7 + $0x80] ss:$8 sps:$4 sm:$0xff]   ;;  %v8371_v61 = vld [vmem:[#allocation7 + $0xc4] ss:$8 sps:$4 sm:$0xff]  }
 0x377   :  { %8206 = vmatprep.subr.bf16.mxu1 %v923_v63  ;;  %8230 = vmatprep.mubr.msk.bf16.mxu0 %vm276_vm8, %v923_v63 }
 0x378   :  { %8207 = vmatpush3.bf16.msra.mxu1 %v923_v63  ;;  %8231 = vmatmul.mubr.msk.bf16.vlgmr.msra.gmra.mrb[8].mxu0 %vm276_vm8, %v924_v62 }
 0x379   :  { %8208 = vmatprep.subr.bf16.mxu1 %v924_v62  ;;  %8235 = vmatpush3.bf16.msra.mxu0 %v8349_v22 }
 0x37a   :  { %8236 = vmatprep.subr.bf16.mxu0 %v8350_v0 }
 0x37c   :  { %8209 = vmatpush3.bf16.msra.mxu1 %v924_v62 }
 0x37d   :  { %8214 = vmatprep.subr.bf16.mxu1 %v923_v63  ;;  %8237 = vmatpush3.bf16.msra.mxu0 %v8350_v0  ;;  %v8380_v0 = vld [vmem:[#allocation7 + $0xf4] ss:$8 sps:$4 sm:$0xff]  }
 0x37e   :  { %8238 = vmatprep.subr.bf16.mxu0 %v8351_v4 }
 0x37f   :  { %8211 = vmatmul.mubr.msk.bf16.vlgmr.msra.gmra.mrb[24].mxu1 %vm939_vm13, %v938_v29 }
 0x380   :  { %8215 = vmatpush3.bf16.msra.mxu1 %v923_v63  ;;  %8218 = vmatprep.mubr.msk.bf16.mxu1 %vm939_vm13, %v1013_v7  ;;  %v8375_v63 = vld [vmem:[#allocation7 + $0xe0] ss:$8 sps:$4 sm:$0xff]   ;;  %v8383_v7 = vld [vmem:[#allocation7 + $0x4] ss:$8 sps:$4 sm:$0xff]  }
 0x381   :  { %8216 = vmatprep.subr.bf16.mxu1 %v924_v62  ;;  %8239 = vmatpush3.bf16.msra.mxu0 %v8351_v4  ;;  %v8378_v4 = vld [vmem:[#allocation7 + $0xf0] ss:$8 sps:$4 sm:$0xff]  }
 0x382   :  { %8240 = vmatprep.subr.bf16.mxu0 %v8352_v47 }
 0x384   :  { %8217 = vmatpush3.bf16.msra.mxu1 %v924_v62  ;;  %v8369_v62 = vld [vmem:[#allocation7 + $0xc0] ss:$8 sps:$4 sm:$0xff]  }
 0x385   :  { %8266 = vmatprep.subr.bf16.mxu1 %v9247_v14  ;;  %8241 = vmatpush3.bf16.msra.mxu0 %v8352_v47  ;;  %v8381_v47 = vld [vmem:[#allocation7] ss:$8 sps:$4 sm:$0xff]  }
 0x386   :  { %8246 = vmatprep.subr.bf16.mxu0 %v8353_v8 }
 0x387   :  { %8219 = vmatmul.mubr.msk.bf16.vlgmr.msra.gmra.mrb[28].mxu1 %vm939_vm13, %v9660_v60 }
 0x388   :  { %8270 = vmatprep.mubr.msk.bf16.mxu1 %vm9248_vm7, %v9247_v14 }
 0x452   :  { %v8212_v9 = vpop.f32.mrb[24].mxu1 }
 0x453   :  { %v980_v26 = vpop.f32.mrb[25].mxu1 }
 0x454   :  { %v8213_v27 = vpop.f32.mrb[26].mxu1 }
 0x455   :  { %v996_v29 = vpack.c.bf16 %v8213_v27, %v8212_v9  ;;  %v983_v10 = vpop.f32.mrb[27].mxu1  ;;  %v8384_v9 = vld [vmem:[#allocation7 + $0x10] ss:$8 sps:$4 sm:$0xff]   ;;  %v8387_v27 = vld [vmem:[#allocation7 + $0x20] ss:$8 sps:$4 sm:$0xff]  }
 0x456   :  { %v995_v11 = vpack.c.bf16 %v983_v10, %v980_v26  ;;  %v8389_v26 = vld [vmem:[#allocation7 + $0x24] ss:$8 sps:$4 sm:$0xff]   ;;  %v8390_v10 = vld [vmem:[#allocation7 + $0x30] ss:$8 sps:$4 sm:$0xff]  }
 0x458   :  { %8242 = vmatprep.mubr.msk.bf16.mxu0 %vm276_vm8, %v995_v11  ;;  %v8395_v11 = vld [vmem:[#allocation7 + $0x44] ss:$8 sps:$4 sm:$0xff]  }
 0x459   :  { %8243 = vmatmul.mubr.msk.bf16.vlgmr.msra.gmra.mrb[8].mxu0 %vm276_vm8, %v996_v29  ;;  %v8392_v29 = vld [vmem:[#allocation7 + $0x34] ss:$8 sps:$4 sm:$0xff]  }
 0x45a   :  { %8247 = vmatpush3.bf16.msra.mxu0 %v8353_v8  ;;  %v8220_v13 = vpop.f32.mrb[28].mxu1  ;;  %v8386_v8 = vld [vmem:[#allocation7 + $0x14] ss:$8 sps:$4 sm:$0xff]  }
 0x45b   :  { %8248 = vmatprep.subr.bf16.mxu0 %v8354_v12  ;;  %v1055_v60 = vpop.f32.mrb[29].mxu1 }
 0x45c   :  { %v8221_v16 = vpop.f32.mrb[30].mxu1 }
 0x45d   :  { %v1071_v17 = vpack.c.bf16 %v8221_v16, %v8220_v13  ;;  %v1058_v18 = vpop.f32.mrb[31].mxu1  ;;  %v8398_v13 = vld [vmem:[#allocation7 + $0x54] ss:$8 sps:$4 sm:$0xff]   ;;  %v8399_v16 = vld [vmem:[#allocation7 + $0x60] ss:$8 sps:$4 sm:$0xff]  }
 0x45e   :  { %8249 = vmatpush3.bf16.msra.mxu0 %v8354_v12  ;;  %v1070_v19 = vpack.c.bf16 %v1058_v18, %v1055_v60  ;;  %v8393_v12 = vld [vmem:[#allocation7 + $0x40] ss:$8 sps:$4 sm:$0xff]   ;;  %v8396_v60 = vld [vmem:[#allocation7 + $0x50] ss:$8 sps:$4 sm:$0xff]  }
 0x45f   :  { %8250 = vmatprep.subr.bf16.mxu0 %v8355_v15  ;;  %v8402_v18 = vld [vmem:[#allocation7 + $0x70] ss:$8 sps:$4 sm:$0xff]  }
 0x460   :  { %8254 = vmatprep.mubr.msk.bf16.mxu0 %vm276_vm8, %v1070_v19  ;;  %v8407_v19 = vld [vmem:[#allocation7 + $0x104] ss:$8 sps:$4 sm:$0xff]  }
 0x462   :  { %8251 = vmatpush3.bf16.msra.mxu0 %v8355_v15  ;;  %v8401_v15 = vld [vmem:[#allocation7 + $0x64] ss:$8 sps:$4 sm:$0xff]  }
 0x463   :  { %8252 = vmatprep.subr.bf16.mxu0 %v8356_v21 }
 0x466   :  { %8253 = vmatpush3.bf16.msra.mxu0 %v8356_v21 }
 0x467   :  { %8258 = vmatprep.subr.bf16.mxu0 %v9247_v14 }
 0x469   :  { %8255 = vmatmul.mubr.msk.bf16.vlgmr.msra.gmra.mrb[8].mxu0 %vm276_vm8, %v1071_v17  ;;  %vm11108_vm8 = vcmask 130048   ;;  %v8404_v17 = vld [vmem:[#allocation7 + $0x74] ss:$8 sps:$4 sm:$0xff]  }
 0x46a   :  { %8262 = vmatprep.mubr.msk.bf16.mxu0 %vm9248_vm7, %v9247_v14 }
 0x53c   :  { %v8256_v28 = vpop.f32.mrb[8].mxu0 }
 0x53d   :  { %v1348_v30 = vadd.f32 %v8256_v28, %v7483_v24  ;;  %v1320_v31 = vpop.f32.mrb[9].mxu0 }
 0x53e   :  { %v1346_v32 = vadd.f32 %v7483_v24, %v1320_v31  ;;  %v8257_v33 = vpop.f32.mrb[10].mxu0 }
 0x53f   :  { %v1349_v34 = vadd.f32 %v8257_v33, %v7483_v24  ;;  %v1323_v35 = vpop.f32.mrb[11].mxu0  ;;  %v1352_v6 = vmax.f32 %v1348_v30, 0.0  ;;  %v8405_v30 = vld [vmem:[#allocation7 + $0x100] ss:$8 sps:$4 sm:$0xff]   ;;  %v8410_v33 = vld [vmem:[#allocation7 + $0x114] ss:$8 sps:$4 sm:$0xff]  }
 0x540   :  { %v1347_v5 = vadd.f32 %v7483_v24, %v1323_v35  ;;  %v1350_v39 = vmax.f32 %v1346_v32, 0.0  ;;  %v8413_v35 = vld [vmem:[#allocation7 + $0x124] ss:$8 sps:$4 sm:$0xff]  }
 0x541   :  { %v1353_v38 = vmax.f32 %v1349_v34, 0.0  ;;  %v8408_v34 = vld [vmem:[#allocation7 + $0x110] ss:$8 sps:$4 sm:$0xff]  }
 0x542   :  { %v1351_v40 = vmax.f32 %v1347_v5, 0.0 }
 0x543   :  { %v1355_v41 = vpack.c.bf16 %v1353_v38, %v1352_v6  ;;  %v8411_v38 = vld [vmem:[#allocation7 + $0x120] ss:$8 sps:$4 sm:$0xff]  }
 0x544   :  { %v1354_v42 = vpack.c.bf16 %v1351_v40, %v1350_v39  ;;  %v8416_v40 = vld [vmem:[#allocation7 + $0x134] ss:$8 sps:$4 sm:$0xff]  }
 0x546   :  { %8259 = vmatpush3.bf16.msra.mxu0 %v1354_v42  ;;  %8267 = vmatpush3.bf16.msra.mxu1 %v1354_v42 }
 0x547   :  { %8260 = vmatprep.subr.bf16.mxu0 %v9247_v14  ;;  %8268 = vmatprep.subr.bf16.mxu1 %v9247_v14 }
 0x54a   :  { %8261 = vmatpush3.bf16.msra.mxu0 %v1355_v41  ;;  %8269 = vmatpush3.bf16.msra.mxu1 %v1355_v41 }
 0x54b   :  { %8274 = vmatprep.subr.bf16.mxu1 %v9247_v14 }
 0x54d   :  { %8263 = vmatmul.mubr.msk.bf16.vlgmr.msra.gmra.mrb[12].mxu0 %vm939_vm13, %v9691_v46  ;;  %8271 = vmatmul.mubr.msk.bf16.vlgmr.msra.gmra.mrb[32].mxu1 %vm939_vm13, %v9699_v52  ;;  %v8359_v52 = vld [vmem:[#allocation7 + $0x84] ss:$8 sps:$4 sm:$0xff]   ;;  %vm2006_vm13 = vmand %vm2004_vm10, %vm2005_vm11 }
 0x54e   :  { %8276 = vmatprep.mubr.msk.bf16.mxu1 %vm9248_vm7, %v9247_v14  ;;  %2090 = vmatprep.mubr.bf16.mxu0 %v11110_v43  ;;  %vm9799_vm2 = vmor %vm2003_vm12, %vm2006_vm13  ;;  %vm2035_vm13 = vcmp.eq.s32.totalorder %v9474_v3, 5 }
 0x54f   :  { %vm2011_vm12 = vmor %vm9799_vm2, %vm2010_vm5  ;;  %vm2038_vm2 = vcmp.eq.s32.totalorder %v9474_v3, 7  ;;  %vm2020_vm5 = vcmp.eq.s32.totalorder %v9469_v1, 5 }
 0x550   :  { %vm2036_vm1 = vmand %vm2004_vm10, %vm2035_vm13  ;;  %vm11221_vm10 = vcmp.eq.s32.totalorder %v9469_v1, 6 }
 0x551   :  { %vm2022_vm13 = vmand %vm2020_vm5, %vm2021_vm4 }
 0x620   :  { %v1392_v44 = vpop.f32.mrb[12].mxu0  ;;  %v1435_v45 = vpop.f32.mrb[32].mxu1 }
 0x621   :  { %v1442_v22 = vmax.f32 %v1392_v44, %v1435_v45  ;;  %v8264_v51 = vpop.f32.mrb[13].mxu0  ;;  %v8272_v36 = vpop.f32.mrb[33].mxu1  ;;  %v8414_v44 = vld [vmem:[#allocation7 + $0x130] ss:$8 sps:$4 sm:$0xff]   ;;  %v8419_v45 = vld [vmem:[#allocation7 + $0x144] ss:$8 sps:$4 sm:$0xff]  }
 0x622   :  { %v1395_v53 = vpop.f32.mrb[14].mxu0  ;;  %v1438_v54 = vpop.f32.mrb[34].mxu1  ;;  %v8422_v51 = vld [vmem:[#allocation7 + $0x154] ss:$8 sps:$4 sm:$0xff]   ;;  %v8420_v36 = vld [vmem:[#allocation7 + $0x150] ss:$8 sps:$4 sm:$0xff]  }
 0x623   :  { %v1443_v2 = vmax.f32 %v1395_v53, %v1438_v54  ;;  %v8265_v55 = vpop.f32.mrb[15].mxu0  ;;  %v8273_v56 = vpop.f32.mrb[35].mxu1  ;;  %v8425_v53 = vld [vmem:[#allocation7 + $0x164] ss:$8 sps:$4 sm:$0xff]   ;;  %v8423_v54 = vld [vmem:[#allocation7 + $0x160] ss:$8 sps:$4 sm:$0xff]  }
 0x624   :  { %v8426_v55 = vld [vmem:[#allocation7 + $0x170] ss:$8 sps:$4 sm:$0xff]  }
 0x625   :  { %v1444_v46 = vpack.c.bf16 %v1443_v2, %v1442_v22  ;;  %v8417_v22 = vld [vmem:[#allocation7 + $0x140] ss:$8 sps:$4 sm:$0xff]   ;;  %v8428_v2 = vld [vmem:[#allocation7 + $0x174] ss:$8 sps:$4 sm:$0xff]  }
 0x626   :  { %v2149_v56 = vld [vmem:[#allocation9 + $0x10] sm:$0xff] }
 0x627   :  { %8275 = vmatpush3.bf16.msra.mxu1 %v1444_v46 }
 0x628   :  { %8280 = vmatprep.subr.bf16.mxu1 %v9247_v14 }
 0x62a   :  { %8277 = vmatmul.mubr.msk.bf16.vlgmr.msra.gmra.mrb[36].mxu1 %vm11108_vm8, %v1451_v25  ;;  %v8368_v25 = vld [vmem:[#allocation7 + $0xb4] ss:$8 sps:$4 sm:$0xff]  }
 0x62b   :  { %8281 = vmatpush3.bf16.msra.mxu1 %v1444_v46  ;;  %8282 = vmatprep.mubr.msk.bf16.mxu1 %vm9248_vm7, %v9247_v14  ;;  %vm2032_vm7 = vcmp.eq.s32.totalorder %v9474_v3, 3 }
 0x62c   :  { %1665 = vmatprep.subr.bf16.mxu1 %v8359_v52  ;;  %vm2033_vm11 = vmand %vm2000_vm3, %vm2032_vm7 }
 0x62d   :  { %vm2034_vm9 = vmor %vm9810_vm6, %vm2033_vm11 }
 0x62e   :  { %vm9827_vm3 = vmor %vm2011_vm12, %vm2014_vm15  ;;  %vm2041_vm12 = vcmp.eq.s32.totalorder %v9474_v3, 9  ;;  %vm2024_vm15 = vcmp.eq.s32.totalorder %v9469_v1, 7 }
 0x62f   :  { %vm9840_vm6 = vmor %vm2034_vm9, %vm2036_vm1  ;;  %vm2025_vm9 = vcmp.eq.s32.totalorder %v9474_v3, 14 }
 0x630   :  { %vm9849_vm11 = vmand %vm11221_vm10, %vm2038_vm2  ;;  %vm2047_vm10 = vcmp.eq.s32.totalorder %v9474_v3, 13 }
 0x631   :  { %vm2040_vm1 = vmor %vm9840_vm6, %vm9849_vm11 }
 0x632   :  { %8283 = vmatmul.mubr.msk.bf16.vlgmr.msra.gmra.mrb[40].mxu1 %vm11108_vm8, %v1506_v50  ;;  %v8377_v50 = vld [vmem:[#allocation7 + $0xe4] ss:$8 sps:$4 sm:$0xff]   ;;  %vm2016_vm8 = vcmp.eq.s32.totalorder %v9469_v1, 3  ;;  %vm2042_vm2 = vmand %vm2012_vm0, %vm2041_vm12  ;;  %vm2050_vm12 = vcmp.eq.s32.totalorder %v9474_v3, 15 }
 0x633   :  { %1666 = vmatpush1.bf16.msra.mxu1 %v8357_v57  ;;  %1697 = vmatprep.mubr.bf16.mxu1 %v11110_v43  ;;  %vm9834_vm7 = vmand %vm2016_vm8, %vm2017_vm14 }
 0x634   :  { %1667 = vmatprep.subr.bf16.mxu1 %v8362_v58  ;;  %v2157_v58 = vld [vmem:[#allocation9 + $0x50] sm:$0xff]  ;;  %vm2019_vm14 = vmor %vm9827_vm3, %vm9834_vm7  ;;  %vm2044_vm7 = vcmp.eq.s32.totalorder %v9474_v3, 11 }
 0x635   :  { %vm9876_vm3 = vmor %vm2019_vm14, %vm2022_vm13 }
 0x636   :  { %vm9883_vm4 = vmand %vm2024_vm15, %vm2025_vm9 }
 0x637   :  { %1668 = vmatpush1.bf16.msra.mxu1 %v8360_v59  ;;  %v2161_v59 = vld [vmem:[#allocation9 + $0x70] sm:$0xff]  ;;  %vm9887_vm6 = vmor %vm2040_vm1, %vm2042_vm2  ;;  %vm7409_vm2 = vcmask 58368  }
 0x638   :  { %1669 = vmatprep.subr.bf16.mxu1 %v8365_v20  ;;  %v7551_v20 = vcombine.high %v2157_v58, %v2161_v59  ;;  %vm9893_vm0 = vmand %vm2016_vm8, %vm2044_vm7 }
 0x639   :  { %vm2027_vm11 = vmor %vm9876_vm3, %vm9883_vm4 }
 0x63a   :  { %vm2046_vm8 = vmor %vm9887_vm6, %vm9893_vm0 }
 0x63b   :  { %1670 = vmatpush1.bf16.msra.mxu1 %v8363_v23  ;;  %v7550_v23 = vcombine.low %v2157_v58, %v2161_v59  ;;  %vm2048_vm14 = vmand %vm2020_vm5, %vm2047_vm10  ;;  %vm11233_vm5 = vcmask 130048   ;;  %v2227_v58 = vld [vmem:[#allocation9 + $0x280] sm:$0xff] }
 0x63c   :  { %1671 = vmatprep.subr.bf16.mxu1 %v8368_v25  ;;  %v2165_v25 = vld [vmem:[#allocation9 + $0x90] sm:$0xff]  ;;  %vm2049_vm13 = vmor %vm2046_vm8, %vm2048_vm14 }
 0x63d   :  { %vm2051_vm9 = vmand %vm2024_vm15, %vm2050_vm12 }
 0x63e   :  { %vm2052_vm1 = vmor %vm2049_vm13, %vm2051_vm9 }
 0x63f   :  { %1672 = vmatpush1.bf16.msra.mxu1 %v8366_v37  ;;  %v2169_v37 = vld [vmem:[#allocation9 + $0xb0] sm:$0xff]  ;;  %v2053_v3 = vsel %vm2052_vm1, 1.0, %v9247_v14  ;;  %vm11234_vm15 = vmmov %vm11233_vm5 }
 0x640   :  { %1673 = vmatprep.subr.bf16.mxu1 %v8371_v61  ;;  %v7559_v61 = vcombine.high %v2165_v25, %v2169_v37 }
 0x643   :  { %1674 = vmatpush1.bf16.msra.mxu1 %v8369_v62  ;;  %v7558_v62 = vcombine.low %v2165_v25, %v2169_v37  ;;  %v2239_v37 = vld [vmem:[#allocation9 + $0x2e0] sm:$0xff] }
 0x644   :  { %1675 = vmatprep.subr.bf16.mxu1 %v8374_v48  ;;  %v2173_v48 = vld [vmem:[#allocation9 + $0xd0] sm:$0xff] }
 0x647   :  { %1676 = vmatpush1.bf16.msra.mxu1 %v8372_v49  ;;  %v2177_v49 = vld [vmem:[#allocation9 + $0xf0] sm:$0xff] }
 0x648   :  { %1677 = vmatprep.subr.bf16.mxu1 %v8377_v50  ;;  %v7567_v50 = vcombine.high %v2173_v48, %v2177_v49 }
 0x64b   :  { %1678 = vmatpush1.bf16.msra.mxu1 %v8375_v63  ;;  %v7566_v63 = vcombine.low %v2173_v48, %v2177_v49 }
 0x64c   :  { %1679 = vmatprep.subr.bf16.mxu1 %v8380_v0  ;;  %v2181_v0 = vld [vmem:[#allocation9 + $0x110] sm:$0xff] }
 0x64f   :  { %1680 = vmatpush1.bf16.msra.mxu1 %v8378_v4  ;;  %v2185_v4 = vld [vmem:[#allocation9 + $0x130] sm:$0xff] }
 0x650   :  { %1788 = vmatprep.subr.bf16.mxu1 %v8383_v7  ;;  %v7575_v7 = vcombine.high %v2181_v0, %v2185_v4 }
 0x652   :  { %1698 = vmatmul.mubr.bf16.vlgmr.msra.gmra.mrb[44].mxu1 %v1444_v46  ;;  %v2153_v46 = vld [vmem:[#allocation9 + $0x30] sm:$0xff] }
 0x653   :  { %1789 = vmatpush1.bf16.msra.mxu1 %v8381_v47  ;;  %1820 = vmatprep.mubr.bf16.mxu1 %v11110_v43  ;;  %v7542_v52 = vcombine.low %v2149_v56, %v2153_v46  ;;  %v7543_v57 = vcombine.high %v2149_v56, %v2153_v46  ;;  %v7574_v47 = vcombine.low %v2181_v0, %v2185_v4  ;;  %v9857_v56 = vsub.s32 1, %v9469_v1 }
 0x654   :  { %1790 = vmatprep.subr.bf16.mxu1 %v8386_v8  ;;  %v2189_v8 = vld [vmem:[#allocation9 + $0x150] sm:$0xff] }
 0x655   :  { %11224 = vst [vmem:[#allocation27_spill] sm:$0xff] %v9857_v56 }
 0x657   :  { %1791 = vmatpush1.bf16.msra.mxu1 %v8384_v9  ;;  %v2193_v9 = vld [vmem:[#allocation9 + $0x170] sm:$0xff] }
 0x658   :  { %1792 = vmatprep.subr.bf16.mxu1 %v8389_v26  ;;  %v7583_v26 = vcombine.high %v2189_v8, %v2193_v9 }
 0x65b   :  { %1793 = vmatpush1.bf16.msra.mxu1 %v8387_v27  ;;  %v7582_v27 = vcombine.low %v2189_v8, %v2193_v9  ;;  %v2028_v8 = vsel %vm2027_vm11, 1.0, %v9247_v14 }
 0x65c   :  { %1794 = vmatprep.subr.bf16.mxu1 %v8392_v29  ;;  %v2197_v29 = vld [vmem:[#allocation9 + $0x190] sm:$0xff] }
 0x65f   :  { %1795 = vmatpush1.bf16.msra.mxu1 %v8390_v10  ;;  %v2201_v10 = vld [vmem:[#allocation9 + $0x1b0] sm:$0xff] }
 0x660   :  { %1796 = vmatprep.subr.bf16.mxu1 %v8395_v11  ;;  %v7591_v11 = vcombine.high %v2197_v29, %v2201_v10 }
 0x663   :  { %1797 = vmatpush1.bf16.msra.mxu1 %v8393_v12  ;;  %v7590_v12 = vcombine.low %v2197_v29, %v2201_v10  ;;  %v2029_v29 = vpack.c.bf16 %v2028_v8, %v2028_v8 }
 0x664   :  { %1798 = vmatprep.subr.bf16.mxu1 %v8398_v13  ;;  %v2205_v13 = vld [vmem:[#allocation9 + $0x1d0] sm:$0xff] }
 0x667   :  { %1799 = vmatpush1.bf16.msra.mxu1 %v8396_v60  ;;  %v2209_v60 = vld [vmem:[#allocation9 + $0x1f0] sm:$0xff] }
 0x668   :  { %1800 = vmatprep.subr.bf16.mxu1 %v8401_v15  ;;  %v7599_v15 = vcombine.high %v2205_v13, %v2209_v60 }
 0x66b   :  { %1801 = vmatpush1.bf16.msra.mxu1 %v8399_v16  ;;  %v7598_v16 = vcombine.low %v2205_v13, %v2209_v60  ;;  %v2054_v13 = vpack.c.bf16 %v2053_v3, %v2053_v3  ;;  %v2263_v3 = vld [vmem:[#allocation9 + $0x3a0] sm:$0xff] }
 0x66c   :  { %1802 = vmatprep.subr.bf16.mxu1 %v8404_v17  ;;  %v2213_v17 = vld [vmem:[#allocation9 + $0x210] sm:$0xff] }
 0x66f   :  { %1803 = vmatpush1.bf16.msra.mxu1 %v8402_v18  ;;  %v2217_v18 = vld [vmem:[#allocation9 + $0x230] sm:$0xff] }
 0x670   :  { %1928 = vmatprep.subr.bf16.mxu1 %v8407_v19  ;;  %v7607_v19 = vcombine.high %v2213_v17, %v2217_v18 }
 0x6fd   :  { %v1490_v21 = vpop.f32.mrb[36].mxu1 }
 0x6fe   :  { %v8278_v24 = vpop.f32.mrb[37].mxu1 }
 0x6ff   :  { %v1493_v28 = vpop.f32.mrb[38].mxu1  ;;  %v2221_v24 = vld [vmem:[#allocation9 + $0x250] sm:$0xff] }
 0x700   :  { %v1497_v31 = vpack.c.bf16 %v1493_v28, %v1490_v21  ;;  %v8279_v32 = vpop.f32.mrb[39].mxu1  ;;  %v7606_v21 = vcombine.low %v2213_v17, %v2217_v18  ;;  %v2225_v28 = vld [vmem:[#allocation9 + $0x270] sm:$0xff]  ;;  %v2167_v17 = vld [vmem:[#allocation9 + $0xa0] sm:$0xff] }
 0x701   :  { %v2229_v32 = vld [vmem:[#allocation9 + $0x290] sm:$0xff] }
 0x702   :  { %1821 = vmatmul.mubr.bf16.vlgmr.msra.gmra.mrb[44].mxu1 %v1497_v31  ;;  %v7614_v31 = vcombine.low %v2221_v24, %v2225_v28 }
 0x703   :  { %1929 = vmatpush1.bf16.msra.mxu1 %v8405_v30  ;;  %1960 = vmatprep.mubr.bf16.mxu1 %v11110_v43  ;;  %v7615_v30 = vcombine.high %v2221_v24, %v2225_v28  ;;  %v2175_v24 = vld [vmem:[#allocation9 + $0xe0] sm:$0xff] }
 0x704   :  { %1930 = vmatprep.subr.bf16.mxu1 %v8410_v33  ;;  %v2233_v33 = vld [vmem:[#allocation9 + $0x2b0] sm:$0xff] }
 0x705   :  { %v1544_v5 = vpop.f32.mrb[40].mxu1 }
 0x706   :  { %v8284_v6 = vpop.f32.mrb[41].mxu1 }
 0x707   :  { %1931 = vmatpush1.bf16.msra.mxu1 %v8408_v34  ;;  %v1547_v39 = vpop.f32.mrb[42].mxu1  ;;  %v7623_v34 = vcombine.high %v2229_v32, %v2233_v33  ;;  %v2241_v6 = vld [vmem:[#allocation9 + $0x2f0] sm:$0xff] }
 0x708   :  { %1932 = vmatprep.subr.bf16.mxu1 %v8413_v35  ;;  %v1551_v41 = vpack.c.bf16 %v1547_v39, %v1544_v5  ;;  %v8285_v42 = vpop.f32.mrb[43].mxu1  ;;  %v7622_v35 = vcombine.low %v2229_v32, %v2233_v33  ;;  %v2237_v5 = vld [vmem:[#allocation9 + $0x2d0] sm:$0xff] }
 0x709   :  { %v7630_v39 = vcombine.low %v2237_v5, %v2241_v6 }
 0x70b   :  { %1933 = vmatpush1.bf16.msra.mxu1 %v8411_v38  ;;  %v7631_v38 = vcombine.high %v2237_v5, %v2241_v6 }
 0x70c   :  { %1934 = vmatprep.subr.bf16.mxu1 %v8416_v40  ;;  %v2245_v40 = vld [vmem:[#allocation9 + $0x310] sm:$0xff] }
 0x70f   :  { %1935 = vmatpush1.bf16.msra.mxu1 %v8414_v44 }
 0x710   :  { %1936 = vmatprep.subr.bf16.mxu1 %v8419_v45 }
 0x713   :  { %1937 = vmatpush1.bf16.msra.mxu1 %v8417_v22 }
 0x714   :  { %1938 = vmatprep.subr.bf16.mxu1 %v8422_v51  ;;  %v2211_v51 = vld [vmem:[#allocation9 + $0x200] sm:$0xff] }
 0x717   :  { %1939 = vmatpush1.bf16.msra.mxu1 %v8420_v36  ;;  %v2215_v36 = vld [vmem:[#allocation9 + $0x220] sm:$0xff] }
 0x718   :  { %1940 = vmatprep.subr.bf16.mxu1 %v8425_v53 }
 0x71b   :  { %1941 = vmatpush1.bf16.msra.mxu1 %v8423_v54  ;;  %v9845_v54 = vsub.s32 0, %v9469_v1 }
 0x71c   :  { %1942 = vmatprep.subr.bf16.mxu1 %v8428_v2  ;;  %v7603_v2 = vcombine.high %v2211_v51, %v2215_v36 }
 0x71d   :  { %11220 = vst [vmem:[#allocation26_spill] sm:$0xff] %v9845_v54 }
 0x71f   :  { %1943 = vmatpush1.bf16.msra.mxu1 %v8426_v55  ;;  %v1975_v55 = vld [vmem:[%s11089_s6] sm:$0x3] }
 0x720   :  { %3039 = vmatprep.subr.bf16.mxu1 %v7543_v57  ;;  %v1980_v46 = vrot.slane %v1975_v55, %v9845_v54 }
 0x722   :  { %1961 = vmatmul.mubr.bf16.vlgmr.msra.gmra.mrb[44].mxu1 %v1551_v41  ;;  %v2249_v41 = vld [vmem:[#allocation9 + $0x330] sm:$0xff] }
 0x723   :  { %3040 = vmatpush1.bf16.msra.mxu1 %v7542_v52  ;;  %v7639_v42 = vcombine.high %v2245_v40, %v2249_v41  ;;  %v7638_v44 = vcombine.low %v2245_v40, %v2249_v41  ;;  %v1984_v52 = vrot.slane %v1975_v55, %v9857_v56  ;;  %v2219_v55 = vld [vmem:[#allocation9 + $0x240] sm:$0xff] }
 0x724   :  { %3041 = vmatprep.subr.bf16.mxu1 %v7551_v20 }
 0x727   :  { %3042 = vmatpush1.bf16.msra.mxu1 %v7550_v23 }
 0x728   :  { %3043 = vmatprep.subr.bf16.mxu1 %v7559_v61 }
 0x72b   :  { %3044 = vmatpush1.bf16.msra.mxu1 %v7558_v62 }
 0x72c   :  { %3045 = vmatprep.subr.bf16.mxu1 %v7567_v50 }
 0x72f   :  { %3046 = vmatpush1.bf16.msra.mxu1 %v7566_v63 }
 0x730   :  { %3047 = vmatprep.subr.bf16.mxu1 %v7575_v7 }
 0x733   :  { %3048 = vmatpush1.bf16.msra.mxu1 %v7574_v47 }
 0x734   :  { %3049 = vmatprep.subr.bf16.mxu1 %v7583_v26  ;;  %v2147_v26 = vld [vmem:[#allocation9] sm:$0xff] }
 0x737   :  { %3050 = vmatpush1.bf16.msra.mxu1 %v7582_v27  ;;  %v2151_v27 = vld [vmem:[#allocation9 + $0x20] sm:$0xff] }
 0x738   :  { %3051 = vmatprep.subr.bf16.mxu1 %v7591_v11  ;;  %v7539_v10 = vcombine.high %v2147_v26, %v2151_v27  ;;  %v2155_v11 = vld [vmem:[#allocation9 + $0x40] sm:$0xff]  ;;  %v7538_v60 = vcombine.low %v2147_v26, %v2151_v27  ;;  %v2257_v26 = vld [vmem:[#allocation9 + $0x370] sm:$0xff] }
 0x73b   :  { %3052 = vmatpush1.bf16.msra.mxu1 %v7590_v12  ;;  %v2159_v12 = vld [vmem:[#allocation9 + $0x60] sm:$0xff] }
 0x73c   :  { %3053 = vmatprep.subr.bf16.mxu1 %v7599_v15  ;;  %v7547_v15 = vcombine.high %v2155_v11, %v2159_v12  ;;  %v7546_v18 = vcombine.low %v2155_v11, %v2159_v12  ;;  %v2261_v11 = vld [vmem:[#allocation9 + $0x390] sm:$0xff] }
 0x73f   :  { %3054 = vmatpush1.bf16.msra.mxu1 %v7598_v16  ;;  %v2163_v16 = vld [vmem:[#allocation9 + $0x80] sm:$0xff] }
 0x740   :  { %3055 = vmatprep.subr.bf16.mxu1 %v7607_v19  ;;  %v7555_v19 = vcombine.high %v2163_v16, %v2167_v17  ;;  %v7554_v28 = vcombine.low %v2163_v16, %v2167_v17  ;;  %v2267_v17 = vld [vmem:[#allocation9 + $0x3c0] sm:$0xff] }
 0x743   :  { %3056 = vmatpush1.bf16.msra.mxu1 %v7606_v21  ;;  %v2171_v21 = vld [vmem:[#allocation9 + $0xc0] sm:$0xff] }
 0x744   :  { %3057 = vmatprep.subr.bf16.mxu1 %v7615_v30  ;;  %v7563_v14 = vcombine.high %v2171_v21, %v2175_v24  ;;  %v2179_v30 = vld [vmem:[#allocation9 + $0x100] sm:$0xff]  ;;  %v7562_v32 = vcombine.low %v2171_v21, %v2175_v24  ;;  %v2273_v24 = vld [vmem:[#allocation9 + $0x3f0] sm:$0xff] }
 0x747   :  { %3058 = vmatpush1.bf16.msra.mxu1 %v7614_v31  ;;  %v2183_v31 = vld [vmem:[#allocation9 + $0x120] sm:$0xff] }
 0x748   :  { %3059 = vmatprep.subr.bf16.mxu1 %v7623_v34  ;;  %v7571_v33 = vcombine.high %v2179_v30, %v2183_v31  ;;  %v2187_v34 = vld [vmem:[#allocation9 + $0x140] sm:$0xff]  ;;  %v7570_v5 = vcombine.low %v2179_v30, %v2183_v31  ;;  %v2148_v31 = vld [vmem:[#allocation9 + $0x8] sm:$0xff] }
 0x74b   :  { %3060 = vmatpush1.bf16.msra.mxu1 %v7622_v35  ;;  %v2191_v35 = vld [vmem:[#allocation9 + $0x160] sm:$0xff] }
 0x74c   :  { %3061 = vmatprep.subr.bf16.mxu1 %v7631_v38  ;;  %v7579_v6 = vcombine.high %v2187_v34, %v2191_v35  ;;  %v2195_v38 = vld [vmem:[#allocation9 + $0x180] sm:$0xff]  ;;  %v7578_v40 = vcombine.low %v2187_v34, %v2191_v35 }
 0x74d   :  { %v9919_v34 = vld [vmem:[%s11092_s9 + $0x4] ss:$16 sps:$4 sm:$0xff]  }
 0x74f   :  { %3062 = vmatpush1.bf16.msra.mxu1 %v7630_v39  ;;  %v2199_v39 = vld [vmem:[#allocation9 + $0x1a0] sm:$0xff] }
 0x750   :  { %3063 = vmatprep.subr.bf16.mxu1 %v7639_v42  ;;  %v7587_v41 = vcombine.high %v2195_v38, %v2199_v39  ;;  %v2203_v42 = vld [vmem:[#allocation9 + $0x1c0] sm:$0xff]  ;;  %v7586_v45 = vcombine.low %v2195_v38, %v2199_v39 }
 0x753   :  { %3064 = vmatpush1.bf16.msra.mxu1 %v7638_v44  ;;  %v2207_v44 = vld [vmem:[#allocation9 + $0x1e0] sm:$0xff] }
 0x754   :  { %v7595_v22 = vcombine.high %v2203_v42, %v2207_v44  ;;  %v7594_v53 = vcombine.low %v2203_v42, %v2207_v44 }
 0x7f5   :  { %v1962_v59 = vpop.f32.mrb[44].mxu1 }
 0x7f6   :  { %v1987_v23 = vadd.f32 %v1980_v46, %v1962_v59  ;;  %v1964_v25 = vpop.f32.mrb[45].mxu1  ;;  %v2231_v59 = vld [vmem:[#allocation9 + $0x2a0] sm:$0xff] }
 0x7f7   :  { %v1988_v61 = vadd.f32 %v1984_v52, %v1964_v25  ;;  %v1966_v62 = vpop.f32.mrb[46].mxu1  ;;  %v2235_v25 = vld [vmem:[#allocation9 + $0x2c0] sm:$0xff] }
 0x7f8   :  { %v1989_v48 = vadd.f32 %v1980_v46, %v1966_v62  ;;  %v1968_v49 = vpop.f32.mrb[47].mxu1  ;;  %v1991_v63 = vmax.f32 %v1987_v23, 0.0  ;;  %v2223_v46 = vld [vmem:[#allocation9 + $0x260] sm:$0xff]  ;;  %v7619_v23 = vcombine.high %v2227_v58, %v2231_v59  ;;  %v7627_v62 = vcombine.high %v2235_v25, %v2239_v37 }
 0x7f9   :  { %v1990_v50 = vadd.f32 %v1984_v52, %v1968_v49  ;;  %v1992_v4 = vmax.f32 %v1988_v61, 0.0  ;;  %v7602_v52 = vcombine.low %v2211_v51, %v2215_v36  ;;  %v7611_v57 = vcombine.high %v2219_v55, %v2223_v46  ;;  %v2247_v49 = vld [vmem:[#allocation9 + $0x320] sm:$0xff]  ;;  %v2160_v51 = vld [vmem:[#allocation9 + $0x68] sm:$0xff] }
 0x7fa   :  { %v1993_v0 = vmax.f32 %v1989_v48, 0.0  ;;  %v7610_v20 = vcombine.low %v2219_v55, %v2223_v46  ;;  %v7618_v61 = vcombine.low %v2227_v58, %v2231_v59  ;;  %v2243_v48 = vld [vmem:[#allocation9 + $0x300] sm:$0xff]  ;;  %v2168_v58 = vld [vmem:[#allocation9 + $0xa8] sm:$0xff] }
 0x7fb   :  { %v1994_v7 = vmax.f32 %v1990_v50, 0.0  ;;  %v7626_v50 = vcombine.low %v2235_v25, %v2239_v37  ;;  %v9950_v25 = vld [vmem:[%s11092_s9 + $0x44] ss:$16 sps:$4 sm:$0xff]   ;;  %v2172_v37 = vld [vmem:[#allocation9 + $0xc8] sm:$0xff] }
 0x7fc   :  { %v1995_v47 = vpack.c.bf16 %v1993_v0, %v1991_v63  ;;  %v7635_v63 = vcombine.high %v2243_v48, %v2247_v49  ;;  %v7634_v0 = vcombine.low %v2243_v48, %v2247_v49  ;;  %v9958_v48 = vld [vmem:[%s11092_s9 + $0x40] ss:$16 sps:$4 sm:$0xff]  }
 0x7fd   :  { %v1996_v9 = vpack.c.bf16 %v1994_v7, %v1992_v4  ;;  %v2251_v4 = vld [vmem:[#allocation9 + $0x340] sm:$0xff] }
 0x7fe   :  { %v2255_v7 = vld [vmem:[#allocation9 + $0x360] sm:$0xff] }
 0x7ff   :  { %2058 = vmatprep.subr.bf16.mxu0 %v1996_v9  ;;  %v7642_v8 = vcombine.low %v2251_v4, %v2255_v7 }
 0x800   :  { %2059 = vmatpush1.bf16.msra.mxu0 %v1995_v47 }
 0x801   :  { %2102 = vmatprep.subr.bf16.mxu0 %v1996_v9  ;;  %v7643_v9 = vcombine.high %v2251_v4, %v2255_v7  ;;  %v9970_v7 = vld [vmem:[%s11092_s9 + $0x60] ss:$16 sps:$4 sm:$0xff]  }
 0x803   :  { %7536 = vmatmul.mubr.msk.bf16.vlgmr.msra.gmra.mrb[16].mxu0 %vm11233_vm5, %v2029_v29 }
 0x804   :  { %2103 = vmatpush1.bf16.msra.mxu0 %v1995_v47  ;;  %2134 = vmatprep.mubr.bf16.mxu0 %v11110_v43  ;;  %v2253_v47 = vld [vmem:[#allocation9 + $0x350] sm:$0xff] }
 0x805   :  { %2957 = vmatprep.subr.bf16.mxu0 %v7539_v10  ;;  %v7646_v27 = vcombine.low %v2253_v47, %v2257_v26  ;;  %v7647_v29 = vcombine.high %v2253_v47, %v2257_v26  ;;  %v2259_v10 = vld [vmem:[#allocation9 + $0x380] sm:$0xff]  ;;  %v2192_v26 = vld [vmem:[#allocation9 + $0x168] sm:$0xff] }
 0x806   :  { %v7650_v12 = vcombine.low %v2259_v10, %v2263_v3 }
 0x807   :  { %3065 = vmatprep.subr.bf16.mxu1 %v7647_v29  ;;  %v9982_v29 = vld [vmem:[%s11092_s9 + $0x80] ss:$16 sps:$4 sm:$0xff]  }
 0x808   :  { %3066 = vmatpush1.bf16.msra.mxu1 %v7646_v27 }
 0x80b   :  { %7537 = vmatmul.mubr.msk.bf16.vlgmr.msra.gmra.mrb[20].mxu0 %vm11234_vm15, %v2054_v13  ;;  %v7651_v13 = vcombine.high %v2259_v10, %v2263_v3  ;;  %v9988_v3 = vld [vmem:[%s11092_s9 + $0xa4] ss:$16 sps:$4 sm:$0xff]  }
 0x80c   :  { %2958 = vmatpush1.bf16.msra.mxu0 %v7538_v60  ;;  %v2265_v60 = vld [vmem:[#allocation9 + $0x3b0] sm:$0xff] }
 0x80d   :  { %2959 = vmatprep.subr.bf16.mxu0 %v7547_v15  ;;  %v7654_v15 = vcombine.low %v2261_v11, %v2265_v60  ;;  %v7655_v16 = vcombine.high %v2261_v11, %v2265_v60  ;;  %v2196_v11 = vld [vmem:[#allocation9 + $0x188] sm:$0xff]  ;;  %v9994_v60 = vld [vmem:[%s11092_s9 + $0xa0] ss:$16 sps:$4 sm:$0xff]  }
 0x80e   :  { %11235 = vst [vmem:[#allocation28_spill] sm:$0xff] %v9994_v60 }
 0x80f   :  { %3067 = vmatprep.subr.bf16.mxu1 %v7655_v16  ;;  %v10000_v16 = vld [vmem:[%s11092_s9 + $0xc4] ss:$16 sps:$4 sm:$0xff]  }
 0x810   :  { %2960 = vmatpush1.bf16.msra.mxu0 %v7546_v18  ;;  %v2271_v18 = vld [vmem:[#allocation9 + $0x3e0] sm:$0xff]  ;;  %3068 = vmatpush1.bf16.msra.mxu1 %v7654_v15  ;;  %11236 = vst [vmem:[#allocation29_spill] sm:$0xff] %v10000_v16 }
 0x811   :  { %2961 = vmatprep.subr.bf16.mxu0 %v7555_v19  ;;  %v2269_v19 = vld [vmem:[#allocation9 + $0x3d0] sm:$0xff]  ;;  %v7659_v21 = vcombine.high %v2267_v17, %v2271_v18 }
 0x812   :  { %v7663_v30 = vcombine.high %v2269_v19, %v2273_v24 }
 0x814   :  { %2962 = vmatpush1.bf16.msra.mxu0 %v7554_v28  ;;  %v7658_v28 = vcombine.low %v2267_v17, %v2271_v18  ;;  %3069 = vmatprep.subr.bf16.mxu1 %v7663_v30  ;;  %v2204_v17 = vld [vmem:[#allocation9 + $0x1c8] sm:$0xff] }
 0x815   :  { %2963 = vmatprep.subr.bf16.mxu0 %v7563_v14  ;;  %v7662_v14 = vcombine.low %v2269_v19, %v2273_v24  ;;  %v2208_v18 = vld [vmem:[#allocation9 + $0x1e8] sm:$0xff] }
 0x816   :  { %v7597_v24 = vcombine.high %v2204_v17, %v2208_v18  ;;  %v2216_v30 = vld [vmem:[#allocation9 + $0x228] sm:$0xff] }
 0x817   :  { %3070 = vmatpush1.bf16.msra.mxu1 %v7662_v14  ;;  %v2212_v14 = vld [vmem:[#allocation9 + $0x208] sm:$0xff] }
 0x818   :  { %2964 = vmatpush1.bf16.msra.mxu0 %v7562_v32  ;;  %v2152_v32 = vld [vmem:[#allocation9 + $0x28] sm:$0xff]  ;;  %3357 = vmatprep.subr.bf16.mxu1 %v9919_v34 }
 0x819   :  { %2965 = vmatprep.subr.bf16.mxu0 %v7571_v33  ;;  %v7541_v33 = vcombine.high %v2148_v31, %v2152_v32  ;;  %v7540_v35 = vcombine.low %v2148_v31, %v2152_v32  ;;  %v7596_v31 = vcombine.low %v2204_v17, %v2208_v18  ;;  %v10018_v32 = vld [vmem:[%s11092_s9 + $0xe0] ss:$16 sps:$4 sm:$0xff]   ;;  %v10092_v17 = vld [vmem:[%s11092_s9 + $0xa8] ss:$16 sps:$4 sm:$0xff]  }
 0x81a   :  { %11239 = vst [vmem:[#allocation32_spill] sm:$0xff] %v10018_v32  ;;  %11240 = vst [vmem:[#allocation33_spill] sm:$0xff] %v10092_v17 }
 0x81c   :  { %2966 = vmatpush1.bf16.msra.mxu0 %v7570_v5 }
 0x81d   :  { %2967 = vmatprep.subr.bf16.mxu0 %v7579_v6 }
 0x820   :  { %2968 = vmatpush1.bf16.msra.mxu0 %v7578_v40 }
 0x821   :  { %2969 = vmatprep.subr.bf16.mxu0 %v7587_v41 }
 0x824   :  { %2970 = vmatpush1.bf16.msra.mxu0 %v7586_v45 }
 0x825   :  { %2971 = vmatprep.subr.bf16.mxu0 %v7595_v22  ;;  %v2156_v22 = vld [vmem:[#allocation9 + $0x48] sm:$0xff] }
 0x826   :  { %v7549_v46 = vcombine.high %v2156_v22, %v2160_v51  ;;  %v7548_v59 = vcombine.low %v2156_v22, %v2160_v51  ;;  %v10043_v22 = vld [vmem:[%s11092_s9 + $0x28] ss:$16 sps:$4 sm:$0xff]  }
 0x828   :  { %2972 = vmatpush1.bf16.msra.mxu0 %v7594_v53 }
 0x829   :  { %2973 = vmatprep.subr.bf16.mxu0 %v7603_v2  ;;  %v9927_v2 = vld [vmem:[%s11092_s9] ss:$16 sps:$4 sm:$0xff]  }
 0x82c   :  { %2974 = vmatpush1.bf16.msra.mxu0 %v7602_v52  ;;  %v9936_v52 = vld [vmem:[%s11092_s9 + $0x24] ss:$16 sps:$4 sm:$0xff]  }
 0x82d   :  { %2975 = vmatprep.subr.bf16.mxu0 %v7611_v57  ;;  %v2164_v57 = vld [vmem:[#allocation9 + $0x88] sm:$0xff] }
 0x830   :  { %2976 = vmatpush1.bf16.msra.mxu0 %v7610_v20  ;;  %v9944_v20 = vld [vmem:[%s11092_s9 + $0x20] ss:$16 sps:$4 sm:$0xff]  }
 0x831   :  { %2977 = vmatprep.subr.bf16.mxu0 %v7619_v23  ;;  %v7557_v23 = vcombine.high %v2164_v57, %v2168_v58 }
 0x834   :  { %2978 = vmatpush1.bf16.msra.mxu0 %v7618_v61  ;;  %v2176_v61 = vld [vmem:[#allocation9 + $0xe8] sm:$0xff] }
 0x835   :  { %2979 = vmatprep.subr.bf16.mxu0 %v7627_v62  ;;  %v7556_v62 = vcombine.low %v2164_v57, %v2168_v58  ;;  %v7565_v49 = vcombine.high %v2172_v37, %v2176_v61  ;;  %v7564_v4 = vcombine.low %v2172_v37, %v2176_v61  ;;  %v2240_v57 = vld [vmem:[#allocation9 + $0x2e8] sm:$0xff] }
 0x836   :  { %v10062_v37 = vld [vmem:[%s11092_s9 + $0x6c] ss:$16 sps:$4 sm:$0xff]  }
 0x837   :  { %v2244_v61 = vld [vmem:[#allocation9 + $0x308] sm:$0xff] }
 0x838   :  { %2980 = vmatpush1.bf16.msra.mxu0 %v7626_v50  ;;  %v9964_v50 = vld [vmem:[%s11092_s9 + $0x64] ss:$16 sps:$4 sm:$0xff]  }
 0x839   :  { %2981 = vmatprep.subr.bf16.mxu0 %v7635_v63  ;;  %v2180_v63 = vld [vmem:[#allocation9 + $0x108] sm:$0xff] }
 0x83c   :  { %2982 = vmatpush1.bf16.msra.mxu0 %v7634_v0  ;;  %v2184_v0 = vld [vmem:[#allocation9 + $0x128] sm:$0xff] }
 0x83d   :  { %2983 = vmatprep.subr.bf16.mxu0 %v7643_v9  ;;  %v7573_v47 = vcombine.high %v2180_v63, %v2184_v0  ;;  %v2188_v9 = vld [vmem:[#allocation9 + $0x148] sm:$0xff]  ;;  %v7572_v27 = vcombine.low %v2180_v63, %v2184_v0 }
 0x83e   :  { %v7581_v10 = vcombine.high %v2188_v9, %v2192_v26  ;;  %v10068_v63 = vld [vmem:[%s11092_s9 + $0x68] ss:$16 sps:$4 sm:$0xff]  }
 0x840   :  { %2984 = vmatpush1.bf16.msra.mxu0 %v7642_v8  ;;  %v9976_v8 = vld [vmem:[%s11092_s9 + $0x84] ss:$16 sps:$4 sm:$0xff]  }
 0x841   :  { %2985 = vmatprep.subr.bf16.mxu0 %v7651_v13  ;;  %v7580_v13 = vcombine.low %v2188_v9, %v2192_v26  ;;  %v2256_v9 = vld [vmem:[#allocation9 + $0x368] sm:$0xff] }
 0x844   :  { %2986 = vmatpush1.bf16.msra.mxu0 %v7650_v12  ;;  %v2200_v12 = vld [vmem:[#allocation9 + $0x1a8] sm:$0xff] }
 0x845   :  { %2987 = vmatprep.subr.bf16.mxu0 %v7659_v21  ;;  %v7589_v15 = vcombine.high %v2196_v11, %v2200_v12  ;;  %v7588_v19 = vcombine.low %v2196_v11, %v2200_v12  ;;  %v10006_v21 = vld [vmem:[%s11092_s9 + $0xc0] ss:$16 sps:$4 sm:$0xff]   ;;  %v10086_v11 = vld [vmem:[%s11092_s9 + $0xac] ss:$16 sps:$4 sm:$0xff]  }
 0x846   :  { %11237 = vst [vmem:[#allocation30_spill] sm:$0xff] %v10006_v21  ;;  %v2260_v12 = vld [vmem:[#allocation9 + $0x388] sm:$0xff] }
 0x848   :  { %2988 = vmatpush1.bf16.msra.mxu0 %v7658_v28  ;;  %v10012_v28 = vld [vmem:[%s11092_s9 + $0xe4] ss:$16 sps:$4 sm:$0xff]  }
 0x849   :  { %2998 = vmatprep.subr.bf16.mxu0 %v7541_v33  ;;  %11238 = vst [vmem:[#allocation31_spill] sm:$0xff] %v10012_v28  ;;  %v7605_v33 = vcombine.high %v2212_v14, %v2216_v30 }
 0x8d6   :  { %v2092_v5 = vpop.f32.mrb[16].mxu0 }
 0x8d7   :  { %v2094_v6 = vpop.f32.mrb[17].mxu0 }
 0x8d8   :  { %v2096_v38 = vpop.f32.mrb[18].mxu0 }
 0x8d9   :  { %v2097_v39 = vpop.f32.mrb[19].mxu0  ;;  %v7604_v38 = vcombine.low %v2212_v14, %v2216_v30  ;;  %v2272_v14 = vld [vmem:[#allocation9 + $0x3e8] sm:$0xff] }
 0x8da   :  { %v10030_v39 = vld [vmem:[%s11092_s9 + $0x8] ss:$16 sps:$4 sm:$0xff]  }
 0x8de   :  { %v2136_v40 = vpop.f32.mrb[20].mxu0 }
 0x8df   :  { %v2143_v41 = vmax.f32 %v2092_v5, %v2136_v40  ;;  %v2138_v42 = vpop.f32.mrb[21].mxu0  ;;  %v2220_v5 = vld [vmem:[#allocation9 + $0x248] sm:$0xff] }
 0x8e0   :  { %v2144_v44 = vmax.f32 %v2094_v6, %v2138_v42  ;;  %v2140_v45 = vpop.f32.mrb[22].mxu0  ;;  %v2224_v6 = vld [vmem:[#allocation9 + $0x268] sm:$0xff] }
 0x8e1   :  { %v2141_v36 = vpop.f32.mrb[23].mxu0  ;;  %v9929_v55 = vpack.c.bf16 %v2143_v41, %v2143_v41  ;;  %v7613_v40 = vcombine.high %v2220_v5, %v2224_v6  ;;  %v10036_v41 = vld [vmem:[%s11092_s9 + $0x2c] ss:$16 sps:$4 sm:$0xff]   ;;  %v7612_v45 = vcombine.low %v2220_v5, %v2224_v6 }
 0x8e2   :  { %v9922_v53 = vpack.c.bf16 %v2144_v44, %v2144_v44  ;;  %v2228_v42 = vld [vmem:[#allocation9 + $0x288] sm:$0xff]  ;;  %v2150_v6 = vld [vmem:[#allocation9 + $0x18] sm:$0xff] }
 0x8e3   :  { %v2232_v44 = vld [vmem:[#allocation9 + $0x2a8] sm:$0xff] }
 0x8e4   :  { %2989 = vmatprep.mubr.bf16.mxu0 %v9922_v53  ;;  %3071 = vmatprep.mubr.bf16.mxu1 %v9922_v53  ;;  %v7621_v51 = vcombine.high %v2228_v42, %v2232_v44  ;;  %v10049_v36 = vld [vmem:[%s11092_s9 + $0x4c] ss:$16 sps:$4 sm:$0xff]   ;;  %v7620_v58 = vcombine.low %v2228_v42, %v2232_v44  ;;  %v10116_v42 = vld [vmem:[%s11092_s9 + $0xe8] ss:$16 sps:$4 sm:$0xff]  }
 0x8e5   :  { %2990 = vmatmul.mubr.bf16.vlgmr.msra.gmra.mrb[24].mxu0 %v9929_v55  ;;  %3072 = vmatmul.mubr.bf16.vlgmr.msra.gmra.mrb[48].mxu1 %v9929_v55  ;;  %v10110_v5 = vld [vmem:[%s11092_s9 + $0xec] ss:$16 sps:$4 sm:$0xff]   ;;  %11244 = vst [vmem:[#allocation37_spill] sm:$0xff] %v10116_v42 }
 0x8e6   :  { %2999 = vmatpush1.bf16.msra.mxu0 %v7540_v35  ;;  %3358 = vmatpush1.bf16.msra.mxu1 %v9927_v2  ;;  %v10024_v35 = vld [vmem:[%s11092_s9 + $0xc] ss:$16 sps:$4 sm:$0xff]   ;;  %11243 = vst [vmem:[#allocation36_spill] sm:$0xff] %v10110_v5 }
 0x8e7   :  { %3030 = vmatprep.mubr.bf16.mxu0 %v9922_v53  ;;  %3000 = vmatprep.subr.bf16.mxu0 %v7549_v46  ;;  %v2236_v46 = vld [vmem:[#allocation9 + $0x2c8] sm:$0xff] }
 0x8e8   :  { %3359 = vmatprep.subr.bf16.mxu1 %v9936_v52  ;;  %3389 = vmatprep.mubr.bf16.mxu1 %v11110_v43 }
 0x8ea   :  { %3001 = vmatpush1.bf16.msra.mxu0 %v7548_v59  ;;  %3360 = vmatpush1.bf16.msra.mxu1 %v9944_v20  ;;  %v10056_v59 = vld [vmem:[%s11092_s9 + $0x48] ss:$16 sps:$4 sm:$0xff]  }
 0x8eb   :  { %3002 = vmatprep.subr.bf16.mxu0 %v7557_v23  ;;  %3361 = vmatprep.subr.bf16.mxu1 %v9950_v25  ;;  %v7629_v23 = vcombine.high %v2236_v46, %v2240_v57 }
 0x8ee   :  { %3003 = vmatpush1.bf16.msra.mxu0 %v7556_v62  ;;  %3362 = vmatpush1.bf16.msra.mxu1 %v9958_v48  ;;  %v2248_v62 = vld [vmem:[#allocation9 + $0x328] sm:$0xff] }
 0x8ef   :  { %3004 = vmatprep.subr.bf16.mxu0 %v7565_v49  ;;  %3363 = vmatprep.subr.bf16.mxu1 %v9964_v50  ;;  %v7628_v49 = vcombine.low %v2236_v46, %v2240_v57  ;;  %v7637_v0 = vcombine.high %v2244_v61, %v2248_v62  ;;  %v7636_v26 = vcombine.low %v2244_v61, %v2248_v62  ;;  %v2162_v46 = vld [vmem:[#allocation9 + $0x78] sm:$0xff] }
 0x8f0   :  { %v2166_v61 = vld [vmem:[#allocation9 + $0x98] sm:$0xff] }
 0x8f1   :  { %v2170_v62 = vld [vmem:[#allocation9 + $0xb8] sm:$0xff] }
 0x8f2   :  { %3005 = vmatpush1.bf16.msra.mxu0 %v7564_v4  ;;  %3364 = vmatpush1.bf16.msra.mxu1 %v9970_v7  ;;  %v10074_v4 = vld [vmem:[%s11092_s9 + $0x8c] ss:$16 sps:$4 sm:$0xff]  }
 0x8f3   :  { %3006 = vmatprep.subr.bf16.mxu0 %v7573_v47  ;;  %3365 = vmatprep.subr.bf16.mxu1 %v9976_v8  ;;  %v2252_v47 = vld [vmem:[#allocation9 + $0x348] sm:$0xff] }
 0x8f6   :  { %3007 = vmatpush1.bf16.msra.mxu0 %v7572_v27  ;;  %3366 = vmatpush1.bf16.msra.mxu1 %v9982_v29  ;;  %v10080_v27 = vld [vmem:[%s11092_s9 + $0x88] ss:$16 sps:$4 sm:$0xff]  }
 0x8f7   :  { %3008 = vmatprep.subr.bf16.mxu0 %v7581_v10  ;;  %3367 = vmatprep.subr.bf16.mxu1 %v9988_v3  ;;  %v7645_v10 = vcombine.high %v2252_v47, %v2256_v9 }
 0x8fa   :  { %3009 = vmatpush1.bf16.msra.mxu0 %v7580_v13  ;;  %3368 = vmatpush1.bf16.msra.mxu1 %v9994_v60  ;;  %v2264_v13 = vld [vmem:[#allocation9 + $0x3a8] sm:$0xff] }
 0x8fb   :  { %3010 = vmatprep.subr.bf16.mxu0 %v7589_v15  ;;  %3369 = vmatprep.subr.bf16.mxu1 %v10000_v16  ;;  %v7644_v15 = vcombine.low %v2252_v47, %v2256_v9  ;;  %v7653_v18 = vcombine.high %v2260_v12, %v2264_v13  ;;  %v7652_v30 = vcombine.low %v2260_v12, %v2264_v13  ;;  %v10131_v9 = vld [vmem:[#allocation10 + $0x28] ss:$16 sps:$4 sm:$0xff]   ;;  %v10134_v12 = vld [vmem:[#allocation10 + $0x4c] ss:$16 sps:$4 sm:$0xff]  }
 0x8fc   :  { %v7561_v47 = vcombine.high %v2166_v61, %v2170_v62  ;;  %v7560_v13 = vcombine.low %v2166_v61, %v2170_v62  ;;  %v2202_v61 = vld [vmem:[#allocation9 + $0x1b8] sm:$0xff] }
 0x8fd   :  { %v10153_v62 = vld [vmem:[#allocation10 + $0xac] ss:$16 sps:$4 sm:$0xff]  }
 0x8fe   :  { %3011 = vmatpush1.bf16.msra.mxu0 %v7588_v19  ;;  %3370 = vmatpush1.bf16.msra.mxu1 %v10006_v21  ;;  %v10098_v19 = vld [vmem:[%s11092_s9 + $0xcc] ss:$16 sps:$4 sm:$0xff]  }
 0x8ff   :  { %3012 = vmatprep.subr.bf16.mxu0 %v7597_v24  ;;  %3371 = vmatprep.subr.bf16.mxu1 %v10012_v28  ;;  %11241 = vst [vmem:[#allocation34_spill] sm:$0xff] %v10098_v19  ;;  %v2268_v24 = vld [vmem:[#allocation9 + $0x3c8] sm:$0xff] }
 0x902   :  { %3013 = vmatpush1.bf16.msra.mxu0 %v7596_v31  ;;  %3372 = vmatpush1.bf16.msra.mxu1 %v10018_v32  ;;  %v10104_v31 = vld [vmem:[%s11092_s9 + $0xc8] ss:$16 sps:$4 sm:$0xff]  }
 0x903   :  { %3014 = vmatprep.subr.bf16.mxu0 %v7605_v33  ;;  %3398 = vmatprep.subr.bf16.mxu1 %v10024_v35  ;;  %11242 = vst [vmem:[#allocation35_spill] sm:$0xff] %v10104_v31  ;;  %v7661_v33 = vcombine.high %v2268_v24, %v2272_v14 }
 0x905   :  { %3390 = vmatmul.mubr.bf16.vlgmr.msra.gmra.mrb[52].mxu1 %v11110_v43 }
 0x906   :  { %3015 = vmatpush1.bf16.msra.mxu0 %v7604_v38  ;;  %3399 = vmatpush1.bf16.msra.mxu1 %v10030_v39  ;;  %v2154_v38 = vld [vmem:[#allocation9 + $0x38] sm:$0xff] }
 0x907   :  { %3016 = vmatprep.subr.bf16.mxu0 %v7613_v40  ;;  %3400 = vmatprep.subr.bf16.mxu1 %v10036_v41  ;;  %v7660_v40 = vcombine.low %v2268_v24, %v2272_v14  ;;  %v7545_v44 = vcombine.high %v2150_v6, %v2154_v38  ;;  %v7544_v57 = vcombine.low %v2150_v6, %v2154_v38  ;;  %v2186_v24 = vld [vmem:[#allocation9 + $0x138] sm:$0xff] }
 0x908   :  { %3430 = vmatprep.mubr.bf16.mxu1 %v11110_v43  ;;  %v10141_v14 = vld [vmem:[#allocation10 + $0x6c] ss:$16 sps:$4 sm:$0xff]   ;;  %v10144_v6 = vld [vmem:[#allocation10 + $0x68] ss:$16 sps:$4 sm:$0xff]  }
 0x909   :  { %v2190_v38 = vld [vmem:[#allocation9 + $0x158] sm:$0xff] }
 0x90a   :  { %3017 = vmatpush1.bf16.msra.mxu0 %v7612_v45  ;;  %3401 = vmatpush1.bf16.msra.mxu1 %v10043_v22  ;;  %v10119_v45 = vld [vmem:[#allocation10 + $0xc] ss:$16 sps:$4 sm:$0xff]  }
 0x90b   :  { %3018 = vmatprep.subr.bf16.mxu0 %v7621_v51  ;;  %3402 = vmatprep.subr.bf16.mxu1 %v10049_v36  ;;  %11245 = vst [vmem:[#allocation38_spill] sm:$0xff] %v10119_v45  ;;  %v2158_v51 = vld [vmem:[#allocation9 + $0x58] sm:$0xff] }
 0x90e   :  { %3019 = vmatpush1.bf16.msra.mxu0 %v7620_v58  ;;  %3403 = vmatpush1.bf16.msra.mxu1 %v10056_v59  ;;  %v7553_v58 = vcombine.high %v2158_v51, %v2162_v46 }
 0x90f   :  { %3020 = vmatprep.subr.bf16.mxu0 %v7629_v23  ;;  %3404 = vmatprep.subr.bf16.mxu1 %v10062_v37  ;;  %v10123_v23 = vld [vmem:[#allocation10 + $0x8] ss:$16 sps:$4 sm:$0xff]  }
 0x912   :  { %3021 = vmatpush1.bf16.msra.mxu0 %v7628_v49  ;;  %3405 = vmatpush1.bf16.msra.mxu1 %v10068_v63  ;;  %v10125_v49 = vld [vmem:[#allocation10 + $0x2c] ss:$16 sps:$4 sm:$0xff]  }
 0x913   :  { %3022 = vmatprep.subr.bf16.mxu0 %v7637_v0  ;;  %3406 = vmatprep.subr.bf16.mxu1 %v10074_v4  ;;  %v7552_v0 = vcombine.low %v2158_v51, %v2162_v46 }
 0x916   :  { %3023 = vmatpush1.bf16.msra.mxu0 %v7636_v26  ;;  %3407 = vmatpush1.bf16.msra.mxu1 %v10080_v27  ;;  %v2174_v26 = vld [vmem:[#allocation9 + $0xd8] sm:$0xff] }
 0x917   :  { %3024 = vmatprep.subr.bf16.mxu0 %v7645_v10  ;;  %3408 = vmatprep.subr.bf16.mxu1 %v10086_v11  ;;  %v2178_v10 = vld [vmem:[#allocation9 + $0xf8] sm:$0xff] }
 0x91a   :  { %3025 = vmatpush1.bf16.msra.mxu0 %v7644_v15  ;;  %3409 = vmatpush1.bf16.msra.mxu1 %v10092_v17  ;;  %v7569_v15 = vcombine.high %v2174_v26, %v2178_v10 }
 0x91b   :  { %3026 = vmatprep.subr.bf16.mxu0 %v7653_v18  ;;  %3410 = vmatprep.subr.bf16.mxu1 %v10098_v19  ;;  %v2182_v18 = vld [vmem:[#allocation9 + $0x118] sm:$0xff] }
 0x91c   :  { %v7576_v51 = vcombine.low %v2182_v18, %v2186_v24 }
 0x91e   :  { %3027 = vmatpush1.bf16.msra.mxu0 %v7652_v30  ;;  %3411 = vmatpush1.bf16.msra.mxu1 %v10104_v31  ;;  %v7568_v30 = vcombine.low %v2174_v26, %v2178_v10  ;;  %v10156_v26 = vld [vmem:[#allocation10 + $0xa8] ss:$16 sps:$4 sm:$0xff]  }
 0x91f   :  { %3028 = vmatprep.subr.bf16.mxu0 %v7661_v33  ;;  %3412 = vmatprep.subr.bf16.mxu1 %v10110_v5  ;;  %v7577_v33 = vcombine.high %v2182_v18, %v2186_v24  ;;  %11246 = vst [vmem:[#allocation39_spill] sm:$0xff] %v10156_v26  ;;  %v2206_v10 = vld [vmem:[#allocation9 + $0x1d8] sm:$0xff] }
 0x922   :  { %3029 = vmatpush1.bf16.msra.mxu0 %v7660_v40  ;;  %3413 = vmatpush1.bf16.msra.mxu1 %v10116_v42  ;;  %v2194_v40 = vld [vmem:[#allocation9 + $0x178] sm:$0xff] }
 0x923   :  { %3080 = vmatprep.subr.bf16.mxu0 %v7545_v44  ;;  %3648 = vmatprep.subr.bf16.mxu1 %v10119_v45  ;;  %v10147_v44 = vld [vmem:[#allocation10 + $0x8c] ss:$16 sps:$4 sm:$0xff]   ;;  %v7585_v46 = vcombine.high %v2190_v38, %v2194_v40 }
 0x925   :  { %3031 = vmatmul.mubr.bf16.vlgmr.msra.gmra.mrb[28].mxu0 %v9929_v55  ;;  %3431 = vmatmul.mubr.bf16.vlgmr.msra.gmra.mrb[56].mxu1 %v11110_v43 }
 0x926   :  { %3081 = vmatpush1.bf16.msra.mxu0 %v7544_v57  ;;  %3112 = vmatprep.mubr.bf16.mxu0 %v9922_v53  ;;  %v10138_v53 = vld [vmem:[#allocation10 + $0x48] ss:$16 sps:$4 sm:$0xff]  }
 0x927   :  { %3082 = vmatprep.subr.bf16.mxu0 %v7553_v58  ;;  %3649 = vmatpush1.bf16.msra.mxu1 %v10123_v23  ;;  %v10150_v57 = vld [vmem:[#allocation10 + $0x88] ss:$16 sps:$4 sm:$0xff]  }
 0x928   :  { %3650 = vmatprep.subr.bf16.mxu1 %v10125_v49  ;;  %3680 = vmatprep.mubr.bf16.mxu1 %v11110_v43  ;;  %v2198_v58 = vld [vmem:[#allocation9 + $0x198] sm:$0xff] }
 0x929   :  { %v7592_v18 = vcombine.low %v2198_v58, %v2202_v61 }
 0x92a   :  { %3083 = vmatpush1.bf16.msra.mxu0 %v7552_v0  ;;  %v7584_v0 = vcombine.low %v2190_v38, %v2194_v40  ;;  %v2218_v38 = vld [vmem:[#allocation9 + $0x238] sm:$0xff] }
 0x92b   :  { %3084 = vmatprep.subr.bf16.mxu0 %v7561_v47  ;;  %3651 = vmatpush1.bf16.msra.mxu1 %v10131_v9  ;;  %v7593_v47 = vcombine.high %v2198_v58, %v2202_v61  ;;  %v10165_v40 = vld [vmem:[#allocation10 + $0xec] ss:$16 sps:$4 sm:$0xff]  }
 0x92c   :  { %3652 = vmatprep.subr.bf16.mxu1 %v10134_v12  ;;  %11248 = vst [vmem:[#allocation41_spill] sm:$0xff] %v10165_v40  ;;  %v2222_v58 = vld [vmem:[#allocation9 + $0x258] sm:$0xff] }
 0x92d   :  { %v2226_v61 = vld [vmem:[#allocation9 + $0x278] sm:$0xff] }
 0x92e   :  { %3085 = vmatpush1.bf16.msra.mxu0 %v7560_v13  ;;  %v2210_v13 = vld [vmem:[#allocation9 + $0x1f8] sm:$0xff]  ;;  %v7617_v43 = vcombine.high %v2222_v58, %v2226_v61 }
 0x92f   :  { %3086 = vmatprep.subr.bf16.mxu0 %v7569_v15  ;;  %3653 = vmatpush1.bf16.msra.mxu1 %v10138_v53  ;;  %v10159_v15 = vld [vmem:[#allocation10 + $0xcc] ss:$16 sps:$4 sm:$0xff]   ;;  %v7601_v24 = vcombine.high %v2206_v10, %v2210_v13 }
 0x930   :  { %3654 = vmatprep.subr.bf16.mxu1 %v10141_v14  ;;  %11247 = vst [vmem:[#allocation40_spill] sm:$0xff] %v10159_v15 }
 0x932   :  { %3087 = vmatpush1.bf16.msra.mxu0 %v7568_v30  ;;  %v10162_v30 = vld [vmem:[#allocation10 + $0xc8] ss:$16 sps:$4 sm:$0xff]  }
 0x933   :  { %3088 = vmatprep.subr.bf16.mxu0 %v7577_v33  ;;  %3655 = vmatpush1.bf16.msra.mxu1 %v10144_v6  ;;  %v2214_v33 = vld [vmem:[#allocation9 + $0x218] sm:$0xff] }
 0x934   :  { %3656 = vmatprep.subr.bf16.mxu1 %v10147_v44 }
 0x936   :  { %3089 = vmatpush1.bf16.msra.mxu0 %v7576_v51  ;;  %v7600_v51 = vcombine.low %v2206_v10, %v2210_v13  ;;  %v7616_v10 = vcombine.low %v2222_v58, %v2226_v61  ;;  %v11249_v13 = vmov 0   ;;  %v2254_v61 = vld [vmem:[#allocation9 + $0x358] sm:$0xff] }
 0x937   :  { %3090 = vmatprep.subr.bf16.mxu0 %v7585_v46  ;;  %3657 = vmatpush1.bf16.msra.mxu1 %v10150_v57  ;;  %v7609_v46 = vcombine.high %v2214_v33, %v2218_v38 }
 0x938   :  { %3658 = vmatprep.subr.bf16.mxu1 %v10153_v62 }
 0x93a   :  { %3091 = vmatpush1.bf16.msra.mxu0 %v7584_v0  ;;  %v10168_v0 = vld [vmem:[#allocation10 + $0xe8] ss:$16 sps:$4 sm:$0xff]  }
 0x93b   :  { %3092 = vmatprep.subr.bf16.mxu0 %v7593_v47  ;;  %3659 = vmatpush1.bf16.msra.mxu1 %v10156_v26  ;;  %v7608_v47 = vcombine.low %v2214_v33, %v2218_v38  ;;  %v2234_v26 = vld [vmem:[#allocation9 + $0x2b8] sm:$0xff] }
 0x93c   :  { %3660 = vmatprep.subr.bf16.mxu1 %v10159_v15  ;;  %v2230_v15 = vld [vmem:[#allocation9 + $0x298] sm:$0xff] }
 0x93d   :  { %v7624_v33 = vcombine.low %v2230_v15, %v2234_v26 }
 0x93e   :  { %3093 = vmatpush1.bf16.msra.mxu0 %v7592_v18  ;;  %v7625_v18 = vcombine.high %v2230_v15, %v2234_v26 }
 0x93f   :  { %3094 = vmatprep.subr.bf16.mxu0 %v7601_v24  ;;  %3661 = vmatpush1.bf16.msra.mxu1 %v10162_v30  ;;  %v2238_v24 = vld [vmem:[#allocation9 + $0x2d8] sm:$0xff] }
 0x940   :  { %3662 = vmatprep.subr.bf16.mxu1 %v10165_v40  ;;  %v2242_v40 = vld [vmem:[#allocation9 + $0x2f8] sm:$0xff] }
 0x941   :  { %v7633_v38 = vcombine.high %v2238_v24, %v2242_v40 }
 0x942   :  { %3095 = vmatpush1.bf16.msra.mxu0 %v7600_v51  ;;  %v2246_v51 = vld [vmem:[#allocation9 + $0x318] sm:$0xff] }
 0x943   :  { %3096 = vmatprep.subr.bf16.mxu0 %v7609_v46  ;;  %3663 = vmatpush1.bf16.msra.mxu1 %v10168_v0  ;;  %v2250_v46 = vld [vmem:[#allocation9 + $0x338] sm:$0xff] }
 0x944   :  { %3801 = vmatprep.subr.bf16.mxu1 %v10024_v35  ;;  %v7641_v58 = vcombine.high %v2246_v51, %v2250_v46  ;;  %v7640_v26 = vcombine.low %v2246_v51, %v2250_v46 }
 0x946   :  { %3097 = vmatpush1.bf16.msra.mxu0 %v7608_v47  ;;  %3681 = vmatmul.mubr.bf16.vlgmr.msra.gmra.mrb[60].mxu1 %v11249_v13  ;;  %v2258_v47 = vld [vmem:[#allocation9 + $0x378] sm:$0xff] }
 0x947   :  { %3098 = vmatprep.subr.bf16.mxu0 %v7617_v43  ;;  %3802 = vmatpush1.bf16.msra.mxu1 %v10030_v39  ;;  %v7632_v43 = vcombine.low %v2238_v24, %v2242_v40  ;;  %v7649_v15 = vcombine.high %v2254_v61, %v2258_v47  ;;  %v7648_v40 = vcombine.low %v2254_v61, %v2258_v47  ;;  %v10191_v61 = vld [vmem:[#allocation10] ss:$16 sps:$4 sm:$0xff]   ;;  %v10194_v47 = vld [vmem:[#allocation10 + $0x24] ss:$16 sps:$4 sm:$0xff]  }
 0x948   :  { %3803 = vmatprep.subr.bf16.mxu1 %v10036_v41  ;;  %3833 = vmatprep.mubr.bf16.mxu1 %v11249_v13 }
 0x94a   :  { %3099 = vmatpush1.bf16.msra.mxu0 %v7616_v10  ;;  %v2262_v10 = vld [vmem:[#allocation9 + $0x398] sm:$0xff] }
 0x94b   :  { %3100 = vmatprep.subr.bf16.mxu0 %v7625_v18  ;;  %3804 = vmatpush1.bf16.msra.mxu1 %v10043_v22  ;;  %v2266_v18 = vld [vmem:[#allocation9 + $0x3b8] sm:$0xff] }
 0x94c   :  { %3805 = vmatprep.subr.bf16.mxu1 %v10049_v36  ;;  %v7657_v24 = vcombine.high %v2262_v10, %v2266_v18  ;;  %v7656_v51 = vcombine.low %v2262_v10, %v2266_v18  ;;  %v10207_v10 = vld [vmem:[#allocation10 + $0x40] ss:$16 sps:$4 sm:$0xff]   ;;  %v10210_v18 = vld [vmem:[#allocation10 + $0x64] ss:$16 sps:$4 sm:$0xff]  }
 0x94e   :  { %3101 = vmatpush1.bf16.msra.mxu0 %v7624_v33  ;;  %v2270_v33 = vld [vmem:[#allocation9 + $0x3d8] sm:$0xff] }
 0x94f   :  { %3102 = vmatprep.subr.bf16.mxu0 %v7633_v38  ;;  %3806 = vmatpush1.bf16.msra.mxu1 %v10056_v59  ;;  %v2274_v38 = vld [vmem:[#allocation9 + $0x3f8] sm:$0xff] }
 0x950   :  { %3807 = vmatprep.subr.bf16.mxu1 %v10062_v37  ;;  %v7665_v46 = vcombine.high %v2270_v33, %v2274_v38 }
 0x952   :  { %3103 = vmatpush1.bf16.msra.mxu0 %v7632_v43  ;;  %v7664_v43 = vcombine.low %v2270_v33, %v2274_v38  ;;  %v10222_v33 = vld [vmem:[#allocation10 + $0xa4] ss:$16 sps:$4 sm:$0xff]   ;;  %v10225_v38 = vld [vmem:[#allocation10 + $0xa0] ss:$16 sps:$4 sm:$0xff]  }
 0x953   :  { %3104 = vmatprep.subr.bf16.mxu0 %v7641_v58  ;;  %3808 = vmatpush1.bf16.msra.mxu1 %v10068_v63  ;;  %v10187_v58 = vld [vmem:[#allocation10 + $0x4] ss:$16 sps:$4 sm:$0xff]  }
 0x954   :  { %3809 = vmatprep.subr.bf16.mxu1 %v10074_v4  ;;  %11250 = vst [vmem:[#allocation42_spill] sm:$0xff] %v10187_v58 }
 0x956   :  { %3105 = vmatpush1.bf16.msra.mxu0 %v7640_v26  ;;  %v10200_v26 = vld [vmem:[#allocation10 + $0x20] ss:$16 sps:$4 sm:$0xff]  }
 0x957   :  { %3106 = vmatprep.subr.bf16.mxu0 %v7649_v15  ;;  %3810 = vmatpush1.bf16.msra.mxu1 %v10080_v27  ;;  %v10204_v15 = vld [vmem:[#allocation10 + $0x44] ss:$16 sps:$4 sm:$0xff]  }
 0x958   :  { %3811 = vmatprep.subr.bf16.mxu1 %v10086_v11 }
 0x95a   :  { %3107 = vmatpush1.bf16.msra.mxu0 %v7648_v40  ;;  %v10216_v40 = vld [vmem:[#allocation10 + $0x84] ss:$16 sps:$4 sm:$0xff]  }
 0x95b   :  { %3108 = vmatprep.subr.bf16.mxu0 %v7657_v24  ;;  %3812 = vmatpush1.bf16.msra.mxu1 %v10092_v17  ;;  %v10219_v24 = vld [vmem:[#allocation10 + $0x80] ss:$16 sps:$4 sm:$0xff]  }
 0x95c   :  { %3813 = vmatprep.subr.bf16.mxu1 %v10098_v19 }
 0x95e   :  { %3109 = vmatpush1.bf16.msra.mxu0 %v7656_v51  ;;  %v10228_v51 = vld [vmem:[#allocation10 + $0xc4] ss:$16 sps:$4 sm:$0xff]  }
 0x95f   :  { %3110 = vmatprep.subr.bf16.mxu0 %v7665_v46  ;;  %3814 = vmatpush1.bf16.msra.mxu1 %v10104_v31  ;;  %v10231_v46 = vld [vmem:[#allocation10 + $0xc0] ss:$16 sps:$4 sm:$0xff]  }
 0x960   :  { %3815 = vmatprep.subr.bf16.mxu1 %v10110_v5 }
 0x962   :  { %3111 = vmatpush1.bf16.msra.mxu0 %v7664_v43  ;;  %v10234_v43 = vld [vmem:[#allocation10 + $0xe4] ss:$16 sps:$4 sm:$0xff]  }
 0x963   :  { %3607 = vmatprep.subr.bf16.mxu0 %v10187_v58  ;;  %3816 = vmatpush1.bf16.msra.mxu1 %v10116_v42 }
 0x964   :  { %3907 = vmatprep.subr.bf16.mxu1 %v10119_v45  ;;  %v10237_v45 = vld [vmem:[#allocation10 + $0xe0] ss:$16 sps:$4 sm:$0xff]  }
 0x965   :  { %3113 = vmatmul.mubr.bf16.vlgmr.msra.gmra.mrb[32].mxu0 %v9929_v55  ;;  %v10213_v55 = vld [vmem:[#allocation10 + $0x60] ss:$16 sps:$4 sm:$0xff]  }
 0x966   :  { %3608 = vmatpush1.bf16.msra.mxu0 %v10191_v61  ;;  %3639 = vmatprep.mubr.bf16.mxu0 %v11249_v13 }
 0x967   :  { %3609 = vmatprep.subr.bf16.mxu0 %v10194_v47 }
 0x96a   :  { %3610 = vmatpush1.bf16.msra.mxu0 %v10200_v26 }
 0x96b   :  { %3611 = vmatprep.subr.bf16.mxu0 %v10204_v15 }
 0x96e   :  { %3612 = vmatpush1.bf16.msra.mxu0 %v10207_v10 }
 0x96f   :  { %3613 = vmatprep.subr.bf16.mxu0 %v10210_v18 }
 0x972   :  { %3614 = vmatpush1.bf16.msra.mxu0 %v10213_v55 }
 0x973   :  { %3615 = vmatprep.subr.bf16.mxu0 %v10216_v40 }
 0x976   :  { %3616 = vmatpush1.bf16.msra.mxu0 %v10219_v24 }
 0x977   :  { %3617 = vmatprep.subr.bf16.mxu0 %v10222_v33 }
 0x97a   :  { %3618 = vmatpush1.bf16.msra.mxu0 %v10225_v38 }
 0x97b   :  { %3619 = vmatprep.subr.bf16.mxu0 %v10228_v51 }
 0x97e   :  { %3620 = vmatpush1.bf16.msra.mxu0 %v10231_v46 }
 0x97f   :  { %3621 = vmatprep.subr.bf16.mxu0 %v10234_v43 }
 0x982   :  { %3622 = vmatpush1.bf16.msra.mxu0 %v10237_v45 }
 0x983   :  { %3760 = vmatprep.subr.bf16.mxu0 %v9919_v34 }
 0x985   :  { %3640 = vmatmul.mubr.bf16.vlgmr.msra.gmra.mrb[36].mxu0 %v11249_v13 }
 0x986   :  { %3761 = vmatpush1.bf16.msra.mxu0 %v9927_v2  ;;  %3792 = vmatprep.mubr.bf16.mxu0 %v11249_v13  ;;  %v11128_v2 = vsub.s32 4, %v9469_v1 }
 0x987   :  { %3762 = vmatprep.subr.bf16.mxu0 %v9936_v52  ;;  %v10264_v52 = vld [vmem:[%s11091_s8] sm:$0xff] }
 0x98a   :  { %3763 = vmatpush1.bf16.msra.mxu0 %v9944_v20  ;;  %v11134_v20 = vsub.s32 5, %v9469_v1 }
 0x98b   :  { %3764 = vmatprep.subr.bf16.mxu0 %v9950_v25  ;;  %v2280_v25 = vrot.slane %v10264_v52, %v9845_v54 }
 0x98e   :  { %3765 = vmatpush1.bf16.msra.mxu0 %v9958_v48  ;;  %v2296_v48 = vrot.slane %v10264_v52, %v11128_v2 }
 0x98f   :  { %3766 = vmatprep.subr.bf16.mxu0 %v9964_v50  ;;  %v2284_v50 = vrot.slane %v10264_v52, %v9857_v56 }
 0x992   :  { %3767 = vmatpush1.bf16.msra.mxu0 %v9970_v7  ;;  %v2300_v7 = vrot.slane %v10264_v52, %v11134_v20 }
 0x993   :  { %3768 = vmatprep.subr.bf16.mxu0 %v9976_v8 }
 0x996   :  { %3769 = vmatpush1.bf16.msra.mxu0 %v9982_v29 }
 0x997   :  { %3770 = vmatprep.subr.bf16.mxu0 %v9988_v3 }
 0x99a   :  { %3771 = vmatpush1.bf16.msra.mxu0 %v9994_v60 }
 0x99b   :  { %3772 = vmatprep.subr.bf16.mxu0 %v10000_v16 }
 0x99e   :  { %3773 = vmatpush1.bf16.msra.mxu0 %v10006_v21 }
 0x99f   :  { %3774 = vmatprep.subr.bf16.mxu0 %v10012_v28 }
 0x9a2   :  { %3775 = vmatpush1.bf16.msra.mxu0 %v10018_v32 }
 0x9a3   :  { %3866 = vmatprep.subr.bf16.mxu0 %v10187_v58 }
 0x9b8   :  { %v2991_v8 = vpop.f32.mrb[24].mxu0  ;;  %v3073_v29 = vpop.f32.mrb[48].mxu1 }
 0x9b9   :  { %v2992_v3 = vadd.f32 %v2991_v8, %v2280_v25  ;;  %v3074_v58 = vadd.f32 %v3073_v29, %v2296_v48  ;;  %v2993_v42 = vpop.f32.mrb[25].mxu0  ;;  %v3075_v32 = vpop.f32.mrb[49].mxu1 }
 0x9ba   :  { %v2994_v5 = vadd.f32 %v2993_v42, %v2284_v50  ;;  %v3076_v28 = vadd.f32 %v3075_v32, %v2300_v7  ;;  %v2995_v54 = vpop.f32.mrb[26].mxu0  ;;  %v3077_v31 = vpop.f32.mrb[50].mxu1  ;;  %v11140_v32 = vsub.s32 2, %v9469_v1 }
 0x9bb   :  { %3121 = vst [vmem:[#allocation2] sm:$0xff] %v2992_v3  ;;  %3125 = vst [vmem:[#allocation2 + $0x20] sm:$0xff] %v3074_v58  ;;  %v2996_v2 = vpop.f32.mrb[27].mxu0  ;;  %v3078_v21 = vpop.f32.mrb[51].mxu1  ;;  %v11139_v54 = vsub.s32 3, %v9469_v1 }
 0x9bc   :  { %3122 = vst [vmem:[#allocation2 + $0x8] sm:$0xff] %v2994_v5  ;;  %3126 = vst [vmem:[#allocation2 + $0x28] sm:$0xff] %v3076_v28  ;;  %v2288_v21 = vrot.slane %v10264_v52, %v11140_v32 }
 0x9c2   :  { %v3193_v60 = vld [vmem:[#allocation2] sm:$0x3] }
 0x9c3   :  { %v3194_v17 = vld [vmem:[#allocation2 + $0x8] sm:$0x3] }
 0x9d8   :  { %v3391_v56 = vpop.f32.mrb[52].mxu1 }
 0x9d9   :  { %v3393_v19 = vpop.f32.mrb[53].mxu1  ;;  %v3439_v48 = vadd.f32 %v3391_v56, %v3193_v60 }
 0x9da   :  { %v3395_v16 = vpop.f32.mrb[54].mxu1  ;;  %v3440_v25 = vadd.f32 %v3393_v19, %v3194_v17 }
 0x9db   :  { %v3396_v20 = vpop.f32.mrb[55].mxu1  ;;  %v7730_v29 = vmul.f32 -1.442695, %v3439_v48  ;;  %v2292_v16 = vrot.slane %v10264_v52, %v11139_v54 }
 0x9dc   :  { %v7731_v8 = vmul.f32 -1.442695, %v3440_v25 }
 0x9de   :  { %8685 = vpow2.f32 %v7731_v8 }
 0x9df   :  { %8687 = vpow2.f32 %v7730_v29 }
 0x9e8   :  { %v8686_v20 = vpop.eup %8685 }
 0x9e9   :  { %v8688_v50 = vpop.eup %8687  ;;  %v3714_v7 = vadd.f32 1.0, %v8686_v20 }
 0x9ea   :  { %v3708_v3 = vadd.f32 1.0, %v8688_v50 }
 0x9eb   :  { %8689 = vrcp.f32 %v3714_v7 }
 0x9ec   :  { %8691 = vrcp.f32 %v3708_v3 }
 0x9f8   :  { %v3032_v28 = vpop.f32.mrb[28].mxu0  ;;  %v3432_v31 = vpop.f32.mrb[56].mxu1 }
 0x9f9   :  { %v3033_v17 = vadd.f32 %v3032_v28, %v2288_v21  ;;  %v3034_v56 = vpop.f32.mrb[29].mxu0  ;;  %v3434_v60 = vpop.f32.mrb[57].mxu1 }
 0x9fa   :  { %v3035_v19 = vadd.f32 %v3034_v56, %v2292_v16  ;;  %v3036_v5 = vpop.f32.mrb[30].mxu0  ;;  %v3436_v42 = vpop.f32.mrb[58].mxu1 }
 0x9fb   :  { %3123 = vst [vmem:[#allocation2 + $0x10] sm:$0xff] %v3033_v17  ;;  %v3037_v58 = vpop.f32.mrb[31].mxu0  ;;  %v3437_v2 = vpop.f32.mrb[59].mxu1 }
 0x9fc   :  { %3124 = vst [vmem:[#allocation2 + $0x18] sm:$0xff] %v3035_v19  ;;  %v8690_v16 = vpop.eup %8689 }
 0x9fd   :  { %v8692_v28 = vpop.eup %8691  ;;  %v3724_v17 = vmul.f32 0.0, %v8690_v16 }
 0xa02   :  { %v3195_v25 = vld [vmem:[#allocation2 + $0x10] sm:$0x3] }
 0xa03   :  { %v3441_v48 = vadd.f32 %v3432_v31, %v3195_v25  ;;  %v3196_v8 = vld [vmem:[#allocation2 + $0x18] sm:$0x3] }
 0xa04   :  { %v3442_v29 = vadd.f32 %v3434_v60, %v3196_v8  ;;  %v11137_v8 = vsub.s32 7, %v9469_v1 }
 0xa05   :  { %8693 = vtanh.f32 %v3441_v48  ;;  %v11138_v48 = vsub.s32 6, %v9469_v1 }
 0xa06   :  { %v7732_v21 = vmul.f32 -1.442695, %v3442_v29 }
 0xa07   :  { %v2304_v29 = vrot.slane %v10264_v52, %v11138_v48 }
 0xa08   :  { %8695 = vpow2.f32 %v7732_v21  ;;  %v2308_v21 = vrot.slane %v10264_v52, %v11137_v8  ;;  %v11253_v52 = vld [vmem:[#allocation41_spill] sm:$0xff] }
 0xa0f   :  { %v8694_v56 = vpop.eup %8693 }
 0xa10   :  { %v3725_v5 = vmul.f32 %v8694_v56, %v8692_v28 }
 0xa12   :  { %v8696_v42 = vpop.eup %8695  ;;  %v10285_v58 = vadd.f32 %v3725_v5, %v3724_v17  ;;  %v11251_v17 = vld [vmem:[#allocation39_spill] sm:$0xff] }
 0xa13   :  { %v3721_v19 = vadd.f32 1.0, %v8696_v42 }
 0xa14   :  { %8697 = vtanh.f32 %v10285_v58 }
 0xa15   :  { %8699 = vrcp.f32 %v3721_v19  ;;  %v11252_v19 = vld [vmem:[#allocation40_spill] sm:$0xff] }
 0xa19   :  { %v10288_v2 = vpop.f32.mrb[60].mxu1 }
 0xa1a   :  { %v10290_v31 = vpop.f32.mrb[61].mxu1 }
 0xa1b   :  { %v3686_v60 = vpop.f32.mrb[62].mxu1 }
 0xa1c   :  { %v3687_v20 = vpop.f32.mrb[63].mxu1 }
 0xa1e   :  { %v8698_v50 = vpop.eup %8697 }
 0xa1f   :  { %v8700_v7 = vpop.eup %8699 }
 0xa20   :  { %v3728_v3 = vmul.f32 %v8700_v7, %v8698_v50 }
 0xa22   :  { %3753 = vst [vmem:[#allocation3] sm:$0x3] %v3728_v3  ;;  %v3759_v25 = vpack.c.bf16 %v3728_v3, %v3728_v3  ;;  %v3443_v3 = vld [vmem:[#allocation2 + $0x20] sm:$0xc0] }
 0xa24   :  { %3793 = vmatmul.mubr.bf16.vlgmr.msra.gmra.mrb[40].mxu0 %v3759_v25  ;;  %3834 = vmatmul.mubr.bf16.vlgmr.msra.gmra.mrb[64].mxu1 %v3759_v25 }
 0xa25   :  { %3867 = vmatpush1.bf16.msra.mxu0 %v10191_v61  ;;  %3908 = vmatpush1.bf16.msra.mxu1 %v10123_v23 }
 0xa26   :  { %3868 = vmatprep.subr.bf16.mxu0 %v10194_v47  ;;  %3909 = vmatprep.subr.bf16.mxu1 %v10125_v49 }
 0xa27   :  { %3898 = vmatprep.mubr.bf16.mxu0 %v11249_v13  ;;  %3939 = vmatprep.mubr.bf16.mxu1 %v11249_v13 }
 0xa29   :  { %3869 = vmatpush1.bf16.msra.mxu0 %v10200_v26  ;;  %3910 = vmatpush1.bf16.msra.mxu1 %v10131_v9 }
 0xa2a   :  { %3870 = vmatprep.subr.bf16.mxu0 %v10204_v15  ;;  %3911 = vmatprep.subr.bf16.mxu1 %v10134_v12 }
 0xa2d   :  { %3871 = vmatpush1.bf16.msra.mxu0 %v10207_v10  ;;  %3912 = vmatpush1.bf16.msra.mxu1 %v10138_v53 }
 0xa2e   :  { %3872 = vmatprep.subr.bf16.mxu0 %v10210_v18  ;;  %3913 = vmatprep.subr.bf16.mxu1 %v10141_v14 }
 0xa31   :  { %3873 = vmatpush1.bf16.msra.mxu0 %v10213_v55  ;;  %3914 = vmatpush1.bf16.msra.mxu1 %v10144_v6 }
 0xa32   :  { %3874 = vmatprep.subr.bf16.mxu0 %v10216_v40  ;;  %3915 = vmatprep.subr.bf16.mxu1 %v10147_v44 }
 0xa35   :  { %3875 = vmatpush1.bf16.msra.mxu0 %v10219_v24  ;;  %3916 = vmatpush1.bf16.msra.mxu1 %v10150_v57 }
 0xa36   :  { %3876 = vmatprep.subr.bf16.mxu0 %v10222_v33  ;;  %3917 = vmatprep.subr.bf16.mxu1 %v10153_v62 }
 0xa38   :  { %v3114_v16 = vpop.f32.mrb[32].mxu0 }
 0xa39   :  { %v3115_v28 = vadd.f32 %v3114_v16, %v2304_v29  ;;  %v3116_v56 = vpop.f32.mrb[33].mxu0  ;;  %3877 = vmatpush1.bf16.msra.mxu0 %v10225_v38  ;;  %3918 = vmatpush1.bf16.msra.mxu1 %v11251_v17  ;;  %v3444_v16 = vld [vmem:[#allocation2 + $0x28] sm:$0xc0] }
 0xa3a   :  { %v3117_v5 = vadd.f32 %v3116_v56, %v2308_v21  ;;  %v3118_v42 = vpop.f32.mrb[34].mxu0  ;;  %3878 = vmatprep.subr.bf16.mxu0 %v10228_v51  ;;  %3919 = vmatprep.subr.bf16.mxu1 %v11252_v19 }
 0xa3b   :  { %3127 = vst [vmem:[#allocation2 + $0x30] sm:$0xff] %v3115_v28  ;;  %v3119_v60 = vpop.f32.mrb[35].mxu0  ;;  %v3696_v42 = vrot.slane %v10290_v31, 2 }
 0xa3c   :  { %3128 = vst [vmem:[#allocation2 + $0x38] sm:$0xff] %v3117_v5 }
 0xa3d   :  { %3879 = vmatpush1.bf16.msra.mxu0 %v10231_v46  ;;  %3920 = vmatpush1.bf16.msra.mxu1 %v10162_v30 }
 0xa3e   :  { %3880 = vmatprep.subr.bf16.mxu0 %v10234_v43  ;;  %3921 = vmatprep.subr.bf16.mxu1 %v11253_v52 }
 0xa41   :  { %3881 = vmatpush1.bf16.msra.mxu0 %v10237_v45  ;;  %3922 = vmatpush1.bf16.msra.mxu1 %v10168_v0 }
 0xa42   :  { %4028 = vmatprep.subr.bf16.mxu0 %v9919_v34  ;;  %4069 = vmatprep.subr.bf16.mxu1 %v10024_v35  ;;  %v3695_v35 = vrot.slane %v10288_v2, 2  ;;  %v3445_v48 = vld [vmem:[#allocation2 + $0x30] sm:$0xc0] }
 0xa43   :  { %v3446_v8 = vld [vmem:[#allocation2 + $0x38] sm:$0xc0] }
 0xa44   :  { %v3704_v34 = vadd.f32 %v3696_v42, %v3446_v8  ;;  %v3703_v54 = vadd.f32 %v3695_v35, %v3445_v48  ;;  %v10342_v42 = vld [vmem:[%s11092_s9] ss:$16 sps:$4 sm:$0xff]  }
 0xa45   :  { %v11256_v35 = vld [vmem:[#allocation28_spill] sm:$0xff] }
 0xa58   :  { %v3641_v20 = vpop.f32.mrb[36].mxu0 }
 0xa59   :  { %v3693_v50 = vrot.slane %v3641_v20, 2  ;;  %v3643_v7 = vpop.f32.mrb[37].mxu0  ;;  %v7735_v20 = vmul.f32 -1.442695, %v3704_v34  ;;  %v10358_v34 = vld [vmem:[%s11092_s9 + $0x20] ss:$16 sps:$4 sm:$0xff]  }
 0xa5a   :  { %v3694_v25 = vrot.slane %v3643_v7, 2  ;;  %v3645_v29 = vpop.f32.mrb[38].mxu0 }
 0xa5b   :  { %v3701_v21 = vadd.f32 %v3693_v50, %v3443_v3  ;;  %v3646_v28 = vpop.f32.mrb[39].mxu0 }
 0xa5c   :  { %v3702_v56 = vadd.f32 %v3694_v25, %v3444_v16 }
 0xa5d   :  { %v7733_v5 = vmul.f32 -1.442695, %v3701_v21 }
 0xa5e   :  { %v7734_v60 = vmul.f32 -1.442695, %v3702_v56 }
 0xa5f   :  { %8701 = vpow2.f32 %v7733_v5 }
 0xa60   :  { %8703 = vpow2.f32 %v7734_v60  ;;  %v10349_v60 = vld [vmem:[%s11092_s9 + $0x24] ss:$16 sps:$4 sm:$0xff]  }
 0xa61   :  { %8705 = vpow2.f32 %v7735_v20  ;;  %v11258_v20 = vld [vmem:[#allocation29_spill] sm:$0xff] }
 0xa62   :  { %8707 = vtanh.f32 %v3703_v54 }
 0xa69   :  { %v8702_v32 = vpop.eup %8701 }
 0xa6a   :  { %v8704_v7 = vpop.eup %8703  ;;  %v3732_v50 = vadd.f32 1.0, %v8702_v32 }
 0xa6b   :  { %v3738_v3 = vadd.f32 1.0, %v8704_v7  ;;  %v8706_v25 = vpop.eup %8705  ;;  %v11259_v7 = vld [vmem:[#allocation34_spill] sm:$0xff] }
 0xa6c   :  { %8709 = vrcp.f32 %v3732_v50  ;;  %v8708_v31 = vpop.eup %8707  ;;  %v3745_v16 = vadd.f32 1.0, %v8706_v25  ;;  %v11260_v50 = vld [vmem:[#allocation30_spill] sm:$0xff]  ;;  %v11263_v25 = vld [vmem:[#allocation36_spill] sm:$0xff] }
 0xa6d   :  { %8711 = vrcp.f32 %v3738_v3  ;;  %v11262_v3 = vld [vmem:[#allocation31_spill] sm:$0xff] }
 0xa6e   :  { %8713 = vrcp.f32 %v3745_v16 }
 0xa76   :  { %v8710_v29 = vpop.eup %8709 }
 0xa77   :  { %v8712_v21 = vpop.eup %8711  ;;  %v3749_v28 = vmul.f32 %v8710_v29, %v8708_v31  ;;  %v11264_v31 = vld [vmem:[#allocation32_spill] sm:$0xff]  ;;  %v11265_v29 = vld [vmem:[#allocation37_spill] sm:$0xff] }
 0xa78   :  { %v3748_v8 = vmul.f32 0.0, %v8712_v21  ;;  %v8714_v2 = vpop.eup %8713  ;;  %v11267_v21 = vld [vmem:[#allocation38_spill] sm:$0xff] }
 0xa7a   :  { %v10336_v56 = vadd.f32 %v3749_v28, %v3748_v8 }
 0xa7c   :  { %8715 = vtanh.f32 %v10336_v56 }
 0xa86   :  { %v8716_v48 = vpop.eup %8715 }
 0xa87   :  { %v3752_v5 = vmul.f32 %v8716_v48, %v8714_v2 }
 0xa89   :  { %3754 = vst [vmem:[#allocation3 + $0x8] sm:$0xc0] %v3752_v5  ;;  %v3862_v32 = vpack.c.bf16 %v3752_v5, %v3752_v5  ;;  %v3755_v5 = vld [vmem:[#allocation2] sm:$0xc] }
 0xa8b   :  { %v3864_v54 = vrot.slane %v3862_v32, 3 }
 0xa8d   :  { %3899 = vmatmul.mubr.bf16.vlgmr.msra.gmra.mrb[44].mxu0 %v3864_v54  ;;  %3940 = vmatmul.mubr.bf16.vlgmr.msra.gmra.mrb[68].mxu1 %v3864_v54 }
 0xa8e   :  { %4029 = vmatpush1.bf16.msra.mxu0 %v10342_v42  ;;  %4070 = vmatpush1.bf16.msra.mxu1 %v10030_v39  ;;  %v10365_v39 = vld [vmem:[%s11092_s9 + $0x44] ss:$16 sps:$4 sm:$0xff]  }
 0xa8f   :  { %4030 = vmatprep.subr.bf16.mxu0 %v10349_v60  ;;  %4071 = vmatprep.subr.bf16.mxu1 %v10036_v41  ;;  %v10372_v41 = vld [vmem:[%s11092_s9 + $0x40] ss:$16 sps:$4 sm:$0xff]  }
 0xa90   :  { %4060 = vmatprep.mubr.bf16.mxu0 %v11249_v13  ;;  %4101 = vmatprep.mubr.bf16.mxu1 %v11249_v13 }
 0xa92   :  { %4031 = vmatpush1.bf16.msra.mxu0 %v10358_v34  ;;  %4072 = vmatpush1.bf16.msra.mxu1 %v10043_v22  ;;  %v10379_v22 = vld [vmem:[%s11092_s9 + $0x64] ss:$16 sps:$4 sm:$0xff]  }
 0xa93   :  { %4032 = vmatprep.subr.bf16.mxu0 %v10365_v39  ;;  %4073 = vmatprep.subr.bf16.mxu1 %v10049_v36  ;;  %v10386_v36 = vld [vmem:[%s11092_s9 + $0x60] ss:$16 sps:$4 sm:$0xff]  }
 0xa96   :  { %4033 = vmatpush1.bf16.msra.mxu0 %v10372_v41  ;;  %4074 = vmatpush1.bf16.msra.mxu1 %v10056_v59  ;;  %v10393_v59 = vld [vmem:[%s11092_s9 + $0x84] ss:$16 sps:$4 sm:$0xff]  }
 0xa97   :  { %4034 = vmatprep.subr.bf16.mxu0 %v10379_v22  ;;  %4075 = vmatprep.subr.bf16.mxu1 %v10062_v37  ;;  %v10400_v37 = vld [vmem:[%s11092_s9 + $0x80] ss:$16 sps:$4 sm:$0xff]  }
 0xa98   :  { %11254 = vst [vmem:[#allocation39_spill] sm:$0xff] %v10400_v37 }
 0xa9a   :  { %4035 = vmatpush1.bf16.msra.mxu0 %v10386_v36  ;;  %4076 = vmatpush1.bf16.msra.mxu1 %v10068_v63  ;;  %v10407_v63 = vld [vmem:[%s11092_s9 + $0xa4] ss:$16 sps:$4 sm:$0xff]  }
 0xa9b   :  { %4036 = vmatprep.subr.bf16.mxu0 %v10393_v59  ;;  %4077 = vmatprep.subr.bf16.mxu1 %v10074_v4  ;;  %11255 = vst [vmem:[#allocation40_spill] sm:$0xff] %v10407_v63  ;;  %v11257_v4 = vld [vmem:[#allocation33_spill] sm:$0xff] }
 0xa9e   :  { %4037 = vmatpush1.bf16.msra.mxu0 %v10400_v37  ;;  %4078 = vmatpush1.bf16.msra.mxu1 %v10080_v27  ;;  %v11261_v27 = vld [vmem:[#allocation35_spill] sm:$0xff] }
 0xa9f   :  { %4038 = vmatprep.subr.bf16.mxu0 %v10407_v63  ;;  %4079 = vmatprep.subr.bf16.mxu1 %v10086_v11  ;;  %v11266_v11 = vld [vmem:[#allocation42_spill] sm:$0xff] }
 0xaa2   :  { %4039 = vmatpush1.bf16.msra.mxu0 %v11256_v35  ;;  %4080 = vmatpush1.bf16.msra.mxu1 %v11257_v4 }
 0xaa3   :  { %4040 = vmatprep.subr.bf16.mxu0 %v11258_v20  ;;  %4081 = vmatprep.subr.bf16.mxu1 %v11259_v7  ;;  %v3756_v20 = vld [vmem:[#allocation2 + $0x8] sm:$0xc] }
 0xaa6   :  { %4041 = vmatpush1.bf16.msra.mxu0 %v11260_v50  ;;  %4082 = vmatpush1.bf16.msra.mxu1 %v11261_v27 }
 0xaa7   :  { %4042 = vmatprep.subr.bf16.mxu0 %v11262_v3  ;;  %4083 = vmatprep.subr.bf16.mxu1 %v11263_v25 }
 0xaaa   :  { %4043 = vmatpush1.bf16.msra.mxu0 %v11264_v31  ;;  %4084 = vmatpush1.bf16.msra.mxu1 %v11265_v29  ;;  %v3758_v29 = vld [vmem:[#allocation2 + $0x18] sm:$0xc] }
 0xaab   :  { %4134 = vmatprep.subr.bf16.mxu0 %v11266_v11  ;;  %4175 = vmatprep.subr.bf16.mxu1 %v11267_v21 }
 0xaf7   :  { %v3794_v16 = vpop.f32.mrb[40].mxu0  ;;  %v3835_v28 = vpop.f32.mrb[64].mxu1 }
 0xaf8   :  { %v3846_v8 = vrot.slane %v3794_v16, 6  ;;  %v3796_v2 = vpop.f32.mrb[41].mxu0  ;;  %v3837_v48 = vpop.f32.mrb[65].mxu1  ;;  %v3848_v1 = vrot.slane %v3835_v28, 6  ;;  %v3757_v16 = vld [vmem:[#allocation2 + $0x10] sm:$0xc] }
 0xaf9   :  { %v3847_v32 = vrot.slane %v3796_v2, 6  ;;  %v3798_v54 = vpop.f32.mrb[42].mxu0  ;;  %v3839_v35 = vpop.f32.mrb[66].mxu1  ;;  %v3849_v31 = vrot.slane %v3837_v48, 6  ;;  %v3984_v48 = vrot.slane %v10285_v58, 6 }
 0xafa   :  { %v3854_v4 = vadd.f32 %v3846_v8, %v3755_v5  ;;  %v3799_v7 = vpop.f32.mrb[43].mxu0  ;;  %v3840_v50 = vpop.f32.mrb[67].mxu1  ;;  %v3856_v63 = vadd.f32 %v3848_v1, %v3757_v16  ;;  %v3859_v58 = vld [vmem:[#allocation2 + $0x28] sm:$0x30] }
 0xafb   :  { %v3855_v27 = vadd.f32 %v3847_v32, %v3756_v20  ;;  %v3857_v21 = vadd.f32 %v3849_v31, %v3758_v29  ;;  %v3861_v29 = vld [vmem:[#allocation2 + $0x38] sm:$0x30] }
 0xafc   :  { %v7736_v3 = vmul.f32 -1.442695, %v3854_v4 }
 0xafd   :  { %v7737_v25 = vmul.f32 -1.442695, %v3855_v27  ;;  %v7738_v11 = vmul.f32 -1.442695, %v3857_v21 }
 0xafe   :  { %8717 = vpow2.f32 %v7736_v3 }
 0xaff   :  { %8719 = vpow2.f32 %v7737_v25 }
 0xb00   :  { %8721 = vpow2.f32 %v7738_v11 }
 0xb01   :  { %8723 = vtanh.f32 %v3856_v63 }
 0xb08   :  { %v8718_v37 = vpop.eup %8717 }
 0xb09   :  { %v8720_v2 = vpop.eup %8719  ;;  %v3967_v54 = vadd.f32 1.0, %v8718_v37 }
 0xb0a   :  { %v3973_v8 = vadd.f32 1.0, %v8720_v2  ;;  %v8722_v5 = vpop.eup %8721  ;;  %v3860_v2 = vld [vmem:[#allocation2 + $0x30] sm:$0x30] }
 0xb0b   :  { %8725 = vrcp.f32 %v3967_v54  ;;  %v8724_v32 = vpop.eup %8723  ;;  %v3980_v7 = vadd.f32 1.0, %v8722_v5 }
 0xb0c   :  { %8727 = vrcp.f32 %v3973_v8 }
 0xb0d   :  { %8729 = vrcp.f32 %v3980_v7 }
 0xb15   :  { %v8726_v35 = vpop.eup %8725 }
 0xb16   :  { %v8728_v4 = vpop.eup %8727  ;;  %v3987_v20 = vmul.f32 %v8726_v35, %v8724_v32 }
 0xb17   :  { %v3986_v28 = vmul.f32 %v8728_v4, %v3984_v48  ;;  %v8730_v1 = vpop.eup %8729 }
 0xb19   :  { %v10424_v50 = vadd.f32 %v3987_v20, %v3986_v28  ;;  %v4011_v28 = vrot.slane %v10336_v56, 2  ;;  %v8953_v56 = vld [vmem:[%s11092_s9 + $0x8] ss:$16 sps:$4 sm:$0xff]  }
 0xb1b   :  { %8731 = vtanh.f32 %v10424_v50 }
 0xb25   :  { %v8732_v37 = vpop.eup %8731 }
 0xb26   :  { %v3990_v63 = vmul.f32 %v8732_v37, %v8730_v1 }
 0xb28   :  { %4018 = vst [vmem:[#allocation3] sm:$0xc] %v3990_v63  ;;  %v4024_v11 = vpack.c.bf16 %v3990_v63, %v3990_v63 }
 0xb2a   :  { %v4026_v27 = vrot.slane %v4024_v11, 1 }
 0xb2c   :  { %4061 = vmatmul.mubr.bf16.vlgmr.msra.gmra.mrb[48].mxu0 %v4026_v27  ;;  %4102 = vmatmul.mubr.bf16.vlgmr.msra.gmra.mrb[72].mxu1 %v4026_v27 }
 0xb2d   :  { %4135 = vmatpush1.bf16.msra.mxu0 %v10191_v61  ;;  %4176 = vmatpush1.bf16.msra.mxu1 %v10123_v23  ;;  %v8951_v23 = vld [vmem:[%s11092_s9 + $0x4] ss:$16 sps:$4 sm:$0xff]  }
 0xb2e   :  { %4136 = vmatprep.subr.bf16.mxu0 %v10194_v47  ;;  %4177 = vmatprep.subr.bf16.mxu1 %v10125_v49  ;;  %v8952_v49 = vld [vmem:[%s11092_s9 + $0xc] ss:$16 sps:$4 sm:$0xff]  }
 0xb2f   :  { %4166 = vmatprep.mubr.bf16.mxu0 %v11249_v13  ;;  %4207 = vmatprep.mubr.bf16.mxu1 %v11249_v13 }
 0xb31   :  { %4137 = vmatpush1.bf16.msra.mxu0 %v10200_v26  ;;  %4178 = vmatpush1.bf16.msra.mxu1 %v10131_v9 }
 0xb32   :  { %4138 = vmatprep.subr.bf16.mxu0 %v10204_v15  ;;  %4179 = vmatprep.subr.bf16.mxu1 %v10134_v12 }
 0xb35   :  { %4139 = vmatpush1.bf16.msra.mxu0 %v10207_v10  ;;  %4180 = vmatpush1.bf16.msra.mxu1 %v10138_v53 }
 0xb36   :  { %4140 = vmatprep.subr.bf16.mxu0 %v10210_v18  ;;  %4181 = vmatprep.subr.bf16.mxu1 %v10141_v14 }
 0xb39   :  { %4141 = vmatpush1.bf16.msra.mxu0 %v10213_v55  ;;  %4182 = vmatpush1.bf16.msra.mxu1 %v10144_v6 }
 0xb3a   :  { %4142 = vmatprep.subr.bf16.mxu0 %v10216_v40  ;;  %4183 = vmatprep.subr.bf16.mxu1 %v10147_v44  ;;  %v3858_v44 = vld [vmem:[#allocation2 + $0x20] sm:$0x30] }
 0xb3d   :  { %4143 = vmatpush1.bf16.msra.mxu0 %v10219_v24  ;;  %4184 = vmatpush1.bf16.msra.mxu1 %v10150_v57 }
 0xb3e   :  { %4144 = vmatprep.subr.bf16.mxu0 %v10222_v33  ;;  %4185 = vmatprep.subr.bf16.mxu1 %v10153_v62 }
 0xb41   :  { %4145 = vmatpush1.bf16.msra.mxu0 %v10225_v38  ;;  %4186 = vmatpush1.bf16.msra.mxu1 %v11251_v17 }
 0xb42   :  { %4146 = vmatprep.subr.bf16.mxu0 %v10228_v51  ;;  %4187 = vmatprep.subr.bf16.mxu1 %v11252_v19 }
 0xb45   :  { %4147 = vmatpush1.bf16.msra.mxu0 %v10231_v46  ;;  %4188 = vmatpush1.bf16.msra.mxu1 %v10162_v30 }
 0xb46   :  { %4148 = vmatprep.subr.bf16.mxu0 %v10234_v43  ;;  %4189 = vmatprep.subr.bf16.mxu1 %v11253_v52 }
 0xb49   :  { %4149 = vmatpush1.bf16.msra.mxu0 %v10237_v45  ;;  %4190 = vmatpush1.bf16.msra.mxu1 %v10168_v0 }
 0xb4a   :  { %4296 = vmatprep.subr.bf16.mxu0 %v8951_v23  ;;  %4337 = vmatprep.subr.bf16.mxu1 %v8952_v49 }
 0xb60   :  { %v3900_v9 = vpop.f32.mrb[44].mxu0  ;;  %v3941_v12 = vpop.f32.mrb[68].mxu1 }
 0xb61   :  { %v3952_v53 = vrot.slane %v3900_v9, 4  ;;  %v3902_v14 = vpop.f32.mrb[45].mxu0  ;;  %v3943_v6 = vpop.f32.mrb[69].mxu1  ;;  %v3954_v16 = vrot.slane %v3941_v12, 4 }
 0xb62   :  { %v3953_v57 = vrot.slane %v3902_v14, 4  ;;  %v3904_v62 = vpop.f32.mrb[46].mxu0  ;;  %v3945_v30 = vpop.f32.mrb[70].mxu1  ;;  %v3955_v31 = vrot.slane %v3943_v6, 4  ;;  %v8954_v14 = vld [vmem:[%s11092_s9 + $0x2c] ss:$16 sps:$4 sm:$0xff]  }
 0xb63   :  { %v3960_v0 = vadd.f32 %v3952_v53, %v3858_v44  ;;  %v3905_v17 = vpop.f32.mrb[47].mxu0  ;;  %v3946_v19 = vpop.f32.mrb[71].mxu1  ;;  %v3962_v8 = vadd.f32 %v3954_v16, %v3860_v2  ;;  %v8957_v6 = vld [vmem:[%s11092_s9 + $0x48] ss:$16 sps:$4 sm:$0xff]   ;;  %v8965_v30 = vld [vmem:[%s11092_s9 + $0xc4] ss:$16 sps:$4 sm:$0xff]  }
 0xb64   :  { %v3961_v52 = vadd.f32 %v3953_v57, %v3859_v58  ;;  %v3963_v21 = vadd.f32 %v3955_v31, %v3861_v29  ;;  %v8961_v44 = vld [vmem:[%s11092_s9 + $0x88] ss:$16 sps:$4 sm:$0xff]   ;;  %v8962_v57 = vld [vmem:[%s11092_s9 + $0xac] ss:$16 sps:$4 sm:$0xff]   ;;  %v8967_v58 = vld [vmem:[%s11092_s9 + $0xc0] ss:$16 sps:$4 sm:$0xff]  }
 0xb65   :  { %v7739_v3 = vmul.f32 -1.442695, %v3960_v0  ;;  %v8964_v62 = vld [vmem:[%s11092_s9 + $0xa8] ss:$16 sps:$4 sm:$0xff]   ;;  %v8966_v0 = vld [vmem:[%s11092_s9 + $0xcc] ss:$16 sps:$4 sm:$0xff]  }
 0xb66   :  { %v7740_v25 = vmul.f32 -1.442695, %v3961_v52  ;;  %v7741_v54 = vmul.f32 -1.442695, %v3963_v21  ;;  %v8968_v17 = vld [vmem:[%s11092_s9 + $0xc8] ss:$16 sps:$4 sm:$0xff]  }
 0xb67   :  { %8733 = vpow2.f32 %v7739_v3  ;;  %v8969_v19 = vld [vmem:[%s11092_s9 + $0xe4] ss:$16 sps:$4 sm:$0xff]   ;;  %v8970_v52 = vld [vmem:[%s11092_s9 + $0xec] ss:$16 sps:$4 sm:$0xff]   ;;  %v8971_v3 = vld [vmem:[%s11092_s9 + $0xe0] ss:$16 sps:$4 sm:$0xff]  }
 0xb68   :  { %8735 = vpow2.f32 %v7740_v25  ;;  %v8972_v25 = vld [vmem:[%s11092_s9 + $0xe8] ss:$16 sps:$4 sm:$0xff]   ;;  %v8973_v29 = vld [vmem:[#allocation10 + $0xc] ss:$16 sps:$4 sm:$0xff]  }
 0xb69   :  { %8737 = vpow2.f32 %v7741_v54  ;;  %v11270_v31 = vld [vmem:[#allocation42_spill] sm:$0xff] }
 0xb6a   :  { %8739 = vtanh.f32 %v3962_v8 }
 0xb71   :  { %v8734_v5 = vpop.eup %8733 }
 0xb72   :  { %v8736_v32 = vpop.eup %8735  ;;  %v3994_v35 = vadd.f32 1.0, %v8734_v5  ;;  %v4020_v5 = vld [vmem:[#allocation2] sm:$0x30] }
 0xb73   :  { %v4000_v48 = vadd.f32 1.0, %v8736_v32  ;;  %v8738_v4 = vpop.eup %8737 }
 0xb74   :  { %8741 = vrcp.f32 %v3994_v35  ;;  %v8740_v20 = vpop.eup %8739  ;;  %v4007_v63 = vadd.f32 1.0, %v8738_v4 }
 0xb75   :  { %8743 = vrcp.f32 %v4000_v48 }
 0xb76   :  { %8745 = vrcp.f32 %v4007_v63 }
 0xb7e   :  { %v8742_v7 = vpop.eup %8741 }
 0xb7f   :  { %v8744_v1 = vpop.eup %8743  ;;  %v4014_v37 = vmul.f32 %v8742_v7, %v8740_v20  ;;  %v4021_v20 = vld [vmem:[#allocation2 + $0x8] sm:$0x30] }
 0xb80   :  { %v4013_v11 = vmul.f32 %v8744_v1, %v4011_v28  ;;  %v8746_v23 = vpop.eup %8745 }
 0xb82   :  { %v10466_v27 = vadd.f32 %v4014_v37, %v4013_v11 }
 0xb84   :  { %8747 = vtanh.f32 %v10466_v27 }
 0xb8e   :  { %v8748_v49 = vpop.eup %8747 }
 0xb8f   :  { %v4017_v9 = vmul.f32 %v8748_v49, %v8746_v23  ;;  %v4023_v23 = vld [vmem:[#allocation2 + $0x18] sm:$0x30] }
 0xb91   :  { %4019 = vst [vmem:[#allocation3 + $0x8] sm:$0x30] %v4017_v9  ;;  %v4130_v12 = vpack.c.bf16 %v4017_v9, %v4017_v9 }
 0xb93   :  { %v4132_v53 = vrot.slane %v4130_v12, 2  ;;  %v4022_v12 = vld [vmem:[#allocation2 + $0x10] sm:$0x30] }
 0xb95   :  { %4167 = vmatmul.mubr.bf16.vlgmr.msra.gmra.mrb[52].mxu0 %v4132_v53  ;;  %4208 = vmatmul.mubr.bf16.vlgmr.msra.gmra.mrb[76].mxu1 %v4132_v53 }
 0xb96   :  { %4297 = vmatpush1.bf16.msra.mxu0 %v10342_v42  ;;  %4338 = vmatpush1.bf16.msra.mxu1 %v8953_v56  ;;  %v8955_v42 = vld [vmem:[%s11092_s9 + $0x28] ss:$16 sps:$4 sm:$0xff]  }
 0xb97   :  { %4298 = vmatprep.subr.bf16.mxu0 %v10349_v60  ;;  %4339 = vmatprep.subr.bf16.mxu1 %v8954_v14  ;;  %v8956_v60 = vld [vmem:[%s11092_s9 + $0x4c] ss:$16 sps:$4 sm:$0xff]  }
 0xb98   :  { %4328 = vmatprep.mubr.bf16.mxu0 %v11249_v13  ;;  %4369 = vmatprep.mubr.bf16.mxu1 %v11249_v13 }
 0xb9a   :  { %4299 = vmatpush1.bf16.msra.mxu0 %v10358_v34  ;;  %4340 = vmatpush1.bf16.msra.mxu1 %v8955_v42  ;;  %v8958_v34 = vld [vmem:[%s11092_s9 + $0x6c] ss:$16 sps:$4 sm:$0xff]  }
 0xb9b   :  { %4300 = vmatprep.subr.bf16.mxu0 %v10365_v39  ;;  %4341 = vmatprep.subr.bf16.mxu1 %v8956_v60  ;;  %v8959_v39 = vld [vmem:[%s11092_s9 + $0x68] ss:$16 sps:$4 sm:$0xff]  }
 0xb9e   :  { %4301 = vmatpush1.bf16.msra.mxu0 %v10372_v41  ;;  %4342 = vmatpush1.bf16.msra.mxu1 %v8957_v6  ;;  %v8960_v41 = vld [vmem:[%s11092_s9 + $0x8c] ss:$16 sps:$4 sm:$0xff]  }
 0xb9f   :  { %4302 = vmatprep.subr.bf16.mxu0 %v10379_v22  ;;  %4343 = vmatprep.subr.bf16.mxu1 %v8958_v34  ;;  %v11268_v22 = vld [vmem:[#allocation39_spill] sm:$0xff] }
 0xba2   :  { %4303 = vmatpush1.bf16.msra.mxu0 %v10386_v36  ;;  %4344 = vmatpush1.bf16.msra.mxu1 %v8959_v39  ;;  %v11269_v36 = vld [vmem:[#allocation40_spill] sm:$0xff] }
 0xba3   :  { %4304 = vmatprep.subr.bf16.mxu0 %v10393_v59  ;;  %4345 = vmatprep.subr.bf16.mxu1 %v8960_v41  ;;  %v8963_v59 = vld [vmem:[%s11092_s9 + $0xa0] ss:$16 sps:$4 sm:$0xff]  }
 0xba6   :  { %4305 = vmatpush1.bf16.msra.mxu0 %v11268_v22  ;;  %4346 = vmatpush1.bf16.msra.mxu1 %v8961_v44  ;;  %v4252_v22 = vrot.slane %v10424_v50, 6  ;;  %v8974_v50 = vld [vmem:[#allocation10 + $0x8] ss:$16 sps:$4 sm:$0xff]  }
 0xba7   :  { %4306 = vmatprep.subr.bf16.mxu0 %v11269_v36  ;;  %4347 = vmatprep.subr.bf16.mxu1 %v8962_v57 }
 0xbaa   :  { %4307 = vmatpush1.bf16.msra.mxu0 %v8963_v59  ;;  %4348 = vmatpush1.bf16.msra.mxu1 %v8964_v62 }
 0xbab   :  { %4308 = vmatprep.subr.bf16.mxu0 %v8965_v30  ;;  %4349 = vmatprep.subr.bf16.mxu1 %v8966_v0 }
 0xbae   :  { %4309 = vmatpush1.bf16.msra.mxu0 %v8967_v58  ;;  %4350 = vmatpush1.bf16.msra.mxu1 %v8968_v17 }
 0xbaf   :  { %4310 = vmatprep.subr.bf16.mxu0 %v8969_v19  ;;  %4351 = vmatprep.subr.bf16.mxu1 %v8970_v52  ;;  %v8975_v52 = vld [vmem:[#allocation10 + $0x2c] ss:$16 sps:$4 sm:$0xff]  }
 0xbb2   :  { %4311 = vmatpush1.bf16.msra.mxu0 %v8971_v3  ;;  %4352 = vmatpush1.bf16.msra.mxu1 %v8972_v25  ;;  %v8976_v3 = vld [vmem:[#allocation10 + $0x28] ss:$16 sps:$4 sm:$0xff]   ;;  %v8977_v25 = vld [vmem:[#allocation10 + $0x4c] ss:$16 sps:$4 sm:$0xff]  }
 0xbb3   :  { %4402 = vmatprep.subr.bf16.mxu0 %v11270_v31  ;;  %4443 = vmatprep.subr.bf16.mxu1 %v8973_v29  ;;  %v8980_v31 = vld [vmem:[#allocation10 + $0x68] ss:$16 sps:$4 sm:$0xff]  }
 0xbff   :  { %v4062_v21 = vpop.f32.mrb[48].mxu0  ;;  %v4103_v16 = vpop.f32.mrb[72].mxu1 }
 0xc00   :  { %v4114_v2 = vrot.slane %v4062_v21, 4  ;;  %v4064_v54 = vpop.f32.mrb[49].mxu0  ;;  %v4105_v8 = vpop.f32.mrb[73].mxu1  ;;  %v4116_v9 = vrot.slane %v4103_v16, 4 }
 0xc01   :  { %v4115_v32 = vrot.slane %v4064_v54, 4  ;;  %v4066_v35 = vpop.f32.mrb[50].mxu0  ;;  %v4107_v48 = vpop.f32.mrb[74].mxu1  ;;  %v4117_v11 = vrot.slane %v4105_v8, 4 }
 0xc02   :  { %v4122_v4 = vadd.f32 %v4114_v2, %v4020_v5  ;;  %v4067_v7 = vpop.f32.mrb[51].mxu0  ;;  %v4108_v28 = vpop.f32.mrb[75].mxu1  ;;  %v4124_v56 = vadd.f32 %v4116_v9, %v4022_v12 }
 0xc03   :  { %v4123_v1 = vadd.f32 %v4115_v32, %v4021_v20  ;;  %v4125_v49 = vadd.f32 %v4117_v11, %v4023_v23  ;;  %v4127_v32 = vld [vmem:[#allocation2 + $0x28] sm:$0xc] }
 0xc04   :  { %v7742_v37 = vmul.f32 -1.442695, %v4122_v4 }
 0xc05   :  { %v7743_v63 = vmul.f32 -1.442695, %v4123_v1  ;;  %v7744_v53 = vmul.f32 -1.442695, %v4125_v49 }
 0xc06   :  { %8749 = vpow2.f32 %v7742_v37  ;;  %v4128_v37 = vld [vmem:[#allocation2 + $0x30] sm:$0xc] }
 0xc07   :  { %8751 = vpow2.f32 %v7743_v63 }
 0xc08   :  { %8753 = vpow2.f32 %v7744_v53 }
 0xc09   :  { %8755 = vtanh.f32 %v4124_v56 }
 0xc10   :  { %v8750_v14 = vpop.eup %8749 }
 0xc11   :  { %v8752_v42 = vpop.eup %8751  ;;  %v4235_v60 = vadd.f32 1.0, %v8750_v14 }
 0xc12   :  { %v4241_v6 = vadd.f32 1.0, %v8752_v42  ;;  %v8754_v34 = vpop.eup %8753  ;;  %v4279_v42 = vrot.slane %v10466_v27, 2  ;;  %v4549_v27 = vld [vmem:[#allocation12 + $0x8] sm:$0xff] }
 0xc13   :  { %8757 = vrcp.f32 %v4235_v60  ;;  %v8756_v39 = vpop.eup %8755  ;;  %v4248_v57 = vadd.f32 1.0, %v8754_v34 }
 0xc14   :  { %8759 = vrcp.f32 %v4241_v6 }
 0xc15   :  { %8761 = vrcp.f32 %v4248_v57 }
 0xc1d   :  { %v8758_v41 = vpop.eup %8757 }
 0xc1e   :  { %v8760_v44 = vpop.eup %8759  ;;  %v4255_v36 = vmul.f32 %v8758_v41, %v8756_v39 }
 0xc1f   :  { %v4254_v59 = vmul.f32 %v8760_v44, %v4252_v22  ;;  %v8762_v30 = vpop.eup %8761 }
 0xc21   :  { %v10543_v62 = vadd.f32 %v4255_v36, %v4254_v59 }
 0xc23   :  { %8763 = vtanh.f32 %v10543_v62 }
 0xc2d   :  { %v8764_v0 = vpop.eup %8763 }
 0xc2e   :  { %v4258_v58 = vmul.f32 %v8764_v0, %v8762_v30  ;;  %v4548_v30 = vld [vmem:[#allocation12] sm:$0xff] }
 0xc2f   :  { %v4552_v0 = vld [vmem:[#allocation12 + $0x20] sm:$0xff] }
 0xc30   :  { %4286 = vst [vmem:[#allocation3] sm:$0x30] %v4258_v58  ;;  %v4292_v17 = vpack.c.bf16 %v4258_v58, %v4258_v58  ;;  %v7754_v58 = vcombine.low %v4548_v30, %v4552_v0 }
 0xc32   :  { %v4294_v19 = vrot.slane %v4292_v17, 2  ;;  %v7755_v17 = vcombine.high %v4548_v30, %v4552_v0 }
 0xc34   :  { %4329 = vmatmul.mubr.bf16.vlgmr.msra.gmra.mrb[56].mxu0 %v4294_v19  ;;  %4370 = vmatmul.mubr.bf16.vlgmr.msra.gmra.mrb[80].mxu1 %v4294_v19  ;;  %v4553_v19 = vld [vmem:[#allocation12 + $0x28] sm:$0xff] }
 0xc35   :  { %4403 = vmatpush1.bf16.msra.mxu0 %v10191_v61  ;;  %4444 = vmatpush1.bf16.msra.mxu1 %v8974_v50  ;;  %v8978_v61 = vld [vmem:[#allocation10 + $0x48] ss:$16 sps:$4 sm:$0xff]   ;;  %v4556_v50 = vld [vmem:[#allocation12 + $0x40] sm:$0xff] }
 0xc36   :  { %4404 = vmatprep.subr.bf16.mxu0 %v10194_v47  ;;  %4445 = vmatprep.subr.bf16.mxu1 %v8975_v52  ;;  %v8979_v47 = vld [vmem:[#allocation10 + $0x6c] ss:$16 sps:$4 sm:$0xff]   ;;  %v4560_v52 = vld [vmem:[#allocation12 + $0x60] sm:$0xff] }
 0xc37   :  { %4434 = vmatprep.mubr.bf16.mxu0 %v11249_v13  ;;  %4475 = vmatprep.mubr.bf16.mxu1 %v11249_v13 }
 0xc39   :  { %4405 = vmatpush1.bf16.msra.mxu0 %v10200_v26  ;;  %4446 = vmatpush1.bf16.msra.mxu1 %v8976_v3  ;;  %v8981_v26 = vld [vmem:[#allocation10 + $0x8c] ss:$16 sps:$4 sm:$0xff]   ;;  %v7756_v3 = vcombine.low %v4549_v27, %v4553_v19 }
 0xc3a   :  { %4406 = vmatprep.subr.bf16.mxu0 %v10204_v15  ;;  %4447 = vmatprep.subr.bf16.mxu1 %v8977_v25  ;;  %v8982_v15 = vld [vmem:[#allocation10 + $0x88] ss:$16 sps:$4 sm:$0xff]   ;;  %v7757_v25 = vcombine.high %v4549_v27, %v4553_v19  ;;  %v4288_v19 = vld [vmem:[#allocation2] sm:$0xc0] }
 0xc3d   :  { %4407 = vmatpush1.bf16.msra.mxu0 %v10207_v10  ;;  %4448 = vmatpush1.bf16.msra.mxu1 %v8978_v61  ;;  %v8983_v10 = vld [vmem:[#allocation10 + $0xac] ss:$16 sps:$4 sm:$0xff]   ;;  %v7763_v61 = vcombine.high %v4556_v50, %v4560_v52 }
 0xc3e   :  { %4408 = vmatprep.subr.bf16.mxu0 %v10210_v18  ;;  %4449 = vmatprep.subr.bf16.mxu1 %v8979_v47  ;;  %v8984_v18 = vld [vmem:[#allocation10 + $0xa8] ss:$16 sps:$4 sm:$0xff]  }
 0xc3f   :  { %v4557_v47 = vld [vmem:[#allocation12 + $0x48] sm:$0xff] }
 0xc41   :  { %4409 = vmatpush1.bf16.msra.mxu0 %v10213_v55  ;;  %4450 = vmatpush1.bf16.msra.mxu1 %v8980_v31  ;;  %v8985_v55 = vld [vmem:[#allocation10 + $0xcc] ss:$16 sps:$4 sm:$0xff]  }
 0xc42   :  { %4410 = vmatprep.subr.bf16.mxu0 %v10216_v40  ;;  %4451 = vmatprep.subr.bf16.mxu1 %v8981_v26  ;;  %v8986_v40 = vld [vmem:[#allocation10 + $0xc8] ss:$16 sps:$4 sm:$0xff]  }
 0xc43   :  { %v4561_v31 = vld [vmem:[#allocation12 + $0x68] sm:$0xff] }
 0xc44   :  { %v7765_v26 = vcombine.high %v4557_v47, %v4561_v31 }
 0xc45   :  { %4411 = vmatpush1.bf16.msra.mxu0 %v10219_v24  ;;  %4452 = vmatpush1.bf16.msra.mxu1 %v8982_v15  ;;  %v8987_v24 = vld [vmem:[#allocation10 + $0xec] ss:$16 sps:$4 sm:$0xff]   ;;  %v7762_v15 = vcombine.low %v4556_v50, %v4560_v52 }
 0xc46   :  { %4412 = vmatprep.subr.bf16.mxu0 %v10222_v33  ;;  %4453 = vmatprep.subr.bf16.mxu1 %v8983_v10  ;;  %v8988_v33 = vld [vmem:[#allocation10 + $0xe8] ss:$16 sps:$4 sm:$0xff]   ;;  %v7764_v10 = vcombine.low %v4557_v47, %v4561_v31  ;;  %v4612_v31 = vld [vmem:[#allocation12 + $0x200] sm:$0xff] }
 0xc49   :  { %4413 = vmatpush1.bf16.msra.mxu0 %v10225_v38  ;;  %4454 = vmatpush1.bf16.msra.mxu1 %v8984_v18  ;;  %v4564_v18 = vld [vmem:[#allocation12 + $0x80] sm:$0xff] }
 0xc4a   :  { %4414 = vmatprep.subr.bf16.mxu0 %v10228_v51  ;;  %4455 = vmatprep.subr.bf16.mxu1 %v8985_v55  ;;  %v4126_v51 = vld [vmem:[#allocation2 + $0x20] sm:$0xc]  ;;  %v4568_v55 = vld [vmem:[#allocation12 + $0xa0] sm:$0xff] }
 0xc4d   :  { %4415 = vmatpush1.bf16.msra.mxu0 %v10231_v46  ;;  %4456 = vmatpush1.bf16.msra.mxu1 %v8986_v40  ;;  %v4565_v40 = vld [vmem:[#allocation12 + $0x88] sm:$0xff] }
 0xc4e   :  { %4416 = vmatprep.subr.bf16.mxu0 %v10234_v43  ;;  %4457 = vmatprep.subr.bf16.mxu1 %v8987_v24  ;;  %v7771_v24 = vcombine.high %v4564_v18, %v4568_v55 }
 0xc51   :  { %4417 = vmatpush1.bf16.msra.mxu0 %v10237_v45  ;;  %4458 = vmatpush1.bf16.msra.mxu1 %v8988_v33  ;;  %v4129_v45 = vld [vmem:[#allocation2 + $0x38] sm:$0xc] }
 0xc52   :  { %5358 = vmatprep.subr.bf16.mxu0 %v7755_v17  ;;  %5399 = vmatprep.subr.bf16.mxu1 %v7757_v25  ;;  %v4569_v33 = vld [vmem:[#allocation12 + $0xa8] sm:$0xff] }
 0xc68   :  { %v4168_v29 = vpop.f32.mrb[52].mxu0  ;;  %v4209_v38 = vpop.f32.mrb[76].mxu1 }
 0xc69   :  { %v4220_v21 = vrot.slane %v4168_v29, 6  ;;  %v4170_v16 = vpop.f32.mrb[53].mxu0  ;;  %v4211_v2 = vpop.f32.mrb[77].mxu1  ;;  %v4222_v1 = vrot.slane %v4209_v38, 6  ;;  %v7770_v29 = vcombine.low %v4564_v18, %v4568_v55  ;;  %v7772_v38 = vcombine.low %v4565_v40, %v4569_v33 }
 0xc6a   :  { %v4221_v54 = vrot.slane %v4170_v16, 6  ;;  %v4172_v8 = vpop.f32.mrb[54].mxu0  ;;  %v4213_v5 = vpop.f32.mrb[78].mxu1  ;;  %v4223_v7 = vrot.slane %v4211_v2, 6  ;;  %v4572_v16 = vld [vmem:[#allocation12 + $0xc0] sm:$0xff] }
 0xc6b   :  { %v4228_v46 = vadd.f32 %v4220_v21, %v4126_v51  ;;  %v4173_v35 = vpop.f32.mrb[55].mxu0  ;;  %v4214_v48 = vpop.f32.mrb[79].mxu1  ;;  %v4230_v11 = vadd.f32 %v4222_v1, %v4128_v37  ;;  %v7773_v21 = vcombine.high %v4565_v40, %v4569_v33  ;;  %v4576_v2 = vld [vmem:[#allocation12 + $0xe0] sm:$0xff]  ;;  %v4573_v51 = vld [vmem:[#allocation12 + $0xc8] sm:$0xff] }
 0xc6c   :  { %v4229_v43 = vadd.f32 %v4221_v54, %v4127_v32  ;;  %v4231_v28 = vadd.f32 %v4223_v7, %v4129_v45  ;;  %v7779_v54 = vcombine.high %v4572_v16, %v4576_v2  ;;  %v4577_v8 = vld [vmem:[#allocation12 + $0xe8] sm:$0xff]  ;;  %v7778_v5 = vcombine.low %v4572_v16, %v4576_v2  ;;  %v4580_v35 = vld [vmem:[#allocation12 + $0x100] sm:$0xff] }
 0xc6d   :  { %v7745_v4 = vmul.f32 -1.442695, %v4228_v46  ;;  %v7780_v46 = vcombine.low %v4573_v51, %v4577_v8  ;;  %v7781_v32 = vcombine.high %v4573_v51, %v4577_v8  ;;  %v4584_v48 = vld [vmem:[#allocation12 + $0x120] sm:$0xff]  ;;  %v4617_v33 = vld [vmem:[#allocation12 + $0x228] sm:$0xff] }
 0xc6e   :  { %v7746_v20 = vmul.f32 -1.442695, %v4229_v43  ;;  %v7747_v63 = vmul.f32 -1.442695, %v4231_v28  ;;  %v4581_v43 = vld [vmem:[#allocation12 + $0x108] sm:$0xff]  ;;  %v7786_v7 = vcombine.low %v4580_v35, %v4584_v48  ;;  %v4588_v1 = vld [vmem:[#allocation12 + $0x140] sm:$0xff] }
 0xc6f   :  { %8765 = vpow2.f32 %v7745_v4  ;;  %v7787_v4 = vcombine.high %v4580_v35, %v4584_v48  ;;  %v4592_v37 = vld [vmem:[#allocation12 + $0x160] sm:$0xff]  ;;  %v4625_v35 = vld [vmem:[#allocation12 + $0x268] sm:$0xff] }
 0xc70   :  { %8767 = vpow2.f32 %v7746_v20  ;;  %v4585_v20 = vld [vmem:[#allocation12 + $0x128] sm:$0xff]  ;;  %v4620_v8 = vld [vmem:[#allocation12 + $0x240] sm:$0xff] }
 0xc71   :  { %8769 = vpow2.f32 %v7747_v63  ;;  %v7788_v45 = vcombine.low %v4581_v43, %v4585_v20  ;;  %v7789_v28 = vcombine.high %v4581_v43, %v4585_v20  ;;  %v4589_v63 = vld [vmem:[#allocation12 + $0x148] sm:$0xff] }
 0xc72   :  { %8771 = vtanh.f32 %v4230_v11  ;;  %v7795_v11 = vcombine.high %v4588_v1, %v4592_v37  ;;  %v4291_v20 = vld [vmem:[#allocation2 + $0x18] sm:$0xc0] }
 0xc79   :  { %v8766_v23 = vpop.eup %8765 }
 0xc7a   :  { %v8768_v49 = vpop.eup %8767  ;;  %v4262_v9 = vadd.f32 1.0, %v8766_v23  ;;  %v4593_v23 = vld [vmem:[#allocation12 + $0x168] sm:$0xff] }
 0xc7b   :  { %v4268_v12 = vadd.f32 1.0, %v8768_v49  ;;  %v8770_v53 = vpop.eup %8769  ;;  %v7794_v49 = vcombine.low %v4588_v1, %v4592_v37  ;;  %v4629_v1 = vld [vmem:[#allocation12 + $0x288] sm:$0xff] }
 0xc7c   :  { %8773 = vrcp.f32 %v4262_v9  ;;  %v8772_v56 = vpop.eup %8771  ;;  %v4275_v34 = vadd.f32 1.0, %v8770_v53  ;;  %v7796_v9 = vcombine.low %v4589_v63, %v4593_v23  ;;  %v4596_v53 = vld [vmem:[#allocation12 + $0x180] sm:$0xff] }
 0xc7d   :  { %8775 = vrcp.f32 %v4268_v12  ;;  %v7797_v12 = vcombine.high %v4589_v63, %v4593_v23 }
 0xc7e   :  { %8777 = vrcp.f32 %v4275_v34 }
 0xc86   :  { %v8774_v14 = vpop.eup %8773 }
 0xc87   :  { %v8776_v60 = vpop.eup %8775  ;;  %v4282_v6 = vmul.f32 %v8774_v14, %v8772_v56  ;;  %v4600_v56 = vld [vmem:[#allocation12 + $0x1a0] sm:$0xff]  ;;  %v4597_v14 = vld [vmem:[#allocation12 + $0x188] sm:$0xff] }
 0xc88   :  { %v4281_v39 = vmul.f32 %v8776_v60, %v4279_v42  ;;  %v8778_v22 = vpop.eup %8777  ;;  %v7803_v42 = vcombine.high %v4596_v53, %v4600_v56  ;;  %v4601_v60 = vld [vmem:[#allocation12 + $0x1a8] sm:$0xff] }
 0xc89   :  { %v7804_v34 = vcombine.low %v4597_v14, %v4601_v60 }
 0xc8a   :  { %v10564_v41 = vadd.f32 %v4282_v6, %v4281_v39  ;;  %v7802_v6 = vcombine.low %v4596_v53, %v4600_v56  ;;  %v7805_v39 = vcombine.high %v4597_v14, %v4601_v60  ;;  %v4636_v56 = vld [vmem:[#allocation12 + $0x2c0] sm:$0xff] }
 0xc8b   :  { %v4640_v14 = vld [vmem:[#allocation12 + $0x2e0] sm:$0xff] }
 0xc8c   :  { %8779 = vtanh.f32 %v10564_v41 }
 0xc96   :  { %v8780_v44 = vpop.eup %8779 }
 0xc97   :  { %v4285_v36 = vmul.f32 %v8780_v44, %v8778_v22  ;;  %v4604_v22 = vld [vmem:[#allocation12 + $0x1c0] sm:$0xff] }
 0xc98   :  { %v4608_v44 = vld [vmem:[#allocation12 + $0x1e0] sm:$0xff] }
 0xc99   :  { %4287 = vst [vmem:[#allocation3 + $0x8] sm:$0xc] %v4285_v36  ;;  %v4398_v57 = vpack.c.bf16 %v4285_v36, %v4285_v36  ;;  %v4605_v36 = vld [vmem:[#allocation12 + $0x1c8] sm:$0xff]  ;;  %v7810_v27 = vcombine.low %v4604_v22, %v4608_v44 }
 0xc9b   :  { %v4400_v59 = vrot.slane %v4398_v57, 1  ;;  %v7811_v57 = vcombine.high %v4604_v22, %v4608_v44 }
 0xc9d   :  { %4435 = vmatmul.mubr.bf16.vlgmr.msra.gmra.mrb[60].mxu0 %v4400_v59  ;;  %4476 = vmatmul.mubr.bf16.vlgmr.msra.gmra.mrb[84].mxu1 %v4400_v59  ;;  %v4609_v59 = vld [vmem:[#allocation12 + $0x1e8] sm:$0xff] }
 0xc9e   :  { %5359 = vmatpush1.bf16.msra.mxu0 %v7754_v58  ;;  %5400 = vmatpush1.bf16.msra.mxu1 %v7756_v3  ;;  %v7812_v58 = vcombine.low %v4605_v36, %v4609_v59  ;;  %v7813_v17 = vcombine.high %v4605_v36, %v4609_v59 }
 0xc9f   :  { %5360 = vmatprep.subr.bf16.mxu0 %v7763_v61  ;;  %5401 = vmatprep.subr.bf16.mxu1 %v7765_v26  ;;  %v4616_v26 = vld [vmem:[#allocation12 + $0x220] sm:$0xff] }
 0xca0   :  { %v7819_v40 = vcombine.high %v4612_v31, %v4616_v26 }
 0xca2   :  { %5361 = vmatpush1.bf16.msra.mxu0 %v7762_v15  ;;  %5402 = vmatpush1.bf16.msra.mxu1 %v7764_v10  ;;  %v4289_v10 = vld [vmem:[#allocation2 + $0x8] sm:$0xc0] }
 0xca3   :  { %5362 = vmatprep.subr.bf16.mxu0 %v7771_v24  ;;  %5403 = vmatprep.subr.bf16.mxu1 %v7773_v21  ;;  %v4613_v24 = vld [vmem:[#allocation12 + $0x208] sm:$0xff] }
 0xca4   :  { %v7820_v21 = vcombine.low %v4613_v24, %v4617_v33  ;;  %v7821_v2 = vcombine.high %v4613_v24, %v4617_v33  ;;  %v4661_v24 = vld [vmem:[#allocation12 + $0x388] sm:$0xff] }
 0xca6   :  { %5363 = vmatpush1.bf16.msra.mxu0 %v7770_v29  ;;  %5404 = vmatpush1.bf16.msra.mxu1 %v7772_v38  ;;  %v7818_v38 = vcombine.low %v4612_v31, %v4616_v26  ;;  %v4657_v26 = vld [vmem:[#allocation12 + $0x368] sm:$0xff] }
 0xca7   :  { %5364 = vmatprep.subr.bf16.mxu0 %v7779_v54  ;;  %5405 = vmatprep.subr.bf16.mxu1 %v7781_v32  ;;  %v4621_v32 = vld [vmem:[#allocation12 + $0x248] sm:$0xff] }
 0xca8   :  { %v7828_v43 = vcombine.low %v4621_v32, %v4625_v35 }
 0xcaa   :  { %5365 = vmatpush1.bf16.msra.mxu0 %v7778_v5  ;;  %5406 = vmatpush1.bf16.msra.mxu1 %v7780_v46  ;;  %v4624_v5 = vld [vmem:[#allocation12 + $0x260] sm:$0xff] }
 0xcab   :  { %5366 = vmatprep.subr.bf16.mxu0 %v7787_v4  ;;  %5407 = vmatprep.subr.bf16.mxu1 %v7789_v28  ;;  %v7827_v46 = vcombine.high %v4620_v8, %v4624_v5  ;;  %v7826_v48 = vcombine.low %v4620_v8, %v4624_v5  ;;  %v7829_v4 = vcombine.high %v4621_v32, %v4625_v35  ;;  %v4632_v28 = vld [vmem:[#allocation12 + $0x2a0] sm:$0xff] }
 0xcae   :  { %5367 = vmatpush1.bf16.msra.mxu0 %v7786_v7  ;;  %5408 = vmatpush1.bf16.msra.mxu1 %v7788_v45  ;;  %v4628_v45 = vld [vmem:[#allocation12 + $0x280] sm:$0xff] }
 0xcaf   :  { %5368 = vmatprep.subr.bf16.mxu0 %v7795_v11  ;;  %5409 = vmatprep.subr.bf16.mxu1 %v7797_v12  ;;  %v7835_v63 = vcombine.high %v4628_v45, %v4632_v28  ;;  %v4633_v11 = vld [vmem:[#allocation12 + $0x2a8] sm:$0xff]  ;;  %v7834_v23 = vcombine.low %v4628_v45, %v4632_v28  ;;  %v4290_v12 = vld [vmem:[#allocation2 + $0x10] sm:$0xc0] }
 0xcb2   :  { %5369 = vmatpush1.bf16.msra.mxu0 %v7794_v49  ;;  %5410 = vmatpush1.bf16.msra.mxu1 %v7796_v9  ;;  %v7836_v49 = vcombine.low %v4629_v1, %v4633_v11  ;;  %v7837_v9 = vcombine.high %v4629_v1, %v4633_v11  ;;  %v10573_v11 = vld [vmem:[#allocation12 + $0x30] sm:$0xff] }
 0xcb3   :  { %5370 = vmatprep.subr.bf16.mxu0 %v7803_v42  ;;  %5411 = vmatprep.subr.bf16.mxu1 %v7805_v39  ;;  %v4637_v42 = vld [vmem:[#allocation12 + $0x2c8] sm:$0xff]  ;;  %v7842_v39 = vcombine.low %v4636_v56, %v4640_v14 }
 0xcb6   :  { %5371 = vmatpush1.bf16.msra.mxu0 %v7802_v6  ;;  %5412 = vmatpush1.bf16.msra.mxu1 %v7804_v34  ;;  %v7843_v6 = vcombine.high %v4636_v56, %v4640_v14  ;;  %v4641_v34 = vld [vmem:[#allocation12 + $0x2e8] sm:$0xff] }
 0xcb7   :  { %5372 = vmatprep.subr.bf16.mxu0 %v7811_v57  ;;  %5413 = vmatprep.subr.bf16.mxu1 %v7813_v17  ;;  %v7844_v22 = vcombine.low %v4637_v42, %v4641_v34  ;;  %v7845_v44 = vcombine.high %v4637_v42, %v4641_v34 }
 0xcba   :  { %5373 = vmatpush1.bf16.msra.mxu0 %v7810_v27  ;;  %5414 = vmatpush1.bf16.msra.mxu1 %v7812_v58  ;;  %v4645_v27 = vld [vmem:[#allocation12 + $0x308] sm:$0xff] }
 0xcbb   :  { %5374 = vmatprep.subr.bf16.mxu0 %v7819_v40  ;;  %5415 = vmatprep.subr.bf16.mxu1 %v7821_v2  ;;  %v4664_v40 = vld [vmem:[#allocation12 + $0x3a0] sm:$0xff] }
 0xcbe   :  { %5375 = vmatpush1.bf16.msra.mxu0 %v7818_v38  ;;  %5416 = vmatpush1.bf16.msra.mxu1 %v7820_v21  ;;  %v4668_v38 = vld [vmem:[#allocation12 + $0x3c0] sm:$0xff] }
 0xcbf   :  { %5376 = vmatprep.subr.bf16.mxu0 %v7827_v46  ;;  %5417 = vmatprep.subr.bf16.mxu1 %v7829_v4  ;;  %v4672_v21 = vld [vmem:[#allocation12 + $0x3e0] sm:$0xff] }
 0xcc0   :  { %v7875_v8 = vcombine.high %v4668_v38, %v4672_v21  ;;  %v7874_v4 = vcombine.low %v4668_v38, %v4672_v21 }
 0xcc2   :  { %5377 = vmatpush1.bf16.msra.mxu0 %v7826_v48  ;;  %5418 = vmatpush1.bf16.msra.mxu1 %v7828_v43  ;;  %v4508_v43 = vrot.slane %v10543_v62, 6 }
 0xcc3   :  { %5378 = vmatprep.subr.bf16.mxu0 %v7835_v63  ;;  %5419 = vmatprep.subr.bf16.mxu1 %v7837_v9  ;;  %v10571_v63 = vld [vmem:[#allocation12 + $0x10] sm:$0xff]  ;;  %v10581_v9 = vld [vmem:[#allocation12 + $0x38] sm:$0xff] }
 0xcc4   :  { %v7758_v62 = vcombine.low %v10571_v63, %v10573_v11 }
 0xcc6   :  { %5379 = vmatpush1.bf16.msra.mxu0 %v7834_v23  ;;  %5420 = vmatpush1.bf16.msra.mxu1 %v7836_v49  ;;  %v10575_v23 = vld [vmem:[#allocation12 + $0x18] sm:$0xff]  ;;  %v7759_v49 = vcombine.high %v10571_v63, %v10573_v11 }
 0xcc7   :  { %5380 = vmatprep.subr.bf16.mxu0 %v7843_v6  ;;  %5421 = vmatprep.subr.bf16.mxu1 %v7845_v44 }
 0xcca   :  { %5381 = vmatpush1.bf16.msra.mxu0 %v7842_v39  ;;  %5422 = vmatpush1.bf16.msra.mxu1 %v7844_v22  ;;  %v4395_v22 = vld [vmem:[#allocation2 + $0x28] sm:$0x3] }
 0xd07   :  { %v4330_v30 = vpop.f32.mrb[56].mxu0  ;;  %v10567_v0 = vpop.f32.mrb[80].mxu1 }
 0xd08   :  { %v4382_v50 = vrot.slane %v4330_v30, 2  ;;  %v4332_v52 = vpop.f32.mrb[57].mxu0  ;;  %v4373_v3 = vpop.f32.mrb[81].mxu1  ;;  %v4384_v37 = vrot.slane %v10567_v0, 2  ;;  %v4644_v30 = vld [vmem:[#allocation12 + $0x300] sm:$0xff] }
 0xd09   :  { %v4383_v25 = vrot.slane %v4332_v52, 2  ;;  %v4334_v61 = vpop.f32.mrb[58].mxu0  ;;  %v4375_v47 = vpop.f32.mrb[82].mxu1  ;;  %v4385_v54 = vrot.slane %v4373_v3, 2  ;;  %v4648_v0 = vld [vmem:[#allocation12 + $0x320] sm:$0xff] }
 0xd0a   :  { %v4390_v15 = vadd.f32 %v4382_v50, %v4288_v19  ;;  %v4335_v18 = vpop.f32.mrb[59].mxu0  ;;  %v4376_v55 = vpop.f32.mrb[83].mxu1  ;;  %v4392_v60 = vadd.f32 %v4384_v37, %v4290_v12  ;;  %v7851_v17 = vcombine.high %v4644_v30, %v4648_v0  ;;  %v4649_v19 = vld [vmem:[#allocation12 + $0x328] sm:$0xff]  ;;  %v7850_v50 = vcombine.low %v4644_v30, %v4648_v0  ;;  %v4656_v61 = vld [vmem:[#allocation12 + $0x360] sm:$0xff] }
 0xd0b   :  { %v4391_v29 = vadd.f32 %v4383_v25, %v4289_v10  ;;  %v4393_v7 = vadd.f32 %v4385_v54, %v4291_v20  ;;  %v7852_v52 = vcombine.low %v4645_v27, %v4649_v19  ;;  %v7853_v3 = vcombine.high %v4645_v27, %v4649_v19  ;;  %v4652_v25 = vld [vmem:[#allocation12 + $0x340] sm:$0xff]  ;;  %v4653_v47 = vld [vmem:[#allocation12 + $0x348] sm:$0xff] }
 0xd0c   :  { %v7748_v16 = vmul.f32 -1.442695, %v4390_v15  ;;  %5382 = vmatprep.subr.bf16.mxu0 %v7851_v17  ;;  %v7859_v31 = vcombine.high %v4652_v25, %v4656_v61  ;;  %v7858_v15 = vcombine.low %v4652_v25, %v4656_v61  ;;  %v7860_v10 = vcombine.low %v4653_v47, %v4657_v26  ;;  %v4660_v55 = vld [vmem:[#allocation12 + $0x380] sm:$0xff]  ;;  %v4673_v54 = vld [vmem:[#allocation12 + $0x3e8] sm:$0xff] }
 0xd0d   :  { %v7749_v51 = vmul.f32 -1.442695, %v4391_v29  ;;  %v7750_v53 = vmul.f32 -1.442695, %v4393_v7  ;;  %5383 = vmatpush1.bf16.msra.mxu0 %v7850_v50  ;;  %5423 = vmatprep.subr.bf16.mxu1 %v7853_v3  ;;  %v7861_v18 = vcombine.high %v4653_v47, %v4657_v26  ;;  %v7867_v33 = vcombine.high %v4660_v55, %v4664_v40  ;;  %v4665_v29 = vld [vmem:[#allocation12 + $0x3a8] sm:$0xff] }
 0xd0e   :  { %8781 = vpow2.f32 %v7748_v16  ;;  %5424 = vmatpush1.bf16.msra.mxu1 %v7852_v52  ;;  %5384 = vmatprep.subr.bf16.mxu0 %v7859_v31  ;;  %v7866_v16 = vcombine.low %v4660_v55, %v4664_v40  ;;  %v7869_v2 = vcombine.high %v4661_v24, %v4665_v29  ;;  %v7868_v46 = vcombine.low %v4661_v24, %v4665_v29  ;;  %v4397_v19 = vld [vmem:[#allocation2 + $0x38] sm:$0x3]  ;;  %v4396_v52 = vld [vmem:[#allocation2 + $0x30] sm:$0x3] }
 0xd0f   :  { %8783 = vpow2.f32 %v7749_v51  ;;  %5425 = vmatprep.subr.bf16.mxu1 %v7861_v18  ;;  %v4669_v51 = vld [vmem:[#allocation12 + $0x3c8] sm:$0xff]  ;;  %v7760_v12 = vcombine.low %v10575_v23, %v10581_v9  ;;  %v4535_v55 = vrot.slane %v10564_v41, 2  ;;  %v4566_v41 = vld [vmem:[#allocation12 + $0x90] sm:$0xff] }
 0xd10   :  { %8785 = vpow2.f32 %v7750_v53  ;;  %v7877_v35 = vcombine.high %v4669_v51, %v4673_v54  ;;  %v7876_v1 = vcombine.low %v4669_v51, %v4673_v54  ;;  %v7761_v53 = vcombine.high %v10575_v23, %v10581_v9  ;;  %v4558_v54 = vld [vmem:[#allocation12 + $0x50] sm:$0xff] }
 0xd11   :  { %8787 = vtanh.f32 %v4392_v60  ;;  %5385 = vmatpush1.bf16.msra.mxu0 %v7858_v15  ;;  %v4394_v60 = vld [vmem:[#allocation2 + $0x20] sm:$0x3] }
 0xd12   :  { %5386 = vmatprep.subr.bf16.mxu0 %v7867_v33  ;;  %5426 = vmatpush1.bf16.msra.mxu1 %v7860_v10  ;;  %v4582_v9 = vld [vmem:[#allocation12 + $0x110] sm:$0xff] }
 0xd13   :  { %5427 = vmatprep.subr.bf16.mxu1 %v7869_v2 }
 0xd15   :  { %5387 = vmatpush1.bf16.msra.mxu0 %v7866_v16 }
 0xd16   :  { %5388 = vmatprep.subr.bf16.mxu0 %v7875_v8  ;;  %5428 = vmatpush1.bf16.msra.mxu1 %v7868_v46  ;;  %v4562_v8 = vld [vmem:[#allocation12 + $0x70] sm:$0xff]  ;;  %v4559_v46 = vld [vmem:[#allocation12 + $0x58] sm:$0xff] }
 0xd17   :  { %5429 = vmatprep.subr.bf16.mxu1 %v7877_v35 }
 0xd18   :  { %v8782_v36 = vpop.eup %8781 }
 0xd19   :  { %v8784_v57 = vpop.eup %8783  ;;  %v4491_v59 = vadd.f32 1.0, %v8782_v36  ;;  %5389 = vmatpush1.bf16.msra.mxu0 %v7874_v4 }
 0xd1a   :  { %v4497_v58 = vadd.f32 1.0, %v8784_v57  ;;  %v8786_v5 = vpop.eup %8785  ;;  %5430 = vmatpush1.bf16.msra.mxu1 %v7876_v1  ;;  %5440 = vmatprep.subr.bf16.mxu0 %v7759_v49 }
 0xd1b   :  { %8789 = vrcp.f32 %v4491_v59  ;;  %v8788_v32 = vpop.eup %8787  ;;  %v4504_v45 = vadd.f32 1.0, %v8786_v5  ;;  %5481 = vmatprep.subr.bf16.mxu1 %v7761_v53  ;;  %v4574_v53 = vld [vmem:[#allocation12 + $0xd0] sm:$0xff] }
 0xd1c   :  { %8791 = vrcp.f32 %v4497_v58 }
 0xd1d   :  { %8793 = vrcp.f32 %v4504_v45  ;;  %v4571_v45 = vld [vmem:[#allocation12 + $0xb8] sm:$0xff] }
 0xd25   :  { %v8790_v48 = vpop.eup %8789 }
 0xd26   :  { %v8792_v20 = vpop.eup %8791  ;;  %v4511_v7 = vmul.f32 %v8790_v48, %v8788_v32  ;;  %v4563_v32 = vld [vmem:[#allocation12 + $0x78] sm:$0xff] }
 0xd27   :  { %v4510_v28 = vmul.f32 %v8792_v20, %v4508_v43  ;;  %v8794_v56 = vpop.eup %8793  ;;  %v7767_v43 = vcombine.high %v4558_v54, %v4562_v8  ;;  %v7769_v4 = vcombine.high %v4559_v46, %v4563_v32  ;;  %v4570_v20 = vld [vmem:[#allocation12 + $0xb0] sm:$0xff]  ;;  %v7768_v1 = vcombine.low %v4559_v46, %v4563_v32  ;;  %v4623_v32 = vld [vmem:[#allocation12 + $0x258] sm:$0xff] }
 0xd28   :  { %v7774_v63 = vcombine.low %v4566_v41, %v4570_v20  ;;  %v4626_v46 = vld [vmem:[#allocation12 + $0x270] sm:$0xff] }
 0xd29   :  { %v4512_v37 = vadd.f32 %v4511_v7, %v4510_v28  ;;  %v4567_v7 = vld [vmem:[#allocation12 + $0x98] sm:$0xff]  ;;  %v7766_v28 = vcombine.low %v4558_v54, %v4562_v8 }
 0xd2a   :  { %v7777_v49 = vcombine.high %v4567_v7, %v4571_v45  ;;  %v7776_v11 = vcombine.low %v4567_v7, %v4571_v45  ;;  %v4630_v7 = vld [vmem:[#allocation12 + $0x290] sm:$0xff] }
 0xd2b   :  { %8795 = vtanh.f32 %v4512_v37  ;;  %v7775_v37 = vcombine.high %v4566_v41, %v4570_v20  ;;  %v4634_v45 = vld [vmem:[#allocation12 + $0x2b0] sm:$0xff] }
 0xd35   :  { %v8796_v14 = vpop.eup %8795 }
 0xd36   :  { %v4514_v42 = vmul.f32 %v8796_v14, %v8794_v56  ;;  %v4578_v56 = vld [vmem:[#allocation12 + $0xf0] sm:$0xff]  ;;  %v4575_v14 = vld [vmem:[#allocation12 + $0xd8] sm:$0xff] }
 0xd37   :  { %v7783_v23 = vcombine.high %v4574_v53, %v4578_v56 }
 0xd38   :  { %4542 = vst [vmem:[#allocation3] sm:$0xc0] %v4514_v42  ;;  %v4579_v42 = vld [vmem:[#allocation12 + $0xf8] sm:$0xff] }
 0xd3f   :  { %v4544_v51 = vld [vmem:[#allocation3] sm:$0xff] }
 0xd40   :  { %v10588_v48 = vpack.c.bf16 %v4544_v51, %v4544_v51 }
 0xd70   :  { %v4436_v6 = vpop.f32.mrb[60].mxu0  ;;  %v4477_v34 = vpop.f32.mrb[84].mxu1 }
 0xd71   :  { %v4484_v39 = vadd.f32 %v4436_v6, %v4394_v60  ;;  %v4438_v44 = vpop.f32.mrb[61].mxu0  ;;  %v4479_v36 = vpop.f32.mrb[85].mxu1  ;;  %v4486_v25 = vadd.f32 %v4477_v34, %v4396_v52  ;;  %v4583_v60 = vld [vmem:[#allocation12 + $0x118] sm:$0xff]  ;;  %v7782_v34 = vcombine.low %v4574_v53, %v4578_v56  ;;  %v7839_v53 = vcombine.high %v4630_v7, %v4634_v45 }
 0xd72   :  { %v4485_v57 = vadd.f32 %v4438_v44, %v4395_v22  ;;  %v4440_v59 = vpop.f32.mrb[62].mxu0  ;;  %v4481_v30 = vpop.f32.mrb[86].mxu1  ;;  %v4487_v50 = vadd.f32 %v4479_v36, %v4397_v19  ;;  %v4587_v6 = vld [vmem:[#allocation12 + $0x138] sm:$0xff]  ;;  %v4590_v36 = vld [vmem:[#allocation12 + $0x150] sm:$0xff] }
 0xd73   :  { %v7751_v0 = vmul.f32 -1.442695, %v4484_v39  ;;  %v4441_v27 = vpop.f32.mrb[63].mxu0  ;;  %v4482_v58 = vpop.f32.mrb[87].mxu1  ;;  %v7784_v39 = vcombine.low %v4575_v14, %v4579_v42  ;;  %v7793_v44 = vcombine.high %v4583_v60, %v4587_v6  ;;  %v4591_v59 = vld [vmem:[#allocation12 + $0x158] sm:$0xff]  ;;  %v4598_v19 = vld [vmem:[#allocation12 + $0x190] sm:$0xff] }
 0xd74   :  { %v7752_v17 = vmul.f32 -1.442695, %v4485_v57  ;;  %v7753_v3 = vmul.f32 -1.442695, %v4487_v50  ;;  %v4594_v57 = vld [vmem:[#allocation12 + $0x170] sm:$0xff]  ;;  %v4595_v30 = vld [vmem:[#allocation12 + $0x178] sm:$0xff]  ;;  %v7792_v27 = vcombine.low %v4583_v60, %v4587_v6 }
 0xd75   :  { %8797 = vpow2.f32 %v7751_v0  ;;  %v7799_v58 = vcombine.high %v4590_v36, %v4594_v57  ;;  %v4602_v50 = vld [vmem:[#allocation12 + $0x1b0] sm:$0xff]  ;;  %v4599_v52 = vld [vmem:[#allocation12 + $0x198] sm:$0xff] }
 0xd76   :  { %8799 = vpow2.f32 %v7752_v17  ;;  %v7801_v17 = vcombine.high %v4591_v59, %v4595_v30  ;;  %v4646_v60 = vld [vmem:[#allocation12 + $0x310] sm:$0xff] }
 0xd77   :  { %8801 = vpow2.f32 %v7753_v3  ;;  %v4603_v3 = vld [vmem:[#allocation12 + $0x1b8] sm:$0xff]  ;;  %v4650_v6 = vld [vmem:[#allocation12 + $0x330] sm:$0xff] }
 0xd78   :  { %8803 = vtanh.f32 %v4486_v25  ;;  %v7798_v25 = vcombine.low %v4590_v36, %v4594_v57  ;;  %v7855_v36 = vcombine.high %v4646_v60, %v4650_v6 }
 0xd7f   :  { %v8798_v61 = vpop.eup %8797 }
 0xd80   :  { %v8800_v47 = vpop.eup %8799  ;;  %v4518_v31 = vadd.f32 1.0, %v8798_v61  ;;  %v7800_v61 = vcombine.low %v4591_v59, %v4595_v30  ;;  %v4654_v59 = vld [vmem:[#allocation12 + $0x350] sm:$0xff] }
 0xd81   :  { %v4524_v26 = vadd.f32 1.0, %v8800_v47  ;;  %v8802_v15 = vpop.eup %8801  ;;  %v7807_v47 = vcombine.high %v4598_v19, %v4602_v50  ;;  %v4658_v30 = vld [vmem:[#allocation12 + $0x370] sm:$0xff] }
 0xd82   :  { %8805 = vrcp.f32 %v4518_v31  ;;  %v8804_v10 = vpop.eup %8803  ;;  %v4531_v33 = vadd.f32 1.0, %v8802_v15  ;;  %v7809_v31 = vcombine.high %v4599_v52, %v4603_v3  ;;  %v4610_v15 = vld [vmem:[#allocation12 + $0x1f0] sm:$0xff] }
 0xd83   :  { %8807 = vrcp.f32 %v4524_v26  ;;  %v4606_v26 = vld [vmem:[#allocation12 + $0x1d0] sm:$0xff] }
 0xd84   :  { %8809 = vrcp.f32 %v4531_v33 }
 0xd8c   :  { %v8806_v18 = vpop.eup %8805 }
 0xd8d   :  { %v8808_v40 = vpop.eup %8807  ;;  %v4538_v24 = vmul.f32 %v8806_v18, %v8804_v10  ;;  %v4607_v10 = vld [vmem:[#allocation12 + $0x1d8] sm:$0xff] }
 0xd8e   :  { %v4537_v29 = vmul.f32 %v8808_v40, %v4535_v55  ;;  %v8810_v21 = vpop.eup %8809  ;;  %v4611_v18 = vld [vmem:[#allocation12 + $0x1f8] sm:$0xff]  ;;  %v7806_v55 = vcombine.low %v4598_v19, %v4602_v50  ;;  %v7808_v40 = vcombine.low %v4599_v52, %v4603_v3  ;;  %v7863_v19 = vcombine.high %v4654_v59, %v4658_v30  ;;  %v4662_v52 = vld [vmem:[#allocation12 + $0x390] sm:$0xff] }
 0xd8f   :  { %v7817_v33 = vcombine.high %v4607_v10, %v4611_v18  ;;  %v7816_v51 = vcombine.low %v4607_v10, %v4611_v18  ;;  %v4666_v3 = vld [vmem:[#allocation12 + $0x3b0] sm:$0xff] }
 0xd90   :  { %v4539_v38 = vadd.f32 %v4538_v24, %v4537_v29  ;;  %v7815_v24 = vcombine.high %v4606_v26, %v4610_v15  ;;  %v4614_v29 = vld [vmem:[#allocation12 + $0x210] sm:$0xff] }
 0xd91   :  { %v4670_v10 = vld [vmem:[#allocation12 + $0x3d0] sm:$0xff] }
 0xd92   :  { %8811 = vtanh.f32 %v4539_v38  ;;  %v4618_v38 = vld [vmem:[#allocation12 + $0x230] sm:$0xff] }
 0xd93   :  { %v7823_v54 = vcombine.high %v4614_v29, %v4618_v38  ;;  %v7822_v41 = vcombine.low %v4614_v29, %v4618_v38  ;;  %v4674_v18 = vld [vmem:[#allocation12 + $0x3f0] sm:$0xff] }
 0xd94   :  { %v7879_v29 = vcombine.high %v4670_v10, %v4674_v18 }
 0xd9c   :  { %v8812_v16 = vpop.eup %8811 }
 0xd9d   :  { %v4541_v2 = vmul.f32 %v8812_v16, %v8810_v21  ;;  %v4615_v21 = vld [vmem:[#allocation12 + $0x218] sm:$0xff] }
 0xd9e   :  { %v4619_v16 = vld [vmem:[#allocation12 + $0x238] sm:$0xff] }
 0xd9f   :  { %4543 = vst [vmem:[#allocation3 + $0x8] sm:$0x3] %v4541_v2  ;;  %v7814_v2 = vcombine.low %v4606_v26, %v4610_v15  ;;  %v7825_v8 = vcombine.high %v4615_v21, %v4619_v16  ;;  %v7871_v26 = vcombine.high %v4662_v52, %v4666_v3 }
 0xda6   :  { %v4545_v5 = vld [vmem:[#allocation3 + $0x8] sm:$0xff] }
 0xda7   :  { %v4547_v35 = vpack.c.bf16 %v4545_v5, %v4545_v5  ;;  %v4622_v5 = vld [vmem:[#allocation12 + $0x250] sm:$0xff] }
 0xda9   :  { %5390 = vmatprep.mubr.bf16.mxu0 %v4547_v35  ;;  %5431 = vmatprep.mubr.bf16.mxu1 %v4547_v35 }
 0xdaa   :  { %5391 = vmatmul.mubr.bf16.vlgmr.msra.gmra.mrb[64].mxu0 %v10588_v48  ;;  %5432 = vmatmul.mubr.bf16.vlgmr.msra.gmra.mrb[88].mxu1 %v10588_v48 }
 0xdab   :  { %5441 = vmatpush1.bf16.msra.mxu0 %v7758_v62  ;;  %5482 = vmatpush1.bf16.msra.mxu1 %v7760_v12  ;;  %v7785_v62 = vcombine.high %v4575_v14, %v4579_v42  ;;  %v4586_v12 = vld [vmem:[#allocation12 + $0x130] sm:$0xff] }
 0xdac   :  { %5472 = vmatprep.mubr.bf16.mxu0 %v4547_v35  ;;  %5513 = vmatprep.mubr.bf16.mxu1 %v4547_v35  ;;  %v7791_v22 = vcombine.high %v4582_v9, %v4586_v12  ;;  %v7790_v0 = vcombine.low %v4582_v9, %v4586_v12  ;;  %v4627_v35 = vld [vmem:[#allocation12 + $0x278] sm:$0xff]  ;;  %v4638_v14 = vld [vmem:[#allocation12 + $0x2d0] sm:$0xff] }
 0xdad   :  { %5442 = vmatprep.subr.bf16.mxu0 %v7767_v43  ;;  %5483 = vmatprep.subr.bf16.mxu1 %v7769_v4  ;;  %v7824_v43 = vcombine.low %v4615_v21, %v4619_v16  ;;  %v7831_v4 = vcombine.high %v4622_v5, %v4626_v46  ;;  %v7833_v20 = vcombine.high %v4623_v32, %v4627_v35  ;;  %v4642_v42 = vld [vmem:[#allocation12 + $0x2f0] sm:$0xff] }
 0xdae   :  { %v7847_v9 = vcombine.high %v4638_v14, %v4642_v42  ;;  %v7878_v21 = vcombine.low %v4670_v10, %v4674_v18  ;;  %v10762_v10 = vld [vmem:[#allocation15 + $0xac] ss:$16 sps:$4 sm:$0xff]   ;;  %v10766_v18 = vld [vmem:[#allocation15 + $0xa0] ss:$16 sps:$4 sm:$0xff]  }
 0xdaf   :  { %5443 = vmatpush1.bf16.msra.mxu0 %v7766_v28  ;;  %5484 = vmatpush1.bf16.msra.mxu1 %v7768_v1  ;;  %v4631_v28 = vld [vmem:[#allocation12 + $0x298] sm:$0xff]  ;;  %11294 = vst [vmem:[#allocation51_spill] sm:$0xff] %v10766_v18 }
 0xdb0   :  { %5444 = vmatprep.subr.bf16.mxu0 %v7775_v37  ;;  %5485 = vmatprep.subr.bf16.mxu1 %v7777_v49  ;;  %v4635_v1 = vld [vmem:[#allocation12 + $0x2b8] sm:$0xff]  ;;  %v7830_v37 = vcombine.low %v4622_v5, %v4626_v46  ;;  %v7832_v49 = vcombine.low %v4623_v32, %v4627_v35  ;;  %v10608_v5 = vld [vmem:[#allocation13 + $0x24] ss:$16 sps:$4 sm:$0xff]   ;;  %v10616_v32 = vld [vmem:[#allocation13 + $0x20] ss:$16 sps:$4 sm:$0xff]  }
 0xdb1   :  { %v7841_v56 = vcombine.high %v4631_v28, %v4635_v1  ;;  %v10610_v46 = vld [vmem:[#allocation13 + $0x2c] ss:$16 sps:$4 sm:$0xff]   ;;  %v10618_v35 = vld [vmem:[#allocation13 + $0x28] ss:$16 sps:$4 sm:$0xff]  }
 0xdb3   :  { %5445 = vmatpush1.bf16.msra.mxu0 %v7774_v63  ;;  %5486 = vmatpush1.bf16.msra.mxu1 %v7776_v11  ;;  %v4639_v63 = vld [vmem:[#allocation12 + $0x2d8] sm:$0xff] }
 0xdb4   :  { %5446 = vmatprep.subr.bf16.mxu0 %v7783_v23  ;;  %5487 = vmatprep.subr.bf16.mxu1 %v7785_v62  ;;  %v4643_v11 = vld [vmem:[#allocation12 + $0x2f8] sm:$0xff]  ;;  %v7838_v23 = vcombine.low %v4630_v7, %v4634_v45  ;;  %v7840_v62 = vcombine.low %v4631_v28, %v4635_v1  ;;  %v10642_v45 = vld [vmem:[#allocation13 + $0x60] ss:$16 sps:$4 sm:$0xff]   ;;  %v10648_v1 = vld [vmem:[#allocation13 + $0x84] ss:$16 sps:$4 sm:$0xff]  }
 0xdb5   :  { %v7849_v12 = vcombine.high %v4639_v63, %v4643_v11  ;;  %v10638_v7 = vld [vmem:[#allocation13 + $0x6c] ss:$16 sps:$4 sm:$0xff]   ;;  %11274 = vst [vmem:[#allocation29_spill] sm:$0xff] %v10642_v45  ;;  %v10644_v28 = vld [vmem:[#allocation13 + $0x68] ss:$16 sps:$4 sm:$0xff]   ;;  %11276 = vst [vmem:[#allocation30_spill] sm:$0xff] %v10648_v1 }
 0xdb6   :  { %11273 = vst [vmem:[#allocation33_spill] sm:$0xff] %v10638_v7  ;;  %11275 = vst [vmem:[#allocation34_spill] sm:$0xff] %v10644_v28 }
 0xdb7   :  { %5447 = vmatpush1.bf16.msra.mxu0 %v7782_v34  ;;  %5488 = vmatpush1.bf16.msra.mxu1 %v7784_v39  ;;  %v4647_v34 = vld [vmem:[#allocation12 + $0x318] sm:$0xff] }
 0xdb8   :  { %5448 = vmatprep.subr.bf16.mxu0 %v7791_v22  ;;  %5489 = vmatprep.subr.bf16.mxu1 %v7793_v44  ;;  %v4651_v39 = vld [vmem:[#allocation12 + $0x338] sm:$0xff]  ;;  %v7846_v22 = vcombine.low %v4638_v14, %v4642_v42  ;;  %v7848_v44 = vcombine.low %v4639_v63, %v4643_v11  ;;  %v10666_v42 = vld [vmem:[#allocation13 + $0xa0] ss:$16 sps:$4 sm:$0xff]   ;;  %v10672_v11 = vld [vmem:[#allocation13 + $0xc4] ss:$16 sps:$4 sm:$0xff]  }
 0xdb9   :  { %v7857_v57 = vcombine.high %v4647_v34, %v4651_v39  ;;  %v10662_v14 = vld [vmem:[#allocation13 + $0xac] ss:$16 sps:$4 sm:$0xff]   ;;  %11282 = vst [vmem:[#allocation38_spill] sm:$0xff] %v10666_v42  ;;  %v10668_v63 = vld [vmem:[#allocation13 + $0xa8] ss:$16 sps:$4 sm:$0xff]   ;;  %11284 = vst [vmem:[#allocation40_spill] sm:$0xff] %v10672_v11 }
 0xdba   :  { %11281 = vst [vmem:[#allocation37_spill] sm:$0xff] %v10662_v14  ;;  %11283 = vst [vmem:[#allocation39_spill] sm:$0xff] %v10668_v63 }
 0xdbb   :  { %5449 = vmatpush1.bf16.msra.mxu0 %v7790_v0  ;;  %5490 = vmatpush1.bf16.msra.mxu1 %v7792_v27  ;;  %v4655_v0 = vld [vmem:[#allocation12 + $0x358] sm:$0xff] }
 0xdbc   :  { %5450 = vmatprep.subr.bf16.mxu0 %v7799_v58  ;;  %5491 = vmatprep.subr.bf16.mxu1 %v7801_v17  ;;  %v4659_v27 = vld [vmem:[#allocation12 + $0x378] sm:$0xff]  ;;  %v7854_v58 = vcombine.low %v4646_v60, %v4650_v6  ;;  %v7856_v17 = vcombine.low %v4647_v34, %v4651_v39  ;;  %v10690_v6 = vld [vmem:[#allocation13 + $0xe0] ss:$16 sps:$4 sm:$0xff]   ;;  %v10696_v39 = vld [vmem:[#allocation15 + $0x4] ss:$16 sps:$4 sm:$0xff]  }
 0xdbd   :  { %v7865_v50 = vcombine.high %v4655_v0, %v4659_v27  ;;  %v10686_v60 = vld [vmem:[#allocation13 + $0xec] ss:$16 sps:$4 sm:$0xff]   ;;  %11290 = vst [vmem:[#allocation47_spill] sm:$0xff] %v10690_v6  ;;  %v10692_v34 = vld [vmem:[#allocation13 + $0xe8] ss:$16 sps:$4 sm:$0xff]   ;;  %11292 = vst [vmem:[#allocation49_spill] sm:$0xff] %v10696_v39 }
 0xdbe   :  { %11289 = vst [vmem:[#allocation46_spill] sm:$0xff] %v10686_v60  ;;  %11291 = vst [vmem:[#allocation48_spill] sm:$0xff] %v10692_v34 }
 0xdbf   :  { %5451 = vmatpush1.bf16.msra.mxu0 %v7798_v25  ;;  %5492 = vmatpush1.bf16.msra.mxu1 %v7800_v61  ;;  %v4663_v25 = vld [vmem:[#allocation12 + $0x398] sm:$0xff] }
 0xdc0   :  { %5452 = vmatprep.subr.bf16.mxu0 %v7807_v47  ;;  %5493 = vmatprep.subr.bf16.mxu1 %v7809_v31  ;;  %v4667_v61 = vld [vmem:[#allocation12 + $0x3b8] sm:$0xff]  ;;  %v7862_v47 = vcombine.low %v4654_v59, %v4658_v30  ;;  %v7864_v31 = vcombine.low %v4655_v0, %v4659_v27  ;;  %v10716_v30 = vld [vmem:[#allocation15 + $0x20] ss:$16 sps:$4 sm:$0xff]   ;;  %v10722_v27 = vld [vmem:[#allocation15 + $0x44] ss:$16 sps:$4 sm:$0xff]  }
 0xdc1   :  { %v7873_v15 = vcombine.high %v4663_v25, %v4667_v61  ;;  %v10710_v59 = vld [vmem:[#allocation15 + $0x2c] ss:$16 sps:$4 sm:$0xff]   ;;  %v10718_v0 = vld [vmem:[#allocation15 + $0x28] ss:$16 sps:$4 sm:$0xff]  }
 0xdc3   :  { %5453 = vmatpush1.bf16.msra.mxu0 %v7806_v55  ;;  %5494 = vmatpush1.bf16.msra.mxu1 %v7808_v40  ;;  %v4671_v55 = vld [vmem:[#allocation12 + $0x3d8] sm:$0xff] }
 0xdc4   :  { %5454 = vmatprep.subr.bf16.mxu0 %v7815_v24  ;;  %5495 = vmatprep.subr.bf16.mxu1 %v7817_v33  ;;  %v4675_v40 = vld [vmem:[#allocation12 + $0x3f8] sm:$0xff]  ;;  %v7870_v24 = vcombine.low %v4662_v52, %v4666_v3  ;;  %v7872_v33 = vcombine.low %v4663_v25, %v4667_v61  ;;  %v10742_v3 = vld [vmem:[#allocation15 + $0x60] ss:$16 sps:$4 sm:$0xff]   ;;  %v10748_v61 = vld [vmem:[#allocation15 + $0x84] ss:$16 sps:$4 sm:$0xff]  }
 0xdc5   :  { %v7881_v38 = vcombine.high %v4671_v55, %v4675_v40  ;;  %v7880_v16 = vcombine.low %v4671_v55, %v4675_v40  ;;  %v10738_v52 = vld [vmem:[#allocation15 + $0x6c] ss:$16 sps:$4 sm:$0xff]   ;;  %v10744_v25 = vld [vmem:[#allocation15 + $0x68] ss:$16 sps:$4 sm:$0xff]   ;;  %v10772_v40 = vld [vmem:[#allocation15 + $0xc4] ss:$16 sps:$4 sm:$0xff]  }
 0xdc6   :  { %v10768_v55 = vld [vmem:[#allocation15 + $0xa8] ss:$16 sps:$4 sm:$0xff]  }
 0xdc7   :  { %5455 = vmatpush1.bf16.msra.mxu0 %v7814_v2  ;;  %5496 = vmatpush1.bf16.msra.mxu1 %v7816_v51  ;;  %v10598_v2 = vld [vmem:[#allocation13 + $0x4] ss:$16 sps:$4 sm:$0xff]   ;;  %v10600_v51 = vld [vmem:[#allocation13 + $0xc] ss:$16 sps:$4 sm:$0xff]  }
 0xdc8   :  { %5456 = vmatprep.subr.bf16.mxu0 %v7823_v54  ;;  %5497 = vmatprep.subr.bf16.mxu1 %v7825_v8  ;;  %v10602_v54 = vld [vmem:[#allocation13] ss:$16 sps:$4 sm:$0xff]   ;;  %v10604_v8 = vld [vmem:[#allocation13 + $0x8] ss:$16 sps:$4 sm:$0xff]  }
 0xdcb   :  { %5457 = vmatpush1.bf16.msra.mxu0 %v7822_v41  ;;  %5498 = vmatpush1.bf16.msra.mxu1 %v7824_v43  ;;  %v10622_v41 = vld [vmem:[#allocation13 + $0x44] ss:$16 sps:$4 sm:$0xff]   ;;  %v10624_v43 = vld [vmem:[#allocation13 + $0x4c] ss:$16 sps:$4 sm:$0xff]  }
 0xdcc   :  { %5458 = vmatprep.subr.bf16.mxu0 %v7831_v4  ;;  %5499 = vmatprep.subr.bf16.mxu1 %v7833_v20  ;;  %v10632_v4 = vld [vmem:[#allocation13 + $0x48] ss:$16 sps:$4 sm:$0xff]   ;;  %v10636_v20 = vld [vmem:[#allocation13 + $0x64] ss:$16 sps:$4 sm:$0xff]  }
 0xdcd   :  { %11271 = vst [vmem:[#allocation41_spill] sm:$0xff] %v10632_v4  ;;  %11272 = vst [vmem:[#allocation28_spill] sm:$0xff] %v10636_v20 }
 0xdcf   :  { %5459 = vmatpush1.bf16.msra.mxu0 %v7830_v37  ;;  %5500 = vmatpush1.bf16.msra.mxu1 %v7832_v49  ;;  %v10650_v37 = vld [vmem:[#allocation13 + $0x8c] ss:$16 sps:$4 sm:$0xff]   ;;  %v10654_v49 = vld [vmem:[#allocation13 + $0x80] ss:$16 sps:$4 sm:$0xff]  }
 0xdd0   :  { %5460 = vmatprep.subr.bf16.mxu0 %v7839_v53  ;;  %5501 = vmatprep.subr.bf16.mxu1 %v7841_v56  ;;  %11277 = vst [vmem:[#allocation35_spill] sm:$0xff] %v10650_v37  ;;  %11278 = vst [vmem:[#allocation31_spill] sm:$0xff] %v10654_v49  ;;  %v10656_v53 = vld [vmem:[#allocation13 + $0x88] ss:$16 sps:$4 sm:$0xff]   ;;  %v10660_v56 = vld [vmem:[#allocation13 + $0xa4] ss:$16 sps:$4 sm:$0xff]  }
 0xdd1   :  { %11279 = vst [vmem:[#allocation36_spill] sm:$0xff] %v10656_v53  ;;  %11280 = vst [vmem:[#allocation32_spill] sm:$0xff] %v10660_v56 }
 0xdd3   :  { %5461 = vmatpush1.bf16.msra.mxu0 %v7838_v23  ;;  %5502 = vmatpush1.bf16.msra.mxu1 %v7840_v62  ;;  %v10674_v23 = vld [vmem:[#allocation13 + $0xcc] ss:$16 sps:$4 sm:$0xff]   ;;  %v10678_v62 = vld [vmem:[#allocation13 + $0xc0] ss:$16 sps:$4 sm:$0xff]  }
 0xdd4   :  { %5462 = vmatprep.subr.bf16.mxu0 %v7847_v9  ;;  %5503 = vmatprep.subr.bf16.mxu1 %v7849_v12  ;;  %11285 = vst [vmem:[#allocation42_spill] sm:$0xff] %v10674_v23  ;;  %11286 = vst [vmem:[#allocation43_spill] sm:$0xff] %v10678_v62  ;;  %v10680_v9 = vld [vmem:[#allocation13 + $0xc8] ss:$16 sps:$4 sm:$0xff]   ;;  %v10684_v12 = vld [vmem:[#allocation13 + $0xe4] ss:$16 sps:$4 sm:$0xff]  }
 0xdd5   :  { %11287 = vst [vmem:[#allocation44_spill] sm:$0xff] %v10680_v9  ;;  %11288 = vst [vmem:[#allocation45_spill] sm:$0xff] %v10684_v12 }
 0xdd7   :  { %5463 = vmatpush1.bf16.msra.mxu0 %v7846_v22  ;;  %5504 = vmatpush1.bf16.msra.mxu1 %v7848_v44  ;;  %v10698_v22 = vld [vmem:[#allocation15 + $0xc] ss:$16 sps:$4 sm:$0xff]   ;;  %v10702_v44 = vld [vmem:[#allocation15] ss:$16 sps:$4 sm:$0xff]  }
 0xdd8   :  { %5464 = vmatprep.subr.bf16.mxu0 %v7855_v36  ;;  %5505 = vmatprep.subr.bf16.mxu1 %v7857_v57  ;;  %11293 = vst [vmem:[#allocation50_spill] sm:$0xff] %v10698_v22  ;;  %v10704_v36 = vld [vmem:[#allocation15 + $0x8] ss:$16 sps:$4 sm:$0xff]   ;;  %v10708_v57 = vld [vmem:[#allocation15 + $0x24] ss:$16 sps:$4 sm:$0xff]  }
 0xddb   :  { %5465 = vmatpush1.bf16.msra.mxu0 %v7854_v58  ;;  %5506 = vmatpush1.bf16.msra.mxu1 %v7856_v17  ;;  %v10724_v58 = vld [vmem:[#allocation15 + $0x4c] ss:$16 sps:$4 sm:$0xff]   ;;  %v10730_v17 = vld [vmem:[#allocation15 + $0x40] ss:$16 sps:$4 sm:$0xff]  }
 0xddc   :  { %5466 = vmatprep.subr.bf16.mxu0 %v7863_v19  ;;  %5507 = vmatprep.subr.bf16.mxu1 %v7865_v50  ;;  %v10732_v19 = vld [vmem:[#allocation15 + $0x48] ss:$16 sps:$4 sm:$0xff]   ;;  %v10736_v50 = vld [vmem:[#allocation15 + $0x64] ss:$16 sps:$4 sm:$0xff]  }
 0xddf   :  { %5467 = vmatpush1.bf16.msra.mxu0 %v7862_v47  ;;  %5508 = vmatpush1.bf16.msra.mxu1 %v7864_v31  ;;  %v10750_v47 = vld [vmem:[#allocation15 + $0x8c] ss:$16 sps:$4 sm:$0xff]   ;;  %v10754_v31 = vld [vmem:[#allocation15 + $0x80] ss:$16 sps:$4 sm:$0xff]  }
 0xde0   :  { %5468 = vmatprep.subr.bf16.mxu0 %v7871_v26  ;;  %5509 = vmatprep.subr.bf16.mxu1 %v7873_v15  ;;  %v10756_v26 = vld [vmem:[#allocation15 + $0x88] ss:$16 sps:$4 sm:$0xff]   ;;  %v10760_v15 = vld [vmem:[#allocation15 + $0xa4] ss:$16 sps:$4 sm:$0xff]  }
 0xde3   :  { %5469 = vmatpush1.bf16.msra.mxu0 %v7870_v24  ;;  %5510 = vmatpush1.bf16.msra.mxu1 %v7872_v33  ;;  %v10774_v24 = vld [vmem:[#allocation15 + $0xcc] ss:$16 sps:$4 sm:$0xff]   ;;  %v10778_v33 = vld [vmem:[#allocation15 + $0xc0] ss:$16 sps:$4 sm:$0xff]  }
 0xde4   :  { %5470 = vmatprep.subr.bf16.mxu0 %v7879_v29  ;;  %5511 = vmatprep.subr.bf16.mxu1 %v7881_v38  ;;  %v10780_v29 = vld [vmem:[#allocation15 + $0xc8] ss:$16 sps:$4 sm:$0xff]   ;;  %v10784_v38 = vld [vmem:[#allocation15 + $0xe4] ss:$16 sps:$4 sm:$0xff]  }
 0xde7   :  { %5471 = vmatpush1.bf16.msra.mxu0 %v7878_v21  ;;  %5512 = vmatpush1.bf16.msra.mxu1 %v7880_v16  ;;  %v10786_v21 = vld [vmem:[#allocation15 + $0xec] ss:$16 sps:$4 sm:$0xff]   ;;  %v10790_v16 = vld [vmem:[#allocation15 + $0xe0] ss:$16 sps:$4 sm:$0xff]  }
 0xde8   :  { %5758 = vmatprep.subr.bf16.mxu0 %v10598_v2  ;;  %5799 = vmatprep.subr.bf16.mxu1 %v10600_v51 }
 0xdea   :  { %5473 = vmatmul.mubr.bf16.vlgmr.msra.gmra.mrb[68].mxu0 %v10588_v48  ;;  %5514 = vmatmul.mubr.bf16.vlgmr.msra.gmra.mrb[92].mxu1 %v10588_v48  ;;  %v10630_v48 = vld [vmem:[#allocation13 + $0x40] ss:$16 sps:$4 sm:$0xff]  }
 0xdeb   :  { %5759 = vmatpush1.bf16.msra.mxu0 %v10602_v54  ;;  %5800 = vmatpush1.bf16.msra.mxu1 %v10604_v8 }
 0xdec   :  { %5760 = vmatprep.subr.bf16.mxu0 %v10608_v5  ;;  %5801 = vmatprep.subr.bf16.mxu1 %v10610_v46 }
 0xded   :  { %5790 = vmatprep.mubr.bf16.mxu0 %v11249_v13  ;;  %5831 = vmatprep.mubr.bf16.mxu1 %v11249_v13 }
 0xdef   :  { %5761 = vmatpush1.bf16.msra.mxu0 %v10616_v32  ;;  %5802 = vmatpush1.bf16.msra.mxu1 %v10618_v35 }
 0xdf0   :  { %5762 = vmatprep.subr.bf16.mxu0 %v10622_v41  ;;  %5803 = vmatprep.subr.bf16.mxu1 %v10624_v43 }
 0xdf3   :  { %5763 = vmatpush1.bf16.msra.mxu0 %v10630_v48  ;;  %5804 = vmatpush1.bf16.msra.mxu1 %v10632_v4 }
 0xdf4   :  { %5764 = vmatprep.subr.bf16.mxu0 %v10636_v20  ;;  %5805 = vmatprep.subr.bf16.mxu1 %v10638_v7 }
 0xdf7   :  { %5765 = vmatpush1.bf16.msra.mxu0 %v10642_v45  ;;  %5806 = vmatpush1.bf16.msra.mxu1 %v10644_v28 }
 0xdf8   :  { %5766 = vmatprep.subr.bf16.mxu0 %v10648_v1  ;;  %5807 = vmatprep.subr.bf16.mxu1 %v10650_v37 }
 0xdfb   :  { %5767 = vmatpush1.bf16.msra.mxu0 %v10654_v49  ;;  %5808 = vmatpush1.bf16.msra.mxu1 %v10656_v53 }
 0xdfc   :  { %5768 = vmatprep.subr.bf16.mxu0 %v10660_v56  ;;  %5809 = vmatprep.subr.bf16.mxu1 %v10662_v14 }
 0xdff   :  { %5769 = vmatpush1.bf16.msra.mxu0 %v10666_v42  ;;  %5810 = vmatpush1.bf16.msra.mxu1 %v10668_v63 }
 0xe00   :  { %5770 = vmatprep.subr.bf16.mxu0 %v10672_v11  ;;  %5811 = vmatprep.subr.bf16.mxu1 %v10674_v23 }
 0xe03   :  { %5771 = vmatpush1.bf16.msra.mxu0 %v10678_v62  ;;  %5812 = vmatpush1.bf16.msra.mxu1 %v10680_v9 }
 0xe04   :  { %5772 = vmatprep.subr.bf16.mxu0 %v10684_v12  ;;  %5813 = vmatprep.subr.bf16.mxu1 %v10686_v60 }
 0xe07   :  { %5773 = vmatpush1.bf16.msra.mxu0 %v10690_v6  ;;  %5814 = vmatpush1.bf16.msra.mxu1 %v10692_v34 }
 0xe08   :  { %6008 = vmatprep.subr.bf16.mxu0 %v10696_v39  ;;  %6049 = vmatprep.subr.bf16.mxu1 %v10698_v22 }
 0xe0a   :  { %5791 = vmatmul.mubr.bf16.vlgmr.msra.gmra.mrb[72].mxu0 %v11249_v13  ;;  %5832 = vmatmul.mubr.bf16.vlgmr.msra.gmra.mrb[96].mxu1 %v11249_v13 }
 0xe0b   :  { %6009 = vmatpush1.bf16.msra.mxu0 %v10702_v44  ;;  %6050 = vmatpush1.bf16.msra.mxu1 %v10704_v36 }
 0xe0c   :  { %6010 = vmatprep.subr.bf16.mxu0 %v10708_v57  ;;  %6051 = vmatprep.subr.bf16.mxu1 %v10710_v59 }
 0xe0d   :  { %6040 = vmatprep.mubr.bf16.mxu0 %v11249_v13  ;;  %6081 = vmatprep.mubr.bf16.mxu1 %v11249_v13 }
 0xe0f   :  { %6011 = vmatpush1.bf16.msra.mxu0 %v10716_v30  ;;  %6052 = vmatpush1.bf16.msra.mxu1 %v10718_v0 }
 0xe10   :  { %6012 = vmatprep.subr.bf16.mxu0 %v10722_v27  ;;  %6053 = vmatprep.subr.bf16.mxu1 %v10724_v58 }
 0xe13   :  { %6013 = vmatpush1.bf16.msra.mxu0 %v10730_v17  ;;  %6054 = vmatpush1.bf16.msra.mxu1 %v10732_v19 }
 0xe14   :  { %6014 = vmatprep.subr.bf16.mxu0 %v10736_v50  ;;  %6055 = vmatprep.subr.bf16.mxu1 %v10738_v52 }
 0xe17   :  { %6015 = vmatpush1.bf16.msra.mxu0 %v10742_v3  ;;  %6056 = vmatpush1.bf16.msra.mxu1 %v10744_v25 }
 0xe18   :  { %6016 = vmatprep.subr.bf16.mxu0 %v10748_v61  ;;  %6057 = vmatprep.subr.bf16.mxu1 %v10750_v47 }
 0xe1b   :  { %6017 = vmatpush1.bf16.msra.mxu0 %v10754_v31  ;;  %6058 = vmatpush1.bf16.msra.mxu1 %v10756_v26 }
 0xe1c   :  { %6018 = vmatprep.subr.bf16.mxu0 %v10760_v15  ;;  %6059 = vmatprep.subr.bf16.mxu1 %v10762_v10 }
 0xe1f   :  { %6019 = vmatpush1.bf16.msra.mxu0 %v10766_v18  ;;  %6060 = vmatpush1.bf16.msra.mxu1 %v10768_v55  ;;  %v10792_v18 = vld [vmem:[#allocation15 + $0xe8] ss:$16 sps:$4 sm:$0xff]  }
 0xe20   :  { %6020 = vmatprep.subr.bf16.mxu0 %v10772_v40  ;;  %6061 = vmatprep.subr.bf16.mxu1 %v10774_v24 }
 0xe23   :  { %6021 = vmatpush1.bf16.msra.mxu0 %v10778_v33  ;;  %6062 = vmatpush1.bf16.msra.mxu1 %v10780_v29 }
 0xe24   :  { %6022 = vmatprep.subr.bf16.mxu0 %v10784_v38  ;;  %6063 = vmatprep.subr.bf16.mxu1 %v10786_v21 }
 0xe27   :  { %6023 = vmatpush1.bf16.msra.mxu0 %v10790_v16  ;;  %6064 = vmatpush1.bf16.msra.mxu1 %v10792_v18 }
 0xe28   :  { %6159 = vmatprep.subr.bf16.mxu0 %v10598_v2  ;;  %6200 = vmatprep.subr.bf16.mxu1 %v10600_v51 }
 0xe2a   :  { %6041 = vmatmul.mubr.bf16.vlgmr.msra.gmra.mrb[76].mxu0 %v11249_v13  ;;  %6082 = vmatmul.mubr.bf16.vlgmr.msra.gmra.mrb[100].mxu1 %v11249_v13 }
 0xe2b   :  { %6160 = vmatpush1.bf16.msra.mxu0 %v10602_v54  ;;  %6201 = vmatpush1.bf16.msra.mxu1 %v10604_v8 }
 0xe2c   :  { %6161 = vmatprep.subr.bf16.mxu0 %v10608_v5  ;;  %6202 = vmatprep.subr.bf16.mxu1 %v10610_v46 }
 0xe2d   :  { %6191 = vmatprep.mubr.bf16.mxu0 %v11249_v13  ;;  %6232 = vmatprep.mubr.bf16.mxu1 %v11249_v13 }
 0xe2f   :  { %6162 = vmatpush1.bf16.msra.mxu0 %v10616_v32  ;;  %6203 = vmatpush1.bf16.msra.mxu1 %v10618_v35 }
 0xe30   :  { %6163 = vmatprep.subr.bf16.mxu0 %v10622_v41  ;;  %6204 = vmatprep.subr.bf16.mxu1 %v10624_v43 }
 0xe33   :  { %6164 = vmatpush1.bf16.msra.mxu0 %v10630_v48  ;;  %6205 = vmatpush1.bf16.msra.mxu1 %v10632_v4 }
 0xe34   :  { %6165 = vmatprep.subr.bf16.mxu0 %v10636_v20  ;;  %6206 = vmatprep.subr.bf16.mxu1 %v10638_v7 }
 0xe37   :  { %6166 = vmatpush1.bf16.msra.mxu0 %v10642_v45  ;;  %6207 = vmatpush1.bf16.msra.mxu1 %v10644_v28 }
 0xe38   :  { %6167 = vmatprep.subr.bf16.mxu0 %v10648_v1  ;;  %6208 = vmatprep.subr.bf16.mxu1 %v10650_v37 }
 0xe3b   :  { %6168 = vmatpush1.bf16.msra.mxu0 %v10654_v49  ;;  %6209 = vmatpush1.bf16.msra.mxu1 %v10656_v53 }
 0xe3c   :  { %6169 = vmatprep.subr.bf16.mxu0 %v10660_v56  ;;  %6210 = vmatprep.subr.bf16.mxu1 %v10662_v14 }
 0xe3f   :  { %6170 = vmatpush1.bf16.msra.mxu0 %v10666_v42  ;;  %6211 = vmatpush1.bf16.msra.mxu1 %v10668_v63  ;;  %v11296_v63 = vld [vmem:[#allocation25_spill] sm:$0xff] }
 0xe40   :  { %6171 = vmatprep.subr.bf16.mxu0 %v10672_v11  ;;  %6212 = vmatprep.subr.bf16.mxu1 %v10674_v23  ;;  %v4676_v23 = vld [vmem:[%s11095_s12] sm:$0xff] }
 0xe41   :  { %v11295_v11 = vld [vmem:[#allocation26_spill] sm:$0xff] }
 0xe43   :  { %6172 = vmatpush1.bf16.msra.mxu0 %v10678_v62  ;;  %6213 = vmatpush1.bf16.msra.mxu1 %v10680_v9  ;;  %v4681_v62 = vrot.slane %v4676_v23, %v11295_v11  ;;  %v11297_v9 = vsub.s32 2, %v11296_v63 }
 0xe44   :  { %6173 = vmatprep.subr.bf16.mxu0 %v10684_v12  ;;  %6214 = vmatprep.subr.bf16.mxu1 %v10686_v60  ;;  %v11298_v12 = vld [vmem:[#allocation27_spill] sm:$0xff]  ;;  %v11299_v60 = vsub.s32 3, %v11296_v63 }
 0xe45   :  { %v4689_v42 = vrot.slane %v4676_v23, %v11297_v9  ;;  %v4685_v14 = vrot.slane %v4676_v23, %v11298_v12  ;;  %v11300_v9 = vsub.s32 4, %v11296_v63 }
 0xe47   :  { %6174 = vmatpush1.bf16.msra.mxu0 %v10690_v6  ;;  %6215 = vmatpush1.bf16.msra.mxu1 %v10692_v34  ;;  %v4693_v6 = vrot.slane %v4676_v23, %v11299_v60  ;;  %v4697_v12 = vrot.slane %v4676_v23, %v11300_v9  ;;  %v11301_v60 = vsub.s32 6, %v11296_v63 }
 0xe48   :  { %6265 = vmatprep.subr.bf16.mxu0 %v10696_v39  ;;  %6306 = vmatprep.subr.bf16.mxu1 %v10698_v22 }
 0xe49   :  { %v4705_v20 = vrot.slane %v4676_v23, %v11301_v60 }
 0xe7d   :  { %v5392_v56 = vpop.f32.mrb[64].mxu0  ;;  %v5433_v34 = vpop.f32.mrb[88].mxu1 }
 0xe7e   :  { %v5393_v53 = vadd.f32 %v5392_v56, %v4681_v62  ;;  %v5434_v39 = vadd.f32 %v5433_v34, %v4689_v42  ;;  %v5394_v49 = vpop.f32.mrb[65].mxu0  ;;  %v5435_v22 = vpop.f32.mrb[89].mxu1  ;;  %v11302_v56 = vsub.s32 5, %v11296_v63 }
 0xe7f   :  { %v5395_v37 = vadd.f32 %v5394_v49, %v4685_v14  ;;  %v5436_v1 = vadd.f32 %v5435_v22, %v4693_v6  ;;  %v5396_v28 = vpop.f32.mrb[66].mxu0  ;;  %v5437_v45 = vpop.f32.mrb[90].mxu1  ;;  %v11303_v49 = vsub.s32 7, %v11296_v63 }
 0xe80   :  { %5522 = vst [vmem:[#allocation2] sm:$0xff] %v5393_v53  ;;  %5524 = vst [vmem:[#allocation2 + $0x10] sm:$0xff] %v5434_v39  ;;  %v5397_v11 = vpop.f32.mrb[67].mxu0  ;;  %v5438_v7 = vpop.f32.mrb[91].mxu1  ;;  %v4701_v42 = vrot.slane %v4676_v23, %v11302_v56 }
 0xe81   :  { %5523 = vst [vmem:[#allocation2 + $0x8] sm:$0xff] %v5395_v37  ;;  %5525 = vst [vmem:[#allocation2 + $0x18] sm:$0xff] %v5436_v1  ;;  %v4709_v14 = vrot.slane %v4676_v23, %v11303_v49 }
 0xe87   :  { %v5594_v9 = vld [vmem:[#allocation2] sm:$0x3] }
 0xe88   :  { %v5595_v56 = vld [vmem:[#allocation2 + $0x8] sm:$0x3] }
 0xebd   :  { %v5474_v28 = vpop.f32.mrb[68].mxu0  ;;  %v5515_v45 = vpop.f32.mrb[92].mxu1 }
 0xebe   :  { %v5475_v53 = vadd.f32 %v5474_v28, %v4697_v12  ;;  %v5516_v62 = vadd.f32 %v5515_v45, %v4705_v20  ;;  %v5476_v11 = vpop.f32.mrb[69].mxu0  ;;  %v5517_v7 = vpop.f32.mrb[93].mxu1 }
 0xebf   :  { %v5477_v37 = vadd.f32 %v5476_v11, %v4701_v42  ;;  %v5518_v1 = vadd.f32 %v5517_v7, %v4709_v14  ;;  %v5478_v6 = vpop.f32.mrb[70].mxu0  ;;  %v5519_v34 = vpop.f32.mrb[94].mxu1 }
 0xec0   :  { %5526 = vst [vmem:[#allocation2 + $0x20] sm:$0xff] %v5475_v53  ;;  %5528 = vst [vmem:[#allocation2 + $0x30] sm:$0xff] %v5516_v62  ;;  %v5479_v39 = vpop.f32.mrb[71].mxu0  ;;  %v5520_v22 = vpop.f32.mrb[95].mxu1  ;;  %v5597_v53 = vld [vmem:[#allocation2 + $0x18] sm:$0x3] }
 0xec1   :  { %5527 = vst [vmem:[#allocation2 + $0x28] sm:$0xff] %v5477_v37  ;;  %5529 = vst [vmem:[#allocation2 + $0x38] sm:$0xff] %v5518_v1  ;;  %v5596_v37 = vld [vmem:[#allocation2 + $0x10] sm:$0x3] }
 0xec7   :  { %v5846_v4 = vld [vmem:[#allocation2 + $0x30] sm:$0xc0] }
 0xedd   :  { %v5792_v60 = vpop.f32.mrb[72].mxu0  ;;  %v5833_v63 = vpop.f32.mrb[96].mxu1 }
 0xede   :  { %v5840_v23 = vadd.f32 %v5792_v60, %v5594_v9  ;;  %v5794_v49 = vpop.f32.mrb[73].mxu0  ;;  %v5835_v12 = vpop.f32.mrb[97].mxu1  ;;  %v5842_v6 = vadd.f32 %v5833_v63, %v5596_v37 }
 0xedf   :  { %v5841_v20 = vadd.f32 %v5794_v49, %v5595_v56  ;;  %v5796_v28 = vpop.f32.mrb[74].mxu0  ;;  %v5837_v45 = vpop.f32.mrb[98].mxu1  ;;  %v5843_v62 = vadd.f32 %v5835_v12, %v5597_v53  ;;  %v5844_v53 = vld [vmem:[#allocation2 + $0x20] sm:$0xc0] }
 0xee0   :  { %v7946_v42 = vmul.f32 -1.442695, %v5840_v23  ;;  %v5797_v14 = vpop.f32.mrb[75].mxu0  ;;  %v5838_v11 = vpop.f32.mrb[99].mxu1 }
 0xee1   :  { %v7947_v7 = vmul.f32 -1.442695, %v5841_v20  ;;  %v7948_v1 = vmul.f32 -1.442695, %v5843_v62 }
 0xee2   :  { %8813 = vpow2.f32 %v7946_v42 }
 0xee3   :  { %8815 = vpow2.f32 %v7947_v7 }
 0xee4   :  { %8817 = vpow2.f32 %v7948_v1 }
 0xee5   :  { %8819 = vtanh.f32 %v5842_v6 }
 0xeec   :  { %v8814_v34 = vpop.eup %8813 }
 0xeed   :  { %v8816_v39 = vpop.eup %8815  ;;  %v6109_v22 = vadd.f32 1.0, %v8814_v34  ;;  %v5845_v34 = vld [vmem:[#allocation2 + $0x28] sm:$0xc0] }
 0xeee   :  { %v6115_v9 = vadd.f32 1.0, %v8816_v39  ;;  %v8818_v60 = vpop.eup %8817 }
 0xeef   :  { %8821 = vrcp.f32 %v6109_v22  ;;  %v8820_v23 = vpop.eup %8819  ;;  %v6122_v28 = vadd.f32 1.0, %v8818_v60 }
 0xef0   :  { %8823 = vrcp.f32 %v6115_v9 }
 0xef1   :  { %8825 = vrcp.f32 %v6122_v28 }
 0xef9   :  { %v8822_v56 = vpop.eup %8821 }
 0xefa   :  { %v8824_v49 = vpop.eup %8823  ;;  %v6126_v20 = vmul.f32 %v8822_v56, %v8820_v23 }
 0xefb   :  { %v6125_v45 = vmul.f32 0.0, %v8824_v49  ;;  %v5847_v49 = vld [vmem:[#allocation2 + $0x38] sm:$0xc0]  ;;  %v8826_v28 = vpop.eup %8825 }
 0xefd   :  { %v10853_v42 = vadd.f32 %v6126_v20, %v6125_v45  ;;  %v6042_v12 = vpop.f32.mrb[76].mxu0  ;;  %v6083_v14 = vpop.f32.mrb[100].mxu1 }
 0xefe   :  { %v6094_v63 = vrot.slane %v6042_v12, 2  ;;  %v6044_v11 = vpop.f32.mrb[77].mxu0  ;;  %v6085_v7 = vpop.f32.mrb[101].mxu1  ;;  %v6096_v45 = vrot.slane %v6083_v14, 2 }
 0xeff   :  { %11304 = vst [vmem:[#allocation25_spill] sm:$0xff] %v10853_v42  ;;  %8827 = vtanh.f32 %v10853_v42  ;;  %v6095_v62 = vrot.slane %v6044_v11, 2  ;;  %v6046_v37 = vpop.f32.mrb[78].mxu0  ;;  %v6087_v1 = vpop.f32.mrb[102].mxu1  ;;  %v6097_v56 = vrot.slane %v6085_v7, 2 }
 0xf00   :  { %v6102_v6 = vadd.f32 %v6094_v63, %v5844_v53  ;;  %v6047_v39 = vpop.f32.mrb[79].mxu0  ;;  %v6088_v22 = vpop.f32.mrb[103].mxu1  ;;  %v6104_v37 = vadd.f32 %v6096_v45, %v5846_v4  ;;  %v11308_v45 = vld [vmem:[#allocation33_spill] sm:$0xff] }
 0xf01   :  { %v6103_v9 = vadd.f32 %v6095_v62, %v5845_v34  ;;  %v6105_v20 = vadd.f32 %v6097_v56, %v5847_v49 }
 0xf02   :  { %v7949_v60 = vmul.f32 -1.442695, %v6102_v6 }
 0xf03   :  { %v7950_v23 = vmul.f32 -1.442695, %v6103_v9  ;;  %v7951_v11 = vmul.f32 -1.442695, %v6105_v20 }
 0xf04   :  { %8829 = vpow2.f32 %v7949_v60  ;;  %v11305_v60 = vld [vmem:[#allocation51_spill] sm:$0xff] }
 0xf05   :  { %8831 = vpow2.f32 %v7950_v23 }
 0xf06   :  { %8833 = vpow2.f32 %v7951_v11  ;;  %v11310_v11 = vld [vmem:[#allocation34_spill] sm:$0xff] }
 0xf07   :  { %8835 = vtanh.f32 %v6104_v37  ;;  %v11311_v37 = vld [vmem:[#allocation30_spill] sm:$0xff] }
 0xf09   :  { %v8828_v12 = vpop.eup %8827 }
 0xf0a   :  { %v6129_v42 = vmul.f32 %v8828_v12, %v8826_v28  ;;  %v11309_v12 = vld [vmem:[#allocation29_spill] sm:$0xff] }
 0xf0c   :  { %v6158_v1 = vpack.c.bf16 %v6129_v42, %v6129_v42 }
 0xf0e   :  { %v8830_v63 = vpop.eup %8829  ;;  %6192 = vmatmul.mubr.bf16.vlgmr.msra.gmra.mrb[80].mxu0 %v6158_v1  ;;  %6233 = vmatmul.mubr.bf16.vlgmr.msra.gmra.mrb[104].mxu1 %v6158_v1  ;;  %v11312_v1 = vld [vmem:[#allocation35_spill] sm:$0xff] }
 0xf0f   :  { %v8832_v53 = vpop.eup %8831  ;;  %v6133_v62 = vadd.f32 1.0, %v8830_v63  ;;  %6266 = vmatpush1.bf16.msra.mxu0 %v10702_v44  ;;  %6307 = vmatpush1.bf16.msra.mxu1 %v10704_v36  ;;  %v11313_v63 = vld [vmem:[#allocation31_spill] sm:$0xff] }
 0xf10   :  { %v6139_v7 = vadd.f32 1.0, %v8832_v53  ;;  %6267 = vmatprep.subr.bf16.mxu0 %v10708_v57  ;;  %6308 = vmatprep.subr.bf16.mxu1 %v10710_v59  ;;  %v8834_v4 = vpop.eup %8833  ;;  %v11314_v53 = vld [vmem:[#allocation36_spill] sm:$0xff] }
 0xf11   :  { %8837 = vrcp.f32 %v6133_v62  ;;  %6297 = vmatprep.mubr.bf16.mxu0 %v11249_v13  ;;  %6338 = vmatprep.mubr.bf16.mxu1 %v11249_v13  ;;  %v8836_v42 = vpop.eup %8835  ;;  %v6146_v39 = vadd.f32 1.0, %v8834_v4  ;;  %v11315_v62 = vld [vmem:[#allocation32_spill] sm:$0xff]  ;;  %v11317_v4 = vld [vmem:[#allocation38_spill] sm:$0xff] }
 0xf12   :  { %8839 = vrcp.f32 %v6139_v7  ;;  %v11316_v7 = vld [vmem:[#allocation37_spill] sm:$0xff] }
 0xf13   :  { %6268 = vmatpush1.bf16.msra.mxu0 %v10716_v30  ;;  %6309 = vmatpush1.bf16.msra.mxu1 %v10718_v0  ;;  %8841 = vrcp.f32 %v6146_v39  ;;  %v11322_v39 = vld [vmem:[#allocation44_spill] sm:$0xff] }
 0xf14   :  { %6269 = vmatprep.subr.bf16.mxu0 %v10722_v27  ;;  %6310 = vmatprep.subr.bf16.mxu1 %v10724_v58 }
 0xf17   :  { %6270 = vmatpush1.bf16.msra.mxu0 %v10730_v17  ;;  %6311 = vmatpush1.bf16.msra.mxu1 %v10732_v19 }
 0xf18   :  { %6271 = vmatprep.subr.bf16.mxu0 %v10736_v50  ;;  %6312 = vmatprep.subr.bf16.mxu1 %v10738_v52 }
 0xf1b   :  { %v8838_v14 = vpop.eup %8837  ;;  %6272 = vmatpush1.bf16.msra.mxu0 %v10742_v3  ;;  %6313 = vmatpush1.bf16.msra.mxu1 %v10744_v25 }
 0xf1c   :  { %v8840_v6 = vpop.eup %8839  ;;  %v6150_v34 = vmul.f32 %v8838_v14, %v8836_v42  ;;  %6273 = vmatprep.subr.bf16.mxu0 %v10748_v61  ;;  %6314 = vmatprep.subr.bf16.mxu1 %v10750_v47  ;;  %v11318_v42 = vld [vmem:[#allocation39_spill] sm:$0xff]  ;;  %v11319_v14 = vld [vmem:[#allocation40_spill] sm:$0xff] }
 0xf1d   :  { %v6149_v22 = vmul.f32 0.0, %v8840_v6  ;;  %v8842_v23 = vpop.eup %8841  ;;  %v11320_v6 = vld [vmem:[#allocation42_spill] sm:$0xff] }
 0xf1f   :  { %v10874_v9 = vadd.f32 %v6150_v34, %v6149_v22  ;;  %6274 = vmatpush1.bf16.msra.mxu0 %v10754_v31  ;;  %6315 = vmatpush1.bf16.msra.mxu1 %v10756_v26  ;;  %v11321_v34 = vld [vmem:[#allocation43_spill] sm:$0xff]  ;;  %v11323_v22 = vld [vmem:[#allocation45_spill] sm:$0xff] }
 0xf20   :  { %6275 = vmatprep.subr.bf16.mxu0 %v10760_v15  ;;  %6316 = vmatprep.subr.bf16.mxu1 %v10762_v10 }
 0xf21   :  { %8843 = vtanh.f32 %v10874_v9 }
 0xf23   :  { %6276 = vmatpush1.bf16.msra.mxu0 %v11305_v60  ;;  %6317 = vmatpush1.bf16.msra.mxu1 %v10768_v55 }
 0xf24   :  { %6277 = vmatprep.subr.bf16.mxu0 %v10772_v40  ;;  %6318 = vmatprep.subr.bf16.mxu1 %v10774_v24 }
 0xf27   :  { %6278 = vmatpush1.bf16.msra.mxu0 %v10778_v33  ;;  %6319 = vmatpush1.bf16.msra.mxu1 %v10780_v29 }
 0xf28   :  { %6279 = vmatprep.subr.bf16.mxu0 %v10784_v38  ;;  %6320 = vmatprep.subr.bf16.mxu1 %v10786_v21 }
 0xf2b   :  { %v8844_v56 = vpop.eup %8843  ;;  %6280 = vmatpush1.bf16.msra.mxu0 %v10790_v16  ;;  %6321 = vmatpush1.bf16.msra.mxu1 %v10792_v18 }
 0xf2c   :  { %v6153_v49 = vmul.f32 %v8844_v56, %v8842_v23  ;;  %6425 = vmatprep.subr.bf16.mxu0 %v10598_v2  ;;  %6466 = vmatprep.subr.bf16.mxu1 %v10600_v51  ;;  %v11324_v23 = vld [vmem:[#allocation46_spill] sm:$0xff]  ;;  %v11325_v56 = vld [vmem:[#allocation47_spill] sm:$0xff] }
 0xf2e   :  { %v6261_v20 = vpack.c.bf16 %v6153_v49, %v6153_v49  ;;  %v11326_v49 = vld [vmem:[#allocation48_spill] sm:$0xff] }
 0xf30   :  { %v6263_v28 = vrot.slane %v6261_v20, 3  ;;  %v11327_v20 = vld [vmem:[#allocation49_spill] sm:$0xff] }
 0xf32   :  { %6298 = vmatmul.mubr.bf16.vlgmr.msra.gmra.mrb[84].mxu0 %v6263_v28  ;;  %6339 = vmatmul.mubr.bf16.vlgmr.msra.gmra.mrb[108].mxu1 %v6263_v28  ;;  %v11328_v28 = vld [vmem:[#allocation50_spill] sm:$0xff] }
 0xf33   :  { %6426 = vmatpush1.bf16.msra.mxu0 %v10602_v54  ;;  %6467 = vmatpush1.bf16.msra.mxu1 %v10604_v8  ;;  %v11306_v54 = vld [vmem:[#allocation41_spill] sm:$0xff]  ;;  %v11307_v8 = vld [vmem:[#allocation28_spill] sm:$0xff] }
 0xf34   :  { %6427 = vmatprep.subr.bf16.mxu0 %v10608_v5  ;;  %6468 = vmatprep.subr.bf16.mxu1 %v10610_v46 }
 0xf35   :  { %6457 = vmatprep.mubr.bf16.mxu0 %v11249_v13  ;;  %6498 = vmatprep.mubr.bf16.mxu1 %v11249_v13 }
 0xf37   :  { %6428 = vmatpush1.bf16.msra.mxu0 %v10616_v32  ;;  %6469 = vmatpush1.bf16.msra.mxu1 %v10618_v35 }
 0xf38   :  { %6429 = vmatprep.subr.bf16.mxu0 %v10622_v41  ;;  %6470 = vmatprep.subr.bf16.mxu1 %v10624_v43 }
 0xf3b   :  { %6430 = vmatpush1.bf16.msra.mxu0 %v10630_v48  ;;  %6471 = vmatpush1.bf16.msra.mxu1 %v11306_v54 }
 0xf3c   :  { %6431 = vmatprep.subr.bf16.mxu0 %v11307_v8  ;;  %6472 = vmatprep.subr.bf16.mxu1 %v11308_v45 }
 0xf3f   :  { %6432 = vmatpush1.bf16.msra.mxu0 %v11309_v12  ;;  %6473 = vmatpush1.bf16.msra.mxu1 %v11310_v11 }
 0xf40   :  { %6433 = vmatprep.subr.bf16.mxu0 %v11311_v37  ;;  %6474 = vmatprep.subr.bf16.mxu1 %v11312_v1 }
 0xf43   :  { %6434 = vmatpush1.bf16.msra.mxu0 %v11313_v63  ;;  %6475 = vmatpush1.bf16.msra.mxu1 %v11314_v53  ;;  %v6155_v63 = vld [vmem:[#allocation2 + $0x8] sm:$0xc] }
 0xf44   :  { %6435 = vmatprep.subr.bf16.mxu0 %v11315_v62  ;;  %6476 = vmatprep.subr.bf16.mxu1 %v11316_v7 }
 0xf47   :  { %6436 = vmatpush1.bf16.msra.mxu0 %v11317_v4  ;;  %6477 = vmatpush1.bf16.msra.mxu1 %v11318_v42 }
 0xf48   :  { %6437 = vmatprep.subr.bf16.mxu0 %v11319_v14  ;;  %6478 = vmatprep.subr.bf16.mxu1 %v11320_v6 }
 0xf4b   :  { %6438 = vmatpush1.bf16.msra.mxu0 %v11321_v34  ;;  %6479 = vmatpush1.bf16.msra.mxu1 %v11322_v39  ;;  %v6154_v34 = vld [vmem:[#allocation2] sm:$0xc] }
 0xf4c   :  { %6439 = vmatprep.subr.bf16.mxu0 %v11323_v22  ;;  %6480 = vmatprep.subr.bf16.mxu1 %v11324_v23 }
 0xf4f   :  { %6440 = vmatpush1.bf16.msra.mxu0 %v11325_v56  ;;  %6481 = vmatpush1.bf16.msra.mxu1 %v11326_v49 }
 0xf50   :  { %6531 = vmatprep.subr.bf16.mxu0 %v11327_v20  ;;  %6572 = vmatprep.subr.bf16.mxu1 %v11328_v28  ;;  %v6157_v28 = vld [vmem:[#allocation2 + $0x18] sm:$0xc] }
 0xfe1   :  { %v6193_v42 = vpop.f32.mrb[80].mxu0  ;;  %v6234_v14 = vpop.f32.mrb[104].mxu1 }
 0xfe2   :  { %v6245_v4 = vrot.slane %v6193_v42, 6  ;;  %v6195_v6 = vpop.f32.mrb[81].mxu0  ;;  %v6236_v7 = vpop.f32.mrb[105].mxu1  ;;  %v6247_v12 = vrot.slane %v6234_v14, 6  ;;  %v6156_v42 = vld [vmem:[#allocation2 + $0x10] sm:$0xc] }
 0xfe3   :  { %v6246_v62 = vrot.slane %v6195_v6, 6  ;;  %v6197_v39 = vpop.f32.mrb[82].mxu0  ;;  %v6238_v53 = vpop.f32.mrb[106].mxu1  ;;  %v6248_v11 = vrot.slane %v6236_v7, 6  ;;  %v11329_v7 = vld [vmem:[#allocation25_spill] sm:$0xff] }
 0xfe4   :  { %v6253_v22 = vadd.f32 %v6245_v4, %v6154_v34  ;;  %v6198_v23 = vpop.f32.mrb[83].mxu0  ;;  %v6239_v1 = vpop.f32.mrb[107].mxu1  ;;  %v6255_v8 = vadd.f32 %v6247_v12, %v6156_v42 }
 0xfe5   :  { %v6254_v56 = vadd.f32 %v6246_v62, %v6155_v63  ;;  %v6256_v20 = vadd.f32 %v6248_v11, %v6157_v28 }
 0xfe6   :  { %v7952_v37 = vmul.f32 -1.442695, %v6253_v22 }
 0xfe7   :  { %v7953_v49 = vmul.f32 -1.442695, %v6254_v56  ;;  %v7954_v45 = vmul.f32 -1.442695, %v6256_v20  ;;  %v6257_v56 = vld [vmem:[#allocation2 + $0x20] sm:$0x30] }
 0xfe8   :  { %8845 = vpow2.f32 %v7952_v37  ;;  %v6383_v37 = vrot.slane %v11329_v7, 6 }
 0xfe9   :  { %8847 = vpow2.f32 %v7953_v49 }
 0xfea   :  { %8849 = vpow2.f32 %v7954_v45 }
 0xfeb   :  { %8851 = vtanh.f32 %v6255_v8 }
 0xff2   :  { %v8846_v54 = vpop.eup %8845 }
 0xff3   :  { %v8848_v6 = vpop.eup %8847  ;;  %v6366_v39 = vadd.f32 1.0, %v8846_v54 }
 0xff4   :  { %v6372_v53 = vadd.f32 1.0, %v8848_v6  ;;  %v8850_v1 = vpop.eup %8849  ;;  %v6258_v6 = vld [vmem:[#allocation2 + $0x28] sm:$0x30] }
 0xff5   :  { %8853 = vrcp.f32 %v6366_v39  ;;  %v8852_v63 = vpop.eup %8851  ;;  %v6379_v11 = vadd.f32 1.0, %v8850_v1 }
 0xff6   :  { %8855 = vrcp.f32 %v6372_v53 }
 0xff7   :  { %8857 = vrcp.f32 %v6379_v11 }
 0xfff   :  { %v8854_v62 = vpop.eup %8853 }
0x1000   :  { %v8856_v4 = vpop.eup %8855  ;;  %v6386_v34 = vmul.f32 %v8854_v62, %v8852_v63 }
0x1001   :  { %v6385_v14 = vmul.f32 %v8856_v4, %v6383_v37  ;;  %v8858_v37 = vpop.eup %8857  ;;  %v6260_v4 = vld [vmem:[#allocation2 + $0x38] sm:$0x30] }
0x1003   :  { %v10928_v22 = vadd.f32 %v6386_v34, %v6385_v14 }
0x1005   :  { %11330 = vst [vmem:[#allocation51_spill] sm:$0xff] %v10928_v22  ;;  %v6299_v12 = vpop.f32.mrb[84].mxu0  ;;  %v6340_v23 = vpop.f32.mrb[108].mxu1  ;;  %8859 = vtanh.f32 %v10928_v22 }
0x1006   :  { %v6351_v54 = vrot.slane %v6299_v12, 4  ;;  %v6301_v8 = vpop.f32.mrb[85].mxu0  ;;  %v6342_v45 = vpop.f32.mrb[109].mxu1  ;;  %v6353_v14 = vrot.slane %v6340_v23, 4 }
0x1007   :  { %v6352_v49 = vrot.slane %v6301_v8, 4  ;;  %v6303_v20 = vpop.f32.mrb[86].mxu0  ;;  %v6344_v28 = vpop.f32.mrb[110].mxu1  ;;  %v6354_v7 = vrot.slane %v6342_v45, 4  ;;  %v6259_v8 = vld [vmem:[#allocation2 + $0x30] sm:$0x30] }
0x1008   :  { %v6359_v42 = vadd.f32 %v6351_v54, %v6257_v56  ;;  %v6304_v39 = vpop.f32.mrb[87].mxu0  ;;  %v6345_v53 = vpop.f32.mrb[111].mxu1  ;;  %v6361_v28 = vadd.f32 %v6353_v14, %v6259_v8 }
0x1009   :  { %v6360_v1 = vadd.f32 %v6352_v49, %v6258_v6  ;;  %v6362_v11 = vadd.f32 %v6354_v7, %v6260_v4  ;;  %v6417_v53 = vld [vmem:[#allocation2] sm:$0x30] }
0x100a   :  { %v7955_v63 = vmul.f32 -1.442695, %v6359_v42 }
0x100b   :  { %v7956_v62 = vmul.f32 -1.442695, %v6360_v1  ;;  %v7957_v20 = vmul.f32 -1.442695, %v6362_v11 }
0x100c   :  { %8861 = vpow2.f32 %v7955_v63 }
0x100d   :  { %8863 = vpow2.f32 %v7956_v62 }
0x100e   :  { %8865 = vpow2.f32 %v7957_v20  ;;  %v6420_v20 = vld [vmem:[#allocation2 + $0x18] sm:$0x30] }
0x100f   :  { %v8860_v34 = vpop.eup %8859  ;;  %8867 = vtanh.f32 %v6361_v28 }
0x1010   :  { %v6389_v12 = vmul.f32 %v8860_v34, %v8858_v37  ;;  %v6418_v37 = vld [vmem:[#allocation2 + $0x8] sm:$0x30] }
0x1012   :  { %v6421_v22 = vpack.c.bf16 %v6389_v12, %v6389_v12 }
0x1014   :  { %v6423_v54 = vrot.slane %v6421_v22, 1 }
0x1016   :  { %v8862_v56 = vpop.eup %8861  ;;  %6458 = vmatmul.mubr.bf16.vlgmr.msra.gmra.mrb[88].mxu0 %v6423_v54  ;;  %6499 = vmatmul.mubr.bf16.vlgmr.msra.gmra.mrb[112].mxu1 %v6423_v54 }
0x1017   :  { %v8864_v49 = vpop.eup %8863  ;;  %v6393_v42 = vadd.f32 1.0, %v8862_v56  ;;  %6532 = vmatpush1.bf16.msra.mxu0 %v10702_v44  ;;  %6573 = vmatpush1.bf16.msra.mxu1 %v10704_v36  ;;  %v6419_v56 = vld [vmem:[#allocation2 + $0x10] sm:$0x30] }
0x1018   :  { %v6399_v45 = vadd.f32 1.0, %v8864_v49  ;;  %6533 = vmatprep.subr.bf16.mxu0 %v10708_v57  ;;  %6574 = vmatprep.subr.bf16.mxu1 %v10710_v59  ;;  %v8866_v44 = vpop.eup %8865  ;;  %v6410_v59 = vrot.slane %v10874_v9, 2  ;;  %v11353_v9 = vld [vmem:[#allocation50_spill] sm:$0xff] }
0x1019   :  { %8869 = vrcp.f32 %v6393_v42  ;;  %6563 = vmatprep.mubr.bf16.mxu0 %v11249_v13  ;;  %6604 = vmatprep.mubr.bf16.mxu1 %v11249_v13  ;;  %v8868_v36 = vpop.eup %8867 }
0x101a   :  { %8871 = vrcp.f32 %v6399_v45 }
0x101b   :  { %6534 = vmatpush1.bf16.msra.mxu0 %v10716_v30  ;;  %6575 = vmatpush1.bf16.msra.mxu1 %v10718_v0 }
0x101c   :  { %6535 = vmatprep.subr.bf16.mxu0 %v10722_v27  ;;  %6576 = vmatprep.subr.bf16.mxu1 %v10724_v58  ;;  %v6406_v27 = vadd.f32 1.0, %v8866_v44 }
0x101e   :  { %8873 = vrcp.f32 %v6406_v27  ;;  %v11354_v27 = vld [vmem:[#allocation51_spill] sm:$0xff] }
0x101f   :  { %6536 = vmatpush1.bf16.msra.mxu0 %v10730_v17  ;;  %6577 = vmatpush1.bf16.msra.mxu1 %v10732_v19 }
0x1020   :  { %6537 = vmatprep.subr.bf16.mxu0 %v10736_v50  ;;  %6578 = vmatprep.subr.bf16.mxu1 %v10738_v52 }
0x1023   :  { %v8870_v57 = vpop.eup %8869  ;;  %6538 = vmatpush1.bf16.msra.mxu0 %v10742_v3  ;;  %6579 = vmatpush1.bf16.msra.mxu1 %v10744_v25 }
0x1024   :  { %v8872_v30 = vpop.eup %8871  ;;  %v6413_v0 = vmul.f32 %v8870_v57, %v8868_v36  ;;  %6539 = vmatprep.subr.bf16.mxu0 %v10748_v61  ;;  %6580 = vmatprep.subr.bf16.mxu1 %v10750_v47  ;;  %v8989_v61 = vld [vmem:[#allocation13] ss:$16 sps:$4 sm:$0xff]   ;;  %v8990_v47 = vld [vmem:[#allocation13 + $0x8] ss:$16 sps:$4 sm:$0xff]  }
0x1025   :  { %v6412_v58 = vmul.f32 %v8872_v30, %v6410_v59 }
0x1027   :  { %v10950_v17 = vadd.f32 %v6413_v0, %v6412_v58  ;;  %6540 = vmatpush1.bf16.msra.mxu0 %v10754_v31  ;;  %6581 = vmatpush1.bf16.msra.mxu1 %v10756_v26  ;;  %v11335_v31 = vld [vmem:[#allocation34_spill] sm:$0xff]  ;;  %v6649_v58 = vrot.slane %v11354_v27, 6 }
0x1028   :  { %6541 = vmatprep.subr.bf16.mxu0 %v10760_v15  ;;  %6582 = vmatprep.subr.bf16.mxu1 %v10762_v10  ;;  %v8874_v19 = vpop.eup %8873  ;;  %v11336_v26 = vld [vmem:[#allocation30_spill] sm:$0xff]  ;;  %v11343_v10 = vld [vmem:[#allocation39_spill] sm:$0xff] }
0x1029   :  { %8875 = vtanh.f32 %v10950_v17  ;;  %v11342_v15 = vld [vmem:[#allocation38_spill] sm:$0xff] }
0x102b   :  { %6542 = vmatpush1.bf16.msra.mxu0 %v11305_v60  ;;  %6583 = vmatpush1.bf16.msra.mxu1 %v10768_v55  ;;  %v11345_v55 = vld [vmem:[#allocation42_spill] sm:$0xff] }
0x102c   :  { %6543 = vmatprep.subr.bf16.mxu0 %v10772_v40  ;;  %6584 = vmatprep.subr.bf16.mxu1 %v10774_v24  ;;  %v11346_v40 = vld [vmem:[#allocation43_spill] sm:$0xff]  ;;  %v11347_v24 = vld [vmem:[#allocation44_spill] sm:$0xff] }
0x102f   :  { %6544 = vmatpush1.bf16.msra.mxu0 %v10778_v33  ;;  %6585 = vmatpush1.bf16.msra.mxu1 %v10780_v29  ;;  %v11348_v33 = vld [vmem:[#allocation45_spill] sm:$0xff]  ;;  %v11349_v29 = vld [vmem:[#allocation46_spill] sm:$0xff] }
0x1030   :  { %6545 = vmatprep.subr.bf16.mxu0 %v10784_v38  ;;  %6586 = vmatprep.subr.bf16.mxu1 %v10786_v21  ;;  %v11350_v38 = vld [vmem:[#allocation47_spill] sm:$0xff]  ;;  %v11351_v21 = vld [vmem:[#allocation48_spill] sm:$0xff] }
0x1033   :  { %v8876_v50 = vpop.eup %8875  ;;  %6546 = vmatpush1.bf16.msra.mxu0 %v10790_v16  ;;  %6587 = vmatpush1.bf16.msra.mxu1 %v10792_v18  ;;  %v11344_v18 = vld [vmem:[#allocation40_spill] sm:$0xff]  ;;  %v11352_v16 = vld [vmem:[#allocation49_spill] sm:$0xff] }
0x1034   :  { %v6416_v52 = vmul.f32 %v8876_v50, %v8874_v19  ;;  %6691 = vmatprep.subr.bf16.mxu0 %v10598_v2  ;;  %6732 = vmatprep.subr.bf16.mxu1 %v10600_v51  ;;  %v11331_v2 = vld [vmem:[#allocation41_spill] sm:$0xff]  ;;  %v11332_v51 = vld [vmem:[#allocation28_spill] sm:$0xff] }
0x1036   :  { %v6527_v3 = vpack.c.bf16 %v6416_v52, %v6416_v52 }
0x1038   :  { %v6529_v25 = vrot.slane %v6527_v3, 2 }
0x103a   :  { %6564 = vmatmul.mubr.bf16.vlgmr.msra.gmra.mrb[92].mxu0 %v6529_v25  ;;  %6605 = vmatmul.mubr.bf16.vlgmr.msra.gmra.mrb[116].mxu1 %v6529_v25 }
0x103b   :  { %6692 = vmatpush1.bf16.msra.mxu0 %v8989_v61  ;;  %6733 = vmatpush1.bf16.msra.mxu1 %v8990_v47 }
0x103c   :  { %6693 = vmatprep.subr.bf16.mxu0 %v10608_v5  ;;  %6734 = vmatprep.subr.bf16.mxu1 %v10610_v46  ;;  %v11333_v5 = vld [vmem:[#allocation33_spill] sm:$0xff] }
0x103d   :  { %6723 = vmatprep.mubr.bf16.mxu0 %v11249_v13  ;;  %6764 = vmatprep.mubr.bf16.mxu1 %v11249_v13  ;;  %v11334_v46 = vld [vmem:[#allocation29_spill] sm:$0xff] }
0x103f   :  { %6694 = vmatpush1.bf16.msra.mxu0 %v10616_v32  ;;  %6735 = vmatpush1.bf16.msra.mxu1 %v10618_v35  ;;  %v11337_v32 = vld [vmem:[#allocation35_spill] sm:$0xff] }
0x1040   :  { %6695 = vmatprep.subr.bf16.mxu0 %v10622_v41  ;;  %6736 = vmatprep.subr.bf16.mxu1 %v10624_v43  ;;  %v11338_v35 = vld [vmem:[#allocation31_spill] sm:$0xff]  ;;  %v11339_v41 = vld [vmem:[#allocation36_spill] sm:$0xff] }
0x1041   :  { %v11340_v43 = vld [vmem:[#allocation32_spill] sm:$0xff] }
0x1043   :  { %6696 = vmatpush1.bf16.msra.mxu0 %v10630_v48  ;;  %6737 = vmatpush1.bf16.msra.mxu1 %v11331_v2  ;;  %v11341_v48 = vld [vmem:[#allocation37_spill] sm:$0xff] }
0x1044   :  { %6697 = vmatprep.subr.bf16.mxu0 %v11332_v51  ;;  %6738 = vmatprep.subr.bf16.mxu1 %v11333_v5 }
0x1047   :  { %6698 = vmatpush1.bf16.msra.mxu0 %v11334_v46  ;;  %6739 = vmatpush1.bf16.msra.mxu1 %v11335_v31  ;;  %v6523_v46 = vld [vmem:[#allocation2 + $0x20] sm:$0xc] }
0x1048   :  { %6699 = vmatprep.subr.bf16.mxu0 %v11336_v26  ;;  %6740 = vmatprep.subr.bf16.mxu1 %v11337_v32 }
0x104b   :  { %6700 = vmatpush1.bf16.msra.mxu0 %v11338_v35  ;;  %6741 = vmatpush1.bf16.msra.mxu1 %v11339_v41  ;;  %v6524_v41 = vld [vmem:[#allocation2 + $0x28] sm:$0xc] }
0x104c   :  { %6701 = vmatprep.subr.bf16.mxu0 %v11340_v43  ;;  %6742 = vmatprep.subr.bf16.mxu1 %v11341_v48 }
0x104f   :  { %6702 = vmatpush1.bf16.msra.mxu0 %v11342_v15  ;;  %6743 = vmatpush1.bf16.msra.mxu1 %v11343_v10 }
0x1050   :  { %6703 = vmatprep.subr.bf16.mxu0 %v11344_v18  ;;  %6744 = vmatprep.subr.bf16.mxu1 %v11345_v55 }
0x1053   :  { %6704 = vmatpush1.bf16.msra.mxu0 %v11346_v40  ;;  %6745 = vmatpush1.bf16.msra.mxu1 %v11347_v24  ;;  %v6526_v24 = vld [vmem:[#allocation2 + $0x38] sm:$0xc] }
0x1054   :  { %6705 = vmatprep.subr.bf16.mxu0 %v11348_v33  ;;  %6746 = vmatprep.subr.bf16.mxu1 %v11349_v29 }
0x1057   :  { %6706 = vmatpush1.bf16.msra.mxu0 %v11350_v38  ;;  %6747 = vmatpush1.bf16.msra.mxu1 %v11351_v21 }
0x1058   :  { %6797 = vmatprep.subr.bf16.mxu0 %v11352_v16  ;;  %6838 = vmatprep.subr.bf16.mxu1 %v11353_v9  ;;  %v6525_v9 = vld [vmem:[#allocation2 + $0x30] sm:$0xc] }
0x10e9   :  { %v6459_v60 = vpop.f32.mrb[88].mxu0  ;;  %v6500_v22 = vpop.f32.mrb[112].mxu1 }
0x10ea   :  { %v6511_v23 = vrot.slane %v6459_v60, 4  ;;  %v6461_v6 = vpop.f32.mrb[89].mxu0  ;;  %v6502_v39 = vpop.f32.mrb[113].mxu1  ;;  %v6513_v54 = vrot.slane %v6500_v22, 4 }
0x10eb   :  { %v6512_v1 = vrot.slane %v6461_v6, 4  ;;  %v6463_v63 = vpop.f32.mrb[90].mxu0  ;;  %v6504_v62 = vpop.f32.mrb[114].mxu1  ;;  %v6514_v8 = vrot.slane %v6502_v39, 4 }
0x10ec   :  { %v6519_v7 = vadd.f32 %v6511_v23, %v6417_v53  ;;  %v6464_v4 = vpop.f32.mrb[91].mxu0  ;;  %v6505_v34 = vpop.f32.mrb[115].mxu1  ;;  %v6521_v42 = vadd.f32 %v6513_v54, %v6419_v56  ;;  %v8992_v63 = vld [vmem:[#allocation15 + $0x8] ss:$16 sps:$4 sm:$0xff]  }
0x10ed   :  { %v6520_v11 = vadd.f32 %v6512_v1, %v6418_v37  ;;  %v6522_v28 = vadd.f32 %v6514_v8, %v6420_v20  ;;  %v8991_v1 = vld [vmem:[#allocation15] ss:$16 sps:$4 sm:$0xff]   ;;  %v8994_v37 = vld [vmem:[#allocation15 + $0x2c] ss:$16 sps:$4 sm:$0xff]   ;;  %v8996_v34 = vld [vmem:[#allocation15 + $0x28] ss:$16 sps:$4 sm:$0xff]  }
0x10ee   :  { %v7958_v14 = vmul.f32 -1.442695, %v6519_v7  ;;  %v8993_v7 = vld [vmem:[#allocation15 + $0x24] ss:$16 sps:$4 sm:$0xff]   ;;  %v8995_v4 = vld [vmem:[#allocation15 + $0x20] ss:$16 sps:$4 sm:$0xff]  }
0x10ef   :  { %v7959_v12 = vmul.f32 -1.442695, %v6520_v11  ;;  %v7960_v49 = vmul.f32 -1.442695, %v6522_v28  ;;  %v8997_v11 = vld [vmem:[#allocation15 + $0x44] ss:$16 sps:$4 sm:$0xff]  }
0x10f0   :  { %8877 = vpow2.f32 %v7958_v14  ;;  %v8998_v14 = vld [vmem:[#allocation15 + $0x4c] ss:$16 sps:$4 sm:$0xff]   ;;  %v9000_v8 = vld [vmem:[#allocation15 + $0x48] ss:$16 sps:$4 sm:$0xff]   ;;  %v9001_v20 = vld [vmem:[#allocation15 + $0x64] ss:$16 sps:$4 sm:$0xff]  }
0x10f1   :  { %8879 = vpow2.f32 %v7959_v12  ;;  %v8999_v12 = vld [vmem:[#allocation15 + $0x40] ss:$16 sps:$4 sm:$0xff]   ;;  %v9002_v28 = vld [vmem:[#allocation15 + $0x6c] ss:$16 sps:$4 sm:$0xff]  }
0x10f2   :  { %8881 = vpow2.f32 %v7960_v49 }
0x10f3   :  { %8883 = vtanh.f32 %v6521_v42  ;;  %v6676_v42 = vrot.slane %v10950_v17, 2  ;;  %v9009_v17 = vld [vmem:[#allocation15 + $0xa4] ss:$16 sps:$4 sm:$0xff]  }
0x10fa   :  { %v8878_v45 = vpop.eup %8877 }
0x10fb   :  { %v8880_v44 = vpop.eup %8879  ;;  %v6632_v36 = vadd.f32 1.0, %v8878_v45  ;;  %v9003_v45 = vld [vmem:[#allocation15 + $0x60] ss:$16 sps:$4 sm:$0xff]  }
0x10fc   :  { %v6638_v57 = vadd.f32 1.0, %v8880_v44  ;;  %v8882_v59 = vpop.eup %8881  ;;  %v9004_v44 = vld [vmem:[#allocation15 + $0x68] ss:$16 sps:$4 sm:$0xff]  }
0x10fd   :  { %8885 = vrcp.f32 %v6632_v36  ;;  %v8884_v30 = vpop.eup %8883  ;;  %v6645_v52 = vadd.f32 1.0, %v8882_v59 }
0x10fe   :  { %8887 = vrcp.f32 %v6638_v57 }
0x10ff   :  { %8889 = vrcp.f32 %v6645_v52  ;;  %v9010_v52 = vld [vmem:[#allocation15 + $0xac] ss:$16 sps:$4 sm:$0xff]  }
0x1107   :  { %v8886_v0 = vpop.eup %8885 }
0x1108   :  { %v8888_v19 = vpop.eup %8887  ;;  %v6652_v50 = vmul.f32 %v8886_v0, %v8884_v30  ;;  %v9005_v30 = vld [vmem:[#allocation15 + $0x84] ss:$16 sps:$4 sm:$0xff]   ;;  %v9006_v0 = vld [vmem:[#allocation15 + $0x8c] ss:$16 sps:$4 sm:$0xff]  }
0x1109   :  { %v6651_v3 = vmul.f32 %v8888_v19, %v6649_v58  ;;  %v8890_v40 = vpop.eup %8889  ;;  %v9007_v19 = vld [vmem:[#allocation15 + $0x80] ss:$16 sps:$4 sm:$0xff]  }
0x110b   :  { %v11002_v25 = vadd.f32 %v6652_v50, %v6651_v3  ;;  %v9008_v50 = vld [vmem:[#allocation15 + $0x88] ss:$16 sps:$4 sm:$0xff]   ;;  %v9011_v3 = vld [vmem:[#allocation15 + $0xa0] ss:$16 sps:$4 sm:$0xff]  }
0x110d   :  { %v6565_v61 = vpop.f32.mrb[92].mxu0  ;;  %v6606_v47 = vpop.f32.mrb[116].mxu1  ;;  %8891 = vtanh.f32 %v11002_v25 }
0x110e   :  { %v6617_v2 = vrot.slane %v6565_v61, 6  ;;  %v6567_v51 = vpop.f32.mrb[93].mxu0  ;;  %v6608_v5 = vpop.f32.mrb[117].mxu1  ;;  %v6619_v38 = vrot.slane %v6606_v47, 6  ;;  %v9012_v61 = vld [vmem:[#allocation15 + $0xa8] ss:$16 sps:$4 sm:$0xff]  }
0x110f   :  { %v6618_v31 = vrot.slane %v6567_v51, 6  ;;  %v6569_v26 = vpop.f32.mrb[94].mxu0  ;;  %v6610_v32 = vpop.f32.mrb[118].mxu1  ;;  %v6620_v55 = vrot.slane %v6608_v5, 6  ;;  %v9013_v47 = vld [vmem:[#allocation15 + $0xc4] ss:$16 sps:$4 sm:$0xff]  }
0x1110   :  { %v6625_v35 = vadd.f32 %v6617_v2, %v6523_v46  ;;  %v6570_v43 = vpop.f32.mrb[95].mxu0  ;;  %v6611_v48 = vpop.f32.mrb[119].mxu1  ;;  %v6627_v22 = vadd.f32 %v6619_v38, %v6525_v9  ;;  %v9014_v2 = vld [vmem:[#allocation15 + $0xcc] ss:$16 sps:$4 sm:$0xff]   ;;  %v9015_v51 = vld [vmem:[#allocation15 + $0xc0] ss:$16 sps:$4 sm:$0xff]  }
0x1111   :  { %v6626_v15 = vadd.f32 %v6618_v31, %v6524_v41  ;;  %v6628_v29 = vadd.f32 %v6620_v55, %v6526_v24  ;;  %v9016_v5 = vld [vmem:[#allocation15 + $0xc8] ss:$16 sps:$4 sm:$0xff]   ;;  %v9017_v46 = vld [vmem:[#allocation15 + $0xe4] ss:$16 sps:$4 sm:$0xff]   ;;  %v9018_v31 = vld [vmem:[#allocation15 + $0xec] ss:$16 sps:$4 sm:$0xff]  }
0x1112   :  { %v7961_v10 = vmul.f32 -1.442695, %v6625_v35  ;;  %v9019_v35 = vld [vmem:[#allocation15 + $0xe0] ss:$16 sps:$4 sm:$0xff]   ;;  %v9020_v41 = vld [vmem:[#allocation15 + $0xe8] ss:$16 sps:$4 sm:$0xff]  }
0x1113   :  { %v7962_v18 = vmul.f32 -1.442695, %v6626_v15  ;;  %v7963_v60 = vmul.f32 -1.442695, %v6628_v29  ;;  %v8626_v55 = vld [vmem:[#allocation16 + $0x14] ss:$8 sps:$4 sm:$0xff]  }
0x1114   :  { %8893 = vpow2.f32 %v7961_v10  ;;  %v8623_v10 = vld [vmem:[#allocation16 + $0x4] ss:$8 sps:$4 sm:$0xff]   ;;  %v8630_v29 = vld [vmem:[#allocation16 + $0x30] ss:$8 sps:$4 sm:$0xff]   ;;  %v8632_v38 = vld [vmem:[#allocation16 + $0x34] ss:$8 sps:$4 sm:$0xff]  }
0x1115   :  { %8895 = vpow2.f32 %v7962_v18  ;;  %v8621_v18 = vld [vmem:[#allocation16] ss:$8 sps:$4 sm:$0xff]   ;;  %v8629_v24 = vld [vmem:[#allocation16 + $0x24] ss:$8 sps:$4 sm:$0xff]   ;;  %v8636_v9 = vld [vmem:[#allocation16 + $0x50] ss:$8 sps:$4 sm:$0xff]  }
0x1116   :  { %8897 = vpow2.f32 %v7963_v60  ;;  %v8641_v60 = vld [vmem:[#allocation16 + $0x64] ss:$8 sps:$4 sm:$0xff]  }
0x1117   :  { %v8892_v33 = vpop.eup %8891  ;;  %8899 = vtanh.f32 %v6627_v22  ;;  %v8639_v22 = vld [vmem:[#allocation16 + $0x60] ss:$8 sps:$4 sm:$0xff]  }
0x1118   :  { %v6655_v21 = vmul.f32 %v8892_v33, %v8890_v40  ;;  %v8624_v40 = vld [vmem:[#allocation16 + $0x10] ss:$8 sps:$4 sm:$0xff]   ;;  %v8627_v33 = vld [vmem:[#allocation16 + $0x20] ss:$8 sps:$4 sm:$0xff]  }
0x111a   :  { %v6687_v16 = vpack.c.bf16 %v6655_v21, %v6655_v21  ;;  %v8635_v21 = vld [vmem:[#allocation16 + $0x44] ss:$8 sps:$4 sm:$0xff]  }
0x111c   :  { %v6689_v23 = vrot.slane %v6687_v16, 2  ;;  %v8633_v16 = vld [vmem:[#allocation16 + $0x40] ss:$8 sps:$4 sm:$0xff]  }
0x111e   :  { %v8894_v6 = vpop.eup %8893  ;;  %6724 = vmatmul.mubr.bf16.vlgmr.msra.gmra.mrb[96].mxu0 %v6689_v23  ;;  %6765 = vmatmul.mubr.bf16.vlgmr.msra.gmra.mrb[120].mxu1 %v6689_v23  ;;  %v8644_v23 = vld [vmem:[#allocation16 + $0x74] ss:$8 sps:$4 sm:$0xff]  }
0x111f   :  { %v8896_v39 = vpop.eup %8895  ;;  %v6659_v53 = vadd.f32 1.0, %v8894_v6  ;;  %6798 = vmatpush1.bf16.msra.mxu0 %v8991_v1  ;;  %6839 = vmatpush1.bf16.msra.mxu1 %v8992_v63  ;;  %v8642_v6 = vld [vmem:[#allocation16 + $0x70] ss:$8 sps:$4 sm:$0xff]   ;;  %v8650_v1 = vld [vmem:[#allocation16 + $0x94] ss:$8 sps:$4 sm:$0xff]  }
0x1120   :  { %v6665_v62 = vadd.f32 1.0, %v8896_v39  ;;  %6799 = vmatprep.subr.bf16.mxu0 %v8993_v7  ;;  %6840 = vmatprep.subr.bf16.mxu1 %v8994_v37  ;;  %v8898_v54 = vpop.eup %8897  ;;  %v8647_v39 = vld [vmem:[#allocation16 + $0x84] ss:$8 sps:$4 sm:$0xff]   ;;  %v8648_v63 = vld [vmem:[#allocation16 + $0x90] ss:$8 sps:$4 sm:$0xff]  }
0x1121   :  { %8901 = vrcp.f32 %v6659_v53  ;;  %6829 = vmatprep.mubr.bf16.mxu0 %v11249_v13  ;;  %6870 = vmatprep.mubr.bf16.mxu1 %v11249_v13  ;;  %v8900_v56 = vpop.eup %8899  ;;  %v6672_v59 = vadd.f32 1.0, %v8898_v54  ;;  %v8645_v53 = vld [vmem:[#allocation16 + $0x80] ss:$8 sps:$4 sm:$0xff]   ;;  %v8656_v37 = vld [vmem:[#allocation16 + $0xb4] ss:$8 sps:$4 sm:$0xff]  }
0x1122   :  { %8903 = vrcp.f32 %v6665_v62  ;;  %v8653_v62 = vld [vmem:[#allocation16 + $0xa4] ss:$8 sps:$4 sm:$0xff]   ;;  %v8651_v7 = vld [vmem:[#allocation16 + $0xa0] ss:$8 sps:$4 sm:$0xff]   ;;  %v8666_v54 = vld [vmem:[#allocation16 + $0xf0] ss:$8 sps:$4 sm:$0xff]  }
0x1123   :  { %6800 = vmatpush1.bf16.msra.mxu0 %v8995_v4  ;;  %6841 = vmatpush1.bf16.msra.mxu1 %v8996_v34  ;;  %8905 = vrcp.f32 %v6672_v59  ;;  %v8654_v4 = vld [vmem:[#allocation16 + $0xb0] ss:$8 sps:$4 sm:$0xff]   ;;  %v8657_v34 = vld [vmem:[#allocation16 + $0xc0] ss:$8 sps:$4 sm:$0xff]  }
0x1124   :  { %6801 = vmatprep.subr.bf16.mxu0 %v8997_v11  ;;  %6842 = vmatprep.subr.bf16.mxu1 %v8998_v14  ;;  %v8659_v11 = vld [vmem:[#allocation16 + $0xc4] ss:$8 sps:$4 sm:$0xff]   ;;  %v8662_v14 = vld [vmem:[#allocation16 + $0xd4] ss:$8 sps:$4 sm:$0xff]  }
0x1127   :  { %6802 = vmatpush1.bf16.msra.mxu0 %v8999_v12  ;;  %6843 = vmatpush1.bf16.msra.mxu1 %v9000_v8  ;;  %v8660_v12 = vld [vmem:[#allocation16 + $0xd0] ss:$8 sps:$4 sm:$0xff]   ;;  %v8665_v8 = vld [vmem:[#allocation16 + $0xe4] ss:$8 sps:$4 sm:$0xff]  }
0x1128   :  { %6803 = vmatprep.subr.bf16.mxu0 %v9001_v20  ;;  %6844 = vmatprep.subr.bf16.mxu1 %v9002_v28  ;;  %v8663_v20 = vld [vmem:[#allocation16 + $0xe0] ss:$8 sps:$4 sm:$0xff]   ;;  %v8668_v28 = vld [vmem:[#allocation16 + $0xf4] ss:$8 sps:$4 sm:$0xff]  }
0x112b   :  { %v8902_v49 = vpop.eup %8901  ;;  %6804 = vmatpush1.bf16.msra.mxu0 %v9003_v45  ;;  %6845 = vmatpush1.bf16.msra.mxu1 %v9004_v44 }
0x112c   :  { %v8904_v36 = vpop.eup %8903  ;;  %v6679_v57 = vmul.f32 %v8902_v49, %v8900_v56  ;;  %6805 = vmatprep.subr.bf16.mxu0 %v9005_v30  ;;  %6846 = vmatprep.subr.bf16.mxu1 %v9006_v0 }
0x112d   :  { %v6678_v27 = vmul.f32 %v8904_v36, %v6676_v42  ;;  %v8906_v26 = vpop.eup %8905  ;;  %v6683_v36 = vld [vmem:[#allocation2] sm:$0xc0] }
0x112f   :  { %v11008_v58 = vadd.f32 %v6679_v57, %v6678_v27  ;;  %6806 = vmatpush1.bf16.msra.mxu0 %v9007_v19  ;;  %6847 = vmatpush1.bf16.msra.mxu1 %v9008_v50  ;;  %v6684_v27 = vld [vmem:[#allocation2 + $0x8] sm:$0xc0] }
0x1130   :  { %6807 = vmatprep.subr.bf16.mxu0 %v9009_v17  ;;  %6848 = vmatprep.subr.bf16.mxu1 %v9010_v52 }
0x1131   :  { %8907 = vtanh.f32 %v11008_v58 }
0x1133   :  { %6808 = vmatpush1.bf16.msra.mxu0 %v9011_v3  ;;  %6849 = vmatpush1.bf16.msra.mxu1 %v9012_v61 }
0x1134   :  { %6809 = vmatprep.subr.bf16.mxu0 %v9013_v47  ;;  %6850 = vmatprep.subr.bf16.mxu1 %v9014_v2  ;;  %v6686_v47 = vld [vmem:[#allocation2 + $0x18] sm:$0xc0] }
0x1137   :  { %6810 = vmatpush1.bf16.msra.mxu0 %v9015_v51  ;;  %6851 = vmatpush1.bf16.msra.mxu1 %v9016_v5  ;;  %v6685_v5 = vld [vmem:[#allocation2 + $0x10] sm:$0xc0] }
0x1138   :  { %6811 = vmatprep.subr.bf16.mxu0 %v9017_v46  ;;  %6852 = vmatprep.subr.bf16.mxu1 %v9018_v31 }
0x113b   :  { %v8908_v32 = vpop.eup %8907  ;;  %6812 = vmatpush1.bf16.msra.mxu0 %v9019_v35  ;;  %6853 = vmatpush1.bf16.msra.mxu1 %v9020_v41 }
0x113c   :  { %v6682_v43 = vmul.f32 %v8908_v32, %v8906_v26  ;;  %7175 = vmatprep.subr.bf16.mxu1 %v8623_v10  ;;  %7051 = vmatprep.subr.bf16.mxu0 %v8647_v39  ;;  %v6903_v10 = vrot.slane %v11002_v25, 6 }
0x113e   :  { %v6793_v48 = vpack.c.bf16 %v6682_v43, %v6682_v43 }
0x1140   :  { %v6795_v15 = vrot.slane %v6793_v48, 1 }
0x1142   :  { %6830 = vmatmul.mubr.bf16.vlgmr.msra.gmra.mrb[100].mxu0 %v6795_v15  ;;  %6871 = vmatmul.mubr.bf16.vlgmr.msra.gmra.mrb[124].mxu1 %v6795_v15 }
0x1143   :  { %7207 = vmatprep.mubr.bf16.mxu1 %v11249_v13  ;;  %7083 = vmatprep.mubr.bf16.mxu0 %v11249_v13  ;;  %v8638_v13 = vld [vmem:[#allocation16 + $0x54] ss:$8 sps:$4 sm:$0xff]  }
0x1144   :  { %7176 = vmatpush1.bf16.msra.mxu1 %v8621_v18  ;;  %7052 = vmatpush1.bf16.msra.mxu0 %v8645_v53 }
0x1145   :  { %7177 = vmatprep.subr.bf16.mxu1 %v8626_v55  ;;  %7053 = vmatprep.subr.bf16.mxu0 %v8650_v1 }
0x1148   :  { %7178 = vmatpush1.bf16.msra.mxu1 %v8624_v40  ;;  %7054 = vmatpush1.bf16.msra.mxu0 %v8648_v63  ;;  %v6792_v63 = vld [vmem:[#allocation2 + $0x38] sm:$0x3] }
0x1149   :  { %7179 = vmatprep.subr.bf16.mxu1 %v8629_v24  ;;  %7055 = vmatprep.subr.bf16.mxu0 %v8653_v62 }
0x114c   :  { %7180 = vmatpush1.bf16.msra.mxu1 %v8627_v33  ;;  %7056 = vmatpush1.bf16.msra.mxu0 %v8651_v7 }
0x114d   :  { %7181 = vmatprep.subr.bf16.mxu1 %v8632_v38  ;;  %7057 = vmatprep.subr.bf16.mxu0 %v8656_v37 }
0x1150   :  { %7182 = vmatpush1.bf16.msra.mxu1 %v8630_v29  ;;  %7058 = vmatpush1.bf16.msra.mxu0 %v8654_v4  ;;  %v6789_v29 = vld [vmem:[#allocation2 + $0x20] sm:$0x3] }
0x1151   :  { %7183 = vmatprep.subr.bf16.mxu1 %v8635_v21  ;;  %7059 = vmatprep.subr.bf16.mxu0 %v8659_v11 }
0x1154   :  { %7184 = vmatpush1.bf16.msra.mxu1 %v8633_v16  ;;  %7060 = vmatpush1.bf16.msra.mxu0 %v8657_v34  ;;  %v6791_v34 = vld [vmem:[#allocation2 + $0x30] sm:$0x3] }
0x1155   :  { %7185 = vmatprep.subr.bf16.mxu1 %v8638_v13  ;;  %7061 = vmatprep.subr.bf16.mxu0 %v8662_v14  ;;  %v6790_v13 = vld [vmem:[#allocation2 + $0x28] sm:$0x3] }
0x1158   :  { %7186 = vmatpush1.bf16.msra.mxu1 %v8636_v9  ;;  %7062 = vmatpush1.bf16.msra.mxu0 %v8660_v12 }
0x1159   :  { %7187 = vmatprep.subr.bf16.mxu1 %v8641_v60  ;;  %7063 = vmatprep.subr.bf16.mxu0 %v8665_v8 }
0x115c   :  { %7188 = vmatpush1.bf16.msra.mxu1 %v8639_v22  ;;  %7064 = vmatpush1.bf16.msra.mxu0 %v8663_v20 }
0x115d   :  { %7189 = vmatprep.subr.bf16.mxu1 %v8644_v23  ;;  %7065 = vmatprep.subr.bf16.mxu0 %v8668_v28 }
0x1160   :  { %7190 = vmatpush1.bf16.msra.mxu1 %v8642_v6  ;;  %7066 = vmatpush1.bf16.msra.mxu0 %v8666_v54 }
0x11f1   :  { %v6725_v56 = vpop.f32.mrb[96].mxu0  ;;  %v6766_v49 = vpop.f32.mrb[120].mxu1 }
0x11f2   :  { %v6777_v42 = vrot.slane %v6725_v56, 2  ;;  %v6727_v45 = vpop.f32.mrb[97].mxu0  ;;  %v6768_v44 = vpop.f32.mrb[121].mxu1  ;;  %v6779_v51 = vrot.slane %v6766_v49, 2 }
0x11f3   :  { %v6778_v57 = vrot.slane %v6727_v45, 2  ;;  %v6729_v59 = vpop.f32.mrb[98].mxu0  ;;  %v6770_v30 = vpop.f32.mrb[122].mxu1  ;;  %v6780_v61 = vrot.slane %v6768_v44, 2  ;;  %v6930_v44 = vrot.slane %v11008_v58, 2  ;;  %v8670_v58 = vld [vmem:[%s11100_s17] sm:$0xff]  }
0x11f4   :  { %v6785_v0 = vadd.f32 %v6777_v42, %v6683_v36  ;;  %v6730_v19 = vpop.f32.mrb[99].mxu0  ;;  %v6771_v50 = vpop.f32.mrb[123].mxu1  ;;  %v6787_v31 = vadd.f32 %v6779_v51, %v6685_v5  ;;  %v8675_v51 = vld [vmem:[%s11100_s17 + $0x58] sm:$0xff]  }
0x11f5   :  { %v6786_v17 = vadd.f32 %v6778_v57, %v6684_v27  ;;  %v6788_v2 = vadd.f32 %v6780_v61, %v6686_v47  ;;  %v8672_v61 = vld [vmem:[%s11100_s17 + $0x8] sm:$0xff]   ;;  %v8673_v47 = vld [vmem:[%s11100_s17 + $0x50] sm:$0xff]   ;;  %v8676_v5 = vld [vmem:[%s11100_s17 + $0x18] sm:$0xff]  }
0x11f6   :  { %v7964_v52 = vmul.f32 -1.442695, %v6785_v0 }
0x11f7   :  { %v7965_v3 = vmul.f32 -1.442695, %v6786_v17  ;;  %v7966_v46 = vmul.f32 -1.442695, %v6788_v2  ;;  %v8674_v2 = vld [vmem:[%s11100_s17 + $0x10] sm:$0xff]  }
0x11f8   :  { %8909 = vpow2.f32 %v7964_v52  ;;  %v8669_v52 = vld [vmem:[%s11100_s17 + $0x40] sm:$0xff]  }
0x11f9   :  { %8911 = vpow2.f32 %v7965_v3  ;;  %v8671_v3 = vld [vmem:[%s11100_s17 + $0x48] sm:$0xff]   ;;  %8098 = vmatprep.subr.bf16.mxu0 %v8669_v52 }
0x11fa   :  { %8913 = vpow2.f32 %v7966_v46  ;;  %v8677_v46 = vld [vmem:[%s11100_s17 + $0x60] sm:$0xff]  }
0x11fb   :  { %8915 = vtanh.f32 %v6787_v31  ;;  %v8678_v31 = vld [vmem:[%s11100_s17 + $0x20] sm:$0xff]  }
0x1202   :  { %v8910_v26 = vpop.eup %8909 }
0x1203   :  { %v8912_v32 = vpop.eup %8911  ;;  %v6886_v35 = vadd.f32 1.0, %v8910_v26  ;;  %v8679_v26 = vld [vmem:[%s11100_s17 + $0x68] sm:$0xff]  }
0x1204   :  { %v6892_v41 = vadd.f32 1.0, %v8912_v32  ;;  %v8914_v43 = vpop.eup %8913  ;;  %v8680_v32 = vld [vmem:[%s11100_s17 + $0x28] sm:$0xff]  }
0x1205   :  { %8917 = vrcp.f32 %v6886_v35  ;;  %v8916_v48 = vpop.eup %8915  ;;  %v6899_v40 = vadd.f32 1.0, %v8914_v43  ;;  %v8681_v35 = vld [vmem:[%s11100_s17 + $0x70] sm:$0xff]   ;;  %v8683_v43 = vld [vmem:[%s11100_s17 + $0x78] sm:$0xff]  }
0x1206   :  { %8919 = vrcp.f32 %v6892_v41  ;;  %v8682_v41 = vld [vmem:[%s11100_s17 + $0x30] sm:$0xff]  }
0x1207   :  { %8921 = vrcp.f32 %v6899_v40  ;;  %v7216_v40 = vld [vmem:[%s11099_s16] sm:$0x3] }
0x120f   :  { %v8918_v15 = vpop.eup %8917 }
0x1210   :  { %v8920_v18 = vpop.eup %8919  ;;  %v6906_v55 = vmul.f32 %v8918_v15, %v8916_v48  ;;  %v8684_v48 = vld [vmem:[%s11100_s17 + $0x38] sm:$0xff]  }
0x1211   :  { %v6905_v24 = vmul.f32 %v8920_v18, %v6903_v10  ;;  %v8922_v7 = vpop.eup %8921 }
0x1213   :  { %v6907_v33 = vadd.f32 %v6906_v55, %v6905_v24  ;;  %v11355_v24 = vld [vmem:[#allocation26_spill] sm:$0xff] }
0x1215   :  { %v6831_v38 = vpop.f32.mrb[100].mxu0  ;;  %v6872_v21 = vpop.f32.mrb[124].mxu1  ;;  %8923 = vtanh.f32 %v6907_v33  ;;  %v7221_v33 = vrot.slane %v7216_v40, %v11355_v24 }
0x1216   :  { %v6879_v16 = vadd.f32 %v6831_v38, %v6789_v29  ;;  %v6833_v9 = vpop.f32.mrb[101].mxu0  ;;  %v6874_v60 = vpop.f32.mrb[125].mxu1  ;;  %v6881_v14 = vadd.f32 %v6872_v21, %v6791_v34  ;;  %v11356_v38 = vld [vmem:[#allocation27_spill] sm:$0xff] }
0x1217   :  { %v6880_v22 = vadd.f32 %v6833_v9, %v6790_v13  ;;  %v6835_v23 = vpop.f32.mrb[102].mxu0  ;;  %v6876_v6 = vpop.f32.mrb[126].mxu1  ;;  %v6882_v62 = vadd.f32 %v6874_v60, %v6792_v63  ;;  %v7225_v21 = vrot.slane %v7216_v40, %v11356_v38 }
0x1218   :  { %v7967_v39 = vmul.f32 -1.442695, %v6879_v16  ;;  %v6836_v53 = vpop.f32.mrb[103].mxu0  ;;  %v6877_v25 = vpop.f32.mrb[127].mxu1 }
0x1219   :  { %v7968_v1 = vmul.f32 -1.442695, %v6880_v22  ;;  %v7969_v11 = vmul.f32 -1.442695, %v6882_v62  ;;  %v8002_v62 = vld [vmem:[%s11101_s18] ss:$0 sm:$0xff] }
0x121a   :  { %8925 = vpow2.f32 %v7967_v39 }
0x121b   :  { %8927 = vpow2.f32 %v7968_v1 }
0x121c   :  { %8929 = vpow2.f32 %v7969_v11 }
0x121d   :  { %8931 = vtanh.f32 %v6881_v14 }
0x121f   :  { %v8924_v37 = vpop.eup %8923 }
0x1220   :  { %v6909_v4 = vmul.f32 %v8924_v37, %v8922_v7 }
0x1222   :  { %v6937_v12 = vpack.c.bf16 %v6909_v4, %v6909_v4 }
0x1224   :  { %v8926_v8 = vpop.eup %8925  ;;  %v7093_v20 = vrot.slane %v6937_v12, 3 }
0x1225   :  { %v8928_v28 = vpop.eup %8927  ;;  %v6913_v54 = vadd.f32 1.0, %v8926_v8 }
0x1226   :  { %v6919_v56 = vadd.f32 1.0, %v8928_v28  ;;  %7208 = vmatmul.mubr.bf16.vlgmr.msra.gmra.mrb[128].mxu1 %v7093_v20  ;;  %v8930_v49 = vpop.eup %8929 }
0x1227   :  { %8933 = vrcp.f32 %v6913_v54  ;;  %v8932_v42 = vpop.eup %8931  ;;  %v6926_v59 = vadd.f32 1.0, %v8930_v49 }
0x1228   :  { %8935 = vrcp.f32 %v6919_v56 }
0x1229   :  { %8937 = vrcp.f32 %v6926_v59 }
0x1231   :  { %v8934_v45 = vpop.eup %8933 }
0x1232   :  { %v8936_v36 = vpop.eup %8935  ;;  %v6933_v57 = vmul.f32 %v8934_v45, %v8932_v42 }
0x1233   :  { %v6932_v30 = vmul.f32 %v8936_v36, %v6930_v44  ;;  %v8938_v27 = vpop.eup %8937 }
0x1235   :  { %v6934_v0 = vadd.f32 %v6933_v57, %v6932_v30 }
0x1237   :  { %8939 = vtanh.f32 %v6934_v0 }
0x1241   :  { %v8940_v19 = vpop.eup %8939 }
0x1242   :  { %v6936_v50 = vmul.f32 %v8940_v19, %v8938_v27 }
0x1244   :  { %v6954_v17 = vpack.c.bf16 %v6936_v50, %v6936_v50 }
0x1246   :  { %7084 = vmatmul.mubr.bf16.vlgmr.msra.gmra.mrb[104].mxu0 %v6954_v17 }
0x1247   :  { %8099 = vmatpush3.bf16.msra.mxu0 %v8670_v58 }
0x1248   :  { %8100 = vmatprep.subr.bf16.mxu0 %v8671_v3 }
0x124b   :  { %8101 = vmatpush3.bf16.msra.mxu0 %v8672_v61 }
0x124c   :  { %8102 = vmatprep.subr.bf16.mxu0 %v8673_v47 }
0x124f   :  { %8103 = vmatpush3.bf16.msra.mxu0 %v8674_v2 }
0x1250   :  { %8104 = vmatprep.subr.bf16.mxu0 %v8675_v51 }
0x1253   :  { %8105 = vmatpush3.bf16.msra.mxu0 %v8676_v5 }
0x1254   :  { %8106 = vmatprep.subr.bf16.mxu0 %v8677_v46 }
0x1257   :  { %8107 = vmatpush3.bf16.msra.mxu0 %v8678_v31 }
0x1258   :  { %8108 = vmatprep.subr.bf16.mxu0 %v8679_v26 }
0x125b   :  { %8109 = vmatpush3.bf16.msra.mxu0 %v8680_v32 }
0x125c   :  { %8110 = vmatprep.subr.bf16.mxu0 %v8681_v35 }
0x125f   :  { %8111 = vmatpush3.bf16.msra.mxu0 %v8682_v41 }
0x1260   :  { %8112 = vmatprep.subr.bf16.mxu0 %v8683_v43 }
0x1263   :  { %8113 = vmatpush3.bf16.msra.mxu0 %v8684_v48 }
0x12f9   :  { %v7209_v15 = vpop.f32.mrb[128].mxu1 }
0x12fa   :  { %v7211_v10 = vpop.f32.mrb[129].mxu1 }
0x12fb   :  { %v7213_v18 = vpop.f32.mrb[130].mxu1 }
0x12fc   :  { %v7214_v55 = vpop.f32.mrb[131].mxu1 }
0x1319   :  { %v7085_v29 = vpop.f32.mrb[104].mxu0 }
0x131a   :  { %v7210_v16 = vadd.f32 %v7209_v15, %v7085_v29  ;;  %v7087_v13 = vpop.f32.mrb[105].mxu0 }
0x131b   :  { %v7212_v9 = vadd.f32 %v7211_v10, %v7087_v13  ;;  %v7089_v60 = vpop.f32.mrb[106].mxu0 }
0x131c   :  { %v7228_v22 = vadd.f32 %v7221_v33, %v7210_v16  ;;  %v7090_v23 = vpop.f32.mrb[107].mxu0 }
0x131d   :  { %v7229_v6 = vadd.f32 %v7225_v21, %v7212_v9 }
0x131e   :  { %v7230_v39 = vmax.f32 %v7228_v22, 0.0 }
0x131f   :  { %v7231_v53 = vmax.f32 %v7229_v6, 0.0 }
0x1320   :  { %v7232_v1 = vpack.c.bf16 %v7230_v39, %v7230_v39 }
0x1321   :  { %v7233_v25 = vpack.c.bf16 %v7231_v53, %v7231_v53 }
0x1323   :  { %7401 = vmatprep.mubr.bf16.mxu0 %v7233_v25 }
0x1324   :  { %7402 = vmatmul.mubr.bf16.vlgmr.msra.gmra.mrb[108].mxu0 %v7232_v1 }
0x13f7   :  { %v8114_v63 = vpop.f32.mrb[108].mxu0 }
0x13f8   :  { %v8115_v7 = vpop.f32.mrb[109].mxu0 }
0x13f9   :  { %v8116_v37 = vadd.f32 %v8115_v7, %v8114_v63  ;;  %v8117_v4 = vpop.f32.mrb[110].mxu0 }
0x13fa   :  { %v8118_v34 = vpop.f32.mrb[111].mxu0 }
0x13fb   :  { %v7404_v11 = vadd.f32 %v8116_v37, %v8002_v62 }
0x13fd   :  { %7410 = vst.msk [vmem:[#allocation18] sm:$0x3] %vm7409_vm2, %v7404_v11 }
0x13fe   :  { %9208 = shalt.err (!%p9205_p12)
}
0x13ff   :  { %s9209_s18 = scalar_lea.hbm %s11102_s19, 32 }
0x1400   :  { %p9210_p13 = scmp.ne.s32.totalorder %s11102_s19, %s9209_s18  ;;  %p9213_p0 = scmp.lt.u32.totalorder %s9209_s18, %s11102_s19 }
0x1402   :  { %p9215_p1 = pnand %p9213_p0, %p9210_p13 }
0x1404   :  { %9218 = shalt.err (!%p9215_p1)
}
0x1405   :  { %7420 = dma.vmem_to_hbm [thread:$0]  %s7418_s13, 32, %s11102_s19, [#allocation6]  }
0x1406   :  { %9229 = dma.done.wait [#allocation6], 32  }
0x1407   :  { %9230 = vsyncadd [#allocation6], 4294967264 }
0x1408   :  { %7424 = vsyncpa [#allocation5], 1 }
0x1409   :  { %7425 = vsyncpa [#allocation8], 1 }
0x140a   :  { %7426 = vsyncpa [#allocation11], 1 }
0x140b   :  { %7427 = vsyncpa [#allocation14], 1 }
0x140c   :  { %7428 = vsyncpa [#allocation17], 1 }
0x140d   :  { %7429 = vsyncpa [#allocation6], 1 }

</bundles_post_ra>
